<compile_context>
chip_gen: v6e
topology: v6e:2x2x1
jax: 0.10.0
libtpu: 0.0.40
codegen_flags: <defaults>
</compile_context>

<pallas_src>
import functools

import numpy as np
import jax
import jax.numpy as jnp
from jax.experimental import pallas as pl
from jax.experimental.pallas import tpu as pltpu

# ---- module default dimensions ---------------------------------------------
MAX_NODES = 9                      # max_nodes
X_WIDTH = 7                        # x_width
HIDDEN = 64                        # hidden_dim
CTX_H = 45                         # context spatial H
CTX_E = 7                          # context_embedding_dim
CTX_PIX = CTX_H * CTX_E            # 315
NODE_PIX = MAX_NODES * X_WIDTH     # 63
ADJ_REP_W = MAX_NODES * NODE_PIX   # 567  (replicated-adjacency lane width)
NPAD = 64                          # node pixels padded 63 -> 64 for the head
PIX_BLK = 4                        # pixels per head block (4*64 = 256 lanes)
N_BLKS = NPAD // PIX_BLK           # 16
OUT_W = 2 * NODE_PIX               # 126 (lane = 2*pixel + channel)


def _round_up(n, m):
    return (n + m - 1) // m * m


# ---- fused kernel: 2x DenseGCNConv + context_net + head net ------------------
def _fused_kernel(
    x_ref,        # (tb, 63)   f32  node features, lane = node*7 + feat
    adj_ref,      # (tb, 567)  f32  normalized adjacency, replicated layout
    ctx_ref,      # (tb, 315)  f32  context pixels, lane = h*7 + e
    wrep1_ref, bg1_ref,    # (63,567) bf16, (1,63) f32
    wrep2_ref, bg2_ref,    # (63,567) bf16, (1,63) f32
    wl_ref, bl_ref,        # (315,63) bf16, (1,63) f32
    g_ref, b1t_ref,        # (126,4096) bf16, (1,4096) f32   head conv1
    w2q_ref, b2q_ref,      # (256,256) bf16, (1,256) f32     head conv2 (kron I4)
    hm_ref, b3t_ref,       # (4096,126) bf16, (1,126) f32    head conv3 + repack
    ca_ref, cb_ref, bc2_ref,   # SMEM: (64,), (64,), (1,) f32 context scalars
    out_ref,      # (tb, 126)  f32  lane = 2*pixel + channel
    *, n_pos,
):
    f32 = jnp.float32
    bf16 = jnp.bfloat16

    adj = adj_ref[...]                                   # (tb, 567)

    # --- two DenseGCNConv layers (normalization pre-baked into adj) ----------
    def gcn(z, wrep_ref, b_ref):
        # one bf16 GEMM does the shared-weight transform AND the 9x lane tiling
        t = jnp.dot(z.astype(bf16), wrep_ref[...],
                    preferred_element_type=f32)          # (tb, 567)
        prod = adj * t
        acc = prod[:, 0:NODE_PIX]
        for j in range(1, MAX_NODES):
            acc = acc + prod[:, j * NODE_PIX:(j + 1) * NODE_PIX]
        return acc + b_ref[...]                          # (tb, 63)

    z = gcn(x_ref[...], wrep1_ref, bg1_ref)
    z = gcn(z, wrep2_ref, bg2_ref)

    # --- context_net: folded Conv1x1(1->64)+ReLU, Conv1x1(64->1) -------------
    # wc2*relu(wc1*u + bc1) == max(a*u + c, 0) if wc2>=0 else min(a*u + c, 0)
    ctx = ctx_ref[...]                                   # (tb, 315)

    def pos_body(k, acc):
        return acc + jnp.maximum(ca_ref[k] * ctx + cb_ref[k], 0.0)

    def neg_body(k, acc):
        return acc + jnp.minimum(ca_ref[k] * ctx + cb_ref[k], 0.0)

    acc = jax.lax.fori_loop(0, n_pos, pos_body, jnp.zeros_like(ctx))
    acc = jax.lax.fori_loop(n_pos, HIDDEN, neg_body, acc)
    c2 = jnp.maximum(acc + bc2_ref[0], 0.0)              # (tb, 315)

    # Linear(315 -> 63) + ReLU on the MXU
    cfl = jnp.maximum(
        jnp.dot(c2.astype(bf16), wl_ref[...], preferred_element_type=f32)
        + bl_ref[...], 0.0)                              # (tb, 63)

    # --- head: 1x1 convs 2->64->64->2 in 16 aligned 256-lane pixel blocks ----
    zc = jnp.concatenate([z.astype(bf16), cfl.astype(bf16)], axis=1)  # (tb,126)
    w2q = w2q_ref[...]
    b2q = b2q_ref[...]
    o_acc = None
    for q in range(N_BLKS):
        lo, hi = q * 256, (q + 1) * 256
        h1 = jnp.maximum(
            jnp.dot(zc, g_ref[:, lo:hi], preferred_element_type=f32)
            + b1t_ref[:, lo:hi], 0.0).astype(bf16)                    # (tb,256)
        h2 = jnp.maximum(
            jnp.dot(h1, w2q, preferred_element_type=f32) + b2q,
            0.0).astype(bf16)                                         # (tb,256)
        part = jnp.dot(h2, hm_ref[lo:hi, :], preferred_element_type=f32)
        o_acc = part if o_acc is None else o_acc + part               # (tb,126)

    out_ref[...] = o_acc + b3t_ref[...]


# ---- wrapper -----------------------------------------------------------------
def conditional_ar_net(x, context, params, *, tb=256):
    """x: (B,1,9,7); context = {'b_adj': (B,9,9), 'context': (B,1,45,7)}.

    Note: weight preprocessing uses host-side numpy, so params must be concrete
    (this wrapper is meant to be called outside jit; the pallas_call itself is
    the compiled fast path).
    """
    B = x.shape[0]

    # --- tile-size policy ------------------------------------------------
    tb = max(8, (int(tb) // 8) * 8)
    b8 = _round_up(B, 8)
    if b8 <= tb:
        # small batch: split once (when possible) so the 'parallel' grid axis
        # can still feed both TensorCores on v7x.
        tb = b8 if b8 <= 8 else _round_up(b8 // 2, 8)
    Bp = _round_up(B, tb)

    f32 = jnp.float32

    # --- batch-dependent operands (cheap XLA precompute) -------------------
    x2d = x.reshape(B, NODE_PIX).astype(f32)
    ctx2d = context["context"].reshape(B, CTX_PIX).astype(f32)

    adj = context["b_adj"].astype(f32)                       # (B, 9, 9)
    eye = jnp.eye(MAX_NODES, dtype=f32)
    a = jnp.where(eye > 0, 1.0, adj)                         # diag := 1 (self loops)
    deg = jnp.maximum(jnp.sum(a, axis=-1), 1.0)              # row sum, clamp 1
    dinv = deg ** -0.5
    a_norm = dinv[:, :, None] * a * dinv[:, None, :]         # (B, 9, 9)
    # replicated layout: adj_rep[b, j*63 + i*7 + f] = a_norm[b, i, j]
    adj_rep = jnp.repeat(jnp.swapaxes(a_norm, 1, 2), X_WIDTH, axis=2)
    adj_rep = adj_rep.reshape(B, ADJ_REP_W)                  # (B, 567)

    if Bp != B:
        pad = ((0, Bp - B), (0, 0))
        x2d = jnp.pad(x2d, pad)
        adj_rep = jnp.pad(adj_rep, pad)
        ctx2d = jnp.pad(ctx2d, pad)

    # --- static weight preprocessing (host-side numpy) ---------------------
    f = lambda t: np.asarray(t, np.float32)

    def gcn_mats(W, b):
        wblk = np.kron(np.eye(MAX_NODES, dtype=np.float32), f(W).T)   # (63,63)
        wrep = np.broadcast_to(
            wblk.reshape(NODE_PIX, MAX_NODES, 1, X_WIDTH),
            (NODE_PIX, MAX_NODES, MAX_NODES, X_WIDTH),
        ).reshape(NODE_PIX, ADJ_REP_W)                                # (63,567)
        bt = np.tile(f(b).reshape(X_WIDTH), MAX_NODES).reshape(1, NODE_PIX)
        return wrep, bt

    wrep1, bg1t = gcn_mats(params["Wg1"], params["bg1"])
    wrep2, bg2t = gcn_mats(params["Wg2"], params["bg2"])

    wl_t = f(params["Wl"]).T                                          # (315,63)
    bl_r = f(params["bl"]).reshape(1, NODE_PIX)

    # head conv1 (2->64) as a sparse per-pixel "select + scale" matrix
    wn1 = f(params["Wn1"])                                            # (64, 2)
    G = np.zeros((2 * NODE_PIX, NPAD * HIDDEN), np.float32)           # (126,4096)
    for p in range(NODE_PIX):
        G[p, p * HIDDEN:(p + 1) * HIDDEN] = wn1[:, 0]
        G[NODE_PIX + p, p * HIDDEN:(p + 1) * HIDDEN] = wn1[:, 1]
    b1t = np.tile(f(params["bn1"]).reshape(HIDDEN), NPAD).reshape(1, NPAD * HIDDEN)

    # head conv2 (64->64), 4 pixels per MXU tile
    w2q = np.kron(np.eye(PIX_BLK, dtype=np.float32), f(params["Wn2"]).T)  # (256,256)
    b2q = np.tile(f(params["bn2"]).reshape(HIDDEN), PIX_BLK).reshape(1, PIX_BLK * HIDDEN)

    # head conv3 (64->2) fused with the lane-dense output repack
    wn3 = f(params["Wn3"])                                            # (2, 64)
    H = np.zeros((NPAD * HIDDEN, OUT_W), np.float32)                  # (4096,126)
    for p in range(NODE_PIX):
        H[p * HIDDEN:(p + 1) * HIDDEN, 2 * p:2 * p + 2] = wn3.T
    b3t = np.tile(f(params["bn3"]).reshape(2), NODE_PIX).reshape(1, OUT_W)

    # context_net folded scalars, statically split by sign of Wc2
    wc1 = f(params["Wc1"]).reshape(HIDDEN)
    wc2 = f(params["Wc2"]).reshape(HIDDEN)
    bc1 = f(params["bc1"]).reshape(HIDDEN)
    A = wc1 * wc2
    C = bc1 * wc2
    pos = wc2 >= 0
    order = np.concatenate([np.nonzero(pos)[0], np.nonzero(~pos)[0]])
    n_pos = int(pos.sum())
    ca = np.ascontiguousarray(A[order])
    cb = np.ascontiguousarray(C[order])
    bc2 = f(params["bc2"]).reshape(1)

    bf = lambda m: jnp.asarray(m, jnp.bfloat16)
    j32 = lambda m: jnp.asarray(m, jnp.float32)

    operands = (
        x2d, adj_rep, ctx2d,
        bf(wrep1), j32(bg1t), bf(wrep2), j32(bg2t),
        bf(wl_t), j32(bl_r),
        bf(G), j32(b1t), bf(w2q), j32(b2q), bf(H), j32(b3t),
        j32(ca), j32(cb), j32(bc2),
    )

    def bspec(c):
        return pl.BlockSpec((tb, c), lambda b: (b, 0))

    def wspec(r, c):
        return pl.BlockSpec((r, c), lambda b: (0, 0))

    smem = pl.BlockSpec(memory_space=pltpu.MemorySpace.SMEM)
    in_specs = [
        bspec(NODE_PIX), bspec(ADJ_REP_W), bspec(CTX_PIX),
        wspec(NODE_PIX, ADJ_REP_W), wspec(1, NODE_PIX),
        wspec(NODE_PIX, ADJ_REP_W), wspec(1, NODE_PIX),
        wspec(CTX_PIX, NODE_PIX), wspec(1, NODE_PIX),
        wspec(2 * NODE_PIX, NPAD * HIDDEN), wspec(1, NPAD * HIDDEN),
        wspec(PIX_BLK * HIDDEN, PIX_BLK * HIDDEN), wspec(1, PIX_BLK * HIDDEN),
        wspec(NPAD * HIDDEN, OUT_W), wspec(1, OUT_W),
        smem, smem, smem,
    ]

    out = pl.pallas_call(
        functools.partial(_fused_kernel, n_pos=n_pos),
        out_shape=jax.ShapeDtypeStruct((Bp, OUT_W), jnp.float32),
        grid=(Bp // tb,),
        in_specs=in_specs,
        out_specs=pl.BlockSpec((tb, OUT_W), lambda b: (b, 0)),
        compiler_params=pltpu.CompilerParams(
            dimension_semantics=("parallel",),
            vmem_limit_bytes=48 * 1024 * 1024,
        ),
    )(*operands)

    out = out[:B]                                      # (B, 126), lane = 2p + c
    return out.reshape(B, MAX_NODES, X_WIDTH, 2).transpose(0, 3, 1, 2)


# ---- pure-JAX reference (mirrors the PyTorch forward) -------------------------
def ref_forward(x, context, p):
    adj = context["b_adj"]
    ctx = context["context"]
    B = x.shape[0]

    def dense_gcn(z, adj, W, b):
        n = adj.shape[-1]
        eye = jnp.eye(n, dtype=adj.dtype)
        a = jnp.where(eye > 0, 1.0, adj)
        deg = jnp.maximum(jnp.sum(a, axis=-1), 1.0)
        dinv = deg ** -0.5
        a_norm = dinv[:, :, None] * a * dinv[:, None, :]
        return jnp.einsum("bij,bjf->bif", a_norm, z @ W.T) + b

    def conv1x1(t, W, b):
        return jnp.einsum("oi,bihw->bohw", W, t) + b[None, :, None, None]

    z = x[:, 0]
    z = dense_gcn(z, adj, p["Wg1"], p["bg1"])
    z = dense_gcn(z, adj, p["Wg2"], p["bg2"])

    c = jax.nn.relu(conv1x1(ctx, p["Wc1"], p["bc1"]))
    c = jax.nn.relu(conv1x1(c, p["Wc2"], p["bc2"]))
    c = c.reshape(B, 1, CTX_PIX)
    c = jax.nn.relu(c @ p["Wl"].T + p["bl"])
    c = c.reshape(B, 1, MAX_NODES, X_WIDTH)

    h = jnp.concatenate([z[:, None], c], axis=1)
    h = jax.nn.relu(conv1x1(h, p["Wn1"], p["bn1"]))
    h = jax.nn.relu(conv1x1(h, p["Wn2"], p["bn2"]))
    return conv1x1(h, p["Wn3"], p["bn3"])


if __name__ == "__main__":
    B = 12                      # not a multiple of 8 -> exercises padding; grid = 2
    key = jax.random.PRNGKey(0)
    ki = iter(jax.random.split(key, 24))

    x = jax.random.normal(next(ki), (B, 1, MAX_NODES, X_WIDTH), jnp.float32)
    ctx = jax.random.normal(next(ki), (B, 1, CTX_H, CTX_E), jnp.float32)
    # general (not necessarily symmetric) 0/1 adjacency: row-sum normalization
    adj = (jax.random.uniform(next(ki), (B, MAX_NODES, MAX_NODES)) > 0.5).astype(jnp.float32)

    def w(k, shape, fan_in):
        return jax.random.normal(k, shape, jnp.float32) / jnp.sqrt(jnp.float32(fan_in))

    params = dict(
        # DenseGCNConv(7, 7) x2
        Wg1=w(next(ki), (X_WIDTH, X_WIDTH), X_WIDTH),
        bg1=0.1 * jax.random.normal(next(ki), (X_WIDTH,), jnp.float32),
        Wg2=w(next(ki), (X_WIDTH, X_WIDTH), X_WIDTH),
        bg2=0.1 * jax.random.normal(next(ki), (X_WIDTH,), jnp.float32),
        # context_net: Conv1x1(1->64), Conv1x1(64->1), Linear(315->63)
        Wc1=w(next(ki), (HIDDEN, 1), 1),
        bc1=0.1 * jax.random.normal(next(ki), (HIDDEN,), jnp.float32),
        Wc2=w(next(ki), (1, HIDDEN), HIDDEN),
        bc2=0.1 * jax.random.normal(next(ki), (1,), jnp.float32),
        Wl=w(next(ki), (NODE_PIX, CTX_PIX), CTX_PIX),
        bl=0.1 * jax.random.normal(next(ki), (NODE_PIX,), jnp.float32),
        # net: Conv1x1(2->64), Conv1x1(64->64), Conv1x1(64->2)
        Wn1=w(next(ki), (HIDDEN, 2), 2),
        bn1=0.1 * jax.random.normal(next(ki), (HIDDEN,), jnp.float32),
        Wn2=w(next(ki), (HIDDEN, HIDDEN), HIDDEN),
        bn2=0.1 * jax.random.normal(next(ki), (HIDDEN,), jnp.float32),
        Wn3=w(next(ki), (2, HIDDEN), HIDDEN),
        bn3=0.1 * jax.random.normal(next(ki), (2,), jnp.float32),
    )

    context = {"b_adj": adj, "context": ctx}

    out = jax.block_until_ready(conditional_ar_net(x, context, params))
    assert out.shape == (B, 2, MAX_NODES, X_WIDTH), out.shape

    with jax.default_matmul_precision("highest"):
        ref = jax.block_until_ready(ref_forward(x, context, params))

    err = float(jnp.max(jnp.abs(out - ref)))
    # bf16 MXU operands with f32 accumulation -> small relative error
    assert jnp.allclose(out, ref, rtol=2e-2, atol=2e-2), f"max_abs_err={err}"

    print("KERNEL_OK")
</pallas_src>

<mosaic_0001>
module attributes {stable_mosaic.version = 11 : i64} {
  func.func @_fused_kernel(%arg0: i32, %arg1: memref<8x63xf32, #tpu.memory_space<vmem>>, %arg2: memref<8x567xf32, #tpu.memory_space<vmem>>, %arg3: memref<8x315xf32, #tpu.memory_space<vmem>>, %arg4: memref<63x567xbf16, #tpu.memory_space<vmem>>, %arg5: memref<1x63xf32, #tpu.memory_space<vmem>>, %arg6: memref<63x567xbf16, #tpu.memory_space<vmem>>, %arg7: memref<1x63xf32, #tpu.memory_space<vmem>>, %arg8: memref<315x63xbf16, #tpu.memory_space<vmem>>, %arg9: memref<1x63xf32, #tpu.memory_space<vmem>>, %arg10: memref<126x4096xbf16, #tpu.memory_space<vmem>>, %arg11: memref<1x4096xf32, #tpu.memory_space<vmem>>, %arg12: memref<256x256xbf16, #tpu.memory_space<vmem>>, %arg13: memref<1x256xf32, #tpu.memory_space<vmem>>, %arg14: memref<4096x126xbf16, #tpu.memory_space<vmem>>, %arg15: memref<1x126xf32, #tpu.memory_space<vmem>>, %arg16: memref<64xf32, #tpu.memory_space<smem>>, %arg17: memref<64xf32, #tpu.memory_space<smem>>, %arg18: memref<1xf32, #tpu.memory_space<smem>>, %arg19: memref<8x126xf32, #tpu.memory_space<vmem>>) attributes {dimension_semantics = [#tpu.dimension_semantics<parallel>], iteration_bounds = array<i64: 2>, scalar_prefetch = 0 : i64, scratch_operands = 0 : i64, tpu.core_type = #tpu.core_type<tc>, window_params = [{transform_indices = @transform_0, window_bounds = array<i64: 8, 63>}, {transform_indices = @transform_1, window_bounds = array<i64: 8, 567>}, {transform_indices = @transform_2, window_bounds = array<i64: 8, 315>}, {pipeline_mode = #tpu.pipeline_mode<synchronous>, transform_indices = @transform_3, window_bounds = array<i64: 63, 567>}, {pipeline_mode = #tpu.pipeline_mode<synchronous>, transform_indices = @transform_4, window_bounds = array<i64: 1, 63>}, {pipeline_mode = #tpu.pipeline_mode<synchronous>, transform_indices = @transform_5, window_bounds = array<i64: 63, 567>}, {pipeline_mode = #tpu.pipeline_mode<synchronous>, transform_indices = @transform_6, window_bounds = array<i64: 1, 63>}, {pipeline_mode = #tpu.pipeline_mode<synchronous>, transform_indices = @transform_7, window_bounds = array<i64: 315, 63>}, {pipeline_mode = #tpu.pipeline_mode<synchronous>, transform_indices = @transform_8, window_bounds = array<i64: 1, 63>}, {pipeline_mode = #tpu.pipeline_mode<synchronous>, transform_indices = @transform_9, window_bounds = array<i64: 126, 4096>}, {pipeline_mode = #tpu.pipeline_mode<synchronous>, transform_indices = @transform_10, window_bounds = array<i64: 1, 4096>}, {pipeline_mode = #tpu.pipeline_mode<synchronous>, transform_indices = @transform_11, window_bounds = array<i64: 256, 256>}, {pipeline_mode = #tpu.pipeline_mode<synchronous>, transform_indices = @transform_12, window_bounds = array<i64: 1, 256>}, {pipeline_mode = #tpu.pipeline_mode<synchronous>, transform_indices = @transform_13, window_bounds = array<i64: 4096, 126>}, {pipeline_mode = #tpu.pipeline_mode<synchronous>, transform_indices = @transform_14, window_bounds = array<i64: 1, 126>}, {transform_indices = @transform_15, window_bounds = array<i64: 64>}, {transform_indices = @transform_16, window_bounds = array<i64: 64>}, {transform_indices = @transform_17, window_bounds = array<i64: 1>}, {transform_indices = @transform_18, window_bounds = array<i64: 8, 126>}]} {
    %c0 = arith.constant 0 : index
    %c0_0 = arith.constant 0 : index
    %0 = vector.load %arg2[%c0, %c0_0] : memref<8x567xf32, #tpu.memory_space<vmem>>, vector<8x567xf32>
    %c0_1 = arith.constant 0 : index
    %c0_2 = arith.constant 0 : index
    %1 = vector.load %arg1[%c0_1, %c0_2] : memref<8x63xf32, #tpu.memory_space<vmem>>, vector<8x63xf32>
    %2 = arith.truncf %1 : vector<8x63xf32> to vector<8x63xbf16>
    %c0_3 = arith.constant 0 : index
    %c0_4 = arith.constant 0 : index
    %3 = vector.load %arg4[%c0_3, %c0_4] : memref<63x567xbf16, #tpu.memory_space<vmem>>, vector<63x567xbf16>
    %cst = arith.constant dense<0.000000e+00> : vector<8x567xf32>
    %4 = tpu.matmul %2, %3, %cst {dimension_numbers = #tpu.dot_dimension_numbers<[1], [0], [0], [1], [0, 0, 1, 1], [], []>} : vector<8x63xbf16>, vector<63x567xbf16>, vector<8x567xf32> -> vector<8x567xf32>
    %5 = arith.mulf %0, %4 : vector<8x567xf32>
    %6 = vector.extract_strided_slice %5 {offsets = [0, 0], sizes = [8, 63], strides = [1, 1]} : vector<8x567xf32> to vector<8x63xf32>
    %7 = vector.extract_strided_slice %5 {offsets = [0, 63], sizes = [8, 63], strides = [1, 1]} : vector<8x567xf32> to vector<8x63xf32>
    %8 = arith.addf %6, %7 : vector<8x63xf32>
    %9 = vector.extract_strided_slice %5 {offsets = [0, 126], sizes = [8, 63], strides = [1, 1]} : vector<8x567xf32> to vector<8x63xf32>
    %10 = arith.addf %8, %9 : vector<8x63xf32>
    %11 = vector.extract_strided_slice %5 {offsets = [0, 189], sizes = [8, 63], strides = [1, 1]} : vector<8x567xf32> to vector<8x63xf32>
    %12 = arith.addf %10, %11 : vector<8x63xf32>
    %13 = vector.extract_strided_slice %5 {offsets = [0, 252], sizes = [8, 63], strides = [1, 1]} : vector<8x567xf32> to vector<8x63xf32>
    %14 = arith.addf %12, %13 : vector<8x63xf32>
    %15 = vector.extract_strided_slice %5 {offsets = [0, 315], sizes = [8, 63], strides = [1, 1]} : vector<8x567xf32> to vector<8x63xf32>
    %16 = arith.addf %14, %15 : vector<8x63xf32>
    %17 = vector.extract_strided_slice %5 {offsets = [0, 378], sizes = [8, 63], strides = [1, 1]} : vector<8x567xf32> to vector<8x63xf32>
    %18 = arith.addf %16, %17 : vector<8x63xf32>
    %19 = vector.extract_strided_slice %5 {offsets = [0, 441], sizes = [8, 63], strides = [1, 1]} : vector<8x567xf32> to vector<8x63xf32>
    %20 = arith.addf %18, %19 : vector<8x63xf32>
    %21 = vector.extract_strided_slice %5 {offsets = [0, 504], sizes = [8, 63], strides = [1, 1]} : vector<8x567xf32> to vector<8x63xf32>
    %22 = arith.addf %20, %21 : vector<8x63xf32>
    %c0_5 = arith.constant 0 : index
    %c0_6 = arith.constant 0 : index
    %23 = vector.load %arg5[%c0_5, %c0_6] : memref<1x63xf32, #tpu.memory_space<vmem>>, vector<1x63xf32>
    %24 = vector.broadcast %23 : vector<1x63xf32> to vector<8x63xf32>
    %25 = arith.addf %22, %24 : vector<8x63xf32>
    %26 = arith.truncf %25 : vector<8x63xf32> to vector<8x63xbf16>
    %c0_7 = arith.constant 0 : index
    %c0_8 = arith.constant 0 : index
    %27 = vector.load %arg6[%c0_7, %c0_8] : memref<63x567xbf16, #tpu.memory_space<vmem>>, vector<63x567xbf16>
    %cst_9 = arith.constant dense<0.000000e+00> : vector<8x567xf32>
    %28 = tpu.matmul %26, %27, %cst_9 {dimension_numbers = #tpu.dot_dimension_numbers<[1], [0], [0], [1], [0, 0, 1, 1], [], []>} : vector<8x63xbf16>, vector<63x567xbf16>, vector<8x567xf32> -> vector<8x567xf32>
    %29 = arith.mulf %0, %28 : vector<8x567xf32>
    %30 = vector.extract_strided_slice %29 {offsets = [0, 0], sizes = [8, 63], strides = [1, 1]} : vector<8x567xf32> to vector<8x63xf32>
    %31 = vector.extract_strided_slice %29 {offsets = [0, 63], sizes = [8, 63], strides = [1, 1]} : vector<8x567xf32> to vector<8x63xf32>
    %32 = arith.addf %30, %31 : vector<8x63xf32>
    %33 = vector.extract_strided_slice %29 {offsets = [0, 126], sizes = [8, 63], strides = [1, 1]} : vector<8x567xf32> to vector<8x63xf32>
    %34 = arith.addf %32, %33 : vector<8x63xf32>
    %35 = vector.extract_strided_slice %29 {offsets = [0, 189], sizes = [8, 63], strides = [1, 1]} : vector<8x567xf32> to vector<8x63xf32>
    %36 = arith.addf %34, %35 : vector<8x63xf32>
    %37 = vector.extract_strided_slice %29 {offsets = [0, 252], sizes = [8, 63], strides = [1, 1]} : vector<8x567xf32> to vector<8x63xf32>
    %38 = arith.addf %36, %37 : vector<8x63xf32>
    %39 = vector.extract_strided_slice %29 {offsets = [0, 315], sizes = [8, 63], strides = [1, 1]} : vector<8x567xf32> to vector<8x63xf32>
    %40 = arith.addf %38, %39 : vector<8x63xf32>
    %41 = vector.extract_strided_slice %29 {offsets = [0, 378], sizes = [8, 63], strides = [1, 1]} : vector<8x567xf32> to vector<8x63xf32>
    %42 = arith.addf %40, %41 : vector<8x63xf32>
    %43 = vector.extract_strided_slice %29 {offsets = [0, 441], sizes = [8, 63], strides = [1, 1]} : vector<8x567xf32> to vector<8x63xf32>
    %44 = arith.addf %42, %43 : vector<8x63xf32>
    %45 = vector.extract_strided_slice %29 {offsets = [0, 504], sizes = [8, 63], strides = [1, 1]} : vector<8x567xf32> to vector<8x63xf32>
    %46 = arith.addf %44, %45 : vector<8x63xf32>
    %c0_10 = arith.constant 0 : index
    %c0_11 = arith.constant 0 : index
    %47 = vector.load %arg7[%c0_10, %c0_11] : memref<1x63xf32, #tpu.memory_space<vmem>>, vector<1x63xf32>
    %48 = vector.broadcast %47 : vector<1x63xf32> to vector<8x63xf32>
    %49 = arith.addf %46, %48 : vector<8x63xf32>
    %c0_12 = arith.constant 0 : index
    %c0_13 = arith.constant 0 : index
    %50 = vector.load %arg3[%c0_12, %c0_13] : memref<8x315xf32, #tpu.memory_space<vmem>>, vector<8x315xf32>
    %cst_14 = arith.constant 0.000000e+00 : f32
    %51 = vector.broadcast %cst_14 : f32 to vector<8x315xf32>
    %c0_i32 = arith.constant 0 : i32
    %c31_i32 = arith.constant 31 : i32
    %52 = arith.addi %c0_i32, %c31_i32 : i32
    %c1_i32 = arith.constant 1 : i32
    %53 = scf.for %arg20 = %c0_i32 to %52 step %c1_i32 iter_args(%arg21 = %51) -> (vector<8x315xf32>)  : i32 {
      %349 = arith.index_cast %arg20 : i32 to index
      %350 = memref.load %arg16[%349] : memref<64xf32, #tpu.memory_space<smem>>
      %351 = vector.broadcast %350 : f32 to vector<8x315xf32>
      %352 = arith.mulf %351, %50 : vector<8x315xf32>
      %353 = arith.index_cast %arg20 : i32 to index
      %354 = memref.load %arg17[%353] : memref<64xf32, #tpu.memory_space<smem>>
      %355 = vector.broadcast %354 : f32 to vector<8x315xf32>
      %356 = arith.addf %352, %355 : vector<8x315xf32>
      %cst_196 = arith.constant 0.000000e+00 : f32
      %357 = vector.broadcast %cst_196 : f32 to vector<8x315xf32>
      %358 = arith.maximumf %356, %357 : vector<8x315xf32>
      %359 = arith.addf %arg21, %358 : vector<8x315xf32>
      scf.yield %359 : vector<8x315xf32>
    }
    %c31_i32_15 = arith.constant 31 : i32
    %c31_i32_16 = arith.constant 31 : i32
    %c33_i32 = arith.constant 33 : i32
    %54 = arith.addi %c31_i32_16, %c33_i32 : i32
    %c1_i32_17 = arith.constant 1 : i32
    %55 = scf.for %arg20 = %c31_i32_16 to %54 step %c1_i32_17 iter_args(%arg21 = %53) -> (vector<8x315xf32>)  : i32 {
      %349 = arith.index_cast %arg20 : i32 to index
      %350 = memref.load %arg16[%349] : memref<64xf32, #tpu.memory_space<smem>>
      %351 = vector.broadcast %350 : f32 to vector<8x315xf32>
      %352 = arith.mulf %351, %50 : vector<8x315xf32>
      %353 = arith.index_cast %arg20 : i32 to index
      %354 = memref.load %arg17[%353] : memref<64xf32, #tpu.memory_space<smem>>
      %355 = vector.broadcast %354 : f32 to vector<8x315xf32>
      %356 = arith.addf %352, %355 : vector<8x315xf32>
      %cst_196 = arith.constant 0.000000e+00 : f32
      %357 = vector.broadcast %cst_196 : f32 to vector<8x315xf32>
      %358 = arith.minimumf %356, %357 : vector<8x315xf32>
      %359 = arith.addf %arg21, %358 : vector<8x315xf32>
      scf.yield %359 : vector<8x315xf32>
    }
    %c33_i32_18 = arith.constant 33 : i32
    %c0_19 = arith.constant 0 : index
    %56 = memref.load %arg18[%c0_19] : memref<1xf32, #tpu.memory_space<smem>>
    %57 = vector.broadcast %56 : f32 to vector<8x315xf32>
    %58 = arith.addf %55, %57 : vector<8x315xf32>
    %cst_20 = arith.constant 0.000000e+00 : f32
    %59 = vector.broadcast %cst_20 : f32 to vector<8x315xf32>
    %60 = arith.maximumf %58, %59 : vector<8x315xf32>
    %61 = arith.truncf %60 : vector<8x315xf32> to vector<8x315xbf16>
    %c0_21 = arith.constant 0 : index
    %c0_22 = arith.constant 0 : index
    %62 = vector.load %arg8[%c0_21, %c0_22] : memref<315x63xbf16, #tpu.memory_space<vmem>>, vector<315x63xbf16>
    %cst_23 = arith.constant dense<0.000000e+00> : vector<8x63xf32>
    %63 = tpu.matmul %61, %62, %cst_23 {dimension_numbers = #tpu.dot_dimension_numbers<[1], [0], [0], [1], [0, 0, 1, 1], [], []>} : vector<8x315xbf16>, vector<315x63xbf16>, vector<8x63xf32> -> vector<8x63xf32>
    %c0_24 = arith.constant 0 : index
    %c0_25 = arith.constant 0 : index
    %64 = vector.load %arg9[%c0_24, %c0_25] : memref<1x63xf32, #tpu.memory_space<vmem>>, vector<1x63xf32>
    %65 = vector.broadcast %64 : vector<1x63xf32> to vector<8x63xf32>
    %66 = arith.addf %63, %65 : vector<8x63xf32>
    %cst_26 = arith.constant 0.000000e+00 : f32
    %67 = vector.broadcast %cst_26 : f32 to vector<8x63xf32>
    %68 = arith.maximumf %66, %67 : vector<8x63xf32>
    %69 = arith.truncf %49 : vector<8x63xf32> to vector<8x63xbf16>
    %70 = arith.truncf %68 : vector<8x63xf32> to vector<8x63xbf16>
    %71 = tpu.concatenate %69, %70 in 1 : vector<8x63xbf16>, vector<8x63xbf16> -> vector<8x126xbf16>
    %c0_27 = arith.constant 0 : index
    %c0_28 = arith.constant 0 : index
    %72 = vector.load %arg12[%c0_27, %c0_28] : memref<256x256xbf16, #tpu.memory_space<vmem>>, vector<256x256xbf16>
    %c0_29 = arith.constant 0 : index
    %c0_30 = arith.constant 0 : index
    %73 = vector.load %arg13[%c0_29, %c0_30] : memref<1x256xf32, #tpu.memory_space<vmem>>, vector<1x256xf32>
    %c0_31 = arith.constant 0 : index
    %c0_32 = arith.constant 0 : index
    %74 = vector.load %arg10[%c0_31, %c0_32] : memref<126x4096xbf16, #tpu.memory_space<vmem>>, vector<126x256xbf16>
    %cst_33 = arith.constant dense<0.000000e+00> : vector<8x256xf32>
    %75 = tpu.matmul %71, %74, %cst_33 {dimension_numbers = #tpu.dot_dimension_numbers<[1], [0], [0], [1], [0, 0, 1, 1], [], []>} : vector<8x126xbf16>, vector<126x256xbf16>, vector<8x256xf32> -> vector<8x256xf32>
    %c0_34 = arith.constant 0 : index
    %c0_35 = arith.constant 0 : index
    %76 = vector.load %arg11[%c0_34, %c0_35] : memref<1x4096xf32, #tpu.memory_space<vmem>>, vector<1x256xf32>
    %77 = vector.broadcast %76 : vector<1x256xf32> to vector<8x256xf32>
    %78 = arith.addf %75, %77 : vector<8x256xf32>
    %cst_36 = arith.constant 0.000000e+00 : f32
    %79 = vector.broadcast %cst_36 : f32 to vector<8x256xf32>
    %80 = arith.maximumf %78, %79 : vector<8x256xf32>
    %81 = arith.truncf %80 : vector<8x256xf32> to vector<8x256xbf16>
    %cst_37 = arith.constant dense<0.000000e+00> : vector<8x256xf32>
    %82 = tpu.matmul %81, %72, %cst_37 {dimension_numbers = #tpu.dot_dimension_numbers<[1], [0], [0], [1], [0, 0, 1, 1], [], []>} : vector<8x256xbf16>, vector<256x256xbf16>, vector<8x256xf32> -> vector<8x256xf32>
    %83 = vector.broadcast %73 : vector<1x256xf32> to vector<8x256xf32>
    %84 = arith.addf %82, %83 : vector<8x256xf32>
    %cst_38 = arith.constant 0.000000e+00 : f32
    %85 = vector.broadcast %cst_38 : f32 to vector<8x256xf32>
    %86 = arith.maximumf %84, %85 : vector<8x256xf32>
    %87 = arith.truncf %86 : vector<8x256xf32> to vector<8x256xbf16>
    %c0_39 = arith.constant 0 : index
    %c0_40 = arith.constant 0 : index
    %88 = vector.load %arg14[%c0_39, %c0_40] : memref<4096x126xbf16, #tpu.memory_space<vmem>>, vector<256x126xbf16>
    %cst_41 = arith.constant dense<0.000000e+00> : vector<8x126xf32>
    %89 = tpu.matmul %87, %88, %cst_41 {dimension_numbers = #tpu.dot_dimension_numbers<[1], [0], [0], [1], [0, 0, 1, 1], [], []>} : vector<8x256xbf16>, vector<256x126xbf16>, vector<8x126xf32> -> vector<8x126xf32>
    %c0_42 = arith.constant 0 : index
    %c256 = arith.constant 256 : index
    %90 = vector.load %arg10[%c0_42, %c256] : memref<126x4096xbf16, #tpu.memory_space<vmem>>, vector<126x256xbf16>
    %cst_43 = arith.constant dense<0.000000e+00> : vector<8x256xf32>
    %91 = tpu.matmul %71, %90, %cst_43 {dimension_numbers = #tpu.dot_dimension_numbers<[1], [0], [0], [1], [0, 0, 1, 1], [], []>} : vector<8x126xbf16>, vector<126x256xbf16>, vector<8x256xf32> -> vector<8x256xf32>
    %c0_44 = arith.constant 0 : index
    %c256_45 = arith.constant 256 : index
    %92 = vector.load %arg11[%c0_44, %c256_45] : memref<1x4096xf32, #tpu.memory_space<vmem>>, vector<1x256xf32>
    %93 = vector.broadcast %92 : vector<1x256xf32> to vector<8x256xf32>
    %94 = arith.addf %91, %93 : vector<8x256xf32>
    %cst_46 = arith.constant 0.000000e+00 : f32
    %95 = vector.broadcast %cst_46 : f32 to vector<8x256xf32>
    %96 = arith.maximumf %94, %95 : vector<8x256xf32>
    %97 = arith.truncf %96 : vector<8x256xf32> to vector<8x256xbf16>
    %cst_47 = arith.constant dense<0.000000e+00> : vector<8x256xf32>
    %98 = tpu.matmul %97, %72, %cst_47 {dimension_numbers = #tpu.dot_dimension_numbers<[1], [0], [0], [1], [0, 0, 1, 1], [], []>} : vector<8x256xbf16>, vector<256x256xbf16>, vector<8x256xf32> -> vector<8x256xf32>
    %99 = vector.broadcast %73 : vector<1x256xf32> to vector<8x256xf32>
    %100 = arith.addf %98, %99 : vector<8x256xf32>
    %cst_48 = arith.constant 0.000000e+00 : f32
    %101 = vector.broadcast %cst_48 : f32 to vector<8x256xf32>
    %102 = arith.maximumf %100, %101 : vector<8x256xf32>
    %103 = arith.truncf %102 : vector<8x256xf32> to vector<8x256xbf16>
    %c256_49 = arith.constant 256 : index
    %c0_50 = arith.constant 0 : index
    %104 = vector.load %arg14[%c256_49, %c0_50] : memref<4096x126xbf16, #tpu.memory_space<vmem>>, vector<256x126xbf16>
    %cst_51 = arith.constant dense<0.000000e+00> : vector<8x126xf32>
    %105 = tpu.matmul %103, %104, %cst_51 {dimension_numbers = #tpu.dot_dimension_numbers<[1], [0], [0], [1], [0, 0, 1, 1], [], []>} : vector<8x256xbf16>, vector<256x126xbf16>, vector<8x126xf32> -> vector<8x126xf32>
    %106 = arith.addf %89, %105 : vector<8x126xf32>
    %c0_52 = arith.constant 0 : index
    %c512 = arith.constant 512 : index
    %107 = vector.load %arg10[%c0_52, %c512] : memref<126x4096xbf16, #tpu.memory_space<vmem>>, vector<126x256xbf16>
    %cst_53 = arith.constant dense<0.000000e+00> : vector<8x256xf32>
    %108 = tpu.matmul %71, %107, %cst_53 {dimension_numbers = #tpu.dot_dimension_numbers<[1], [0], [0], [1], [0, 0, 1, 1], [], []>} : vector<8x126xbf16>, vector<126x256xbf16>, vector<8x256xf32> -> vector<8x256xf32>
    %c0_54 = arith.constant 0 : index
    %c512_55 = arith.constant 512 : index
    %109 = vector.load %arg11[%c0_54, %c512_55] : memref<1x4096xf32, #tpu.memory_space<vmem>>, vector<1x256xf32>
    %110 = vector.broadcast %109 : vector<1x256xf32> to vector<8x256xf32>
    %111 = arith.addf %108, %110 : vector<8x256xf32>
    %cst_56 = arith.constant 0.000000e+00 : f32
    %112 = vector.broadcast %cst_56 : f32 to vector<8x256xf32>
    %113 = arith.maximumf %111, %112 : vector<8x256xf32>
    %114 = arith.truncf %113 : vector<8x256xf32> to vector<8x256xbf16>
    %cst_57 = arith.constant dense<0.000000e+00> : vector<8x256xf32>
    %115 = tpu.matmul %114, %72, %cst_57 {dimension_numbers = #tpu.dot_dimension_numbers<[1], [0], [0], [1], [0, 0, 1, 1], [], []>} : vector<8x256xbf16>, vector<256x256xbf16>, vector<8x256xf32> -> vector<8x256xf32>
    %116 = vector.broadcast %73 : vector<1x256xf32> to vector<8x256xf32>
    %117 = arith.addf %115, %116 : vector<8x256xf32>
    %cst_58 = arith.constant 0.000000e+00 : f32
    %118 = vector.broadcast %cst_58 : f32 to vector<8x256xf32>
    %119 = arith.maximumf %117, %118 : vector<8x256xf32>
    %120 = arith.truncf %119 : vector<8x256xf32> to vector<8x256xbf16>
    %c512_59 = arith.constant 512 : index
    %c0_60 = arith.constant 0 : index
    %121 = vector.load %arg14[%c512_59, %c0_60] : memref<4096x126xbf16, #tpu.memory_space<vmem>>, vector<256x126xbf16>
    %cst_61 = arith.constant dense<0.000000e+00> : vector<8x126xf32>
    %122 = tpu.matmul %120, %121, %cst_61 {dimension_numbers = #tpu.dot_dimension_numbers<[1], [0], [0], [1], [0, 0, 1, 1], [], []>} : vector<8x256xbf16>, vector<256x126xbf16>, vector<8x126xf32> -> vector<8x126xf32>
    %123 = arith.addf %106, %122 : vector<8x126xf32>
    %c0_62 = arith.constant 0 : index
    %c768 = arith.constant 768 : index
    %124 = vector.load %arg10[%c0_62, %c768] : memref<126x4096xbf16, #tpu.memory_space<vmem>>, vector<126x256xbf16>
    %cst_63 = arith.constant dense<0.000000e+00> : vector<8x256xf32>
    %125 = tpu.matmul %71, %124, %cst_63 {dimension_numbers = #tpu.dot_dimension_numbers<[1], [0], [0], [1], [0, 0, 1, 1], [], []>} : vector<8x126xbf16>, vector<126x256xbf16>, vector<8x256xf32> -> vector<8x256xf32>
    %c0_64 = arith.constant 0 : index
    %c768_65 = arith.constant 768 : index
    %126 = vector.load %arg11[%c0_64, %c768_65] : memref<1x4096xf32, #tpu.memory_space<vmem>>, vector<1x256xf32>
    %127 = vector.broadcast %126 : vector<1x256xf32> to vector<8x256xf32>
    %128 = arith.addf %125, %127 : vector<8x256xf32>
    %cst_66 = arith.constant 0.000000e+00 : f32
    %129 = vector.broadcast %cst_66 : f32 to vector<8x256xf32>
    %130 = arith.maximumf %128, %129 : vector<8x256xf32>
    %131 = arith.truncf %130 : vector<8x256xf32> to vector<8x256xbf16>
    %cst_67 = arith.constant dense<0.000000e+00> : vector<8x256xf32>
    %132 = tpu.matmul %131, %72, %cst_67 {dimension_numbers = #tpu.dot_dimension_numbers<[1], [0], [0], [1], [0, 0, 1, 1], [], []>} : vector<8x256xbf16>, vector<256x256xbf16>, vector<8x256xf32> -> vector<8x256xf32>
    %133 = vector.broadcast %73 : vector<1x256xf32> to vector<8x256xf32>
    %134 = arith.addf %132, %133 : vector<8x256xf32>
    %cst_68 = arith.constant 0.000000e+00 : f32
    %135 = vector.broadcast %cst_68 : f32 to vector<8x256xf32>
    %136 = arith.maximumf %134, %135 : vector<8x256xf32>
    %137 = arith.truncf %136 : vector<8x256xf32> to vector<8x256xbf16>
    %c768_69 = arith.constant 768 : index
    %c0_70 = arith.constant 0 : index
    %138 = vector.load %arg14[%c768_69, %c0_70] : memref<4096x126xbf16, #tpu.memory_space<vmem>>, vector<256x126xbf16>
    %cst_71 = arith.constant dense<0.000000e+00> : vector<8x126xf32>
    %139 = tpu.matmul %137, %138, %cst_71 {dimension_numbers = #tpu.dot_dimension_numbers<[1], [0], [0], [1], [0, 0, 1, 1], [], []>} : vector<8x256xbf16>, vector<256x126xbf16>, vector<8x126xf32> -> vector<8x126xf32>
    %140 = arith.addf %123, %139 : vector<8x126xf32>
    %c0_72 = arith.constant 0 : index
    %c1024 = arith.constant 1024 : index
    %141 = vector.load %arg10[%c0_72, %c1024] : memref<126x4096xbf16, #tpu.memory_space<vmem>>, vector<126x256xbf16>
    %cst_73 = arith.constant dense<0.000000e+00> : vector<8x256xf32>
    %142 = tpu.matmul %71, %141, %cst_73 {dimension_numbers = #tpu.dot_dimension_numbers<[1], [0], [0], [1], [0, 0, 1, 1], [], []>} : vector<8x126xbf16>, vector<126x256xbf16>, vector<8x256xf32> -> vector<8x256xf32>
    %c0_74 = arith.constant 0 : index
    %c1024_75 = arith.constant 1024 : index
    %143 = vector.load %arg11[%c0_74, %c1024_75] : memref<1x4096xf32, #tpu.memory_space<vmem>>, vector<1x256xf32>
    %144 = vector.broadcast %143 : vector<1x256xf32> to vector<8x256xf32>
    %145 = arith.addf %142, %144 : vector<8x256xf32>
    %cst_76 = arith.constant 0.000000e+00 : f32
    %146 = vector.broadcast %cst_76 : f32 to vector<8x256xf32>
    %147 = arith.maximumf %145, %146 : vector<8x256xf32>
    %148 = arith.truncf %147 : vector<8x256xf32> to vector<8x256xbf16>
    %cst_77 = arith.constant dense<0.000000e+00> : vector<8x256xf32>
    %149 = tpu.matmul %148, %72, %cst_77 {dimension_numbers = #tpu.dot_dimension_numbers<[1], [0], [0], [1], [0, 0, 1, 1], [], []>} : vector<8x256xbf16>, vector<256x256xbf16>, vector<8x256xf32> -> vector<8x256xf32>
    %150 = vector.broadcast %73 : vector<1x256xf32> to vector<8x256xf32>
    %151 = arith.addf %149, %150 : vector<8x256xf32>
    %cst_78 = arith.constant 0.000000e+00 : f32
    %152 = vector.broadcast %cst_78 : f32 to vector<8x256xf32>
    %153 = arith.maximumf %151, %152 : vector<8x256xf32>
    %154 = arith.truncf %153 : vector<8x256xf32> to vector<8x256xbf16>
    %c1024_79 = arith.constant 1024 : index
    %c0_80 = arith.constant 0 : index
    %155 = vector.load %arg14[%c1024_79, %c0_80] : memref<4096x126xbf16, #tpu.memory_space<vmem>>, vector<256x126xbf16>
    %cst_81 = arith.constant dense<0.000000e+00> : vector<8x126xf32>
    %156 = tpu.matmul %154, %155, %cst_81 {dimension_numbers = #tpu.dot_dimension_numbers<[1], [0], [0], [1], [0, 0, 1, 1], [], []>} : vector<8x256xbf16>, vector<256x126xbf16>, vector<8x126xf32> -> vector<8x126xf32>
    %157 = arith.addf %140, %156 : vector<8x126xf32>
    %c0_82 = arith.constant 0 : index
    %c1280 = arith.constant 1280 : index
    %158 = vector.load %arg10[%c0_82, %c1280] : memref<126x4096xbf16, #tpu.memory_space<vmem>>, vector<126x256xbf16>
    %cst_83 = arith.constant dense<0.000000e+00> : vector<8x256xf32>
    %159 = tpu.matmul %71, %158, %cst_83 {dimension_numbers = #tpu.dot_dimension_numbers<[1], [0], [0], [1], [0, 0, 1, 1], [], []>} : vector<8x126xbf16>, vector<126x256xbf16>, vector<8x256xf32> -> vector<8x256xf32>
    %c0_84 = arith.constant 0 : index
    %c1280_85 = arith.constant 1280 : index
    %160 = vector.load %arg11[%c0_84, %c1280_85] : memref<1x4096xf32, #tpu.memory_space<vmem>>, vector<1x256xf32>
    %161 = vector.broadcast %160 : vector<1x256xf32> to vector<8x256xf32>
    %162 = arith.addf %159, %161 : vector<8x256xf32>
    %cst_86 = arith.constant 0.000000e+00 : f32
    %163 = vector.broadcast %cst_86 : f32 to vector<8x256xf32>
    %164 = arith.maximumf %162, %163 : vector<8x256xf32>
    %165 = arith.truncf %164 : vector<8x256xf32> to vector<8x256xbf16>
    %cst_87 = arith.constant dense<0.000000e+00> : vector<8x256xf32>
    %166 = tpu.matmul %165, %72, %cst_87 {dimension_numbers = #tpu.dot_dimension_numbers<[1], [0], [0], [1], [0, 0, 1, 1], [], []>} : vector<8x256xbf16>, vector<256x256xbf16>, vector<8x256xf32> -> vector<8x256xf32>
    %167 = vector.broadcast %73 : vector<1x256xf32> to vector<8x256xf32>
    %168 = arith.addf %166, %167 : vector<8x256xf32>
    %cst_88 = arith.constant 0.000000e+00 : f32
    %169 = vector.broadcast %cst_88 : f32 to vector<8x256xf32>
    %170 = arith.maximumf %168, %169 : vector<8x256xf32>
    %171 = arith.truncf %170 : vector<8x256xf32> to vector<8x256xbf16>
    %c1280_89 = arith.constant 1280 : index
    %c0_90 = arith.constant 0 : index
    %172 = vector.load %arg14[%c1280_89, %c0_90] : memref<4096x126xbf16, #tpu.memory_space<vmem>>, vector<256x126xbf16>
    %cst_91 = arith.constant dense<0.000000e+00> : vector<8x126xf32>
    %173 = tpu.matmul %171, %172, %cst_91 {dimension_numbers = #tpu.dot_dimension_numbers<[1], [0], [0], [1], [0, 0, 1, 1], [], []>} : vector<8x256xbf16>, vector<256x126xbf16>, vector<8x126xf32> -> vector<8x126xf32>
    %174 = arith.addf %157, %173 : vector<8x126xf32>
    %c0_92 = arith.constant 0 : index
    %c1536 = arith.constant 1536 : index
    %175 = vector.load %arg10[%c0_92, %c1536] : memref<126x4096xbf16, #tpu.memory_space<vmem>>, vector<126x256xbf16>
    %cst_93 = arith.constant dense<0.000000e+00> : vector<8x256xf32>
    %176 = tpu.matmul %71, %175, %cst_93 {dimension_numbers = #tpu.dot_dimension_numbers<[1], [0], [0], [1], [0, 0, 1, 1], [], []>} : vector<8x126xbf16>, vector<126x256xbf16>, vector<8x256xf32> -> vector<8x256xf32>
    %c0_94 = arith.constant 0 : index
    %c1536_95 = arith.constant 1536 : index
    %177 = vector.load %arg11[%c0_94, %c1536_95] : memref<1x4096xf32, #tpu.memory_space<vmem>>, vector<1x256xf32>
    %178 = vector.broadcast %177 : vector<1x256xf32> to vector<8x256xf32>
    %179 = arith.addf %176, %178 : vector<8x256xf32>
    %cst_96 = arith.constant 0.000000e+00 : f32
    %180 = vector.broadcast %cst_96 : f32 to vector<8x256xf32>
    %181 = arith.maximumf %179, %180 : vector<8x256xf32>
    %182 = arith.truncf %181 : vector<8x256xf32> to vector<8x256xbf16>
    %cst_97 = arith.constant dense<0.000000e+00> : vector<8x256xf32>
    %183 = tpu.matmul %182, %72, %cst_97 {dimension_numbers = #tpu.dot_dimension_numbers<[1], [0], [0], [1], [0, 0, 1, 1], [], []>} : vector<8x256xbf16>, vector<256x256xbf16>, vector<8x256xf32> -> vector<8x256xf32>
    %184 = vector.broadcast %73 : vector<1x256xf32> to vector<8x256xf32>
    %185 = arith.addf %183, %184 : vector<8x256xf32>
    %cst_98 = arith.constant 0.000000e+00 : f32
    %186 = vector.broadcast %cst_98 : f32 to vector<8x256xf32>
    %187 = arith.maximumf %185, %186 : vector<8x256xf32>
    %188 = arith.truncf %187 : vector<8x256xf32> to vector<8x256xbf16>
    %c1536_99 = arith.constant 1536 : index
    %c0_100 = arith.constant 0 : index
    %189 = vector.load %arg14[%c1536_99, %c0_100] : memref<4096x126xbf16, #tpu.memory_space<vmem>>, vector<256x126xbf16>
    %cst_101 = arith.constant dense<0.000000e+00> : vector<8x126xf32>
    %190 = tpu.matmul %188, %189, %cst_101 {dimension_numbers = #tpu.dot_dimension_numbers<[1], [0], [0], [1], [0, 0, 1, 1], [], []>} : vector<8x256xbf16>, vector<256x126xbf16>, vector<8x126xf32> -> vector<8x126xf32>
    %191 = arith.addf %174, %190 : vector<8x126xf32>
    %c0_102 = arith.constant 0 : index
    %c1792 = arith.constant 1792 : index
    %192 = vector.load %arg10[%c0_102, %c1792] : memref<126x4096xbf16, #tpu.memory_space<vmem>>, vector<126x256xbf16>
    %cst_103 = arith.constant dense<0.000000e+00> : vector<8x256xf32>
    %193 = tpu.matmul %71, %192, %cst_103 {dimension_numbers = #tpu.dot_dimension_numbers<[1], [0], [0], [1], [0, 0, 1, 1], [], []>} : vector<8x126xbf16>, vector<126x256xbf16>, vector<8x256xf32> -> vector<8x256xf32>
    %c0_104 = arith.constant 0 : index
    %c1792_105 = arith.constant 1792 : index
    %194 = vector.load %arg11[%c0_104, %c1792_105] : memref<1x4096xf32, #tpu.memory_space<vmem>>, vector<1x256xf32>
    %195 = vector.broadcast %194 : vector<1x256xf32> to vector<8x256xf32>
    %196 = arith.addf %193, %195 : vector<8x256xf32>
    %cst_106 = arith.constant 0.000000e+00 : f32
    %197 = vector.broadcast %cst_106 : f32 to vector<8x256xf32>
    %198 = arith.maximumf %196, %197 : vector<8x256xf32>
    %199 = arith.truncf %198 : vector<8x256xf32> to vector<8x256xbf16>
    %cst_107 = arith.constant dense<0.000000e+00> : vector<8x256xf32>
    %200 = tpu.matmul %199, %72, %cst_107 {dimension_numbers = #tpu.dot_dimension_numbers<[1], [0], [0], [1], [0, 0, 1, 1], [], []>} : vector<8x256xbf16>, vector<256x256xbf16>, vector<8x256xf32> -> vector<8x256xf32>
    %201 = vector.broadcast %73 : vector<1x256xf32> to vector<8x256xf32>
    %202 = arith.addf %200, %201 : vector<8x256xf32>
    %cst_108 = arith.constant 0.000000e+00 : f32
    %203 = vector.broadcast %cst_108 : f32 to vector<8x256xf32>
    %204 = arith.maximumf %202, %203 : vector<8x256xf32>
    %205 = arith.truncf %204 : vector<8x256xf32> to vector<8x256xbf16>
    %c1792_109 = arith.constant 1792 : index
    %c0_110 = arith.constant 0 : index
    %206 = vector.load %arg14[%c1792_109, %c0_110] : memref<4096x126xbf16, #tpu.memory_space<vmem>>, vector<256x126xbf16>
    %cst_111 = arith.constant dense<0.000000e+00> : vector<8x126xf32>
    %207 = tpu.matmul %205, %206, %cst_111 {dimension_numbers = #tpu.dot_dimension_numbers<[1], [0], [0], [1], [0, 0, 1, 1], [], []>} : vector<8x256xbf16>, vector<256x126xbf16>, vector<8x126xf32> -> vector<8x126xf32>
    %208 = arith.addf %191, %207 : vector<8x126xf32>
    %c0_112 = arith.constant 0 : index
    %c2048 = arith.constant 2048 : index
    %209 = vector.load %arg10[%c0_112, %c2048] : memref<126x4096xbf16, #tpu.memory_space<vmem>>, vector<126x256xbf16>
    %cst_113 = arith.constant dense<0.000000e+00> : vector<8x256xf32>
    %210 = tpu.matmul %71, %209, %cst_113 {dimension_numbers = #tpu.dot_dimension_numbers<[1], [0], [0], [1], [0, 0, 1, 1], [], []>} : vector<8x126xbf16>, vector<126x256xbf16>, vector<8x256xf32> -> vector<8x256xf32>
    %c0_114 = arith.constant 0 : index
    %c2048_115 = arith.constant 2048 : index
    %211 = vector.load %arg11[%c0_114, %c2048_115] : memref<1x4096xf32, #tpu.memory_space<vmem>>, vector<1x256xf32>
    %212 = vector.broadcast %211 : vector<1x256xf32> to vector<8x256xf32>
    %213 = arith.addf %210, %212 : vector<8x256xf32>
    %cst_116 = arith.constant 0.000000e+00 : f32
    %214 = vector.broadcast %cst_116 : f32 to vector<8x256xf32>
    %215 = arith.maximumf %213, %214 : vector<8x256xf32>
    %216 = arith.truncf %215 : vector<8x256xf32> to vector<8x256xbf16>
    %cst_117 = arith.constant dense<0.000000e+00> : vector<8x256xf32>
    %217 = tpu.matmul %216, %72, %cst_117 {dimension_numbers = #tpu.dot_dimension_numbers<[1], [0], [0], [1], [0, 0, 1, 1], [], []>} : vector<8x256xbf16>, vector<256x256xbf16>, vector<8x256xf32> -> vector<8x256xf32>
    %218 = vector.broadcast %73 : vector<1x256xf32> to vector<8x256xf32>
    %219 = arith.addf %217, %218 : vector<8x256xf32>
    %cst_118 = arith.constant 0.000000e+00 : f32
    %220 = vector.broadcast %cst_118 : f32 to vector<8x256xf32>
    %221 = arith.maximumf %219, %220 : vector<8x256xf32>
    %222 = arith.truncf %221 : vector<8x256xf32> to vector<8x256xbf16>
    %c2048_119 = arith.constant 2048 : index
    %c0_120 = arith.constant 0 : index
    %223 = vector.load %arg14[%c2048_119, %c0_120] : memref<4096x126xbf16, #tpu.memory_space<vmem>>, vector<256x126xbf16>
    %cst_121 = arith.constant dense<0.000000e+00> : vector<8x126xf32>
    %224 = tpu.matmul %222, %223, %cst_121 {dimension_numbers = #tpu.dot_dimension_numbers<[1], [0], [0], [1], [0, 0, 1, 1], [], []>} : vector<8x256xbf16>, vector<256x126xbf16>, vector<8x126xf32> -> vector<8x126xf32>
    %225 = arith.addf %208, %224 : vector<8x126xf32>
    %c0_122 = arith.constant 0 : index
    %c2304 = arith.constant 2304 : index
    %226 = vector.load %arg10[%c0_122, %c2304] : memref<126x4096xbf16, #tpu.memory_space<vmem>>, vector<126x256xbf16>
    %cst_123 = arith.constant dense<0.000000e+00> : vector<8x256xf32>
    %227 = tpu.matmul %71, %226, %cst_123 {dimension_numbers = #tpu.dot_dimension_numbers<[1], [0], [0], [1], [0, 0, 1, 1], [], []>} : vector<8x126xbf16>, vector<126x256xbf16>, vector<8x256xf32> -> vector<8x256xf32>
    %c0_124 = arith.constant 0 : index
    %c2304_125 = arith.constant 2304 : index
    %228 = vector.load %arg11[%c0_124, %c2304_125] : memref<1x4096xf32, #tpu.memory_space<vmem>>, vector<1x256xf32>
    %229 = vector.broadcast %228 : vector<1x256xf32> to vector<8x256xf32>
    %230 = arith.addf %227, %229 : vector<8x256xf32>
    %cst_126 = arith.constant 0.000000e+00 : f32
    %231 = vector.broadcast %cst_126 : f32 to vector<8x256xf32>
    %232 = arith.maximumf %230, %231 : vector<8x256xf32>
    %233 = arith.truncf %232 : vector<8x256xf32> to vector<8x256xbf16>
    %cst_127 = arith.constant dense<0.000000e+00> : vector<8x256xf32>
    %234 = tpu.matmul %233, %72, %cst_127 {dimension_numbers = #tpu.dot_dimension_numbers<[1], [0], [0], [1], [0, 0, 1, 1], [], []>} : vector<8x256xbf16>, vector<256x256xbf16>, vector<8x256xf32> -> vector<8x256xf32>
    %235 = vector.broadcast %73 : vector<1x256xf32> to vector<8x256xf32>
    %236 = arith.addf %234, %235 : vector<8x256xf32>
    %cst_128 = arith.constant 0.000000e+00 : f32
    %237 = vector.broadcast %cst_128 : f32 to vector<8x256xf32>
    %238 = arith.maximumf %236, %237 : vector<8x256xf32>
    %239 = arith.truncf %238 : vector<8x256xf32> to vector<8x256xbf16>
    %c2304_129 = arith.constant 2304 : index
    %c0_130 = arith.constant 0 : index
    %240 = vector.load %arg14[%c2304_129, %c0_130] : memref<4096x126xbf16, #tpu.memory_space<vmem>>, vector<256x126xbf16>
    %cst_131 = arith.constant dense<0.000000e+00> : vector<8x126xf32>
    %241 = tpu.matmul %239, %240, %cst_131 {dimension_numbers = #tpu.dot_dimension_numbers<[1], [0], [0], [1], [0, 0, 1, 1], [], []>} : vector<8x256xbf16>, vector<256x126xbf16>, vector<8x126xf32> -> vector<8x126xf32>
    %242 = arith.addf %225, %241 : vector<8x126xf32>
    %c0_132 = arith.constant 0 : index
    %c2560 = arith.constant 2560 : index
    %243 = vector.load %arg10[%c0_132, %c2560] : memref<126x4096xbf16, #tpu.memory_space<vmem>>, vector<126x256xbf16>
    %cst_133 = arith.constant dense<0.000000e+00> : vector<8x256xf32>
    %244 = tpu.matmul %71, %243, %cst_133 {dimension_numbers = #tpu.dot_dimension_numbers<[1], [0], [0], [1], [0, 0, 1, 1], [], []>} : vector<8x126xbf16>, vector<126x256xbf16>, vector<8x256xf32> -> vector<8x256xf32>
    %c0_134 = arith.constant 0 : index
    %c2560_135 = arith.constant 2560 : index
    %245 = vector.load %arg11[%c0_134, %c2560_135] : memref<1x4096xf32, #tpu.memory_space<vmem>>, vector<1x256xf32>
    %246 = vector.broadcast %245 : vector<1x256xf32> to vector<8x256xf32>
    %247 = arith.addf %244, %246 : vector<8x256xf32>
    %cst_136 = arith.constant 0.000000e+00 : f32
    %248 = vector.broadcast %cst_136 : f32 to vector<8x256xf32>
    %249 = arith.maximumf %247, %248 : vector<8x256xf32>
    %250 = arith.truncf %249 : vector<8x256xf32> to vector<8x256xbf16>
    %cst_137 = arith.constant dense<0.000000e+00> : vector<8x256xf32>
    %251 = tpu.matmul %250, %72, %cst_137 {dimension_numbers = #tpu.dot_dimension_numbers<[1], [0], [0], [1], [0, 0, 1, 1], [], []>} : vector<8x256xbf16>, vector<256x256xbf16>, vector<8x256xf32> -> vector<8x256xf32>
    %252 = vector.broadcast %73 : vector<1x256xf32> to vector<8x256xf32>
    %253 = arith.addf %251, %252 : vector<8x256xf32>
    %cst_138 = arith.constant 0.000000e+00 : f32
    %254 = vector.broadcast %cst_138 : f32 to vector<8x256xf32>
    %255 = arith.maximumf %253, %254 : vector<8x256xf32>
    %256 = arith.truncf %255 : vector<8x256xf32> to vector<8x256xbf16>
    %c2560_139 = arith.constant 2560 : index
    %c0_140 = arith.constant 0 : index
    %257 = vector.load %arg14[%c2560_139, %c0_140] : memref<4096x126xbf16, #tpu.memory_space<vmem>>, vector<256x126xbf16>
    %cst_141 = arith.constant dense<0.000000e+00> : vector<8x126xf32>
    %258 = tpu.matmul %256, %257, %cst_141 {dimension_numbers = #tpu.dot_dimension_numbers<[1], [0], [0], [1], [0, 0, 1, 1], [], []>} : vector<8x256xbf16>, vector<256x126xbf16>, vector<8x126xf32> -> vector<8x126xf32>
    %259 = arith.addf %242, %258 : vector<8x126xf32>
    %c0_142 = arith.constant 0 : index
    %c2816 = arith.constant 2816 : index
    %260 = vector.load %arg10[%c0_142, %c2816] : memref<126x4096xbf16, #tpu.memory_space<vmem>>, vector<126x256xbf16>
    %cst_143 = arith.constant dense<0.000000e+00> : vector<8x256xf32>
    %261 = tpu.matmul %71, %260, %cst_143 {dimension_numbers = #tpu.dot_dimension_numbers<[1], [0], [0], [1], [0, 0, 1, 1], [], []>} : vector<8x126xbf16>, vector<126x256xbf16>, vector<8x256xf32> -> vector<8x256xf32>
    %c0_144 = arith.constant 0 : index
    %c2816_145 = arith.constant 2816 : index
    %262 = vector.load %arg11[%c0_144, %c2816_145] : memref<1x4096xf32, #tpu.memory_space<vmem>>, vector<1x256xf32>
    %263 = vector.broadcast %262 : vector<1x256xf32> to vector<8x256xf32>
    %264 = arith.addf %261, %263 : vector<8x256xf32>
    %cst_146 = arith.constant 0.000000e+00 : f32
    %265 = vector.broadcast %cst_146 : f32 to vector<8x256xf32>
    %266 = arith.maximumf %264, %265 : vector<8x256xf32>
    %267 = arith.truncf %266 : vector<8x256xf32> to vector<8x256xbf16>
    %cst_147 = arith.constant dense<0.000000e+00> : vector<8x256xf32>
    %268 = tpu.matmul %267, %72, %cst_147 {dimension_numbers = #tpu.dot_dimension_numbers<[1], [0], [0], [1], [0, 0, 1, 1], [], []>} : vector<8x256xbf16>, vector<256x256xbf16>, vector<8x256xf32> -> vector<8x256xf32>
    %269 = vector.broadcast %73 : vector<1x256xf32> to vector<8x256xf32>
    %270 = arith.addf %268, %269 : vector<8x256xf32>
    %cst_148 = arith.constant 0.000000e+00 : f32
    %271 = vector.broadcast %cst_148 : f32 to vector<8x256xf32>
    %272 = arith.maximumf %270, %271 : vector<8x256xf32>
    %273 = arith.truncf %272 : vector<8x256xf32> to vector<8x256xbf16>
    %c2816_149 = arith.constant 2816 : index
    %c0_150 = arith.constant 0 : index
    %274 = vector.load %arg14[%c2816_149, %c0_150] : memref<4096x126xbf16, #tpu.memory_space<vmem>>, vector<256x126xbf16>
    %cst_151 = arith.constant dense<0.000000e+00> : vector<8x126xf32>
    %275 = tpu.matmul %273, %274, %cst_151 {dimension_numbers = #tpu.dot_dimension_numbers<[1], [0], [0], [1], [0, 0, 1, 1], [], []>} : vector<8x256xbf16>, vector<256x126xbf16>, vector<8x126xf32> -> vector<8x126xf32>
    %276 = arith.addf %259, %275 : vector<8x126xf32>
    %c0_152 = arith.constant 0 : index
    %c3072 = arith.constant 3072 : index
    %277 = vector.load %arg10[%c0_152, %c3072] : memref<126x4096xbf16, #tpu.memory_space<vmem>>, vector<126x256xbf16>
    %cst_153 = arith.constant dense<0.000000e+00> : vector<8x256xf32>
    %278 = tpu.matmul %71, %277, %cst_153 {dimension_numbers = #tpu.dot_dimension_numbers<[1], [0], [0], [1], [0, 0, 1, 1], [], []>} : vector<8x126xbf16>, vector<126x256xbf16>, vector<8x256xf32> -> vector<8x256xf32>
    %c0_154 = arith.constant 0 : index
    %c3072_155 = arith.constant 3072 : index
    %279 = vector.load %arg11[%c0_154, %c3072_155] : memref<1x4096xf32, #tpu.memory_space<vmem>>, vector<1x256xf32>
    %280 = vector.broadcast %279 : vector<1x256xf32> to vector<8x256xf32>
    %281 = arith.addf %278, %280 : vector<8x256xf32>
    %cst_156 = arith.constant 0.000000e+00 : f32
    %282 = vector.broadcast %cst_156 : f32 to vector<8x256xf32>
    %283 = arith.maximumf %281, %282 : vector<8x256xf32>
    %284 = arith.truncf %283 : vector<8x256xf32> to vector<8x256xbf16>
    %cst_157 = arith.constant dense<0.000000e+00> : vector<8x256xf32>
    %285 = tpu.matmul %284, %72, %cst_157 {dimension_numbers = #tpu.dot_dimension_numbers<[1], [0], [0], [1], [0, 0, 1, 1], [], []>} : vector<8x256xbf16>, vector<256x256xbf16>, vector<8x256xf32> -> vector<8x256xf32>
    %286 = vector.broadcast %73 : vector<1x256xf32> to vector<8x256xf32>
    %287 = arith.addf %285, %286 : vector<8x256xf32>
    %cst_158 = arith.constant 0.000000e+00 : f32
    %288 = vector.broadcast %cst_158 : f32 to vector<8x256xf32>
    %289 = arith.maximumf %287, %288 : vector<8x256xf32>
    %290 = arith.truncf %289 : vector<8x256xf32> to vector<8x256xbf16>
    %c3072_159 = arith.constant 3072 : index
    %c0_160 = arith.constant 0 : index
    %291 = vector.load %arg14[%c3072_159, %c0_160] : memref<4096x126xbf16, #tpu.memory_space<vmem>>, vector<256x126xbf16>
    %cst_161 = arith.constant dense<0.000000e+00> : vector<8x126xf32>
    %292 = tpu.matmul %290, %291, %cst_161 {dimension_numbers = #tpu.dot_dimension_numbers<[1], [0], [0], [1], [0, 0, 1, 1], [], []>} : vector<8x256xbf16>, vector<256x126xbf16>, vector<8x126xf32> -> vector<8x126xf32>
    %293 = arith.addf %276, %292 : vector<8x126xf32>
    %c0_162 = arith.constant 0 : index
    %c3328 = arith.constant 3328 : index
    %294 = vector.load %arg10[%c0_162, %c3328] : memref<126x4096xbf16, #tpu.memory_space<vmem>>, vector<126x256xbf16>
    %cst_163 = arith.constant dense<0.000000e+00> : vector<8x256xf32>
    %295 = tpu.matmul %71, %294, %cst_163 {dimension_numbers = #tpu.dot_dimension_numbers<[1], [0], [0], [1], [0, 0, 1, 1], [], []>} : vector<8x126xbf16>, vector<126x256xbf16>, vector<8x256xf32> -> vector<8x256xf32>
    %c0_164 = arith.constant 0 : index
    %c3328_165 = arith.constant 3328 : index
    %296 = vector.load %arg11[%c0_164, %c3328_165] : memref<1x4096xf32, #tpu.memory_space<vmem>>, vector<1x256xf32>
    %297 = vector.broadcast %296 : vector<1x256xf32> to vector<8x256xf32>
    %298 = arith.addf %295, %297 : vector<8x256xf32>
    %cst_166 = arith.constant 0.000000e+00 : f32
    %299 = vector.broadcast %cst_166 : f32 to vector<8x256xf32>
    %300 = arith.maximumf %298, %299 : vector<8x256xf32>
    %301 = arith.truncf %300 : vector<8x256xf32> to vector<8x256xbf16>
    %cst_167 = arith.constant dense<0.000000e+00> : vector<8x256xf32>
    %302 = tpu.matmul %301, %72, %cst_167 {dimension_numbers = #tpu.dot_dimension_numbers<[1], [0], [0], [1], [0, 0, 1, 1], [], []>} : vector<8x256xbf16>, vector<256x256xbf16>, vector<8x256xf32> -> vector<8x256xf32>
    %303 = vector.broadcast %73 : vector<1x256xf32> to vector<8x256xf32>
    %304 = arith.addf %302, %303 : vector<8x256xf32>
    %cst_168 = arith.constant 0.000000e+00 : f32
    %305 = vector.broadcast %cst_168 : f32 to vector<8x256xf32>
    %306 = arith.maximumf %304, %305 : vector<8x256xf32>
    %307 = arith.truncf %306 : vector<8x256xf32> to vector<8x256xbf16>
    %c3328_169 = arith.constant 3328 : index
    %c0_170 = arith.constant 0 : index
    %308 = vector.load %arg14[%c3328_169, %c0_170] : memref<4096x126xbf16, #tpu.memory_space<vmem>>, vector<256x126xbf16>
    %cst_171 = arith.constant dense<0.000000e+00> : vector<8x126xf32>
    %309 = tpu.matmul %307, %308, %cst_171 {dimension_numbers = #tpu.dot_dimension_numbers<[1], [0], [0], [1], [0, 0, 1, 1], [], []>} : vector<8x256xbf16>, vector<256x126xbf16>, vector<8x126xf32> -> vector<8x126xf32>
    %310 = arith.addf %293, %309 : vector<8x126xf32>
    %c0_172 = arith.constant 0 : index
    %c3584 = arith.constant 3584 : index
    %311 = vector.load %arg10[%c0_172, %c3584] : memref<126x4096xbf16, #tpu.memory_space<vmem>>, vector<126x256xbf16>
    %cst_173 = arith.constant dense<0.000000e+00> : vector<8x256xf32>
    %312 = tpu.matmul %71, %311, %cst_173 {dimension_numbers = #tpu.dot_dimension_numbers<[1], [0], [0], [1], [0, 0, 1, 1], [], []>} : vector<8x126xbf16>, vector<126x256xbf16>, vector<8x256xf32> -> vector<8x256xf32>
    %c0_174 = arith.constant 0 : index
    %c3584_175 = arith.constant 3584 : index
    %313 = vector.load %arg11[%c0_174, %c3584_175] : memref<1x4096xf32, #tpu.memory_space<vmem>>, vector<1x256xf32>
    %314 = vector.broadcast %313 : vector<1x256xf32> to vector<8x256xf32>
    %315 = arith.addf %312, %314 : vector<8x256xf32>
    %cst_176 = arith.constant 0.000000e+00 : f32
    %316 = vector.broadcast %cst_176 : f32 to vector<8x256xf32>
    %317 = arith.maximumf %315, %316 : vector<8x256xf32>
    %318 = arith.truncf %317 : vector<8x256xf32> to vector<8x256xbf16>
    %cst_177 = arith.constant dense<0.000000e+00> : vector<8x256xf32>
    %319 = tpu.matmul %318, %72, %cst_177 {dimension_numbers = #tpu.dot_dimension_numbers<[1], [0], [0], [1], [0, 0, 1, 1], [], []>} : vector<8x256xbf16>, vector<256x256xbf16>, vector<8x256xf32> -> vector<8x256xf32>
    %320 = vector.broadcast %73 : vector<1x256xf32> to vector<8x256xf32>
    %321 = arith.addf %319, %320 : vector<8x256xf32>
    %cst_178 = arith.constant 0.000000e+00 : f32
    %322 = vector.broadcast %cst_178 : f32 to vector<8x256xf32>
    %323 = arith.maximumf %321, %322 : vector<8x256xf32>
    %324 = arith.truncf %323 : vector<8x256xf32> to vector<8x256xbf16>
    %c3584_179 = arith.constant 3584 : index
    %c0_180 = arith.constant 0 : index
    %325 = vector.load %arg14[%c3584_179, %c0_180] : memref<4096x126xbf16, #tpu.memory_space<vmem>>, vector<256x126xbf16>
    %cst_181 = arith.constant dense<0.000000e+00> : vector<8x126xf32>
    %326 = tpu.matmul %324, %325, %cst_181 {dimension_numbers = #tpu.dot_dimension_numbers<[1], [0], [0], [1], [0, 0, 1, 1], [], []>} : vector<8x256xbf16>, vector<256x126xbf16>, vector<8x126xf32> -> vector<8x126xf32>
    %327 = arith.addf %310, %326 : vector<8x126xf32>
    %c0_182 = arith.constant 0 : index
    %c3840 = arith.constant 3840 : index
    %328 = vector.load %arg10[%c0_182, %c3840] : memref<126x4096xbf16, #tpu.memory_space<vmem>>, vector<126x256xbf16>
    %cst_183 = arith.constant dense<0.000000e+00> : vector<8x256xf32>
    %329 = tpu.matmul %71, %328, %cst_183 {dimension_numbers = #tpu.dot_dimension_numbers<[1], [0], [0], [1], [0, 0, 1, 1], [], []>} : vector<8x126xbf16>, vector<126x256xbf16>, vector<8x256xf32> -> vector<8x256xf32>
    %c0_184 = arith.constant 0 : index
    %c3840_185 = arith.constant 3840 : index
    %330 = vector.load %arg11[%c0_184, %c3840_185] : memref<1x4096xf32, #tpu.memory_space<vmem>>, vector<1x256xf32>
    %331 = vector.broadcast %330 : vector<1x256xf32> to vector<8x256xf32>
    %332 = arith.addf %329, %331 : vector<8x256xf32>
    %cst_186 = arith.constant 0.000000e+00 : f32
    %333 = vector.broadcast %cst_186 : f32 to vector<8x256xf32>
    %334 = arith.maximumf %332, %333 : vector<8x256xf32>
    %335 = arith.truncf %334 : vector<8x256xf32> to vector<8x256xbf16>
    %cst_187 = arith.constant dense<0.000000e+00> : vector<8x256xf32>
    %336 = tpu.matmul %335, %72, %cst_187 {dimension_numbers = #tpu.dot_dimension_numbers<[1], [0], [0], [1], [0, 0, 1, 1], [], []>} : vector<8x256xbf16>, vector<256x256xbf16>, vector<8x256xf32> -> vector<8x256xf32>
    %337 = vector.broadcast %73 : vector<1x256xf32> to vector<8x256xf32>
    %338 = arith.addf %336, %337 : vector<8x256xf32>
    %cst_188 = arith.constant 0.000000e+00 : f32
    %339 = vector.broadcast %cst_188 : f32 to vector<8x256xf32>
    %340 = arith.maximumf %338, %339 : vector<8x256xf32>
    %341 = arith.truncf %340 : vector<8x256xf32> to vector<8x256xbf16>
    %c3840_189 = arith.constant 3840 : index
    %c0_190 = arith.constant 0 : index
    %342 = vector.load %arg14[%c3840_189, %c0_190] : memref<4096x126xbf16, #tpu.memory_space<vmem>>, vector<256x126xbf16>
    %cst_191 = arith.constant dense<0.000000e+00> : vector<8x126xf32>
    %343 = tpu.matmul %341, %342, %cst_191 {dimension_numbers = #tpu.dot_dimension_numbers<[1], [0], [0], [1], [0, 0, 1, 1], [], []>} : vector<8x256xbf16>, vector<256x126xbf16>, vector<8x126xf32> -> vector<8x126xf32>
    %344 = arith.addf %327, %343 : vector<8x126xf32>
    %c0_192 = arith.constant 0 : index
    %c0_193 = arith.constant 0 : index
    %345 = vector.load %arg15[%c0_192, %c0_193] : memref<1x126xf32, #tpu.memory_space<vmem>>, vector<1x126xf32>
    %346 = vector.broadcast %345 : vector<1x126xf32> to vector<8x126xf32>
    %347 = arith.addf %344, %346 : vector<8x126xf32>
    %c0_194 = arith.constant 0 : index
    %c0_195 = arith.constant 0 : index
    %348 = vector.load %arg19[%c0_194, %c0_195] : memref<8x126xf32, #tpu.memory_space<vmem>>, vector<8x126xf32>
    tpu.vector_store %arg19[%c0_194, %c0_195], %347 {strides = array<i32>} : memref<8x126xf32, #tpu.memory_space<vmem>>, vector<8x126xf32>,
    return
  }
  func.func @transform_0(%arg0: i32) -> (i32, i32) {
    %c0_i32 = arith.constant 0 : i32
    %c0_i32_0 = arith.constant 0 : i32
    return %arg0, %c0_i32 : i32, i32
  }
  func.func @transform_1(%arg0: i32) -> (i32, i32) {
    %c0_i32 = arith.constant 0 : i32
    %c0_i32_0 = arith.constant 0 : i32
    return %arg0, %c0_i32 : i32, i32
  }
  func.func @transform_2(%arg0: i32) -> (i32, i32) {
    %c0_i32 = arith.constant 0 : i32
    %c0_i32_0 = arith.constant 0 : i32
    return %arg0, %c0_i32 : i32, i32
  }
  func.func @transform_3(%arg0: i32) -> (i32, i32) {
    %c0_i32 = arith.constant 0 : i32
    %c0_i32_0 = arith.constant 0 : i32
    %c0_i32_1 = arith.constant 0 : i32
    return %c0_i32, %c0_i32_0 : i32, i32
  }
  func.func @transform_4(%arg0: i32) -> (i32, i32) {
    %c0_i32 = arith.constant 0 : i32
    %c0_i32_0 = arith.constant 0 : i32
    %c0_i32_1 = arith.constant 0 : i32
    return %c0_i32, %c0_i32_0 : i32, i32
  }
  func.func @transform_5(%arg0: i32) -> (i32, i32) {
    %c0_i32 = arith.constant 0 : i32
    %c0_i32_0 = arith.constant 0 : i32
    %c0_i32_1 = arith.constant 0 : i32
    return %c0_i32, %c0_i32_0 : i32, i32
  }
  func.func @transform_6(%arg0: i32) -> (i32, i32) {
    %c0_i32 = arith.constant 0 : i32
    %c0_i32_0 = arith.constant 0 : i32
    %c0_i32_1 = arith.constant 0 : i32
    return %c0_i32, %c0_i32_0 : i32, i32
  }
  func.func @transform_7(%arg0: i32) -> (i32, i32) {
    %c0_i32 = arith.constant 0 : i32
    %c0_i32_0 = arith.constant 0 : i32
    %c0_i32_1 = arith.constant 0 : i32
    return %c0_i32, %c0_i32_0 : i32, i32
  }
  func.func @transform_8(%arg0: i32) -> (i32, i32) {
    %c0_i32 = arith.constant 0 : i32
    %c0_i32_0 = arith.constant 0 : i32
    %c0_i32_1 = arith.constant 0 : i32
    return %c0_i32, %c0_i32_0 : i32, i32
  }
  func.func @transform_9(%arg0: i32) -> (i32, i32) {
    %c0_i32 = arith.constant 0 : i32
    %c0_i32_0 = arith.constant 0 : i32
    %c0_i32_1 = arith.constant 0 : i32
    return %c0_i32, %c0_i32_0 : i32, i32
  }
  func.func @transform_10(%arg0: i32) -> (i32, i32) {
    %c0_i32 = arith.constant 0 : i32
    %c0_i32_0 = arith.constant 0 : i32
    %c0_i32_1 = arith.constant 0 : i32
    return %c0_i32, %c0_i32_0 : i32, i32
  }
  func.func @transform_11(%arg0: i32) -> (i32, i32) {
    %c0_i32 = arith.constant 0 : i32
    %c0_i32_0 = arith.constant 0 : i32
    %c0_i32_1 = arith.constant 0 : i32
    return %c0_i32, %c0_i32_0 : i32, i32
  }
  func.func @transform_12(%arg0: i32) -> (i32, i32) {
    %c0_i32 = arith.constant 0 : i32
    %c0_i32_0 = arith.constant 0 : i32
    %c0_i32_1 = arith.constant 0 : i32
    return %c0_i32, %c0_i32_0 : i32, i32
  }
  func.func @transform_13(%arg0: i32) -> (i32, i32) {
    %c0_i32 = arith.constant 0 : i32
    %c0_i32_0 = arith.constant 0 : i32
    %c0_i32_1 = arith.constant 0 : i32
    return %c0_i32, %c0_i32_0 : i32, i32
  }
  func.func @transform_14(%arg0: i32) -> (i32, i32) {
    %c0_i32 = arith.constant 0 : i32
    %c0_i32_0 = arith.constant 0 : i32
    %c0_i32_1 = arith.constant 0 : i32
    return %c0_i32, %c0_i32_0 : i32, i32
  }
  func.func @transform_15(%arg0: i32) -> i32 {
    %c0_i32 = arith.constant 0 : i32
    %c0_i32_0 = arith.constant 0 : i32
    return %c0_i32 : i32
  }
  func.func @transform_16(%arg0: i32) -> i32 {
    %c0_i32 = arith.constant 0 : i32
    %c0_i32_0 = arith.constant 0 : i32
    return %c0_i32 : i32
  }
  func.func @transform_17(%arg0: i32) -> i32 {
    %c0_i32 = arith.constant 0 : i32
    %c0_i32_0 = arith.constant 0 : i32
    return %c0_i32 : i32
  }
  func.func @transform_18(%arg0: i32) -> (i32, i32) {
    %c0_i32 = arith.constant 0 : i32
    %c0_i32_0 = arith.constant 0 : i32
    return %arg0, %c0_i32 : i32, i32
  }
}

</mosaic_0001>

<bundles_post_ra>
// kernel: tpu_custom_call.1
= control target key start
LH: loop header
LB: loop body
LE: loop exit
PB: predicated region body
PF: predicated region fallthrough
CT: control target
= control target key end

     0   :  { %s12240_s0 = inlined_call_operand.vmem [shape: f32[16,63], index: 0, kind: input, shape index: {}]   ;;  %s12241_s1 = inlined_call_operand.hbm [shape: f32[16,567], index: 1, kind: input, shape index: {}]   ;;  %s12242_s2 = inlined_call_operand.hbm [shape: f32[16,315], index: 2, kind: input, shape index: {}]   ;;  %s12243_s3 = inlined_call_operand.hbm [shape: bf16[63,567], index: 3, kind: input, shape index: {}]   ;;  %s12244_s4 = inlined_call_operand.vmem [shape: f32[1,63], index: 4, kind: input, shape index: {}]   ;;  %s12245_s5 = inlined_call_operand.hbm [shape: bf16[63,567], index: 5, kind: input, shape index: {}]   ;;  %s12246_s6 = inlined_call_operand.vmem [shape: f32[1,63], index: 6, kind: input, shape index: {}]   ;;  %s12247_s7 = inlined_call_operand.vmem [shape: bf16[315,63], index: 7, kind: input, shape index: {}]   ;;  %s12248_s8 = inlined_call_operand.vmem [shape: f32[1,63], index: 8, kind: input, shape index: {}]   ;;  %s12249_s9 = inlined_call_operand.hbm [shape: bf16[126,4096], index: 9, kind: input, shape index: {}]   ;;  %s12250_s10 = inlined_call_operand.hbm [shape: f32[1,4096], index: 10, kind: input, shape index: {}]   ;;  %s12251_s11 = inlined_call_operand.vmem [shape: bf16[256,256], index: 11, kind: input, shape index: {}]   ;;  %s12252_s12 = inlined_call_operand.vmem [shape: f32[1,256], index: 12, kind: input, shape index: {}]   ;;  %s12253_s13 = inlined_call_operand.hbm [shape: bf16[4096,126], index: 13, kind: input, shape index: {}]   ;;  %s12254_s14 = inlined_call_operand.vmem [shape: f32[1,126], index: 14, kind: input, shape index: {}]   ;;  %s12255_s15 = inlined_call_operand.vmem [shape: f32[64], index: 15, kind: input, shape index: {}]   ;;  %s12256_s16 = inlined_call_operand.vmem [shape: f32[64], index: 16, kind: input, shape index: {}]   ;;  %s12257_s17 = inlined_call_operand.<no memory space> [shape: f32[1], index: 17, kind: input, shape index: {}]   ;;  %s12258_s18 = inlined_call_operand.hbm [shape: f32[16,126], index: 18, kind: output, shape index: {}]  }
   0x1   :  { %12268 = sst [smem:[#allocation30_spill]] %s12240_s0 }
   0x2   :  { %12269 = sst [smem:[#allocation31_spill]] %s12241_s1 }
   0x3   :  { %12270 = sst [smem:[#allocation32_spill]] %s12242_s2 }
   0x4   :  { %12271 = sst [smem:[#allocation33_spill]] %s12243_s3 }
   0x5   :  { %12272 = sst [smem:[#allocation34_spill]] %s12245_s5 }
   0x6   :  { %12273 = sst [smem:[#allocation35_spill]] %s12249_s9 }
   0x7   :  { %12274 = sst [smem:[#allocation36_spill]] %s12250_s10 }
   0x8   :  { %12275 = sst [smem:[#allocation37_spill]] %s12253_s13 }
   0x9   :  { %12276 = sst [smem:[#allocation38_spill]] %s12254_s14 }
   0xa   :  { %12277 = sst [smem:[#allocation39_spill]] %s12255_s15 }
   0xb   :  { %12278 = sst [smem:[#allocation40_spill]] %s12256_s16 }
   0xc   :  { %12279 = sst [smem:[#allocation41_spill]] %s12258_s18 }
   0xd   :  { %23 = sst [smem:[#allocation2]] %s12257_s17 }
   0xe   :  { %24 = vsyncpa [#allocation4], 0 }
   0xf   :  { %26 = vsyncpa [#allocation4 + $0x1], 0 }
  0x10   :  { %27 = vsyncpa [#allocation8], 0 }
  0x11   :  { %29 = vsyncpa [#allocation8 + $0x1], 0 }
  0x12   :  { %30 = vsyncpa [#allocation11], 0 }
  0x13   :  { %31 = vsyncpa [#allocation14], 0 }
  0x14   :  { %32 = vsyncpa [#allocation6], 0 }
  0x15   :  { %33 = vsyncpa [#allocation18], 0 }
  0x16   :  { %34 = vsyncpa [#allocation5], 0 }
  0x17   :  { %36 = vsyncpa [#allocation5 + $0x1], 0  ;;  %s10391_s29 = smov 0   ;;  %s10393_s30 = smov 0  }
  0x18   :  { %s10395_s0 = smov 0   ;;  %s10397_s19 = smov 0  }
  0x19 LB: > { %12280 = sst [smem:[#allocation28_spill]] %s10226_s0  ;;  %s10264_s17 = smov [#allocation9]   ;;  %s10230_s19 = sphi %s10397_s19, %s12321_s19   ;;  %s10226_s0 = sphi %s10395_s0, %s12318_s0   ;;  %s10222_s30 = sphi %s10393_s30, %s12320_s30   ;;  %s10218_s29 = sphi %s10391_s29, %s12319_s29  }
  0x1a   : > { %s478_s1 = sshll.u32 %s10264_s17, 4  ;;  %s10412_s20 = sadd.s32 4294967295, %s10230_s19   ;;  %s479_s1 = int_to_ptr.vmem [resolvable:$true] %s478_s1 }
  0x1b   : > { %p8110_p0 = scmp.ge.s32.totalorder %s10230_s19, 1  ;;  %p12262_p1 = scmp.eq.s32.totalorder %s10412_s20, 0 }
  0x1c   : > { %p466_p2 = scmp.lt.s32.totalorder %s10230_s19, 3  ;;  %s10265_s22 = smov [#allocation10]  }
  0x1d   : > { %s494_s2 = sshll.u32 %s10265_s22, 4  ;;  %s10266_s24 = smov [#allocation13]   ;;  %s10430_s2 = int_to_ptr.vmem [resolvable:$true] %s494_s2 }
  0x1e   : > { %p10417_p3 = pnand %p8110_p0, %p466_p2  ;;  %s530_s25 = sshll.u32 %s10266_s24, 4  ;;  %s10432_s25 = int_to_ptr.vmem [resolvable:$true] %s530_s25 }
  0x1f   : > { %s9905_s27 = scalar_lea.vmem %s479_s1, 2560  ;;  %p9913_p11 = scmp.lt.s32.totalorder %s479_s1, %s479_s1 }
  0x20   : > { %s12281_s21 = scalar_select %p10417_p3, 1, 0 }
  0x21   : > { %p9247_p5 = pneg %p10417_p3  ;;  %p9906_p8 = scmp.ne.s32.totalorder %s479_s1, %s9905_s27 }
  0x22   : > { %p9914_p12 = scmp.lt.s32.totalorder %s9905_s27, %s9905_s27 }
  0x23   : > { %p10426_p6 = pnand %p9247_p5, %p12262_p1 }
  0x24   : > { %p9915_p13 = por %p9914_p12, %p9913_p11 }
  0x25   : > { %p10436_p7 = pneg %p10426_p6 }
  0x27   : > { %p9908_p9 = pnand %p9906_p8, %p10436_p7 }
  0x29   : > { %p9909_p10 = pneg %p9908_p9 }
  0x2b   : > { %p9916_p0 = pnand %p9915_p13, %p9909_p10 }
  0x2d   : > { %9919 = shalt.err (!%p9916_p0)
}
  0x2e   : > { %s10267_s28 = smov 320   ;;  %s10268_s17 = smov 20  }
  0x2f   : > { %s12284_s3 = sld [smem:[#allocation33_spill]]  ;;  %s9931_s18 = scalar_lea.vmem %s10430_s2, 2560 }
  0x30   : > { %p9932_p2 = scmp.ne.s32.totalorder %s10430_s2, %s9931_s18  ;;  %p9939_p9 = scmp.lt.s32.totalorder %s10430_s2, %s10430_s2 }
  0x31   : > { %p9940_p10 = scmp.lt.s32.totalorder %s9931_s18, %s9931_s18 }
  0x32   : > { %p9934_p5 = pnand %p9932_p2, %p10436_p7 }
  0x33   : > { %p9941_p11 = por %p9940_p10, %p9939_p9 }
  0x34   : > { %p9935_p8 = pneg %p9934_p5 }
  0x35   : > { %9250 = dma.hbm_to_vmem [thread:$0]  (!%p10426_p6), %s12284_s3, 2560, %s479_s1, [#allocation8], %s10267_s28, %s10267_s28, %s10268_s17  }
  0x36   : > { %p9942_p12 = pnand %p9941_p11, %p9935_p8 }
  0x38   : > { %9945 = shalt.err (!%p9942_p12)
}
  0x39   : > { %s12285_s5 = sld [smem:[#allocation34_spill]]  ;;  %s9957_s1 = scalar_lea.vmem %s10432_s25, 512 }
  0x3a   : > { %p9958_p13 = scmp.ne.s32.totalorder %s10432_s25, %s9957_s1  ;;  %p9965_p5 = scmp.lt.s32.totalorder %s10432_s25, %s10432_s25 }
  0x3b   : > { %p9966_p8 = scmp.lt.s32.totalorder %s9957_s1, %s9957_s1 }
  0x3c   : > { %p9960_p0 = pnand %p9958_p13, %p10436_p7 }
  0x3d   : > { %p9967_p9 = por %p9966_p8, %p9965_p5 }
  0x3e   : > { %p9961_p2 = pneg %p9960_p0 }
  0x3f   : > { %9253 = dma.hbm_to_vmem [thread:$0]  (!%p10426_p6), %s12285_s5, 2560, %s10430_s2, [#allocation11], %s10267_s28, %s10267_s28, %s10268_s17  }
  0x40   : > { %p9968_p10 = pnand %p9967_p9, %p9961_p2 }
  0x42   : > { %9971 = shalt.err (!%p9968_p10)
}
  0x43   : > { %s12286_s10 = sld [smem:[#allocation36_spill]]  ;;  %s10269_s2 = smov [#allocation12]  }
  0x44   : > { %s516_s28 = sshll.u32 %s10269_s2, 4  ;;  %s517_s28 = int_to_ptr.vmem [resolvable:$true] %s516_s28 }
  0x45   : > { %s9983_s17 = scalar_lea.vmem %s517_s28, 32768  ;;  %p9991_p0 = scmp.lt.s32.totalorder %s517_s28, %s517_s28 }
  0x46   : > { %p9984_p11 = scmp.ne.s32.totalorder %s517_s28, %s9983_s17  ;;  %p9992_p5 = scmp.lt.s32.totalorder %s9983_s17, %s9983_s17 }
  0x48   : > { %p9986_p12 = pnand %p9984_p11, %p10436_p7  ;;  %p9993_p2 = por %p9992_p5, %p9991_p0 }
  0x49   : > { %9259 = dma.hbm_to_vmem [thread:$0]  (!%p10426_p6), %s12286_s10, 512, %s10432_s25, [#allocation14]  }
  0x4a   : > { %p9987_p13 = pneg %p9986_p12 }
  0x4c   : > { %p9994_p8 = pnand %p9993_p2, %p9987_p13 }
  0x4e   : > { %9997 = shalt.err (!%p9994_p8)
}
  0x4f   : > { %s10270_s22 = smov 2048   ;;  %s10271_s24 = smov 128  }
  0x50   : > { %s12287_s9 = sld [smem:[#allocation35_spill]]  ;;  %s10272_s1 = smov [#allocation15]  }
  0x51   : > { %s546_s14 = sshll.u32 %s10272_s1, 4  ;;  %s12288_s15 = sld [smem:[#allocation39_spill]]  ;;  %s547_s14 = int_to_ptr.vmem [resolvable:$true] %s546_s14 }
  0x52   : > { %s10009_s17 = scalar_lea.vmem %s547_s14, 32768  ;;  %p10017_p12 = scmp.lt.s32.totalorder %s547_s14, %s547_s14 }
  0x53   : > { %p10010_p9 = scmp.ne.s32.totalorder %s547_s14, %s10009_s17  ;;  %p10018_p13 = scmp.lt.s32.totalorder %s10009_s17, %s10009_s17 }
  0x55   : > { %p10012_p10 = pnand %p10010_p9, %p10436_p7  ;;  %p10019_p0 = por %p10018_p13, %p10017_p12 }
  0x56   : > { %9256 = dma.hbm_to_vmem [thread:$0]  (!%p10426_p6), %s12287_s9, 32768, %s517_s28, [#allocation11], %s10270_s22, %s10270_s22, %s10271_s24  }
  0x57   : > { %s563_s3 = sshll.u32 %s12288_s15, 4  ;;  %p10013_p11 = pneg %p10012_p10  ;;  %s564_s3 = int_to_ptr.vmem [resolvable:$true] %s563_s3 }
  0x59   : > { %p10020_p5 = pnand %p10019_p0, %p10013_p11 }
  0x5b   : > { %10023 = shalt.err (!%p10020_p5)
}
  0x5c   : > { %s10273_s5 = smov 64   ;;  %s10274_s28 = smov 4  }
  0x5d   : > { %s12289_s13 = sld [smem:[#allocation37_spill]]  ;;  %s10024_s27 = scalar_lea.vmem %s564_s3, 16 }
  0x5e   : > { %p10025_p2 = scmp.ne.s32.totalorder %s564_s3, %s10024_s27  ;;  %p10032_p10 = scmp.lt.s32.totalorder %s564_s3, %s564_s3 }
  0x5f   : > { %p10033_p4 = scmp.lt.s32.totalorder %s10024_s27, %s10024_s27 }
  0x60   : > { %p10027_p8 = pnand %p10025_p2, %p10436_p7 }
  0x61   : > { %p10034_p12 = por %p10033_p4, %p10032_p10 }
  0x62   : > { %p10028_p9 = pneg %p10027_p8 }
  0x63   : > { %9262 = dma.hbm_to_vmem [thread:$0]  (!%p10426_p6), %s12289_s13, 32768, %s547_s14, [#allocation14], %s10273_s5, %s10273_s5, %s10274_s28  }
  0x64   : > { %p10035_p11 = pnand %p10034_p12, %p10028_p9 }
  0x66   : > { %10038 = shalt.err (!%p10035_p11)
}
  0x67   : > { %s10275_s25 = smov [#allocation16]   ;;  %s12290_s16 = sld [smem:[#allocation40_spill]] }
  0x68   : > { %9265 = dma.vmem_to_smem (!%p10426_p6), %s564_s3, 16, %s10275_s25, [#allocation6]  }
  0x6d   : > { %s574_s5 = sshll.u32 %s12290_s16, 4  ;;  %s575_s5 = int_to_ptr.vmem [resolvable:$true] %s574_s5 }
  0x6e   : > { %s10039_s14 = scalar_lea.vmem %s575_s5, 16  ;;  %p10047_p2 = scmp.lt.s32.totalorder %s575_s5, %s575_s5 }
  0x6f   : > { %p10040_p13 = scmp.ne.s32.totalorder %s575_s5, %s10039_s14  ;;  %p10048_p8 = scmp.lt.s32.totalorder %s10039_s14, %s10039_s14 }
  0x71   : > { %p10042_p0 = pnand %p10040_p13, %p10436_p7  ;;  %p10049_p4 = por %p10048_p8, %p10047_p2 }
  0x73   : > { %p10043_p5 = pneg %p10042_p0 }
  0x75   : > { %p10050_p9 = pnand %p10049_p4, %p10043_p5 }
  0x77   : > { %10053 = shalt.err (!%p10050_p9)
}
  0x78   : > { %s10276_s2 = smov [#allocation17]   ;;  %s8109_s3 = sadd.s32 4294967294, %s10230_s19  }
  0x79   : > { %9268 = dma.vmem_to_smem (!%p10426_p6), %s575_s5, 16, %s10276_s2, [#allocation18]  }
  0x7a   : > { %s10501_s26 = sadd.s32 1, %s10230_s19   ;;  %s75_s23 = sadd.s32 1, %s10226_s0 }
  0x7b   : > { %s72_s17 = ssub.s32 %s10230_s19, %s10501_s26  ;;  %p82_p7 = scmp.ne.s32.totalorder %s10226_s0, %s10222_s30 }
  0x7c   : > { %p73_p10 = scmp.eq.s32.totalorder %s72_s17, 0  ;;  %p83_p12 = scmp.eq.s32.totalorder %s10230_s19, 0 }
  0x7d   : > { %p88_p11 = scmp.ne.s32.totalorder %s10222_s30, %s10218_s29  ;;  %p453_p13 = scmp.eq.s32.totalorder %s10412_s20, 1 }
  0x7e   : > { %s10513_s28 = scalar_select %p73_p10, %s10226_s0, %s75_s23  }
  0x7f   : > { %p84_p0 = por %p83_p12, %p82_p7  ;;  %p10517_p5 = por %p12262_p1, %p88_p11 }
  0x80   : > { %12291 = sst [smem:[#allocation29_spill]] %s10513_s28  ;;  %p10521_p6 = por %p453_p13, %p82_p7 }
  0x81   : > { %s12292_s22 = scalar_select %p10517_p5, 1, 0 }
  0x82   : > { %s12293_s24 = scalar_select %p10521_p6, 1, 0 }
  0x83   : > { %p459_p2 = scmp.eq.s32.totalorder %s8109_s3, 1  ;;  %p9287_p8 = scmp.lt.s32.totalorder %s10230_s19, 2 }
  0x84   : > { %s10527_s27 = sand.u32 1, %s10226_s0   ;;  %s9208_s5 = smul.u32 640, %s10230_s19 }
  0x85   : > { %p10529_p4 = por %p459_p2, %p88_p11  ;;  %s9207_s1 = smul.u32 40, %s10527_s27 }
  0x86   : > { %p10534_p9 = pnand %p9287_p8, %p84_p0  ;;  %s12296_s3 = sld [smem:[#allocation31_spill]] }
  0x87   : > { %s12294_s25 = scalar_select %p10529_p4, 1, 0 }
  0x88   : > { %s599_s17 = scalar_lea.vmem [#allocation3], %s9207_s1  ;;  %s596_s13 = scalar_lea.sflag [#allocation4], %s10527_s27 }
  0x89   : > { %s607_s9 = sshll.u32 %s599_s17, 4  ;;  %p10056_p10 = pneg %p10534_p9  ;;  %s608_s9 = int_to_ptr.vmem [resolvable:$true] %s607_s9 }
  0x8c   : > { %s10542_s23 = scalar_lea.hbm %s12296_s3, %s9208_s5  ;;  %s10059_s5 = scalar_lea.hbm %s12296_s3, 1280 }
  0x8d   : > { %s10054_s15 = scalar_lea.hbm %s10542_s23, 640  ;;  %p10060_p13 = scmp.lt.s32.totalorder %s10542_s23, %s12296_s3 }
  0x8e   : > { %p10055_p7 = scmp.ne.s32.totalorder %s10542_s23, %s10054_s15  ;;  %p10061_p0 = scmp.lt.s32.totalorder %s10059_s5, %s10054_s15 }
  0x90   : > { %p10057_p12 = pnand %p10056_p10, %p10055_p7  ;;  %p10062_p2 = por %p10061_p0, %p10060_p13 }
  0x92   : > { %p10058_p11 = pneg %p10057_p12 }
  0x94   : > { %p10063_p8 = pnand %p10062_p2, %p10058_p11 }
  0x96   : > { %10066 = shalt.err (!%p10063_p8)
}
  0x97   : > { %s10067_s1 = scalar_lea.vmem %s608_s9, 640  ;;  %s10277_s17 = smov [#allocation3]  }
  0x98   : > { %p10068_p1 = scmp.ne.s32.totalorder %s608_s9, %s10067_s1  ;;  %s10072_s10 = sshll.u32 %s10277_s17, 4  ;;  %s10073_s10 = int_to_ptr.vmem [resolvable:$false] %s10072_s10 }
  0x99   : > { %s10074_s16 = scalar_lea.vmem %s10073_s10, 1280  ;;  %p10075_p12 = scmp.lt.s32.totalorder %s608_s9, %s10073_s10 }
  0x9a   : > { %p10070_p4 = pnand %p10068_p1, %p10056_p10  ;;  %p10076_p6 = scmp.lt.s32.totalorder %s10074_s16, %s10067_s1 }
  0x9c   : > { %p10071_p7 = pneg %p10070_p4  ;;  %p10077_p5 = por %p10076_p6, %p10075_p12 }
  0x9e   : > { %p10078_p3 = pnand %p10077_p5, %p10071_p7 }
  0xa0   : > { %10081 = shalt.err (!%p10078_p3)
}
  0xa1   : > { %9272 = dma.hbm_to_vmem [thread:$0]  (!%p10534_p9), %s10542_s23, 640, %s608_s9, %s596_s13  }
  0xa2   : > { %s9209_s15 = smul.u32 24, %s10527_s27  ;;  %s12297_s2 = sld [smem:[#allocation32_spill]] }
  0xa3   : > { %s9210_s28 = smul.u32 384, %s10230_s19  ;;  %s12298_s16 = sand.u32 1, %s10230_s19  }
  0xa4   : > { %s618_s10 = scalar_lea.vmem [#allocation7], %s9209_s15  ;;  %s615_s3 = scalar_lea.sflag [#allocation8], %s12298_s16 }
  0xa5   : > { %s626_s1 = sshll.u32 %s618_s10, 4  ;;  %s627_s1 = int_to_ptr.vmem [resolvable:$true] %s626_s1 }
  0xa8   : > { %s10571_s17 = scalar_lea.hbm %s12297_s2, %s9210_s28  ;;  %s10087_s27 = scalar_lea.hbm %s12297_s2, 768 }
  0xa9   : > { %s10082_s0 = scalar_lea.hbm %s10571_s17, 384  ;;  %p10088_p6 = scmp.lt.s32.totalorder %s10571_s17, %s12297_s2 }
  0xaa   : > { %p10083_p1 = scmp.ne.s32.totalorder %s10571_s17, %s10082_s0  ;;  %p10089_p4 = scmp.lt.s32.totalorder %s10087_s27, %s10082_s0 }
  0xac   : > { %p10085_p3 = pnand %p10083_p1, %p10056_p10  ;;  %p10090_p11 = por %p10089_p4, %p10088_p6 }
  0xae   : > { %p10086_p5 = pneg %p10085_p3 }
  0xb0   : > { %p10091_p13 = pnand %p10090_p11, %p10086_p5 }
  0xb2   : > { %10094 = shalt.err (!%p10091_p13)
}
  0xb3   : > { %s10095_s15 = scalar_lea.vmem %s627_s1, 384  ;;  %s10278_s14 = smov [#allocation7]  }
  0xb4   : > { %p10096_p0 = scmp.ne.s32.totalorder %s627_s1, %s10095_s15  ;;  %s10100_s5 = sshll.u32 %s10278_s14, 4  ;;  %s10101_s5 = int_to_ptr.vmem [resolvable:$false] %s10100_s5 }
  0xb5   : > { %s10102_s10 = scalar_lea.vmem %s10101_s5, 768  ;;  %p10103_p7 = scmp.lt.s32.totalorder %s627_s1, %s10101_s5 }
  0xb6   : > { %p10098_p2 = pnand %p10096_p0, %p10056_p10  ;;  %p10104_p12 = scmp.lt.s32.totalorder %s10102_s10, %s10095_s15 }
  0xb8   : > { %p10099_p8 = pneg %p10098_p2  ;;  %p10105_p1 = por %p10104_p12, %p10103_p7 }
  0xba   : > { %p10106_p3 = pnand %p10105_p1, %p10099_p8 }
  0xbc   : > { %10109 = shalt.err (!%p10106_p3)
}
  0xbd   : > { %9275 = dma.hbm_to_vmem [thread:$0]  (!%p10534_p9), %s10571_s17, 384, %s627_s1, %s615_s3  }
  0xbe   : > { %p12299_p5 = scmp.ne.s32.totalorder %s12281_s21, 0 }
  0xbf   : > { %s10596_s0 = sand.u32 (!%p12299_p5), 1, %s10222_s30   ;;  %p12300_p10 = scmp.ne.s32.totalorder (!%p12299_p5), %s12292_s22, 0 }
  0xc0   : > { %635 = sbr.rel (%p12299_p5) target bundleno = 7903 (0x1edf), region = 92  ;;  %s638_s9 = scalar_lea.sflag (!%p12299_p5), [#allocation4], %s10596_s0 }
  0xc1   : > { %s9211_s16 = smul.u32 (!%p12299_p5), 40, %s10596_s0 }
  0xc3   : > { %s10600_s13 = scalar_lea.vmem (!%p12299_p5), [#allocation3], %s9211_s16 }
  0xc5   : > { %10185 = dma.done.wait (%p12300_p10), %s638_s9, 640  }
  0xc6   : > { %10187 = vsyncadd (%p12300_p10), %s638_s9, 4294966656  ;;  %s646_s21 = sand.u32 1, %s10412_s20   ;;  %s9212_s18 = smul.u32 24, %s10596_s0 }
  0xc7   : > { %s647_s3 = scalar_lea.sflag [#allocation8], %s646_s21 }
  0xc8   : > { %s10608_s17 = scalar_lea.vmem [#allocation7], %s9212_s18 }
  0xc9   : > { %10189 = dma.done.wait (%p12300_p10), %s647_s3, 384  }
  0xca   : > { %10191 = vsyncadd (%p12300_p10), %s647_s3, 4294966912  ;;  %p12301_p9 = scmp.eq.s32.totalorder %s10412_s20, 0 }
  0xcc   : > { %10193 = dma.done.wait (%p12301_p9), [#allocation8], 2560   ;;  %p12302_p6 = pmov %p12301_p9 }
  0xce   : > { %10195 = vsyncadd (%p12302_p6), [#allocation8], 4294964736  ;;  %p12303_p4 = pmov %p12302_p6 }
  0xd0   : > { %10197 = dma.done.wait (%p12303_p4), [#allocation11], 35328   ;;  %p12304_p11 = pmov %p12303_p4 }
  0xd1   : > { %p12305_p13 = pmov %p12303_p4 }
  0xd2   : > { %10199 = vsyncadd (%p12304_p11), [#allocation11], 4294931968 }
  0xd3   : > { %10201 = dma.done.wait (%p12305_p13), [#allocation14], 33280   ;;  %p12306_p0 = pmov %p12303_p4 }
  0xd5   : > { %10203 = vsyncadd (%p12306_p0), [#allocation14], 4294934016  ;;  %p12307_p2 = pmov %p12306_p0 }
  0xd6   : > { %p12308_p8 = pmov %p12306_p0 }
  0xd7   : > { %10205 = dma.done.wait (%p12307_p2), [#allocation6], 16  }
  0xd8   : > { %10207 = vsyncadd (%p12308_p8), [#allocation6], 4294967280  ;;  %p12309_p7 = pmov %p12306_p0 }
  0xd9   : > { %p12310_p12 = pmov %p12306_p0 }
  0xda   : > { %10209 = dma.done.wait (%p12309_p7), [#allocation18], 16  }
  0xdb   : > { %10211 = vsyncadd (%p12310_p12), [#allocation18], 4294967280 }
  0xdc   : > { %683 = sfence }
  0xdd   : > { %s8129_s22 = sshll.u32 %s10596_s0, 3  ;;  %v9418_v0 = vld [vmem:[#allocation9 + $0x7c] ss:$20 sps:$4 sm:$0xff]   ;;  %vm880_vm0 = vcmask 1046528   ;;  %vm881_vm1 = vcmask 1047552   ;;  %v10279_v1 = vmov 65535  }
  0xde   : > { %v882_v2 = vsel %vm880_vm0, 4294967295, %v10279_v1  ;;  %v9420_v3 = vld [vmem:[#allocation9 + $0x84] ss:$20 sps:$4 sm:$0xff]   ;;  %v9423_v6 = vld [vmem:[#allocation9 + $0x80] ss:$20 sps:$4 sm:$0xff]   ;;  %v10280_v13 = vmov 0  }
  0xdf   : > { %v9422_v4 = vld [vmem:[#allocation9 + $0x78] ss:$20 sps:$4 sm:$0xff]   ;;  %v10637_v5 = vsel %vm881_vm1, %v882_v2, 0  ;;  %v9424_v10 = vld [vmem:[#allocation9 + $0x54] ss:$20 sps:$4 sm:$0xff]   ;;  %931 = vmatprep.mubr.bf16.mxu0 %v10280_v13  ;;  %972 = vmatprep.mubr.bf16.mxu1 %v10280_v13  ;;  %p741_p1 = scmp.lt.s32.totalorder %s10412_s20, 1 }
  0xe0   : > { %v888_v7 = vand.u32 %v9418_v0, %v10637_v5  ;;  %v894_v8 = vand.u32 %v9420_v3, %v10637_v5  ;;  %v885_v9 = vand.u32 %v9422_v4, %v10637_v5  ;;  %v9426_v11 = vld [vmem:[#allocation9 + $0x5c] ss:$20 sps:$4 sm:$0xff]   ;;  %v891_v12 = vand.u32 %v9423_v6, %v10637_v5  ;;  %v9429_v15 = vld [vmem:[#allocation9 + $0x58] ss:$20 sps:$4 sm:$0xff]   ;;  %v9432_v17 = vld [vmem:[#allocation9 + $0x34] ss:$20 sps:$4 sm:$0xff]  }
  0xe1   : > { %v9428_v14 = vld [vmem:[#allocation9 + $0x50] ss:$20 sps:$4 sm:$0xff]   ;;  %v9430_v16 = vld [vmem:[#allocation9 + $0x2c] ss:$20 sps:$4 sm:$0xff]   ;;  %s742_s1 = scalar_select %p741_p1, %s10412_s20, 1  ;;  %vm876_vm2 = vcmask 515072  }
  0xe2   : > { %907 = vmatprep.subr.bf16.mxu0 %v888_v7  ;;  %948 = vmatprep.subr.bf16.mxu1 %v894_v8  ;;  %v9434_v18 = vld [vmem:[#allocation9 + $0x28] ss:$20 sps:$4 sm:$0xff]   ;;  %v9435_v19 = vld [vmem:[#allocation9 + $0x30] ss:$20 sps:$4 sm:$0xff]   ;;  %v9438_v21 = vld [vmem:[#allocation9 + $0xc] ss:$20 sps:$4 sm:$0xff]  }
  0xe3   : > { %908 = vmatpush1.bf16.msra.mxu0 %v885_v9  ;;  %949 = vmatpush1.bf16.msra.mxu1 %v891_v12  ;;  %s8130_s27 = sshll.u32 %s742_s1, 3  ;;  %v9436_v20 = vld [vmem:[#allocation9 + $0x4] ss:$20 sps:$4 sm:$0xff]   ;;  %s12311_s15 = sld [smem:[#allocation30_spill]]  ;;  %v9440_v22 = vld [vmem:[#allocation9] ss:$20 sps:$4 sm:$0xff]  }
  0xe4   : > { %909 = vmatprep.subr.bf16.mxu0 %v9424_v10  ;;  %950 = vmatprep.subr.bf16.mxu1 %v9426_v11  ;;  %v9441_v23 = vld [vmem:[#allocation9 + $0x8] ss:$20 sps:$4 sm:$0xff]   ;;  %v10281_v28 = vmov 0.0   ;;  %v9443_v29 = vld [vmem:[#allocation9 + $0x60] ss:$20 sps:$4 sm:$0xff]   ;;  %vm10282_vm3 = vmmov 0  }
  0xe5   : > { %v9442_v24 = vld [vmem:[#allocation9 + $0x88] ss:$20 sps:$4 sm:$0xff]   ;;  %v9444_v30 = vld [vmem:[#allocation9 + $0x38] ss:$20 sps:$4 sm:$0xff]   ;;  %v9445_v31 = vld [vmem:[#allocation9 + $0x10] ss:$20 sps:$4 sm:$0xff]  }
  0xe6   : > { %v897_v27 = vand.u32 %v9442_v24, %v10637_v5  ;;  %v9448_v32 = vld [vmem:[#allocation10 + $0x7c] ss:$20 sps:$4 sm:$0xff]   ;;  %v9446_v33 = vld [vmem:[#allocation10 + $0x78] ss:$20 sps:$4 sm:$0xff]   ;;  %v9449_v38 = vld [vmem:[#allocation10 + $0x80] ss:$20 sps:$4 sm:$0xff]  }
  0xe7   : > { %910 = vmatpush1.bf16.msra.mxu0 %v9428_v14  ;;  %951 = vmatpush1.bf16.msra.mxu1 %v9429_v15  ;;  %v9451_v34 = vld [vmem:[#allocation10 + $0x84] ss:$20 sps:$4 sm:$0xff]   ;;  %v1218_v37 = vand.u32 %v9448_v32, %v10637_v5  ;;  %v1215_v39 = vand.u32 %v9446_v33, %v10637_v5  ;;  %v1221_v43 = vand.u32 %v9449_v38, %v10637_v5  ;;  %v10677_v46 = vld [vmem:[%s10600_s13 + $0x8] sm:$0xff]  ;;  %s10283_s5 = smov 4   ;;  %s10284_s10 = smov 65   ;;  %vm1036_vm4 = vcmask 15360  }
  0xe8   : > { %911 = vmatprep.subr.bf16.mxu0 %v9430_v16  ;;  %952 = vmatprep.subr.bf16.mxu1 %v9432_v17  ;;  %v10663_v35 = vld [vmem:[%s10600_s13] sm:$0xff]  ;;  %v10666_v36 = vld [vmem:[%s10600_s13 + $0x10] sm:$0xff]  ;;  %v1224_v40 = vand.u32 %v9451_v34, %v10637_v5  ;;  %s10285_s16 = smov 2   ;;  %s10286_s9 = smov 69   ;;  %v10689_v3 = vld [vmem:[%s10600_s13 + $0x18] sm:$0xff]  ;;  %vm1049_vm5 = vcmask 31744  }
  0xe9   : > { %s744_s14 = scalar_lea.vmem %s12311_s15, %s8130_s27  ;;  %v9454_v49 = vld [vmem:[#allocation10 + $0x54] ss:$20 sps:$4 sm:$0xff]   ;;  %v9452_v50 = vld [vmem:[#allocation10 + $0x50] ss:$20 sps:$4 sm:$0xff]   ;;  %v9455_v51 = vld [vmem:[#allocation10 + $0x58] ss:$20 sps:$4 sm:$0xff]  }
  0xea   : > { %v751_v25 = vld [vmem:[%s744_s14] sm:$0xff]  ;;  %v9457_v52 = vld [vmem:[#allocation10 + $0x5c] ss:$20 sps:$4 sm:$0xff]   ;;  %v9463_v60 = vld [vmem:[#allocation10 + $0x34] ss:$20 sps:$4 sm:$0xff]   ;;  %s10287_s21 = smov 67  }
  0xeb   : > { %912 = vmatpush1.bf16.msra.mxu0 %v9434_v18  ;;  %953 = vmatpush1.bf16.msra.mxu1 %v9435_v19  ;;  %v752_v26 = vpack.c.bf16 %v751_v25, %v751_v25  ;;  %v9460_v58 = vld [vmem:[#allocation10 + $0x2c] ss:$20 sps:$4 sm:$0xff]   ;;  %v9458_v59 = vld [vmem:[#allocation10 + $0x28] ss:$20 sps:$4 sm:$0xff]   ;;  %v9461_v61 = vld [vmem:[#allocation10 + $0x30] ss:$20 sps:$4 sm:$0xff]  }
  0xec   : > { %913 = vmatprep.subr.bf16.mxu0 %v9436_v20  ;;  %954 = vmatprep.subr.bf16.mxu1 %v9438_v21  ;;  %v9466_v62 = vld [vmem:[#allocation10 + $0x4] ss:$20 sps:$4 sm:$0xff]   ;;  %v9464_v63 = vld [vmem:[#allocation10] ss:$20 sps:$4 sm:$0xff]   ;;  %v9467_v2 = vld [vmem:[#allocation10 + $0x8] ss:$20 sps:$4 sm:$0xff]  }
  0xed   : > { %v9469_v0 = vld [vmem:[#allocation10 + $0xc] ss:$20 sps:$4 sm:$0xff]   ;;  %s10288_s18 = smov 6   ;;  %s10289_s3 = smov 71   ;;  %vm1062_vm6 = vcmask 48128   ;;  %vm1075_vm7 = vcmask 64512  }
  0xee   : > { %v10695_v4 = vld [vmem:[%s10600_s13 + $0x20] sm:$0xff]  ;;  %s10290_s1 = smov 8   ;;  %s10757_s28 = scalar_lea.vmem [#allocation19], %s8129_s22 }
  0xef   : > { %914 = vmatpush1.bf16.msra.mxu0 %v9440_v22  ;;  %955 = vmatpush1.bf16.msra.mxu1 %v9441_v23  ;;  %v8154_v38 = vld [vmem:[%s12244_s4] ss:$0 sm:$0xff]  ;;  %s10244_s15 = smov 0  }
  0xf0   : > { %9171 = vmatprep.subr.bf16.mxu0 %v10281_v28  ;;  %1237 = vmatprep.subr.bf16.mxu1 %v1218_v37 }
  0xf2   : > { %8151 = vmatmul.mubr.msk.bf16.vlgmr.msra.gmra.mxu0 %vm876_vm2, %v752_v26  ;;  %8152 = vmatmul.mubr.msk.bf16.vlgmr.msra.gmra.mxu1 %vm876_vm2, %v752_v26 }
  0xf3   : > { %9172 = vmatpush3.bf16.msra.mxu0 %v897_v27  ;;  %9179 = vmatprep.mubr.msk.bf16.mxu0 %vm10282_vm3, %v10281_v28 }
  0xf4   : > { %9173 = vmatprep.subr.bf16.mxu0 %v10281_v28  ;;  %1261 = vmatprep.mubr.bf16.mxu1 %v10280_v13 }
  0xf5   : > { %1238 = vmatpush1.bf16.msra.mxu1 %v1215_v39 }
  0xf6   : > { %1239 = vmatprep.subr.bf16.mxu1 %v9454_v49 }
  0xf7   : > { %9174 = vmatpush3.bf16.msra.mxu0 %v9443_v29 }
  0xf8   : > { %9175 = vmatprep.subr.bf16.mxu0 %v10281_v28 }
  0xf9   : > { %1240 = vmatpush1.bf16.msra.mxu1 %v9452_v50 }
  0xfa   : > { %1241 = vmatprep.subr.bf16.mxu1 %v9460_v58  ;;  %v10730_v58 = vld [vmem:[%s10608_s17] sm:$0xff] }
  0xfb   : > { %9176 = vmatpush3.bf16.msra.mxu0 %v9444_v30 }
  0xfc   : > { %9177 = vmatprep.subr.bf16.mxu0 %v10281_v28 }
  0xfd   : > { %1242 = vmatpush1.bf16.msra.mxu1 %v9458_v59  ;;  %v10733_v59 = vld [vmem:[%s10608_s17 + $0x8] sm:$0xff] }
  0xfe   : > { %1243 = vmatprep.subr.bf16.mxu1 %v9466_v62 }
  0xff   : > { %9178 = vmatpush3.bf16.msra.mxu0 %v9445_v31 }
 0x100   : > { %1278 = vmatprep.subr.bf16.mxu0 %v1224_v40  ;;  %v9470_v40 = vld [vmem:[#allocation10 + $0x88] ss:$20 sps:$4 sm:$0xff]  }
 0x101   : > { %1244 = vmatpush1.bf16.msra.mxu1 %v9464_v63 }
 0x102   : > { %9180 = vmatmul.mubr.msk.bf16.vlgmr.msra.gmra.mxu0 %vm876_vm2, %v752_v26  ;;  %9183 = vmatprep.subr.bf16.mxu1 %v10281_v28 }
 0x103   : > { %1302 = vmatprep.mubr.bf16.mxu0 %v10280_v13  ;;  %1279 = vmatpush1.bf16.msra.mxu0 %v1221_v43  ;;  %v1227_v43 = vand.u32 %v9470_v40, %v10637_v5 }
 0x104   : > { %1280 = vmatprep.subr.bf16.mxu0 %v9457_v52 }
 0x107   : > { %1281 = vmatpush1.bf16.msra.mxu0 %v9455_v51 }
 0x108   : > { %1282 = vmatprep.subr.bf16.mxu0 %v9463_v60  ;;  %v10736_v60 = vld [vmem:[%s10608_s17 + $0x10] sm:$0xff] }
 0x10b   : > { %1283 = vmatpush1.bf16.msra.mxu0 %v9461_v61 }
 0x10c   : > { %1284 = vmatprep.subr.bf16.mxu0 %v9469_v0 }
 0x10f   : > { %1285 = vmatpush1.bf16.msra.mxu0 %v9467_v2 }
 0x1b2   : > { %v933_v41 = vpop.f32.mrf.mxu0  ;;  %v974_v42 = vpop.f32.mrf.mxu1 }
 0x1b3   : > { %v10673_v44 = vmul.f32 %v933_v41, %v10663_v35  ;;  %v1023_v45 = vmul.f32 %v974_v42, %v10666_v36 }
 0x1b4   : > { %v935_v47 = vpop.f32.mrf.mxu0  ;;  %v976_v48 = vpop.f32.mrf.mxu1 }
 0x1b5   : > { %1047 = vrot.lane.b32.xlu1 %v1023_v45, %s10283_s5  ;;  %1027 = vrot.lane.b32.xlu0 %v10673_v44, %s10284_s10  ;;  %v1022_v55 = vmul.f32 %v935_v47, %v10677_v46  ;;  %v1024_v7 = vmul.f32 %v976_v48, %v10689_v3  ;;  %v9472_v47 = vld [vmem:[#allocation10 + $0x38] ss:$20 sps:$4 sm:$0xff]   ;;  %v9473_v48 = vld [vmem:[#allocation10 + $0x10] ss:$20 sps:$4 sm:$0xff]  }
 0x1b6   : > { %v937_v53 = vpop.f32.mrf.mxu0  ;;  %v978_v54 = vpop.f32.mrf.mxu1 }
 0x1b8   : > { %v938_v56 = vpop.f32.mrf.mxu0  ;;  %v979_v57 = vpop.f32.mrf.mxu1 }
 0x1b9   : > { %1032 = vrot.lane.b32.xlu0 %v10673_v44, %s10285_s16  ;;  %1034 = vrot.lane.b32.xlu1 %v1022_v55, %s10285_s16 }
 0x1bd   : > { %1053 = vrot.lane.b32.xlu0 %v1023_v45, %s10286_s9  ;;  %1040 = vrot.lane.b32.xlu1 %v1022_v55, %s10287_s21 }
 0x1c1   : > { %1045 = vrot.lane.b32.xlu0 %v1022_v55, %s10283_s5  ;;  %1058 = vrot.lane.b32.xlu1 %v1023_v45, %s10288_s18  ;;  %v9471_v45 = vld [vmem:[#allocation10 + $0x60] ss:$20 sps:$4 sm:$0xff]  }
 0x1c2   : > { %v1015_v6 = vpop.f32.mrf.mxu0 }
 0x1c3   : > { %v1025_v9 = vmul.f32 %v1015_v6, %v10695_v4 }
 0x1c4   : > { %v9181_v8 = vpop.f32.mrf.mxu0 }
 0x1c5   : > { %1060 = vrot.lane.b32.xlu0 %v1024_v7, %s10288_s18  ;;  %1066 = vrot.lane.b32.xlu1 %v1024_v7, %s10289_s3 }
 0x1c6   : > { %v1018_v10 = vpop.f32.mrf.mxu0 }
 0x1c8   : > { %v9182_v11 = vpop.f32.mrf.mxu0 }
 0x1c9   : > { %1071 = vrot.lane.b32.xlu0 %v1024_v7, %s10290_s1  ;;  %1073 = vrot.lane.b32.xlu1 %v1025_v9, %s10290_s1 }
 0x227   : > { %v1048_v12 = vpop.permute.xlu1 %1047  ;;  %v1028_v14 = vpop.permute.xlu0 %1027 }
 0x228   : > { %v1030_v18 = vadd.f32 %v1028_v14, %v10673_v44 }
 0x22b   : > { %v1033_v15 = vpop.permute.xlu0 %1032  ;;  %v1035_v16 = vpop.permute.xlu1 %1034 }
 0x22c   : > { %v1037_v17 = vsel %vm1036_vm4, %v1033_v15, %v1035_v16 }
 0x22d   : > { %v1039_v20 = vadd.f32 %v1037_v17, %v1030_v18 }
 0x22f   : > { %v1054_v19 = vpop.permute.xlu0 %1053  ;;  %v1041_v21 = vpop.permute.xlu1 %1040 }
 0x230   : > { %v1043_v22 = vadd.f32 %v1041_v21, %v1039_v20 }
 0x233   : > { %v1046_v23 = vpop.permute.xlu0 %1045  ;;  %v1059_v24 = vpop.permute.xlu1 %1058 }
 0x234   : > { %v1050_v25 = vsel %vm1049_vm5, %v1046_v23, %v1048_v12 }
 0x235   : > { %v1052_v26 = vadd.f32 %v1050_v25, %v1043_v22 }
 0x237   : > { %v1061_v27 = vpop.permute.xlu0 %1060  ;;  %v1056_v29 = vadd.f32 %v1054_v19, %v1052_v26  ;;  %v1067_v30 = vpop.permute.xlu1 %1066  ;;  %v8178_v26 = vld [vmem:[%s12246_s6] ss:$0 sm:$0xff] }
 0x238   : > { %v1063_v31 = vsel %vm1062_vm6, %v1059_v24, %v1061_v27 }
 0x239   : > { %v1065_v32 = vadd.f32 %v1063_v31, %v1056_v29  ;;  %v10232_v31 = vmov 0.0  }
 0x23b   : > { %v1069_v33 = vadd.f32 %v1067_v30, %v1065_v32  ;;  %v1072_v34 = vpop.permute.xlu0 %1071  ;;  %v1074_v37 = vpop.permute.xlu1 %1073  ;;  %v10236_v32 = vmov 0.0  }
 0x23c   : > { %v1076_v39 = vsel %vm1075_vm7, %v1072_v34, %v1074_v37 }
 0x23d   : > { %v1078_v41 = vadd.f32 %v1076_v39, %v1069_v33  ;;  %v10240_v33 = vmov 0.0  }
 0x23f   : > { %v1086_v42 = vadd.f32 %v8154_v38, %v1078_v41 }
 0x241   : > { %v1087_v44 = vpack.c.bf16 %v1086_v42, %v1086_v42 }
 0x243   : > { %8175 = vmatmul.mubr.msk.bf16.vlgmr.msra.gmra.mxu1 %vm876_vm2, %v1087_v44  ;;  %8176 = vmatmul.mubr.msk.bf16.vlgmr.msra.gmra.mxu0 %vm876_vm2, %v1087_v44 }
 0x244   : > { %9184 = vmatpush3.bf16.msra.mxu1 %v1227_v43  ;;  %9191 = vmatprep.mubr.msk.bf16.mxu1 %vm10282_vm3, %v10281_v28 }
 0x245   : > { %9185 = vmatprep.subr.bf16.mxu1 %v10281_v28 }
 0x248   : > { %9186 = vmatpush3.bf16.msra.mxu1 %v9471_v45 }
 0x249   : > { %9187 = vmatprep.subr.bf16.mxu1 %v10281_v28 }
 0x24c   : > { %9188 = vmatpush3.bf16.msra.mxu1 %v9472_v47 }
 0x24d   : > { %9189 = vmatprep.subr.bf16.mxu1 %v10281_v28 }
 0x250   : > { %9190 = vmatpush3.bf16.msra.mxu1 %v9473_v48 }
 0x253   : > { %9192 = vmatmul.mubr.msk.bf16.vlgmr.msra.gmra.mxu1 %vm876_vm2, %v1087_v44 }
 0x303   : > { %v1263_v5 = vpop.f32.mrf.mxu1  ;;  %v1304_v49 = vpop.f32.mrf.mxu0 }
 0x304   : > { %v1351_v50 = vmul.f32 %v1263_v5, %v10663_v35  ;;  %v1353_v55 = vmul.f32 %v1304_v49, %v10666_v36 }
 0x305   : > { %v1265_v51 = vpop.f32.mrf.mxu1  ;;  %v1306_v52 = vpop.f32.mrf.mxu0 }
 0x306   : > { %1362 = vrot.lane.b32.xlu1 %v1351_v50, %s10285_s16  ;;  %1357 = vrot.lane.b32.xlu0 %v1351_v50, %s10284_s10  ;;  %v1352_v35 = vmul.f32 %v1265_v51, %v10677_v46  ;;  %v1354_v61 = vmul.f32 %v1306_v52, %v10689_v3 }
 0x307   : > { %v1267_v53 = vpop.f32.mrf.mxu1  ;;  %v1308_v54 = vpop.f32.mrf.mxu0 }
 0x309   : > { %v1268_v56 = vpop.f32.mrf.mxu1  ;;  %v1309_v57 = vpop.f32.mrf.mxu0 }
 0x30a   : > { %1381 = vrot.lane.b32.xlu0 %v1353_v55, %s10286_s9  ;;  %1376 = vrot.lane.b32.xlu1 %v1353_v55, %s10283_s5 }
 0x30e   : > { %1364 = vrot.lane.b32.xlu0 %v1352_v35, %s10285_s16  ;;  %1369 = vrot.lane.b32.xlu1 %v1352_v35, %s10287_s21 }
 0x312   : > { %1374 = vrot.lane.b32.xlu0 %v1352_v35, %s10283_s5  ;;  %1386 = vrot.lane.b32.xlu1 %v1353_v55, %s10288_s18 }
 0x313   : > { %v1345_v36 = vpop.f32.mrf.mxu1 }
 0x314   : > { %v1355_v63 = vmul.f32 %v1345_v36, %v10695_v4 }
 0x315   : > { %v9193_v62 = vpop.f32.mrf.mxu1 }
 0x316   : > { %1393 = vrot.lane.b32.xlu1 %v1354_v61, %s10289_s3  ;;  %1388 = vrot.lane.b32.xlu0 %v1354_v61, %s10288_s18 }
 0x317   : > { %v1348_v46 = vpop.f32.mrf.mxu1 }
 0x319   : > { %v9194_v0 = vpop.f32.mrf.mxu1 }
 0x31a   : > { %1400 = vrot.lane.b32.xlu1 %v1355_v63, %s10290_s1  ;;  %1398 = vrot.lane.b32.xlu0 %v1354_v61, %s10290_s1 }
 0x378   : > { %v1363_v2 = vpop.permute.xlu1 %1362  ;;  %v1358_v6 = vpop.permute.xlu0 %1357 }
 0x379   : > { %v1360_v9 = vadd.f32 %v1358_v6, %v1351_v50 }
 0x37c   : > { %v1382_v7 = vpop.permute.xlu0 %1381  ;;  %v1377_v8 = vpop.permute.xlu1 %1376 }
 0x380   : > { %v1365_v10 = vpop.permute.xlu0 %1364  ;;  %v1370_v3 = vpop.permute.xlu1 %1369 }
 0x381   : > { %v1366_v11 = vsel %vm1036_vm4, %v1363_v2, %v1365_v10 }
 0x382   : > { %v1368_v12 = vadd.f32 %v1366_v11, %v1360_v9 }
 0x384   : > { %v1372_v14 = vadd.f32 %v1370_v3, %v1368_v12  ;;  %v1375_v15 = vpop.permute.xlu0 %1374  ;;  %v1387_v16 = vpop.permute.xlu1 %1386 }
 0x385   : > { %v1378_v4 = vsel %vm1049_vm5, %v1375_v15, %v1377_v8 }
 0x386   : > { %v1380_v17 = vadd.f32 %v1378_v4, %v1372_v14 }
 0x388   : > { %v1394_v18 = vpop.permute.xlu1 %1393  ;;  %v1384_v19 = vadd.f32 %v1382_v7, %v1380_v17  ;;  %v1389_v20 = vpop.permute.xlu0 %1388 }
 0x389   : > { %v1390_v21 = vsel %vm1062_vm6, %v1387_v16, %v1389_v20 }
 0x38a   : > { %v1392_v22 = vadd.f32 %v1390_v21, %v1384_v19 }
 0x38c   : > { %v1401_v23 = vpop.permute.xlu1 %1400  ;;  %v1396_v24 = vadd.f32 %v1394_v18, %v1392_v22  ;;  %v1399_v25 = vpop.permute.xlu0 %1398 }
 0x38d   : > { %v1402_v27 = vsel %vm1075_vm7, %v1399_v25, %v1401_v23 }
 0x38e   : > { %v1404_v29 = vadd.f32 %v1402_v27, %v1396_v24 }
 0x390   : > { %v10753_v30 = vadd.f32 %v8178_v26, %v1404_v29 }
 0x391 LB: >> { %s1425_s14 = sld [smem:[#allocation16 + %s10246_s15]]  ;;  %s10246_s15 = sphi %s10244_s15, %s1421_s15   ;;  %v10242_v33 = vphi %v10240_v33, %v10241_v33   ;;  %v10238_v32 = vphi %v10236_v32, %v10237_v32   ;;  %v10234_v31 = vphi %v10232_v31, %v10233_v31  }
 0x392   : >> { %s1430_s5 = sld [smem:[#allocation17 + %s10246_s15]]  ;;  %s1421_s15 = sadd.s32 1, %s10246_s15  }
 0x393   : >> { %p1418_p3 = scmp.ge.s32.totalorder %s1421_s15, 31  }
 0x394   : > { %s10260_s22 = smov (%p1418_p3), 31  }
 0x397   : >> { %v1426_v34 = vstv %s1425_s14 }
 0x398   : >> { %v1427_v37 = vmul.f32 %v1426_v34, %v10730_v58  ;;  %v1428_v38 = vmul.f32 %v1426_v34, %v10733_v59  ;;  %v1429_v39 = vmul.f32 %v1426_v34, %v10736_v60  ;;  %v1431_v40 = vstv %s1430_s5 }
 0x39a   : >> { %v1432_v41 = vadd.f32 %v1431_v40, %v1427_v37  ;;  %v1433_v42 = vadd.f32 %v1431_v40, %v1428_v38  ;;  %v1434_v43 = vadd.f32 %v1431_v40, %v1429_v39 }
 0x39c   : >> { %v1435_v44 = vmax.f32 %v1432_v41, 0.0  ;;  %v1436_v45 = vmax.f32 %v1433_v42, 0.0  ;;  %v1437_v47 = vmax.f32 %v1434_v43, 0.0  ;;  %1420 = sbr.rel (!%p1418_p3) target bundleno = 913 (0x391), region = 196 }
 0x39e   : >> { %v1438_v48 = vadd.f32 %v10242_v33, %v1435_v44   ;;  %v1439_v5 = vadd.f32 %v10238_v32, %v1436_v45   ;;  %v1440_v49 = vadd.f32 %v10234_v31, %v1437_v47  }
 0x3a0   : >> { %v10233_v31 = vmov %v1440_v49   ;;  %v10237_v32 = vmov %v1439_v5   ;;  %v10241_v33 = vmov %v1438_v48   ;;  %v10248_v50 = vmov (%p1418_p3), %v1440_v49  }
 0x3a1   : > { %v10252_v51 = vmov %v1439_v5   ;;  %v10256_v52 = vmov %v1438_v48  }
 0x3a2 LB: >> { %s1450_s10 = sld [smem:[#allocation16 + %s10262_s22]]  ;;  %s10262_s22 = sphi %s10260_s22, %s1446_s22   ;;  %v10258_v52 = vphi %v10256_v52, %v10257_v52   ;;  %v10254_v51 = vphi %v10252_v51, %v10253_v51   ;;  %v10250_v50 = vphi %v10248_v50, %v10249_v50  }
 0x3a3   : >> { %s1455_s16 = sld [smem:[#allocation17 + %s10262_s22]]  ;;  %s1446_s22 = sadd.s32 1, %s10262_s22  }
 0x3a4   : >> { %p1443_p5 = scmp.ge.s32.totalorder %s1446_s22, 64  }
 0x3a5   : > { %v9474_v7 = vld [vmem:[%s12247_s7 + $0x78] sm:$0xff] (%p1443_p5)   ;;  %9195 = vmatprep.subr.bf16.mxu1 (%p1443_p5), %v10281_v28  ;;  %9203 = vmatprep.mubr.msk.bf16.mxu1 (%p1443_p5), %vm10282_vm3, %v10281_v28  ;;  %v9476_v9 = vld [vmem:[%s12247_s7 + $0x70] sm:$0xff] (%p1443_p5)   ;;  %vm1647_vm8 = vcmask (%p1443_p5), 1044480   ;;  %vm1648_vm9 = vcmask (%p1443_p5), 1045504   ;;  %v9479_v10 = vld [vmem:[%s12247_s7 + $0x28] sm:$0xff] (%p1443_p5)   ;;  %s1466_s1 = sld [smem:[#allocation2]] (%p1443_p5) }
 0x3a6   : > { %v9475_v8 = vld [vmem:[%s12247_s7 + $0x38] sm:$0xff] (%p1443_p5)   ;;  %8792 = vmatprep.subr.bf16.mxu0 (%p1443_p5), %v9474_v7  ;;  %v9480_v3 = vld [vmem:[%s12247_s7 + $0x60] sm:$0xff] (%p1443_p5)   ;;  %v9487_v16 = vld [vmem:[%s12247_s7 + $0x90] sm:$0xff] (%p1443_p5)   ;;  %vm1643_vm10 = vcmask (%p1443_p5), 482304   ;;  %vm1882_vm11 = vcmask (%p1443_p5), 1031168   ;;  %s8779_s13 = sshll.u32 (%p1443_p5), %s10412_s20, 7 }
 0x3a7   : > { %8793 = vmatpush3.bf16.msra.mxu0 (%p1443_p5), %v9475_v8  ;;  %v9484_v12 = vld [vmem:[%s12247_s7 + $0x98] sm:$0x3f] (%p1443_p5)   ;;  %v9485_v17 = vld [vmem:[%s12247_s7 + $0x50] sm:$0xff] (%p1443_p5)   ;;  %v9490_v19 = vld [vmem:[%s12247_s7 + $0x88] sm:$0xff] (%p1443_p5)   ;;  %s7907_s27 = sshll.u32 (%p1443_p5), %s10757_s28, 4  ;;  %s12313_s15 = sld [smem:[#allocation41_spill]] (%p1443_p5)  ;;  %s7908_s27 = int_to_ptr.vmem [resolvable:$true] %s7907_s27 }
 0x3a8   : >> { %v1451_v53 = vstv %s1450_s10  ;;  %8794 = vmatprep.subr.bf16.mxu0 (%p1443_p5), %v9476_v9  ;;  %v9482_v14 = vld [vmem:[%s12247_s7 + $0x58] sm:$0xff] (%p1443_p5)   ;;  %v9486_v18 = vld [vmem:[%s12247_s7 + $0x10] sm:$0xff] (%p1443_p5)   ;;  %v9488_v20 = vld [vmem:[%s12247_s7 + $0x48] sm:$0xff] (%p1443_p5)   ;;  %s10291_s10 = smov (%p1443_p5), 63   ;;  %s7894_s5 = scalar_lea.sflag (%p1443_p5), [#allocation5], %s10596_s0 }
 0x3a9   : >> { %v1452_v54 = vmul.f32 %v1451_v53, %v10730_v58  ;;  %v1453_v55 = vmul.f32 %v1451_v53, %v10733_v59  ;;  %v1454_v56 = vmul.f32 %v1451_v53, %v10736_v60  ;;  %v1456_v57 = vstv %s1455_s16  ;;  %v9477_v58 = vld [vmem:[%s12247_s7 + $0x30] sm:$0xff] (%p1443_p5)   ;;  %v9478_v59 = vld [vmem:[%s12247_s7 + $0x68] sm:$0xff] (%p1443_p5)   ;;  %v9483_v4 = vld [vmem:[%s12247_s7 + $0x18] sm:$0xff] (%p1443_p5)   ;;  %s10110_s22 = scalar_lea.vmem (%p1443_p5), %s7908_s27, 128  ;;  %p12314_p9 = scmp.ne.s32.totalorder (%p1443_p5), %s12293_s24, 0 }
 0x3aa   : > { %v1649_v60 = vsel (%p1443_p5), %vm1647_vm8, 4294967295, %v10279_v1  ;;  %v9481_v1 = vld [vmem:[%s12247_s7 + $0x20] sm:$0xff] (%p1443_p5)   ;;  %v9489_v22 = vld [vmem:[%s12247_s7 + $0x8] sm:$0xff] (%p1443_p5)   ;;  %p10111_p10 = scmp.ne.s32.totalorder (%p1443_p5), %s7908_s27, %s10110_s22 }
 0x3ab   : >> { %v1457_v35 = vadd.f32 %v1456_v57, %v1452_v54  ;;  %v1458_v36 = vadd.f32 %v1456_v57, %v1453_v55  ;;  %v1459_v61 = vadd.f32 %v1456_v57, %v1454_v56  ;;  %8795 = vmatpush3.bf16.msra.mxu0 (%p1443_p5), %v9477_v58  ;;  %v1650_v11 = vsel (%p1443_p5), %vm1648_vm9, %v1649_v60, 0  ;;  %v9493_v21 = vld [vmem:[%s12247_s7 + $0x80] sm:$0xff] (%p1443_p5)   ;;  %v10837_v60 = vld [vmem:[#allocation12 + $0x788] sm:$0x77] (%p1443_p5) }
 0x3ac   : > { %8796 = vmatprep.subr.bf16.mxu0 (%p1443_p5), %v9478_v59  ;;  %v1652_v15 = vand.u32 (%p1443_p5), %v9484_v12, %v1650_v11  ;;  %v9491_v23 = vld [vmem:[%s12247_s7 + $0x40] sm:$0xff] (%p1443_p5)   ;;  %v1467_v25 = vstv (%p1443_p5), %s1466_s1  ;;  %v10835_v59 = vld [vmem:[#allocation12 + $0x708] sm:$0xff] (%p1443_p5)  ;;  %s12312_s1 = sld [smem:[#allocation38_spill]] (%p1443_p5)  ;;  %p10112_p6 = pnand (%p1443_p5), %p10111_p10, %p12314_p9 }
 0x3ad   : >> { %v1460_v62 = vmin.f32 %v1457_v35, 0.0  ;;  %v1461_v46 = vmin.f32 %v1458_v36, 0.0  ;;  %v1462_v63 = vmin.f32 %v1459_v61, 0.0  ;;  %1445 = sbr.rel (!%p1443_p5) target bundleno = 930 (0x3a2), region = 207  ;;  %v9492_v24 = vld [vmem:[%s12247_s7] sm:$0xff] (%p1443_p5)   ;;  %s7905_s14 = scalar_lea.hbm (%p1443_p5), %s12313_s15, %s8779_s13 }
 0x3ae   : > { %9196 = vmatpush3.bf16.msra.mxu1 (%p1443_p5), %v1652_v15  ;;  %v1790_v38 = vld [vmem:[#allocation12 + $0x700] sm:$0xff] (%p1443_p5)  ;;  %p10113_p4 = pneg (%p1443_p5), %p10112_p6 }
 0x3af   : >> { %v1463_v0 = vadd.f32 %v10258_v52, %v1460_v62   ;;  %v1464_v2 = vadd.f32 %v10254_v51, %v1461_v46   ;;  %v1465_v6 = vadd.f32 %v10250_v50, %v1462_v63   ;;  %8797 = vmatpush3.bf16.msra.mxu0 (%p1443_p5), %v9479_v10  ;;  %9197 = vmatprep.subr.bf16.mxu1 (%p1443_p5), %v10281_v28  ;;  %v1791_v39 = vld [vmem:[#allocation12 + $0x780] sm:$0x77] (%p1443_p5) }
 0x3b0   : > { %8798 = vmatprep.subr.bf16.mxu0 (%p1443_p5), %v9480_v3  ;;  %v1788_v40 = vld [vmem:[#allocation12 + $0x600] sm:$0xff] (%p1443_p5)  ;;  %v8216_v41 = vcombine.high (%p1443_p5), %v1790_v38, %v1791_v39  ;;  %v8215_v42 = vcombine.low (%p1443_p5), %v1790_v38, %v1791_v39  ;;  %v8266_v10 = vcombine.high (%p1443_p5), %v10835_v59, %v10837_v60  ;;  %v8265_v3 = vcombine.low (%p1443_p5), %v10835_v59, %v10837_v60  ;;  %v10921_v39 = vld [vmem:[%s12251_s11 + $0x14] ss:$8 sps:$4 sm:$0xff] (%p1443_p5)  }
 0x3b1   : >> { %v10249_v50 = vmov %v1465_v6   ;;  %v10253_v51 = vmov %v1464_v2   ;;  %v10257_v52 = vmov %v1463_v0   ;;  %v1469_v26 = vadd.f32 (%p1443_p5), %v1467_v25, %v1464_v2  ;;  %v1789_v43 = vld [vmem:[#allocation12 + $0x680] sm:$0xff] (%p1443_p5) }
 0x3b2   : > { %9198 = vmatpush3.bf16.msra.mxu1 %v9487_v16  ;;  %v1470_v27 = vadd.f32 %v1467_v25, %v1465_v6  ;;  %v1468_v29 = vadd.f32 %v1467_v25, %v1463_v0  ;;  %v8214_v44 = vcombine.high %v1788_v40, %v1789_v43  ;;  %v1786_v45 = vld [vmem:[#allocation12 + $0x500] sm:$0xff]  ;;  %v1886_v48 = vsel %vm880_vm0, %v8215_v42, 0  ;;  %v10855_v25 = vld [vmem:[%s12251_s11 + $0x70] ss:$8 sps:$4 sm:$0xff]  }
 0x3b3   : > { %8799 = vmatpush3.bf16.msra.mxu0 %v9481_v1  ;;  %9199 = vmatprep.subr.bf16.mxu1 %v10281_v28  ;;  %v1472_v31 = vmax.f32 %v1469_v26, 0.0  ;;  %v1787_v47 = vld [vmem:[#allocation12 + $0x580] sm:$0xff]  ;;  %v8213_v5 = vcombine.low %v1788_v40, %v1789_v43  ;;  %v10927_v40 = vld [vmem:[%s12251_s11 + $0x10] ss:$8 sps:$4 sm:$0xff]   ;;  %v10945_v43 = vld [vmem:[%s12251_s11 + $0xf4] ss:$8 sps:$4 sm:$0xff]  }
 0x3b4   : > { %8800 = vmatprep.subr.bf16.mxu0 %v9482_v14  ;;  %v1473_v32 = vmax.f32 %v1470_v27, 0.0  ;;  %v1471_v33 = vmax.f32 %v1468_v29, 0.0  ;;  %v1784_v49 = vld [vmem:[#allocation12 + $0x400] sm:$0xff]  ;;  %v8212_v50 = vcombine.high %v1786_v45, %v1787_v47  ;;  %v8211_v52 = vcombine.low %v1786_v45, %v1787_v47  ;;  %v10873_v29 = vld [vmem:[%s12251_s11 + $0x54] ss:$8 sps:$4 sm:$0xff]  }
 0x3b5   : > { %v1475_v34 = vpack.c.bf16 %v1472_v31, %v1472_v31  ;;  %v1785_v51 = vld [vmem:[#allocation12 + $0x480] sm:$0xff]  ;;  %v10879_v31 = vld [vmem:[%s12251_s11 + $0x50] ss:$8 sps:$4 sm:$0xff]  }
 0x3b6   : > { %9200 = vmatpush3.bf16.msra.mxu1 %v9490_v19  ;;  %v1476_v37 = vpack.c.bf16 %v1473_v32, %v1473_v32  ;;  %v1782_v53 = vld [vmem:[#allocation12 + $0x300] sm:$0xff]  ;;  %v8210_v55 = vcombine.high %v1784_v49, %v1785_v51  ;;  %v8209_v56 = vcombine.low %v1784_v49, %v1785_v51  ;;  %v10993_v51 = vld [vmem:[%s12251_s11 + $0xb4] ss:$8 sps:$4 sm:$0xff]  }
 0x3b7   : > { %8801 = vmatpush3.bf16.msra.mxu0 %v9483_v4  ;;  %9201 = vmatprep.subr.bf16.mxu1 %v10281_v28  ;;  %v1474_v28 = vpack.c.bf16 %v1471_v33, %v1471_v33  ;;  %v1783_v54 = vld [vmem:[#allocation12 + $0x380] sm:$0xff] }
 0x3b8   : > { %8802 = vmatprep.subr.bf16.mxu0 %v9485_v17  ;;  %1686 = vmatprep.mubr.bf16.mxu0 %v1475_v34  ;;  %v1780_v57 = vld [vmem:[#allocation12 + $0x200] sm:$0xff]  ;;  %v8208_v36 = vcombine.high %v1782_v53, %v1783_v54  ;;  %v8207_v61 = vcombine.low %v1782_v53, %v1783_v54  ;;  %v10897_v34 = vld [vmem:[%s12251_s11 + $0x34] ss:$8 sps:$4 sm:$0xff]  }
 0x3b9   : > { %v1781_v35 = vld [vmem:[#allocation12 + $0x280] sm:$0xff] }
 0x3ba   : > { %9202 = vmatpush3.bf16.msra.mxu1 %v9493_v21  ;;  %v1778_v62 = vld [vmem:[#allocation12 + $0x100] sm:$0xff]  ;;  %v8206_v63 = vcombine.high %v1780_v57, %v1781_v35  ;;  %v8205_v0 = vcombine.low %v1780_v57, %v1781_v35  ;;  %v2197_v57 = vld [vmem:[#allocation12 + $0x688] sm:$0xff] }
 0x3bb   : > { %8803 = vmatpush3.bf16.msra.mxu0 %v9486_v18  ;;  %8217 = vmatprep.subr.msk.bf16.mxu1 %vm880_vm0, %v8216_v41  ;;  %v1779_v46 = vld [vmem:[#allocation12 + $0x180] sm:$0xff] }
 0x3bc   : > { %8804 = vmatprep.subr.bf16.mxu0 %v9488_v20  ;;  %v1776_v2 = vld [vmem:[#allocation12] sm:$0xff]  ;;  %v8204_v7 = vcombine.high %v1778_v62, %v1779_v46  ;;  %v8203_v8 = vcombine.low %v1778_v62, %v1779_v46  ;;  %v2194_v46 = vld [vmem:[#allocation12 + $0x508] sm:$0xff] }
 0x3bd   : > { %9204 = vmatmul.mubr.msk.bf16.vlgmr.msra.gmra.mxu1 %vm1643_vm10, %v1476_v37  ;;  %v1777_v6 = vld [vmem:[#allocation12 + $0x80] sm:$0xff]  ;;  %v10903_v37 = vld [vmem:[%s12251_s11 + $0x30] ss:$8 sps:$4 sm:$0xff]  }
 0x3be   : > { %1923 = vmatprep.mubr.bf16.mxu1 %v10280_v13  ;;  %1892 = vmatpush1.bf16.msra.mxu1 %v1886_v48  ;;  %v8202_v9 = vcombine.high %v1776_v2, %v1777_v6  ;;  %v8201_v58 = vcombine.low %v1776_v2, %v1777_v6  ;;  %v8179_v14 = vld [vmem:[%s12248_s8] ss:$0 sm:$0xff]  ;;  %v10860_v26 = vld [vmem:[%s12251_s11 + $0x64] ss:$8 sps:$4 sm:$0xff]   ;;  %v10969_v48 = vld [vmem:[%s12251_s11 + $0xd4] ss:$8 sps:$4 sm:$0xff]  }
 0x3bf   : > { %8805 = vmatpush3.bf16.msra.mxu0 %v9489_v22  ;;  %1893 = vmatprep.subr.bf16.mxu1 %v8214_v44  ;;  %v10867_v27 = vld [vmem:[%s12251_s11 + $0x60] ss:$8 sps:$4 sm:$0xff]   ;;  %v10885_v32 = vld [vmem:[%s12251_s11 + $0x44] ss:$8 sps:$4 sm:$0xff]   ;;  %v10951_v44 = vld [vmem:[%s12251_s11 + $0xf0] ss:$8 sps:$4 sm:$0xff]  }
 0x3c0   : > { %8806 = vmatprep.subr.bf16.mxu0 %v9491_v23  ;;  %v10891_v33 = vld [vmem:[%s12251_s11 + $0x40] ss:$8 sps:$4 sm:$0xff]   ;;  %v10933_v41 = vld [vmem:[%s12251_s11 + $0x4] ss:$8 sps:$4 sm:$0xff]  }
 0x3c1   : > { %v10915_v38 = vld [vmem:[%s12251_s11 + $0x20] ss:$8 sps:$4 sm:$0xff]   ;;  %v10957_v45 = vld [vmem:[%s12251_s11 + $0xe4] ss:$8 sps:$4 sm:$0xff]  }
 0x3c2   : > { %1894 = vmatpush1.bf16.msra.mxu1 %v8213_v5  ;;  %v10939_v42 = vld [vmem:[%s12251_s11] ss:$8 sps:$4 sm:$0xff]   ;;  %v10975_v5 = vld [vmem:[%s12251_s11 + $0xd0] ss:$8 sps:$4 sm:$0xff]   ;;  %v10981_v49 = vld [vmem:[%s12251_s11 + $0xc4] ss:$8 sps:$4 sm:$0xff]  }
 0x3c3   : > { %8807 = vmatpush3.bf16.msra.mxu0 %v9492_v24  ;;  %1895 = vmatprep.subr.bf16.mxu1 %v8212_v50  ;;  %v10850_v24 = vld [vmem:[%s12251_s11 + $0x74] ss:$8 sps:$4 sm:$0xff]   ;;  %v10963_v47 = vld [vmem:[%s12251_s11 + $0xe0] ss:$8 sps:$4 sm:$0xff]   ;;  %v11005_v53 = vld [vmem:[%s12251_s11 + $0xa4] ss:$8 sps:$4 sm:$0xff]  }
 0x3c4   : > { %2107 = vmatprep.subr.bf16.mxu0 %v10850_v24  ;;  %v10987_v50 = vld [vmem:[%s12251_s11 + $0xc0] ss:$8 sps:$4 sm:$0xff]  }
 0x3c5   : > { %v11011_v54 = vld [vmem:[%s12251_s11 + $0xa0] ss:$8 sps:$4 sm:$0xff]  }
 0x3c6   : > { %1687 = vmatmul.mubr.bf16.vlgmr.msra.gmra.mxu0 %v1474_v28  ;;  %1896 = vmatpush1.bf16.msra.mxu1 %v8211_v52  ;;  %v10909_v28 = vld [vmem:[%s12251_s11 + $0x24] ss:$8 sps:$4 sm:$0xff]   ;;  %v10999_v52 = vld [vmem:[%s12251_s11 + $0xb0] ss:$8 sps:$4 sm:$0xff]  }
 0x3c7   : > { %1897 = vmatprep.subr.bf16.mxu1 %v8210_v55  ;;  %2108 = vmatpush1.bf16.msra.mxu0 %v10855_v25  ;;  %v1735_v55 = vpack.c.bf16 %v10753_v30, %v10753_v30  ;;  %v2192_v2 = vld [vmem:[#allocation12 + $0x408] sm:$0xff] }
 0x3c8   : > { %2109 = vmatprep.subr.bf16.mxu0 %v10860_v26  ;;  %v2193_v6 = vld [vmem:[#allocation12 + $0x488] sm:$0xff] }
 0x3c9   : > { %v8259_v59 = vcombine.low %v2192_v2, %v2193_v6 }
 0x3ca   : > { %1898 = vmatpush1.bf16.msra.mxu1 %v8209_v56  ;;  %v2196_v56 = vld [vmem:[#allocation12 + $0x608] sm:$0xff] }
 0x3cb   : > { %1899 = vmatprep.subr.bf16.mxu1 %v8208_v36  ;;  %2110 = vmatpush1.bf16.msra.mxu0 %v10867_v27  ;;  %v2291_v36 = vsel %vm880_vm0, %v8265_v3, 0  ;;  %v8263_v30 = vcombine.low %v2196_v56, %v2197_v57  ;;  %v2189_v3 = vld [vmem:[#allocation12 + $0x288] sm:$0xff] }
 0x3cc   : > { %2111 = vmatprep.subr.bf16.mxu0 %v10873_v29 }
 0x3ce   : > { %1900 = vmatpush1.bf16.msra.mxu1 %v8207_v61  ;;  %v8264_v61 = vcombine.high %v2196_v56, %v2197_v57  ;;  %v2704_v56 = vld [vmem:[#allocation12 + $0x710] sm:$0xff] }
 0x3cf   : > { %1901 = vmatprep.subr.bf16.mxu1 %v8206_v63  ;;  %2112 = vmatpush1.bf16.msra.mxu0 %v10879_v31  ;;  %v2195_v63 = vld [vmem:[#allocation12 + $0x588] sm:$0xff]  ;;  %v2705_v57 = vld [vmem:[#allocation12 + $0x790] sm:$0x77] }
 0x3d0   : > { %2113 = vmatprep.subr.bf16.mxu0 %v10885_v32 }
 0x3d2   : > { %1902 = vmatpush1.bf16.msra.mxu1 %v8205_v0  ;;  %v8262_v0 = vcombine.high %v2194_v46, %v2195_v63 }
 0x3d3   : > { %1903 = vmatprep.subr.bf16.mxu1 %v8204_v7  ;;  %2114 = vmatpush1.bf16.msra.mxu0 %v10891_v33  ;;  %v8261_v7 = vcombine.low %v2194_v46, %v2195_v63 }
 0x3d4   : > { %2115 = vmatprep.subr.bf16.mxu0 %v10897_v34 }
 0x3d6   : > { %1904 = vmatpush1.bf16.msra.mxu1 %v8203_v8  ;;  %v8260_v8 = vcombine.high %v2192_v2, %v2193_v6 }
 0x3d7   : > { %1905 = vmatprep.subr.bf16.mxu1 %v8202_v9  ;;  %2116 = vmatpush1.bf16.msra.mxu0 %v10903_v37  ;;  %v2190_v9 = vld [vmem:[#allocation12 + $0x308] sm:$0xff] }
 0x3d8   : > { %2117 = vmatprep.subr.bf16.mxu0 %v10909_v28 }
 0x3da   : > { %1906 = vmatpush1.bf16.msra.mxu1 %v8201_v58  ;;  %v2191_v58 = vld [vmem:[#allocation12 + $0x388] sm:$0xff] }
 0x3db   : > { %8267 = vmatprep.subr.msk.bf16.mxu1 %vm880_vm0, %v8266_v10  ;;  %2118 = vmatpush1.bf16.msra.mxu0 %v10915_v38  ;;  %v8258_v60 = vcombine.high %v2190_v9, %v2191_v58  ;;  %v2188_v10 = vld [vmem:[#allocation12 + $0x208] sm:$0xff] }
 0x3dc   : > { %2119 = vmatprep.subr.bf16.mxu0 %v10921_v39 }
 0x3df   : > { %2120 = vmatpush1.bf16.msra.mxu0 %v10927_v40 }
 0x3e0   : > { %2121 = vmatprep.subr.bf16.mxu0 %v10933_v41 }
 0x3e3   : > { %2122 = vmatpush1.bf16.msra.mxu0 %v10939_v42 }
 0x3e4   : > { %2123 = vmatprep.subr.bf16.mxu0 %v10945_v43 }
 0x3e7   : > { %2124 = vmatpush2.bf16.msra.mxu0 %v10951_v44 }
 0x3e8   : > { %2125 = vmatprep.subr.bf16.mxu0 %v10957_v45 }
 0x3eb   : > { %2126 = vmatpush2.bf16.msra.mxu0 %v10963_v47 }
 0x3ec   : > { %2127 = vmatprep.subr.bf16.mxu0 %v10969_v48 }
 0x3ef   : > { %2128 = vmatpush2.bf16.msra.mxu0 %v10975_v5 }
 0x3f0   : > { %2129 = vmatprep.subr.bf16.mxu0 %v10981_v49 }
 0x3f3   : > { %2130 = vmatpush2.bf16.msra.mxu0 %v10987_v50 }
 0x3f4   : > { %2131 = vmatprep.subr.bf16.mxu0 %v10993_v51 }
 0x3f7   : > { %2132 = vmatpush2.bf16.msra.mxu0 %v10999_v52 }
 0x3f8   : > { %2133 = vmatprep.subr.bf16.mxu0 %v11005_v53 }
 0x3fb   : > { %2134 = vmatpush2.bf16.msra.mxu0 %v11011_v54 }
 0x47d   : > { %v1728_v11 = vpop.f32.mrf.mxu1 }
 0x47f   : > { %v9205_v1 = vpop.f32.mrf.mxu1 }
 0x480   : > { %v2186_v1 = vld [vmem:[#allocation12 + $0x108] sm:$0xff] }
 0x481   : > { %v1731_v4 = vpop.f32.mrf.mxu1 }
 0x482   : > { %v2184_v4 = vld [vmem:[#allocation12 + $0x8] sm:$0xff] }
 0x483   : > { %v9206_v19 = vpop.f32.mrf.mxu1 }
 0x486   : > { %v8808_v12 = vpop.f32.mrf.mxu0 }
 0x488   : > { %v8809_v15 = vpop.f32.mrf.mxu0 }
 0x489   : > { %v8810_v16 = vadd.f32 %v8809_v15, %v8808_v12  ;;  %v8256_v12 = vcombine.high %v2188_v10, %v2189_v3  ;;  %v8255_v15 = vcombine.low %v2188_v10, %v2189_v3 }
 0x48a   : > { %v8811_v17 = vpop.f32.mrf.mxu0 }
 0x48b   : > { %v1689_v18 = vadd.f32 %v8810_v16, %v8179_v14  ;;  %v2187_v14 = vld [vmem:[#allocation12 + $0x188] sm:$0xff] }
 0x48c   : > { %v8812_v20 = vpop.f32.mrf.mxu0  ;;  %v8254_v16 = vcombine.high %v2186_v1, %v2187_v14  ;;  %v2185_v17 = vld [vmem:[#allocation12 + $0x88] sm:$0xff] }
 0x48d   : > { %v1729_v21 = vadd.f32 %v1728_v11, %v1689_v18  ;;  %v8257_v11 = vcombine.low %v2190_v9, %v2191_v58  ;;  %v8253_v18 = vcombine.low %v2186_v1, %v2187_v14  ;;  %v8252_v19 = vcombine.high %v2184_v4, %v2185_v17  ;;  %v2200_v1 = vld [vmem:[#allocation13 + $0x2] sm:$0x3] }
 0x48e   : > { %v8251_v20 = vcombine.low %v2184_v4, %v2185_v17 }
 0x48f   : > { %v1734_v22 = vmax.f32 %v1729_v21, 0.0  ;;  %v11049_v21 = vld [vmem:[%s12251_s11 + $0x94] ss:$8 sps:$4 sm:$0xff]  }
 0x490   : > { %2135 = vmatprep.subr.bf16.mxu0 %v11049_v21 }
 0x491   : > { %v1736_v23 = vpack.c.bf16 %v1734_v22, %v1734_v22  ;;  %v11055_v22 = vld [vmem:[%s12251_s11 + $0x90] ss:$8 sps:$4 sm:$0xff]  }
 0x492   : > { %2136 = vmatpush2.bf16.msra.mxu0 %v11055_v22 }
 0x493   : > { %1738 = vrot.lane.b32.xlu0 %v1736_v23, %s10291_s10  ;;  %v11063_v23 = vld [vmem:[%s12251_s11 + $0x84] ss:$8 sps:$4 sm:$0xff]   ;;  %s10292_s10 = smov [#allocation19]  }
 0x494   : > { %2137 = vmatprep.subr.bf16.mxu0 %v11063_v23  ;;  %s10114_s16 = sshll.u32 %s10292_s10, 4  ;;  %s10115_s16 = int_to_ptr.vmem [resolvable:$false] %s10114_s16 }
 0x495   : > { %s10116_s20 = scalar_lea.vmem %s10115_s16, 256  ;;  %p10117_p11 = scmp.lt.s32.totalorder %s7908_s27, %s10115_s16 }
 0x496   : > { %p10118_p13 = scmp.lt.s32.totalorder %s10116_s20, %s10110_s22 }
 0x498   : > { %p10119_p0 = por %p10118_p13, %p10117_p11 }
 0x49a   : > { %p10120_p2 = pnand %p10119_p0, %p10113_p4 }
 0x505   : > { %v1739_v35 = vpop.permute.xlu0 %1738 }
 0x506   : > { %v11022_v62 = vsel %vm876_vm2, %v1735_v55, %v1739_v35  ;;  %v11069_v55 = vld [vmem:[%s12251_s11 + $0x80] ss:$8 sps:$4 sm:$0xff]   ;;  %v8316_v35 = vcombine.high %v2704_v56, %v2705_v57 }
 0x507   : > { %8218 = vmatmul.mubr.msk.bf16.vlgmr.msra.gmra.mxu1 %vm1882_vm11, %v11022_v62  ;;  %2138 = vmatpush2.bf16.msra.mxu0 %v11069_v55 }
 0x508   : > { %2297 = vmatpush1.bf16.msra.mxu1 %v2291_v36  ;;  %2328 = vmatprep.mubr.bf16.mxu1 %v10280_v13  ;;  %v8315_v36 = vcombine.low %v2704_v56, %v2705_v57  ;;  %v2702_v57 = vld [vmem:[#allocation12 + $0x610] sm:$0xff] }
 0x509   : > { %2298 = vmatprep.subr.bf16.mxu1 %v8264_v61  ;;  %v1794_v61 = vlaneseq }
 0x50b   : > { %v1795_v46 = vshrl.u32 %v1794_v61, 7 }
 0x50c   : > { %2299 = vmatpush1.bf16.msra.mxu1 %v8263_v30  ;;  %v1792_v30 = vld [vmem:[#allocation13] sm:$0x3] }
 0x50d   : > { %2300 = vmatprep.subr.bf16.mxu1 %v8262_v0  ;;  %v11086_v63 = vsub.s32 0, %v1795_v46  ;;  %v11088_v0 = vsub.s32 1, %v1795_v46 }
 0x50f   : > { %v1797_v2 = vrot.slane %v1792_v30, %v11086_v63  ;;  %v1801_v6 = vrot.slane %v1792_v30, %v11088_v0  ;;  %v2205_v14 = vrot.slane %v2200_v1, %v11086_v63 }
 0x510   : > { %2301 = vmatpush1.bf16.msra.mxu1 %v8261_v7 }
 0x511   : > { %2302 = vmatprep.subr.bf16.mxu1 %v8260_v8 }
 0x514   : > { %2303 = vmatpush1.bf16.msra.mxu1 %v8259_v59 }
 0x515   : > { %2304 = vmatprep.subr.bf16.mxu1 %v8258_v60 }
 0x518   : > { %2305 = vmatpush1.bf16.msra.mxu1 %v8257_v11 }
 0x519   : > { %2306 = vmatprep.subr.bf16.mxu1 %v8256_v12 }
 0x51c   : > { %2307 = vmatpush1.bf16.msra.mxu1 %v8255_v15  ;;  %v2209_v15 = vrot.slane %v2200_v1, %v11088_v0 }
 0x51d   : > { %2308 = vmatprep.subr.bf16.mxu1 %v8254_v16 }
 0x520   : > { %2309 = vmatpush1.bf16.msra.mxu1 %v8253_v18 }
 0x521   : > { %2310 = vmatprep.subr.bf16.mxu1 %v8252_v19 }
 0x524   : > { %2311 = vmatpush1.bf16.msra.mxu1 %v8251_v20 }
 0x525   : > { %2341 = vmatprep.subr.bf16.mxu1 %v10850_v24 }
 0x527   : > { %8268 = vmatmul.mubr.msk.bf16.vlgmr.msra.gmra.mxu1 %vm1882_vm11, %v11022_v62 }
 0x528   : > { %2342 = vmatpush1.bf16.msra.mxu1 %v10855_v25 }
 0x529   : > { %2343 = vmatprep.subr.bf16.mxu1 %v10860_v26 }
 0x52c   : > { %2344 = vmatpush1.bf16.msra.mxu1 %v10867_v27 }
 0x52d   : > { %2345 = vmatprep.subr.bf16.mxu1 %v10873_v29 }
 0x530   : > { %2346 = vmatpush1.bf16.msra.mxu1 %v10879_v31 }
 0x531   : > { %2347 = vmatprep.subr.bf16.mxu1 %v10885_v32 }
 0x534   : > { %2348 = vmatpush1.bf16.msra.mxu1 %v10891_v33 }
 0x535   : > { %2349 = vmatprep.subr.bf16.mxu1 %v10897_v34 }
 0x538   : > { %2350 = vmatpush1.bf16.msra.mxu1 %v10903_v37 }
 0x539   : > { %2351 = vmatprep.subr.bf16.mxu1 %v10909_v28 }
 0x53c   : > { %2352 = vmatpush1.bf16.msra.mxu1 %v10915_v38 }
 0x53d   : > { %2353 = vmatprep.subr.bf16.mxu1 %v10921_v39 }
 0x540   : > { %2354 = vmatpush1.bf16.msra.mxu1 %v10927_v40 }
 0x541   : > { %2355 = vmatprep.subr.bf16.mxu1 %v10933_v41 }
 0x544   : > { %2356 = vmatpush1.bf16.msra.mxu1 %v10939_v42 }
 0x545   : > { %2357 = vmatprep.subr.bf16.mxu1 %v10945_v43 }
 0x548   : > { %2358 = vmatpush2.bf16.msra.mxu1 %v10951_v44 }
 0x549   : > { %2359 = vmatprep.subr.bf16.mxu1 %v10957_v45 }
 0x54c   : > { %2360 = vmatpush2.bf16.msra.mxu1 %v10963_v47 }
 0x54d   : > { %2361 = vmatprep.subr.bf16.mxu1 %v10969_v48 }
 0x550   : > { %2362 = vmatpush2.bf16.msra.mxu1 %v10975_v5 }
 0x551   : > { %2363 = vmatprep.subr.bf16.mxu1 %v10981_v49 }
 0x554   : > { %2364 = vmatpush2.bf16.msra.mxu1 %v10987_v50 }
 0x555   : > { %2365 = vmatprep.subr.bf16.mxu1 %v10993_v51 }
 0x558   : > { %2366 = vmatpush2.bf16.msra.mxu1 %v10999_v52 }
 0x559   : > { %2367 = vmatprep.subr.bf16.mxu1 %v11005_v53 }
 0x55c   : > { %2368 = vmatpush2.bf16.msra.mxu1 %v11011_v54 }
 0x55d   : > { %2369 = vmatprep.subr.bf16.mxu1 %v11049_v21 }
 0x560   : > { %2370 = vmatpush2.bf16.msra.mxu1 %v11055_v22 }
 0x561   : > { %2371 = vmatprep.subr.bf16.mxu1 %v11063_v23 }
 0x564   : > { %2372 = vmatpush2.bf16.msra.mxu1 %v11069_v55 }
 0x565   : > { %8317 = vmatprep.subr.msk.bf16.mxu1 %vm880_vm0, %v8316_v35  ;;  %v2703_v35 = vld [vmem:[#allocation12 + $0x690] sm:$0xff] }
 0x5c7   : > { %v1925_v7 = vpop.f32.mrf.mxu1 }
 0x5c8   : > { %v1926_v8 = vadd.f32 %v1925_v7, %v1797_v2  ;;  %v2797_v2 = vsel %vm880_vm0, %v8315_v36, 0  ;;  %v2700_v7 = vld [vmem:[#allocation12 + $0x510] sm:$0xff] }
 0x5c9   : > { %v1927_v9 = vpop.f32.mrf.mxu1 }
 0x5ca   : > { %v1928_v58 = vadd.f32 %v1927_v9, %v1801_v6  ;;  %v1932_v59 = vmax.f32 %v1926_v8, 0.0  ;;  %v8314_v6 = vcombine.high %v2702_v57, %v2703_v35  ;;  %v2701_v8 = vld [vmem:[#allocation12 + $0x590] sm:$0xff]  ;;  %v8313_v9 = vcombine.low %v2702_v57, %v2703_v35 }
 0x5cb   : > { %v1929_v60 = vpop.f32.mrf.mxu1  ;;  %v2691_v57 = vld [vmem:[#allocation12 + $0x90] sm:$0xff] }
 0x5cc   : > { %v1933_v10 = vmax.f32 %v1928_v58, 0.0  ;;  %v1934_v12 = vpack.c.bf16 %v1932_v59, %v1932_v59  ;;  %v8312_v58 = vcombine.high %v2700_v7, %v2701_v8  ;;  %v2698_v59 = vld [vmem:[#allocation12 + $0x410] sm:$0xff] }
 0x5cd   : > { %v1930_v3 = vpop.f32.mrf.mxu1  ;;  %v2699_v60 = vld [vmem:[#allocation12 + $0x490] sm:$0xff] }
 0x5ce   : > { %v1935_v11 = vpack.c.bf16 %v1933_v10, %v1933_v10  ;;  %v8311_v10 = vcombine.low %v2700_v7, %v2701_v8  ;;  %v8310_v3 = vcombine.high %v2698_v59, %v2699_v60  ;;  %v8309_v36 = vcombine.low %v2698_v59, %v2699_v60  ;;  %v9545_v7 = vld [vmem:[#allocation15 + $0xb0] sm:$0xff]   ;;  %v9546_v8 = vld [vmem:[#allocation15 + $0xe8] sm:$0xff]   ;;  %v9549_v59 = vld [vmem:[#allocation15 + $0xa0] sm:$0xff]  }
 0x5cf   : > { %v9550_v60 = vld [vmem:[#allocation15 + $0xd8] sm:$0xff]  }
 0x5d0   : > { %2139 = vmatprep.mubr.bf16.mxu0 %v1935_v11  ;;  %v2696_v11 = vld [vmem:[#allocation12 + $0x310] sm:$0xff] }
 0x5d1   : > { %2140 = vmatmul.mubr.bf16.vlgmr.msra.gmra.mxu0 %v1934_v12  ;;  %v2697_v12 = vld [vmem:[#allocation12 + $0x390] sm:$0xff] }
 0x5d2   : > { %v8308_v1 = vcombine.high %v2696_v11, %v2697_v12 }
 0x5e7   : > { %v2330_v16 = vpop.f32.mrf.mxu1 }
 0x5e8   : > { %v2331_v4 = vadd.f32 %v2330_v16, %v2205_v14  ;;  %v2694_v14 = vld [vmem:[#allocation12 + $0x210] sm:$0xff]  ;;  %v8307_v16 = vcombine.low %v2696_v11, %v2697_v12  ;;  %v9554_v12 = vld [vmem:[#allocation15 + $0xc8] sm:$0xff]  }
 0x5e9   : > { %v2332_v17 = vpop.f32.mrf.mxu1  ;;  %v9553_v11 = vld [vmem:[#allocation15 + $0x90] sm:$0xff]  }
 0x5ea   : > { %v2333_v18 = vadd.f32 %v2332_v17, %v2209_v15  ;;  %v2337_v19 = vmax.f32 %v2331_v4, 0.0  ;;  %v2695_v15 = vld [vmem:[#allocation12 + $0x290] sm:$0xff] }
 0x5eb   : > { %v2334_v20 = vpop.f32.mrf.mxu1  ;;  %v8306_v4 = vcombine.high %v2694_v14, %v2695_v15  ;;  %v2692_v17 = vld [vmem:[#allocation12 + $0x110] sm:$0xff] }
 0x5ec   : > { %v2338_v56 = vmax.f32 %v2333_v18, 0.0  ;;  %v2339_v30 = vpack.c.bf16 %v2337_v19, %v2337_v19  ;;  %v2693_v18 = vld [vmem:[#allocation12 + $0x190] sm:$0xff]  ;;  %v8305_v19 = vcombine.low %v2694_v14, %v2695_v15  ;;  %v9557_v14 = vld [vmem:[#allocation15 + $0x80] sm:$0xff]   ;;  %v9558_v15 = vld [vmem:[#allocation15 + $0x78] sm:$0xff]  }
 0x5ed   : > { %v2335_v61 = vpop.f32.mrf.mxu1  ;;  %v8304_v20 = vcombine.high %v2692_v17, %v2693_v18  ;;  %v8303_v35 = vcombine.low %v2692_v17, %v2693_v18 }
 0x5ee   : > { %v2340_v46 = vpack.c.bf16 %v2338_v56, %v2338_v56  ;;  %v2690_v56 = vld [vmem:[#allocation12 + $0x10] sm:$0xff] }
 0x5ef   : > { %v8302_v61 = vcombine.high %v2690_v56, %v2691_v57 }
 0x5f0   : > { %2373 = vmatprep.mubr.bf16.mxu1 %v2340_v46  ;;  %v8301_v46 = vcombine.low %v2690_v56, %v2691_v57 }
 0x5f1   : > { %2374 = vmatmul.mubr.bf16.vlgmr.msra.gmra.mxu1 %v2339_v30  ;;  %v9542_v30 = vld [vmem:[#allocation15 + $0xf8] sm:$0xff]  }
 0x5f2   : > { %2803 = vmatpush1.bf16.msra.mxu1 %v2797_v2  ;;  %2834 = vmatprep.mubr.bf16.mxu1 %v10280_v13  ;;  %v9543_v2 = vld [vmem:[#allocation15 + $0xb8] sm:$0xff]  }
 0x5f3   : > { %2804 = vmatprep.subr.bf16.mxu1 %v8314_v6  ;;  %v9544_v6 = vld [vmem:[#allocation15 + $0xf0] sm:$0xff]   ;;  %8819 = vmatprep.subr.bf16.mxu0 %v9542_v30 }
 0x5f4   : > { %8820 = vmatpush3.bf16.msra.mxu0 %v9543_v2 }
 0x5f5   : > { %8821 = vmatprep.subr.bf16.mxu0 %v9544_v6 }
 0x5f6   : > { %2805 = vmatpush1.bf16.msra.mxu1 %v8313_v9  ;;  %v9547_v9 = vld [vmem:[#allocation15 + $0xa8] sm:$0xff]  }
 0x5f7   : > { %2806 = vmatprep.subr.bf16.mxu1 %v8312_v58  ;;  %v9548_v58 = vld [vmem:[#allocation15 + $0xe0] sm:$0xff]  }
 0x5f8   : > { %8822 = vmatpush3.bf16.msra.mxu0 %v9545_v7 }
 0x5f9   : > { %8823 = vmatprep.subr.bf16.mxu0 %v9546_v8 }
 0x5fa   : > { %2807 = vmatpush1.bf16.msra.mxu1 %v8311_v10  ;;  %v9551_v10 = vld [vmem:[#allocation15 + $0x98] sm:$0xff]  }
 0x5fb   : > { %2808 = vmatprep.subr.bf16.mxu1 %v8310_v3  ;;  %v9552_v3 = vld [vmem:[#allocation15 + $0xd0] sm:$0xff]  }
 0x5fc   : > { %8824 = vmatpush3.bf16.msra.mxu0 %v9547_v9 }
 0x5fd   : > { %8825 = vmatprep.subr.bf16.mxu0 %v9548_v58 }
 0x5fe   : > { %2809 = vmatpush1.bf16.msra.mxu1 %v8309_v36  ;;  %v9555_v36 = vld [vmem:[#allocation15 + $0x88] sm:$0xff]  }
 0x5ff   : > { %2810 = vmatprep.subr.bf16.mxu1 %v8308_v1  ;;  %v9556_v1 = vld [vmem:[#allocation15 + $0xc0] sm:$0xff]  }
 0x600   : > { %8826 = vmatpush3.bf16.msra.mxu0 %v9549_v59  ;;  %v9559_v59 = vld [vmem:[#allocation15 + $0x38] sm:$0xff]  }
 0x601   : > { %8827 = vmatprep.subr.bf16.mxu0 %v9550_v60 }
 0x602   : > { %2811 = vmatpush1.bf16.msra.mxu1 %v8307_v16 }
 0x603   : > { %2812 = vmatprep.subr.bf16.mxu1 %v8306_v4 }
 0x604   : > { %8828 = vmatpush3.bf16.msra.mxu0 %v9551_v10  ;;  %v9560_v10 = vld [vmem:[#allocation15 + $0x70] sm:$0xff]  }
 0x605   : > { %8829 = vmatprep.subr.bf16.mxu0 %v9552_v3 }
 0x606   : > { %2813 = vmatpush1.bf16.msra.mxu1 %v8305_v19  ;;  %v1775_v19 = vld [vmem:[%s12252_s12] sm:$0x3] }
 0x607   : > { %2814 = vmatprep.subr.bf16.mxu1 %v8304_v20  ;;  %v11102_v20 = vrot.slane %v1775_v19, %v11088_v0  ;;  %v11105_v56 = vrot.slane %v1775_v19, %v11086_v63  ;;  %v9570_v19 = vld [vmem:[#allocation15 + $0x48] sm:$0xff]  }
 0x608   : > { %8830 = vmatpush3.bf16.msra.mxu0 %v9553_v11  ;;  %v9561_v11 = vld [vmem:[#allocation15 + $0x30] sm:$0xff]  }
 0x609   : > { %8831 = vmatprep.subr.bf16.mxu0 %v9554_v12  ;;  %v9562_v12 = vld [vmem:[#allocation15 + $0x68] sm:$0xff]  }
 0x60a   : > { %2815 = vmatpush1.bf16.msra.mxu1 %v8303_v35 }
 0x60b   : > { %2816 = vmatprep.subr.bf16.mxu1 %v8302_v61 }
 0x60c   : > { %8832 = vmatpush3.bf16.msra.mxu0 %v9555_v36  ;;  %v9563_v36 = vld [vmem:[#allocation15 + $0x28] sm:$0xff]  }
 0x60d   : > { %8833 = vmatprep.subr.bf16.mxu0 %v9556_v1  ;;  %v9564_v1 = vld [vmem:[#allocation15 + $0x60] sm:$0xff]  }
 0x60e   : > { %2817 = vmatpush1.bf16.msra.mxu1 %v8301_v46 }
 0x610   : > { %8834 = vmatpush3.bf16.msra.mxu0 %v9557_v14  ;;  %v9565_v14 = vld [vmem:[#allocation15 + $0x20] sm:$0xff]  }
 0x611   : > { %8318 = vmatmul.mubr.msk.bf16.vlgmr.msra.gmra.mxu1 %vm1882_vm11, %v11022_v62  ;;  %8841 = vmatprep.subr.bf16.mxu0 %v9558_v15  ;;  %v9566_v15 = vld [vmem:[#allocation15 + $0x58] sm:$0xff]  }
 0x691   : > { %v2141_v16 = vpop.f32.mrf.mxu0 }
 0x693   : > { %v2143_v4 = vpop.f32.mrf.mxu0 }
 0x694   : > { %v2144_v35 = vadd.f32 %v2143_v4, %v11102_v20  ;;  %v9567_v4 = vld [vmem:[#allocation15 + $0x18] sm:$0xff]  }
 0x695   : > { %v2145_v17 = vpop.f32.mrf.mxu0 }
 0x696   : > { %v2149_v7 = vmax.f32 %v2144_v35, 0.0  ;;  %v9568_v17 = vld [vmem:[#allocation15 + $0x50] sm:$0xff]  }
 0x697   : > { %v2146_v18 = vpop.f32.mrf.mxu0 }
 0x698   : > { %v2151_v3 = vpack.c.bf16 %v2149_v7, %v2149_v7  ;;  %v9569_v18 = vld [vmem:[#allocation15 + $0x10] sm:$0xff]  }
 0x6b1   : > { %v2375_v57 = vpop.f32.mrf.mxu1 }
 0x6b2   : > { %v2376_v61 = vadd.f32 %v2375_v57, %v11105_v56  ;;  %v2706_v57 = vld [vmem:[#allocation13 + $0x4] sm:$0x3] }
 0x6b3   : > { %v2377_v46 = vpop.f32.mrf.mxu1  ;;  %v2715_v35 = vrot.slane %v2706_v57, %v11088_v0 }
 0x6b4   : > { %v2378_v30 = vadd.f32 %v2377_v46, %v11102_v20  ;;  %v2382_v2 = vmax.f32 %v2376_v61, 0.0  ;;  %v9571_v61 = vld [vmem:[#allocation15 + $0x8] sm:$0xff]   ;;  %v2142_v46 = vadd.f32 %v2141_v16, %v11105_v56  ;;  %v2711_v16 = vrot.slane %v2706_v57, %v11086_v63 }
 0x6b5   : > { %v2379_v6 = vpop.f32.mrf.mxu1 }
 0x6b6   : > { %v2383_v8 = vmax.f32 %v2378_v30, 0.0  ;;  %v2384_v60 = vpack.c.bf16 %v2382_v2, %v2382_v2  ;;  %v9572_v2 = vld [vmem:[#allocation15 + $0x40] sm:$0xff]  }
 0x6b7   : > { %v2380_v9 = vpop.f32.mrf.mxu1 }
 0x6b8   : > { %v2385_v58 = vpack.c.bf16 %v2383_v8, %v2383_v8  ;;  %v9573_v8 = vld [vmem:[#allocation15] sm:$0xff]   ;;  %v2148_v9 = vmax.f32 %v2142_v46, 0.0  ;;  %v3073_v46 = vld [vmem:[#allocation12 + $0x618] sm:$0xff] }
 0x6ba   : > { %2546 = vmatprep.mubr.bf16.mxu0 %v2385_v58 }
 0x6bb   : > { %2547 = vmatmul.mubr.bf16.vlgmr.msra.gmra.mxu0 %v2384_v60 }
 0x6bc   : > { %8842 = vmatpush3.bf16.msra.mxu0 %v9559_v59  ;;  %2682 = vmatprep.mubr.bf16.mxu0 %v2151_v3 }
 0x6bd   : > { %8843 = vmatprep.subr.bf16.mxu0 %v9560_v10  ;;  %v2150_v10 = vpack.c.bf16 %v2148_v9, %v2148_v9 }
 0x6c0   : > { %8844 = vmatpush3.bf16.msra.mxu0 %v9561_v11 }
 0x6c1   : > { %8845 = vmatprep.subr.bf16.mxu0 %v9562_v12 }
 0x6c4   : > { %8846 = vmatpush3.bf16.msra.mxu0 %v9563_v36 }
 0x6c5   : > { %8847 = vmatprep.subr.bf16.mxu0 %v9564_v1  ;;  %v9574_v1 = vld [vmem:[#allocation15 + $0x178] sm:$0xff]  }
 0x6c6   : > { %8863 = vmatprep.subr.bf16.mxu1 %v9574_v1  ;;  %v3068_v1 = vld [vmem:[#allocation12 + $0x398] sm:$0xff] }
 0x6c8   : > { %8848 = vmatpush3.bf16.msra.mxu0 %v9565_v14  ;;  %v9575_v14 = vld [vmem:[#allocation15 + $0x138] sm:$0xff]  }
 0x6c9   : > { %8849 = vmatprep.subr.bf16.mxu0 %v9566_v15  ;;  %v9576_v15 = vld [vmem:[#allocation15 + $0x170] sm:$0xff]   ;;  %8864 = vmatpush3.bf16.msra.mxu1 %v9575_v14 }
 0x6ca   : > { %8865 = vmatprep.subr.bf16.mxu1 %v9576_v15 }
 0x6cc   : > { %8850 = vmatpush3.bf16.msra.mxu0 %v9567_v4  ;;  %v9577_v4 = vld [vmem:[#allocation15 + $0x130] sm:$0xff]  }
 0x6cd   : > { %8851 = vmatprep.subr.bf16.mxu0 %v9568_v17  ;;  %v9578_v17 = vld [vmem:[#allocation15 + $0x168] sm:$0xff]   ;;  %8866 = vmatpush3.bf16.msra.mxu1 %v9577_v4  ;;  %v3065_v4 = vld [vmem:[#allocation12 + $0x218] sm:$0xff] }
 0x6ce   : > { %8867 = vmatprep.subr.bf16.mxu1 %v9578_v17  ;;  %v3066_v17 = vld [vmem:[#allocation12 + $0x298] sm:$0xff] }
 0x6d0   : > { %8852 = vmatpush3.bf16.msra.mxu0 %v9569_v18 }
 0x6d1   : > { %v2836_v30 = vpop.f32.mrf.mxu1  ;;  %8853 = vmatprep.subr.bf16.mxu0 %v9570_v19 }
 0x6d2   : > { %v2837_v11 = vadd.f32 %v2836_v30, %v2711_v16  ;;  %v3074_v30 = vld [vmem:[#allocation12 + $0x698] sm:$0xff] }
 0x6d3   : > { %v2838_v6 = vpop.f32.mrf.mxu1  ;;  %v8348_v9 = vcombine.high %v3073_v46, %v3074_v30  ;;  %v3070_v16 = vld [vmem:[#allocation12 + $0x498] sm:$0xff] }
 0x6d4   : > { %v2839_v7 = vadd.f32 %v2838_v6, %v2715_v35  ;;  %8854 = vmatpush3.bf16.msra.mxu0 %v9571_v61  ;;  %v2843_v12 = vmax.f32 %v2837_v11, 0.0 }
 0x6d5   : > { %v2840_v58 = vpop.f32.mrf.mxu1  ;;  %8855 = vmatprep.subr.bf16.mxu0 %v9572_v2 }
 0x6d6   : > { %v2844_v59 = vmax.f32 %v2839_v7, 0.0  ;;  %v2845_v36 = vpack.c.bf16 %v2843_v12, %v2843_v12  ;;  %v3071_v58 = vld [vmem:[#allocation12 + $0x518] sm:$0xff] }
 0x6d7   : > { %v2841_v60 = vpop.f32.mrf.mxu1 }
 0x6d8   : > { %8856 = vmatpush3.bf16.msra.mxu0 %v9573_v8  ;;  %v2846_v3 = vpack.c.bf16 %v2844_v59, %v2844_v59  ;;  %v3072_v59 = vld [vmem:[#allocation12 + $0x598] sm:$0xff]  ;;  %v8347_v60 = vcombine.low %v3073_v46, %v3074_v30 }
 0x6d9   : > { %2847 = vmatprep.subr.bf16.mxu0 %v10850_v24  ;;  %v8345_v11 = vcombine.low %v3071_v58, %v3072_v59 }
 0x6db   : > { %2683 = vmatmul.mubr.bf16.vlgmr.msra.gmra.mxu0 %v2150_v10  ;;  %v8346_v10 = vcombine.high %v3071_v58, %v3072_v59 }
 0x6dc   : > { %2848 = vmatpush1.bf16.msra.mxu0 %v10855_v25  ;;  %2879 = vmatprep.mubr.bf16.mxu0 %v2846_v3  ;;  %v3069_v3 = vld [vmem:[#allocation12 + $0x418] sm:$0xff] }
 0x6dd   : > { %2849 = vmatprep.subr.bf16.mxu0 %v10860_v26  ;;  %v8344_v12 = vcombine.high %v3069_v3, %v3070_v16  ;;  %v8343_v14 = vcombine.low %v3069_v3, %v3070_v16  ;;  %v11207_v3 = vld [vmem:[%s12251_s11 + $0x60] ss:$8 sps:$4 sm:$0xff]   ;;  %v11213_v16 = vld [vmem:[%s12251_s11 + $0x54] ss:$8 sps:$4 sm:$0xff]  }
 0x6e0   : > { %2850 = vmatpush1.bf16.msra.mxu0 %v10867_v27 }
 0x6e1   : > { %2851 = vmatprep.subr.bf16.mxu0 %v10873_v29 }
 0x6e4   : > { %2852 = vmatpush1.bf16.msra.mxu0 %v10879_v31 }
 0x6e5   : > { %2853 = vmatprep.subr.bf16.mxu0 %v10885_v32 }
 0x6e8   : > { %2854 = vmatpush1.bf16.msra.mxu0 %v10891_v33 }
 0x6e9   : > { %2855 = vmatprep.subr.bf16.mxu0 %v10897_v34 }
 0x6ec   : > { %2856 = vmatpush1.bf16.msra.mxu0 %v10903_v37 }
 0x6ed   : > { %2857 = vmatprep.subr.bf16.mxu0 %v10909_v28 }
 0x6f0   : > { %2858 = vmatpush1.bf16.msra.mxu0 %v10915_v38 }
 0x6f1   : > { %2859 = vmatprep.subr.bf16.mxu0 %v10921_v39 }
 0x6f4   : > { %2860 = vmatpush1.bf16.msra.mxu0 %v10927_v40 }
 0x6f5   : > { %2861 = vmatprep.subr.bf16.mxu0 %v10933_v41 }
 0x6f8   : > { %2862 = vmatpush1.bf16.msra.mxu0 %v10939_v42 }
 0x6f9   : > { %2863 = vmatprep.subr.bf16.mxu0 %v10945_v43 }
 0x6fc   : > { %2864 = vmatpush2.bf16.msra.mxu0 %v10951_v44 }
 0x6fd   : > { %2865 = vmatprep.subr.bf16.mxu0 %v10957_v45 }
 0x700   : > { %2866 = vmatpush2.bf16.msra.mxu0 %v10963_v47 }
 0x701   : > { %2867 = vmatprep.subr.bf16.mxu0 %v10969_v48 }
 0x704   : > { %2868 = vmatpush2.bf16.msra.mxu0 %v10975_v5 }
 0x705   : > { %2869 = vmatprep.subr.bf16.mxu0 %v10981_v49 }
 0x708   : > { %2870 = vmatpush2.bf16.msra.mxu0 %v10987_v50 }
 0x709   : > { %2871 = vmatprep.subr.bf16.mxu0 %v10993_v51 }
 0x70c   : > { %2872 = vmatpush2.bf16.msra.mxu0 %v10999_v52 }
 0x70d   : > { %2873 = vmatprep.subr.bf16.mxu0 %v11005_v53 }
 0x710   : > { %2874 = vmatpush2.bf16.msra.mxu0 %v11011_v54 }
 0x711   : > { %2875 = vmatprep.subr.bf16.mxu0 %v11049_v21 }
 0x714   : > { %2876 = vmatpush2.bf16.msra.mxu0 %v11055_v22 }
 0x715   : > { %2877 = vmatprep.subr.bf16.mxu0 %v11063_v23 }
 0x718   : > { %2878 = vmatpush2.bf16.msra.mxu0 %v11069_v55 }
 0x719   : > { %3218 = vmatprep.subr.bf16.mxu0 %v10850_v24 }
 0x71b   : > { %2880 = vmatmul.mubr.bf16.vlgmr.msra.gmra.mxu0 %v2845_v36  ;;  %v3067_v36 = vld [vmem:[#allocation12 + $0x318] sm:$0xff] }
 0x71c   : > { %3219 = vmatpush1.bf16.msra.mxu0 %v10855_v25  ;;  %v9579_v25 = vld [vmem:[#allocation15 + $0x128] sm:$0xff]   ;;  %v8342_v15 = vcombine.high %v3067_v36, %v3068_v1 }
 0x71d   : > { %3220 = vmatprep.subr.bf16.mxu0 %v10860_v26  ;;  %v9580_v26 = vld [vmem:[#allocation15 + $0x160] sm:$0xff]   ;;  %8868 = vmatpush3.bf16.msra.mxu1 %v9579_v25  ;;  %v8341_v25 = vcombine.low %v3067_v36, %v3068_v1  ;;  %v11237_v1 = vld [vmem:[%s12251_s11 + $0x34] ss:$8 sps:$4 sm:$0xff]  }
 0x71e   : > { %8869 = vmatprep.subr.bf16.mxu1 %v9580_v26  ;;  %v8340_v26 = vcombine.high %v3065_v4, %v3066_v17  ;;  %v11231_v36 = vld [vmem:[%s12251_s11 + $0x40] ss:$8 sps:$4 sm:$0xff]  }
 0x720   : > { %3221 = vmatpush1.bf16.msra.mxu0 %v10867_v27  ;;  %v9581_v27 = vld [vmem:[#allocation15 + $0x120] sm:$0xff]  }
 0x721   : > { %3222 = vmatprep.subr.bf16.mxu0 %v10873_v29  ;;  %v9582_v29 = vld [vmem:[#allocation15 + $0x158] sm:$0xff]   ;;  %8870 = vmatpush3.bf16.msra.mxu1 %v9581_v27 }
 0x722   : > { %8871 = vmatprep.subr.bf16.mxu1 %v9582_v29  ;;  %v3063_v27 = vld [vmem:[#allocation12 + $0x118] sm:$0xff] }
 0x723   : > { %v3064_v29 = vld [vmem:[#allocation12 + $0x198] sm:$0xff] }
 0x724   : > { %3223 = vmatpush1.bf16.msra.mxu0 %v10879_v31  ;;  %v9583_v31 = vld [vmem:[#allocation15 + $0x118] sm:$0xff]  }
 0x725   : > { %3224 = vmatprep.subr.bf16.mxu0 %v10885_v32  ;;  %v9584_v32 = vld [vmem:[#allocation15 + $0x150] sm:$0xff]   ;;  %8872 = vmatpush3.bf16.msra.mxu1 %v9583_v31  ;;  %v8339_v31 = vcombine.low %v3065_v4, %v3066_v17  ;;  %v11255_v4 = vld [vmem:[%s12251_s11 + $0x20] ss:$8 sps:$4 sm:$0xff]  }
 0x726   : > { %8873 = vmatprep.subr.bf16.mxu1 %v9584_v32  ;;  %v8338_v32 = vcombine.high %v3063_v27, %v3064_v29  ;;  %v11261_v17 = vld [vmem:[%s12251_s11 + $0x14] ss:$8 sps:$4 sm:$0xff]  }
 0x728   : > { %3225 = vmatpush1.bf16.msra.mxu0 %v10891_v33  ;;  %v9585_v33 = vld [vmem:[#allocation15 + $0x110] sm:$0xff]  }
 0x729   : > { %3226 = vmatprep.subr.bf16.mxu0 %v10897_v34  ;;  %8874 = vmatpush3.bf16.msra.mxu1 %v9585_v33  ;;  %v9586_v34 = vld [vmem:[#allocation15 + $0x148] sm:$0xff]   ;;  %v3061_v33 = vld [vmem:[#allocation12 + $0x18] sm:$0xff] }
 0x72a   : > { %8875 = vmatprep.subr.bf16.mxu1 %v9586_v34  ;;  %v3062_v34 = vld [vmem:[#allocation12 + $0x98] sm:$0xff] }
 0x72c   : > { %3227 = vmatpush1.bf16.msra.mxu0 %v10903_v37  ;;  %v9587_v37 = vld [vmem:[#allocation15 + $0x108] sm:$0xff]  }
 0x72d   : > { %3228 = vmatprep.subr.bf16.mxu0 %v10909_v28  ;;  %8876 = vmatpush3.bf16.msra.mxu1 %v9587_v37  ;;  %v9588_v28 = vld [vmem:[#allocation15 + $0x140] sm:$0xff]   ;;  %v8337_v37 = vcombine.low %v3063_v27, %v3064_v29  ;;  %v11285_v29 = vld [vmem:[%s12251_s11 + $0xf4] ss:$8 sps:$4 sm:$0xff]  }
 0x72e   : > { %8877 = vmatprep.subr.bf16.mxu1 %v9588_v28  ;;  %v8336_v28 = vcombine.high %v3061_v33, %v3062_v34  ;;  %v11279_v27 = vld [vmem:[%s12251_s11] ss:$8 sps:$4 sm:$0xff]  }
 0x730   : > { %3229 = vmatpush1.bf16.msra.mxu0 %v10915_v38  ;;  %v9589_v38 = vld [vmem:[#allocation15 + $0x100] sm:$0xff]  }
 0x731   : > { %3230 = vmatprep.subr.bf16.mxu0 %v10921_v39  ;;  %8878 = vmatpush3.bf16.msra.mxu1 %v9589_v38  ;;  %v3075_v39 = vld [vmem:[#allocation12 + $0x718] sm:$0xff]  ;;  %v8335_v38 = vcombine.low %v3061_v33, %v3062_v34  ;;  %v11303_v33 = vld [vmem:[%s12251_s11 + $0xe0] ss:$8 sps:$4 sm:$0xff]  }
 0x732   : > { %v11309_v34 = vld [vmem:[%s12251_s11 + $0xd4] ss:$8 sps:$4 sm:$0xff]  }
 0x734   : > { %3231 = vmatpush1.bf16.msra.mxu0 %v10927_v40  ;;  %v3076_v40 = vld [vmem:[#allocation12 + $0x798] sm:$0x77] }
 0x735   : > { %3232 = vmatprep.subr.bf16.mxu0 %v10933_v41  ;;  %v8350_v41 = vcombine.high %v3075_v39, %v3076_v40 }
 0x737   : > { %8351 = vmatprep.subr.msk.bf16.mxu1 %vm880_vm0, %v8350_v41  ;;  %v9592_v41 = vld [vmem:[#allocation15 + $0x1f0] sm:$0xff]  }
 0x738   : > { %3233 = vmatpush1.bf16.msra.mxu0 %v10939_v42  ;;  %v8349_v42 = vcombine.low %v3075_v39, %v3076_v40  ;;  %v9590_v39 = vld [vmem:[#allocation15 + $0x1f8] sm:$0xff]  }
 0x739   : > { %3234 = vmatprep.subr.bf16.mxu0 %v10945_v43  ;;  %v9591_v40 = vld [vmem:[#allocation15 + $0x1b8] sm:$0xff]  }
 0x73a   : > { %v3168_v8 = vsel %vm880_vm0, %v8349_v42, 0  ;;  %v9593_v42 = vld [vmem:[#allocation15 + $0x1b0] sm:$0xff]  }
 0x73c   : > { %3235 = vmatpush2.bf16.msra.mxu0 %v10951_v44 }
 0x73d   : > { %3236 = vmatprep.subr.bf16.mxu0 %v10957_v45 }
 0x740   : > { %3237 = vmatpush2.bf16.msra.mxu0 %v10963_v47 }
 0x741   : > { %3238 = vmatprep.subr.bf16.mxu0 %v10969_v48 }
 0x744   : > { %3239 = vmatpush2.bf16.msra.mxu0 %v10975_v5 }
 0x745   : > { %3240 = vmatprep.subr.bf16.mxu0 %v10981_v49 }
 0x748   : > { %3241 = vmatpush2.bf16.msra.mxu0 %v10987_v50 }
 0x749   : > { %3242 = vmatprep.subr.bf16.mxu0 %v10993_v51 }
 0x74c   : > { %3243 = vmatpush2.bf16.msra.mxu0 %v10999_v52 }
 0x74d   : > { %3244 = vmatprep.subr.bf16.mxu0 %v11005_v53 }
 0x750   : > { %3245 = vmatpush2.bf16.msra.mxu0 %v11011_v54 }
 0x751   : > { %3246 = vmatprep.subr.bf16.mxu0 %v11049_v21 }
 0x754   : > { %3247 = vmatpush2.bf16.msra.mxu0 %v11055_v22 }
 0x755   : > { %3248 = vmatprep.subr.bf16.mxu0 %v11063_v23 }
 0x758   : > { %3249 = vmatpush2.bf16.msra.mxu0 %v11069_v55 }
 0x759   : > { %3589 = vmatprep.subr.bf16.mxu0 %v10850_v24 }
 0x77b   : > { %v8835_v43 = vpop.f32.mrf.mxu0 }
 0x77d   : > { %v8836_v44 = vpop.f32.mrf.mxu0 }
 0x77e   : > { %v8837_v45 = vadd.f32 %v8836_v44, %v8835_v43  ;;  %v9594_v43 = vld [vmem:[#allocation15 + $0x1e8] sm:$0xff]  }
 0x77f   : > { %v8838_v47 = vpop.f32.mrf.mxu0  ;;  %v9595_v44 = vld [vmem:[#allocation15 + $0x1a8] sm:$0xff]  }
 0x780   : > { %v9597_v47 = vld [vmem:[#allocation15 + $0x1a0] sm:$0xff]  }
 0x781   : > { %v8839_v48 = vpop.f32.mrf.mxu0 }
 0x782   : > { %v9598_v48 = vld [vmem:[#allocation15 + $0x1d8] sm:$0xff]  }
 0x79b   : > { %v8857_v24 = vpop.f32.mrf.mxu0 }
 0x79d   : > { %v8858_v5 = vpop.f32.mrf.mxu0 }
 0x79e   : > { %v8859_v49 = vadd.f32 %v8858_v5, %v8857_v24  ;;  %v9599_v24 = vld [vmem:[#allocation15 + $0x198] sm:$0xff]   ;;  %v9600_v5 = vld [vmem:[#allocation15 + $0x1d0] sm:$0xff]  }
 0x79f   : > { %v8860_v50 = vpop.f32.mrf.mxu0 }
 0x7a0   : > { %v11179_v51 = vadd.f32 %v8859_v49, %v8837_v45  ;;  %v9596_v45 = vld [vmem:[#allocation15 + $0x1e0] sm:$0xff]   ;;  %v9601_v49 = vld [vmem:[#allocation15 + $0x190] sm:$0xff]  }
 0x7a1   : > { %v8861_v52 = vpop.f32.mrf.mxu0 }
 0x7db   : > { %v2881_v53 = vpop.f32.mrf.mxu0 }
 0x7dc   : > { %v2882_v54 = vadd.f32 %v2881_v53, %v11105_v56 }
 0x7dd   : > { %v2883_v18 = vpop.f32.mrf.mxu0 }
 0x7de   : > { %v2884_v19 = vadd.f32 %v2883_v18, %v11102_v20  ;;  %v2888_v57 = vmax.f32 %v2882_v54, 0.0 }
 0x7df   : > { %v2885_v35 = vpop.f32.mrf.mxu0 }
 0x7e0   : > { %v2889_v61 = vmax.f32 %v2884_v19, 0.0  ;;  %v2890_v7 = vpack.c.bf16 %v2888_v57, %v2888_v57  ;;  %v3077_v57 = vld [vmem:[#allocation13 + $0x6] sm:$0x3] }
 0x7e1   : > { %v2886_v2 = vpop.f32.mrf.mxu0  ;;  %v3082_v35 = vrot.slane %v3077_v57, %v11086_v63 }
 0x7e2   : > { %v2891_v6 = vpack.c.bf16 %v2889_v61, %v2889_v61  ;;  %v3086_v61 = vrot.slane %v3077_v57, %v11088_v0  ;;  %v3445_v57 = vld [vmem:[#allocation12 + $0x6a0] sm:$0xff] }
 0x7e4   : > { %3052 = vmatprep.mubr.bf16.mxu1 %v2891_v6 }
 0x7e5   : > { %3053 = vmatmul.mubr.bf16.vlgmr.msra.gmra.mxu1 %v2890_v7 }
 0x7e6   : > { %3174 = vmatpush1.bf16.msra.mxu1 %v3168_v8  ;;  %3205 = vmatprep.mubr.bf16.mxu1 %v10280_v13 }
 0x7e7   : > { %3175 = vmatprep.subr.bf16.mxu1 %v8348_v9 }
 0x7ea   : > { %3176 = vmatpush1.bf16.msra.mxu1 %v8347_v60 }
 0x7eb   : > { %3177 = vmatprep.subr.bf16.mxu1 %v8346_v10  ;;  %v11201_v10 = vld [vmem:[%s12251_s11 + $0x64] ss:$8 sps:$4 sm:$0xff]  }
 0x7ee   : > { %3178 = vmatpush1.bf16.msra.mxu1 %v8345_v11  ;;  %v11219_v11 = vld [vmem:[%s12251_s11 + $0x50] ss:$8 sps:$4 sm:$0xff]  }
 0x7ef   : > { %3179 = vmatprep.subr.bf16.mxu1 %v8344_v12  ;;  %v11225_v12 = vld [vmem:[%s12251_s11 + $0x44] ss:$8 sps:$4 sm:$0xff]  }
 0x7f2   : > { %3180 = vmatpush1.bf16.msra.mxu1 %v8343_v14  ;;  %v11243_v14 = vld [vmem:[%s12251_s11 + $0x30] ss:$8 sps:$4 sm:$0xff]  }
 0x7f3   : > { %3181 = vmatprep.subr.bf16.mxu1 %v8342_v15  ;;  %v11249_v15 = vld [vmem:[%s12251_s11 + $0x24] ss:$8 sps:$4 sm:$0xff]  }
 0x7f6   : > { %3182 = vmatpush1.bf16.msra.mxu1 %v8341_v25  ;;  %v11267_v25 = vld [vmem:[%s12251_s11 + $0x10] ss:$8 sps:$4 sm:$0xff]  }
 0x7f7   : > { %3183 = vmatprep.subr.bf16.mxu1 %v8340_v26  ;;  %v11273_v26 = vld [vmem:[%s12251_s11 + $0x4] ss:$8 sps:$4 sm:$0xff]  }
 0x7fa   : > { %3184 = vmatpush1.bf16.msra.mxu1 %v8339_v31  ;;  %v11291_v31 = vld [vmem:[%s12251_s11 + $0xf0] ss:$8 sps:$4 sm:$0xff]  }
 0x7fb   : > { %3185 = vmatprep.subr.bf16.mxu1 %v8338_v32  ;;  %v11297_v32 = vld [vmem:[%s12251_s11 + $0xe4] ss:$8 sps:$4 sm:$0xff]  }
 0x7fe   : > { %3186 = vmatpush1.bf16.msra.mxu1 %v8337_v37  ;;  %v11315_v37 = vld [vmem:[%s12251_s11 + $0xd0] ss:$8 sps:$4 sm:$0xff]  }
 0x7ff   : > { %3187 = vmatprep.subr.bf16.mxu1 %v8336_v28  ;;  %v11321_v28 = vld [vmem:[%s12251_s11 + $0xc4] ss:$8 sps:$4 sm:$0xff]  }
 0x802   : > { %3188 = vmatpush1.bf16.msra.mxu1 %v8335_v38  ;;  %v11327_v38 = vld [vmem:[%s12251_s11 + $0xc0] ss:$8 sps:$4 sm:$0xff]  }
 0x803   : > { %8885 = vmatprep.subr.bf16.mxu1 %v9590_v39  ;;  %v11333_v39 = vld [vmem:[%s12251_s11 + $0xb4] ss:$8 sps:$4 sm:$0xff]  }
 0x805   : > { %8352 = vmatmul.mubr.msk.bf16.vlgmr.msra.gmra.mxu1 %vm1882_vm11, %v11022_v62 }
 0x806   : > { %8886 = vmatpush3.bf16.msra.mxu1 %v9591_v40  ;;  %v11339_v40 = vld [vmem:[%s12251_s11 + $0xb0] ss:$8 sps:$4 sm:$0xff]  }
 0x807   : > { %8887 = vmatprep.subr.bf16.mxu1 %v9592_v41  ;;  %v11345_v41 = vld [vmem:[%s12251_s11 + $0xa4] ss:$8 sps:$4 sm:$0xff]  }
 0x80a   : > { %8888 = vmatpush3.bf16.msra.mxu1 %v9593_v42  ;;  %v11351_v42 = vld [vmem:[%s12251_s11 + $0xa0] ss:$8 sps:$4 sm:$0xff]  }
 0x80b   : > { %8889 = vmatprep.subr.bf16.mxu1 %v9594_v43  ;;  %v11361_v43 = vld [vmem:[%s12251_s11 + $0x74] ss:$8 sps:$4 sm:$0xff]  }
 0x80e   : > { %8890 = vmatpush3.bf16.msra.mxu1 %v9595_v44  ;;  %v9602_v44 = vld [vmem:[#allocation15 + $0x1c8] sm:$0xff]  }
 0x80f   : > { %8891 = vmatprep.subr.bf16.mxu1 %v9596_v45  ;;  %v9603_v45 = vld [vmem:[#allocation15 + $0x188] sm:$0xff]  }
 0x812   : > { %8892 = vmatpush3.bf16.msra.mxu1 %v9597_v47  ;;  %v9604_v47 = vld [vmem:[#allocation15 + $0x1c0] sm:$0xff]  }
 0x813   : > { %8893 = vmatprep.subr.bf16.mxu1 %v9598_v48  ;;  %v9605_v48 = vld [vmem:[#allocation15 + $0x180] sm:$0xff]  }
 0x816   : > { %8894 = vmatpush3.bf16.msra.mxu1 %v9599_v24 }
 0x817   : > { %8895 = vmatprep.subr.bf16.mxu1 %v9600_v5 }
 0x81a   : > { %8896 = vmatpush3.bf16.msra.mxu1 %v9601_v49 }
 0x81b   : > { %8897 = vmatprep.subr.bf16.mxu1 %v9602_v44 }
 0x81e   : > { %8898 = vmatpush3.bf16.msra.mxu1 %v9603_v45  ;;  %v3438_v45 = vld [vmem:[#allocation12 + $0x320] sm:$0xff] }
 0x81f   : > { %8899 = vmatprep.subr.bf16.mxu1 %v9604_v47  ;;  %v3439_v47 = vld [vmem:[#allocation12 + $0x3a0] sm:$0xff] }
 0x822   : > { %8900 = vmatpush3.bf16.msra.mxu1 %v9605_v48 }
 0x8a5   : > { %v8879_v50 = vpop.f32.mrf.mxu1 }
 0x8a7   : > { %v8880_v52 = vpop.f32.mrf.mxu1 }
 0x8a8   : > { %v8881_v53 = vadd.f32 %v8880_v52, %v8879_v50 }
 0x8a9   : > { %v8882_v54 = vpop.f32.mrf.mxu1 }
 0x8aa   : > { %v11188_v18 = vadd.f32 %v8881_v53, %v11179_v51  ;;  %v11195_v51 = vld [vmem:[%s12251_s11 + $0x70] ss:$8 sps:$4 sm:$0xff]  }
 0x8ab   : > { %v8883_v19 = vpop.f32.mrf.mxu1 }
 0x8ac   : > { %v3444_v19 = vld [vmem:[#allocation12 + $0x620] sm:$0xff] }
 0x8c5   : > { %v3207_v46 = vpop.f32.mrf.mxu1 }
 0x8c6   : > { %v3208_v30 = vadd.f32 %v3207_v46, %v3082_v35 }
 0x8c7   : > { %v3209_v2 = vpop.f32.mrf.mxu1 }
 0x8c8   : > { %v3210_v6 = vadd.f32 %v3209_v2, %v3086_v61  ;;  %v3214_v7 = vmax.f32 %v3208_v30, 0.0  ;;  %v8382_v2 = vcombine.high %v3444_v19, %v3445_v57 }
 0x8c9   : > { %v3211_v8 = vpop.f32.mrf.mxu1 }
 0x8ca   : > { %v3215_v9 = vmax.f32 %v3210_v6, 0.0  ;;  %v3216_v60 = vpack.c.bf16 %v3214_v7, %v3214_v7  ;;  %v3442_v6 = vld [vmem:[#allocation12 + $0x520] sm:$0xff]  ;;  %v8381_v8 = vcombine.low %v3444_v19, %v3445_v57 }
 0x8cb   : > { %v3212_v58 = vpop.f32.mrf.mxu1  ;;  %v3443_v7 = vld [vmem:[#allocation12 + $0x5a0] sm:$0xff] }
 0x8cc   : > { %v3217_v59 = vpack.c.bf16 %v3215_v9, %v3215_v9  ;;  %v8380_v9 = vcombine.high %v3442_v6, %v3443_v7  ;;  %v3440_v58 = vld [vmem:[#allocation12 + $0x420] sm:$0xff] }
 0x8ce   : > { %3250 = vmatprep.mubr.bf16.mxu0 %v3217_v59  ;;  %v3441_v59 = vld [vmem:[#allocation12 + $0x4a0] sm:$0xff] }
 0x8cf   : > { %3251 = vmatmul.mubr.bf16.vlgmr.msra.gmra.mxu0 %v3216_v60  ;;  %v8379_v60 = vcombine.low %v3442_v6, %v3443_v7  ;;  %v8378_v44 = vcombine.high %v3440_v58, %v3441_v59  ;;  %v8377_v48 = vcombine.low %v3440_v58, %v3441_v59  ;;  %v9610_v6 = vld [vmem:[#allocation15 + $0x268] sm:$0xff]   ;;  %v9614_v58 = vld [vmem:[#allocation15 + $0x258] sm:$0xff]  }
 0x8d0   : > { %3590 = vmatpush1.bf16.msra.mxu0 %v11195_v51  ;;  %v9611_v7 = vld [vmem:[#allocation15 + $0x228] sm:$0xff]   ;;  %v9615_v59 = vld [vmem:[#allocation15 + $0x218] sm:$0xff]  }
 0x8d1   : > { %3591 = vmatprep.subr.bf16.mxu0 %v11201_v10 }
 0x8d4   : > { %3592 = vmatpush1.bf16.msra.mxu0 %v11207_v3 }
 0x8d5   : > { %3593 = vmatprep.subr.bf16.mxu0 %v11213_v16 }
 0x8d8   : > { %3594 = vmatpush1.bf16.msra.mxu0 %v11219_v11 }
 0x8d9   : > { %3595 = vmatprep.subr.bf16.mxu0 %v11225_v12 }
 0x8dc   : > { %3596 = vmatpush1.bf16.msra.mxu0 %v11231_v36 }
 0x8dd   : > { %3597 = vmatprep.subr.bf16.mxu0 %v11237_v1 }
 0x8e0   : > { %3598 = vmatpush1.bf16.msra.mxu0 %v11243_v14 }
 0x8e1   : > { %3599 = vmatprep.subr.bf16.mxu0 %v11249_v15 }
 0x8e4   : > { %3600 = vmatpush1.bf16.msra.mxu0 %v11255_v4 }
 0x8e5   : > { %3601 = vmatprep.subr.bf16.mxu0 %v11261_v17 }
 0x8e8   : > { %3602 = vmatpush1.bf16.msra.mxu0 %v11267_v25 }
 0x8e9   : > { %3603 = vmatprep.subr.bf16.mxu0 %v11273_v26 }
 0x8ec   : > { %3604 = vmatpush1.bf16.msra.mxu0 %v11279_v27 }
 0x8ed   : > { %3605 = vmatprep.subr.bf16.mxu0 %v11285_v29 }
 0x8f0   : > { %3606 = vmatpush2.bf16.msra.mxu0 %v11291_v31 }
 0x8f1   : > { %3607 = vmatprep.subr.bf16.mxu0 %v11297_v32 }
 0x8f4   : > { %3608 = vmatpush2.bf16.msra.mxu0 %v11303_v33 }
 0x8f5   : > { %3609 = vmatprep.subr.bf16.mxu0 %v11309_v34 }
 0x8f8   : > { %3610 = vmatpush2.bf16.msra.mxu0 %v11315_v37 }
 0x8f9   : > { %3611 = vmatprep.subr.bf16.mxu0 %v11321_v28 }
 0x8fc   : > { %3612 = vmatpush2.bf16.msra.mxu0 %v11327_v38 }
 0x8fd   : > { %3613 = vmatprep.subr.bf16.mxu0 %v11333_v39 }
 0x900   : > { %3614 = vmatpush2.bf16.msra.mxu0 %v11339_v40 }
 0x901   : > { %3615 = vmatprep.subr.bf16.mxu0 %v11345_v41 }
 0x904   : > { %3616 = vmatpush2.bf16.msra.mxu0 %v11351_v42 }
 0x905   : > { %3617 = vmatprep.subr.bf16.mxu0 %v11049_v21  ;;  %v3446_v21 = vld [vmem:[#allocation12 + $0x720] sm:$0xff] }
 0x908   : > { %3618 = vmatpush2.bf16.msra.mxu0 %v11055_v22  ;;  %v3447_v22 = vld [vmem:[#allocation12 + $0x7a0] sm:$0x77] }
 0x909   : > { %3619 = vmatprep.subr.bf16.mxu0 %v11063_v23  ;;  %v8384_v23 = vcombine.high %v3446_v21, %v3447_v22  ;;  %v8383_v24 = vcombine.low %v3446_v21, %v3447_v22  ;;  %v8376_v21 = vcombine.high %v3438_v45, %v3439_v47  ;;  %v3436_v22 = vld [vmem:[#allocation12 + $0x220] sm:$0xff] }
 0x90b   : > { %8385 = vmatprep.subr.msk.bf16.mxu1 %vm880_vm0, %v8384_v23  ;;  %v3539_v30 = vsel %vm880_vm0, %v8383_v24, 0  ;;  %v3437_v23 = vld [vmem:[#allocation12 + $0x2a0] sm:$0xff]  ;;  %v8375_v24 = vcombine.low %v3438_v45, %v3439_v47 }
 0x90c   : > { %3620 = vmatpush2.bf16.msra.mxu0 %v11069_v55 }
 0x90d   : > { %3960 = vmatprep.subr.bf16.mxu0 %v11361_v43 }
 0x98f   : > { %v3252_v55 = vpop.f32.mrf.mxu0 }
 0x990   : > { %v3253_v5 = vadd.f32 %v3252_v55, %v11105_v56  ;;  %v8374_v55 = vcombine.high %v3436_v22, %v3437_v23 }
 0x991   : > { %v3254_v49 = vpop.f32.mrf.mxu0 }
 0x992   : > { %v3255_v50 = vadd.f32 %v3254_v49, %v11102_v20  ;;  %v3259_v52 = vmax.f32 %v3253_v5, 0.0  ;;  %v3434_v5 = vld [vmem:[#allocation12 + $0x120] sm:$0xff] }
 0x993   : > { %v3256_v53 = vpop.f32.mrf.mxu0  ;;  %v3435_v49 = vld [vmem:[#allocation12 + $0x1a0] sm:$0xff] }
 0x994   : > { %v3260_v54 = vmax.f32 %v3255_v50, 0.0  ;;  %v3261_v46 = vpack.c.bf16 %v3259_v52, %v3259_v52  ;;  %v8373_v50 = vcombine.low %v3436_v22, %v3437_v23  ;;  %v8372_v52 = vcombine.high %v3434_v5, %v3435_v49  ;;  %v3432_v53 = vld [vmem:[#allocation12 + $0x20] sm:$0xff] }
 0x995   : > { %v3257_v35 = vpop.f32.mrf.mxu0  ;;  %v8371_v19 = vcombine.low %v3434_v5, %v3435_v49 }
 0x996   : > { %v3262_v61 = vpack.c.bf16 %v3260_v54, %v3260_v54  ;;  %v3433_v54 = vld [vmem:[#allocation12 + $0xa0] sm:$0xff] }
 0x997   : > { %v8370_v57 = vcombine.high %v3432_v53, %v3433_v54  ;;  %v8369_v35 = vcombine.low %v3432_v53, %v3433_v54 }
 0x998   : > { %3423 = vmatprep.mubr.bf16.mxu1 %v3262_v61  ;;  %v9606_v61 = vld [vmem:[#allocation15 + $0x278] sm:$0xff]  }
 0x999   : > { %3424 = vmatmul.mubr.bf16.vlgmr.msra.gmra.mxu1 %v3261_v46  ;;  %v9607_v46 = vld [vmem:[#allocation15 + $0x238] sm:$0xff]  }
 0x99a   : > { %3545 = vmatpush1.bf16.msra.mxu1 %v3539_v30  ;;  %3576 = vmatprep.mubr.bf16.mxu1 %v10280_v13  ;;  %v9608_v30 = vld [vmem:[#allocation15 + $0x270] sm:$0xff]  }
 0x99b   : > { %3546 = vmatprep.subr.bf16.mxu1 %v8382_v2  ;;  %v9609_v2 = vld [vmem:[#allocation15 + $0x230] sm:$0xff]  }
 0x99e   : > { %3547 = vmatpush1.bf16.msra.mxu1 %v8381_v8  ;;  %v9612_v8 = vld [vmem:[#allocation15 + $0x260] sm:$0xff]  }
 0x99f   : > { %3548 = vmatprep.subr.bf16.mxu1 %v8380_v9  ;;  %v9613_v9 = vld [vmem:[#allocation15 + $0x220] sm:$0xff]  }
 0x9a2   : > { %3549 = vmatpush1.bf16.msra.mxu1 %v8379_v60  ;;  %v9616_v60 = vld [vmem:[#allocation15 + $0x250] sm:$0xff]  }
 0x9a3   : > { %3550 = vmatprep.subr.bf16.mxu1 %v8378_v44  ;;  %v9617_v44 = vld [vmem:[#allocation15 + $0x210] sm:$0xff]  }
 0x9a6   : > { %3551 = vmatpush1.bf16.msra.mxu1 %v8377_v48 }
 0x9a7   : > { %3552 = vmatprep.subr.bf16.mxu1 %v8376_v21 }
 0x9aa   : > { %3553 = vmatpush1.bf16.msra.mxu1 %v8375_v24  ;;  %v3448_v24 = vld [vmem:[#allocation13 + $0x8] sm:$0x3] }
 0x9ab   : > { %3554 = vmatprep.subr.bf16.mxu1 %v8374_v55  ;;  %v3453_v55 = vrot.slane %v3448_v24, %v11086_v63  ;;  %v3457_v5 = vrot.slane %v3448_v24, %v11088_v0 }
 0x9ae   : > { %3555 = vmatpush1.bf16.msra.mxu1 %v8373_v50 }
 0x9af   : > { %3556 = vmatprep.subr.bf16.mxu1 %v8372_v52 }
 0x9b2   : > { %3557 = vmatpush1.bf16.msra.mxu1 %v8371_v19 }
 0x9b3   : > { %3558 = vmatprep.subr.bf16.mxu1 %v8370_v57 }
 0x9b6   : > { %3559 = vmatpush1.bf16.msra.mxu1 %v8369_v35 }
 0x9b7   : > { %8907 = vmatprep.subr.bf16.mxu1 %v9606_v61 }
 0x9b9   : > { %8386 = vmatmul.mubr.msk.bf16.vlgmr.msra.gmra.mxu1 %vm1882_vm11, %v11022_v62 }
 0x9ba   : > { %8908 = vmatpush3.bf16.msra.mxu1 %v9607_v46 }
 0x9bb   : > { %8909 = vmatprep.subr.bf16.mxu1 %v9608_v30  ;;  %v11412_v30 = vld [vmem:[%s12251_s11 + $0x90] ss:$8 sps:$4 sm:$0xff]  }
 0x9be   : > { %8910 = vmatpush3.bf16.msra.mxu1 %v9609_v2  ;;  %v11418_v2 = vld [vmem:[%s12251_s11 + $0x84] ss:$8 sps:$4 sm:$0xff]  }
 0x9bf   : > { %8911 = vmatprep.subr.bf16.mxu1 %v9610_v6  ;;  %v11424_v6 = vld [vmem:[%s12251_s11 + $0x80] ss:$8 sps:$4 sm:$0xff]  }
 0x9c2   : > { %8912 = vmatpush3.bf16.msra.mxu1 %v9611_v7  ;;  %v9618_v7 = vld [vmem:[#allocation15 + $0x248] sm:$0xff]  }
 0x9c3   : > { %8913 = vmatprep.subr.bf16.mxu1 %v9612_v8  ;;  %v9619_v8 = vld [vmem:[#allocation15 + $0x208] sm:$0xff]  }
 0x9c6   : > { %8914 = vmatpush3.bf16.msra.mxu1 %v9613_v9  ;;  %v9620_v9 = vld [vmem:[#allocation15 + $0x240] sm:$0xff]  }
 0x9c7   : > { %8915 = vmatprep.subr.bf16.mxu1 %v9614_v58  ;;  %v9621_v58 = vld [vmem:[#allocation15 + $0x200] sm:$0xff]  }
 0x9ca   : > { %8916 = vmatpush3.bf16.msra.mxu1 %v9615_v59  ;;  %v3817_v59 = vld [vmem:[#allocation12 + $0x728] sm:$0xff] }
 0x9cb   : > { %8917 = vmatprep.subr.bf16.mxu1 %v9616_v60  ;;  %v3818_v60 = vld [vmem:[#allocation12 + $0x7a8] sm:$0x77] }
 0x9ce   : > { %8918 = vmatpush3.bf16.msra.mxu1 %v9617_v44  ;;  %v8418_v44 = vcombine.high %v3817_v59, %v3818_v60 }
 0x9cf   : > { %8919 = vmatprep.subr.bf16.mxu1 %v9618_v7 }
 0x9d2   : > { %8920 = vmatpush3.bf16.msra.mxu1 %v9619_v8  ;;  %v3811_v8 = vld [vmem:[#allocation12 + $0x428] sm:$0xff] }
 0x9d3   : > { %8921 = vmatprep.subr.bf16.mxu1 %v9620_v9  ;;  %v3812_v9 = vld [vmem:[#allocation12 + $0x4a8] sm:$0xff] }
 0x9d6   : > { %8922 = vmatpush3.bf16.msra.mxu1 %v9621_v58 }
 0x9d7   : > { %8419 = vmatprep.subr.msk.bf16.mxu1 %vm880_vm0, %v8418_v44  ;;  %v3810_v44 = vld [vmem:[#allocation12 + $0x3a8] sm:$0xff] }
 0xa59   : > { %v8901_v45 = vpop.f32.mrf.mxu1 }
 0xa5b   : > { %v8902_v47 = vpop.f32.mrf.mxu1 }
 0xa5c   : > { %v8903_v48 = vadd.f32 %v8902_v47, %v8901_v45  ;;  %v8417_v45 = vcombine.low %v3817_v59, %v3818_v60  ;;  %v8412_v59 = vcombine.high %v3811_v8, %v3812_v9  ;;  %v3809_v60 = vld [vmem:[#allocation12 + $0x328] sm:$0xff] }
 0xa5d   : > { %v8904_v21 = vpop.f32.mrf.mxu1 }
 0xa5e   : > { %v11372_v22 = vadd.f32 %v8903_v48, %v11188_v18  ;;  %v11406_v18 = vld [vmem:[%s12251_s11 + $0x94] ss:$8 sps:$4 sm:$0xff]  }
 0xa5f   : > { %v8905_v23 = vpop.f32.mrf.mxu1 }
 0xa79   : > { %v3578_v49 = vpop.f32.mrf.mxu1 }
 0xa7a   : > { %v3579_v50 = vadd.f32 %v3578_v49, %v3453_v55  ;;  %v3815_v49 = vld [vmem:[#allocation12 + $0x628] sm:$0xff] }
 0xa7b   : > { %v3580_v52 = vpop.f32.mrf.mxu1 }
 0xa7c   : > { %v3581_v53 = vadd.f32 %v3580_v52, %v3457_v5  ;;  %v3585_v54 = vmax.f32 %v3579_v50, 0.0  ;;  %v3816_v50 = vld [vmem:[#allocation12 + $0x6a8] sm:$0xff] }
 0xa7d   : > { %v3582_v19 = vpop.f32.mrf.mxu1 }
 0xa7e   : > { %v3586_v57 = vmax.f32 %v3581_v53, 0.0  ;;  %v3587_v46 = vpack.c.bf16 %v3585_v54, %v3585_v54  ;;  %v3910_v19 = vsel %vm880_vm0, %v8417_v45, 0  ;;  %v8411_v45 = vcombine.low %v3811_v8, %v3812_v9  ;;  %v9626_v8 = vld [vmem:[#allocation15 + $0x2e8] sm:$0xff]  }
 0xa7f   : > { %v3583_v35 = vpop.f32.mrf.mxu1  ;;  %v9627_v9 = vld [vmem:[#allocation15 + $0x2a8] sm:$0xff]  }
 0xa80   : > { %v3588_v61 = vpack.c.bf16 %v3586_v57, %v3586_v57  ;;  %v8416_v57 = vcombine.high %v3815_v49, %v3816_v50  ;;  %v3813_v35 = vld [vmem:[#allocation12 + $0x528] sm:$0xff] }
 0xa82   : > { %3621 = vmatprep.mubr.bf16.mxu0 %v3588_v61  ;;  %v3814_v61 = vld [vmem:[#allocation12 + $0x5a8] sm:$0xff] }
 0xa83   : > { %3622 = vmatmul.mubr.bf16.vlgmr.msra.gmra.mxu0 %v3587_v46  ;;  %v8415_v46 = vcombine.low %v3815_v49, %v3816_v50  ;;  %v8414_v7 = vcombine.high %v3813_v35, %v3814_v61  ;;  %v8413_v58 = vcombine.low %v3813_v35, %v3814_v61  ;;  %v9622_v35 = vld [vmem:[#allocation15 + $0x2f8] sm:$0xff]  }
 0xa84   : > { %3961 = vmatpush1.bf16.msra.mxu0 %v11195_v51  ;;  %v9623_v61 = vld [vmem:[#allocation15 + $0x2b8] sm:$0xff]  }
 0xa85   : > { %3962 = vmatprep.subr.bf16.mxu0 %v11201_v10 }
 0xa88   : > { %3963 = vmatpush1.bf16.msra.mxu0 %v11207_v3 }
 0xa89   : > { %3964 = vmatprep.subr.bf16.mxu0 %v11213_v16 }
 0xa8c   : > { %3965 = vmatpush1.bf16.msra.mxu0 %v11219_v11 }
 0xa8d   : > { %3966 = vmatprep.subr.bf16.mxu0 %v11225_v12 }
 0xa90   : > { %3967 = vmatpush1.bf16.msra.mxu0 %v11231_v36 }
 0xa91   : > { %3968 = vmatprep.subr.bf16.mxu0 %v11237_v1 }
 0xa94   : > { %3969 = vmatpush1.bf16.msra.mxu0 %v11243_v14 }
 0xa95   : > { %3970 = vmatprep.subr.bf16.mxu0 %v11249_v15 }
 0xa98   : > { %3971 = vmatpush1.bf16.msra.mxu0 %v11255_v4 }
 0xa99   : > { %3972 = vmatprep.subr.bf16.mxu0 %v11261_v17 }
 0xa9c   : > { %3973 = vmatpush1.bf16.msra.mxu0 %v11267_v25 }
 0xa9d   : > { %3974 = vmatprep.subr.bf16.mxu0 %v11273_v26 }
 0xaa0   : > { %3975 = vmatpush1.bf16.msra.mxu0 %v11279_v27 }
 0xaa1   : > { %3976 = vmatprep.subr.bf16.mxu0 %v11285_v29 }
 0xaa4   : > { %3977 = vmatpush2.bf16.msra.mxu0 %v11291_v31 }
 0xaa5   : > { %3978 = vmatprep.subr.bf16.mxu0 %v11297_v32 }
 0xaa8   : > { %3979 = vmatpush2.bf16.msra.mxu0 %v11303_v33 }
 0xaa9   : > { %3980 = vmatprep.subr.bf16.mxu0 %v11309_v34 }
 0xaac   : > { %3981 = vmatpush2.bf16.msra.mxu0 %v11315_v37 }
 0xaad   : > { %3982 = vmatprep.subr.bf16.mxu0 %v11321_v28 }
 0xab0   : > { %3983 = vmatpush2.bf16.msra.mxu0 %v11327_v38 }
 0xab1   : > { %3984 = vmatprep.subr.bf16.mxu0 %v11333_v39 }
 0xab4   : > { %3985 = vmatpush2.bf16.msra.mxu0 %v11339_v40 }
 0xab5   : > { %3986 = vmatprep.subr.bf16.mxu0 %v11345_v41 }
 0xab8   : > { %3987 = vmatpush2.bf16.msra.mxu0 %v11351_v42 }
 0xab9   : > { %3988 = vmatprep.subr.bf16.mxu0 %v11406_v18 }
 0xabc   : > { %3989 = vmatpush2.bf16.msra.mxu0 %v11412_v30 }
 0xabd   : > { %3990 = vmatprep.subr.bf16.mxu0 %v11418_v2 }
 0xac0   : > { %3991 = vmatpush2.bf16.msra.mxu0 %v11424_v6 }
 0xac1   : > { %4331 = vmatprep.subr.bf16.mxu0 %v11361_v43 }
 0xb43   : > { %v3623_v47 = vpop.f32.mrf.mxu0 }
 0xb44   : > { %v3624_v48 = vadd.f32 %v3623_v47, %v11105_v56  ;;  %v8410_v47 = vcombine.high %v3809_v60, %v3810_v44 }
 0xb45   : > { %v3625_v21 = vpop.f32.mrf.mxu0 }
 0xb46   : > { %v3626_v23 = vadd.f32 %v3625_v21, %v11102_v20  ;;  %v3630_v24 = vmax.f32 %v3624_v48, 0.0  ;;  %v3807_v48 = vld [vmem:[#allocation12 + $0x228] sm:$0xff] }
 0xb47   : > { %v3627_v55 = vpop.f32.mrf.mxu0  ;;  %v3808_v21 = vld [vmem:[#allocation12 + $0x2a8] sm:$0xff] }
 0xb48   : > { %v3631_v5 = vmax.f32 %v3626_v23, 0.0  ;;  %v3632_v54 = vpack.c.bf16 %v3630_v24, %v3630_v24  ;;  %v8409_v23 = vcombine.low %v3809_v60, %v3810_v44  ;;  %v8408_v24 = vcombine.high %v3807_v48, %v3808_v21  ;;  %v3805_v55 = vld [vmem:[#allocation12 + $0x128] sm:$0xff]  ;;  %v9630_v60 = vld [vmem:[#allocation15 + $0x2d8] sm:$0xff]  }
 0xb49   : > { %v3628_v52 = vpop.f32.mrf.mxu0  ;;  %v8407_v49 = vcombine.low %v3807_v48, %v3808_v21  ;;  %v9631_v44 = vld [vmem:[#allocation15 + $0x298] sm:$0xff]  }
 0xb4a   : > { %v3633_v53 = vpack.c.bf16 %v3631_v5, %v3631_v5  ;;  %v3806_v5 = vld [vmem:[#allocation12 + $0x1a8] sm:$0xff] }
 0xb4b   : > { %v8406_v50 = vcombine.high %v3805_v55, %v3806_v5  ;;  %v3803_v52 = vld [vmem:[#allocation12 + $0x28] sm:$0xff] }
 0xb4c   : > { %3794 = vmatprep.mubr.bf16.mxu1 %v3633_v53  ;;  %v3804_v53 = vld [vmem:[#allocation12 + $0xa8] sm:$0xff] }
 0xb4d   : > { %3795 = vmatmul.mubr.bf16.vlgmr.msra.gmra.mxu1 %v3632_v54  ;;  %v8405_v54 = vcombine.low %v3805_v55, %v3806_v5 }
 0xb4e   : > { %3916 = vmatpush1.bf16.msra.mxu1 %v3910_v19  ;;  %3947 = vmatprep.mubr.bf16.mxu1 %v10280_v13  ;;  %v8404_v19 = vcombine.high %v3803_v52, %v3804_v53 }
 0xb4f   : > { %3917 = vmatprep.subr.bf16.mxu1 %v8416_v57  ;;  %v8403_v57 = vcombine.low %v3803_v52, %v3804_v53 }
 0xb52   : > { %3918 = vmatpush1.bf16.msra.mxu1 %v8415_v46  ;;  %v9624_v46 = vld [vmem:[#allocation15 + $0x2f0] sm:$0xff]  }
 0xb53   : > { %3919 = vmatprep.subr.bf16.mxu1 %v8414_v7  ;;  %v9625_v7 = vld [vmem:[#allocation15 + $0x2b0] sm:$0xff]  }
 0xb56   : > { %3920 = vmatpush1.bf16.msra.mxu1 %v8413_v58  ;;  %v9628_v58 = vld [vmem:[#allocation15 + $0x2e0] sm:$0xff]  }
 0xb57   : > { %3921 = vmatprep.subr.bf16.mxu1 %v8412_v59  ;;  %v9629_v59 = vld [vmem:[#allocation15 + $0x2a0] sm:$0xff]  }
 0xb5a   : > { %3922 = vmatpush1.bf16.msra.mxu1 %v8411_v45  ;;  %v9632_v45 = vld [vmem:[#allocation15 + $0x2d0] sm:$0xff]  }
 0xb5b   : > { %3923 = vmatprep.subr.bf16.mxu1 %v8410_v47  ;;  %v9633_v47 = vld [vmem:[#allocation15 + $0x290] sm:$0xff]  }
 0xb5e   : > { %3924 = vmatpush1.bf16.msra.mxu1 %v8409_v23 }
 0xb5f   : > { %3925 = vmatprep.subr.bf16.mxu1 %v8408_v24 }
 0xb62   : > { %3926 = vmatpush1.bf16.msra.mxu1 %v8407_v49  ;;  %v3819_v49 = vld [vmem:[#allocation13 + $0xa] sm:$0x3] }
 0xb63   : > { %3927 = vmatprep.subr.bf16.mxu1 %v8406_v50  ;;  %v3824_v50 = vrot.slane %v3819_v49, %v11086_v63  ;;  %v3828_v52 = vrot.slane %v3819_v49, %v11088_v0 }
 0xb66   : > { %3928 = vmatpush1.bf16.msra.mxu1 %v8405_v54 }
 0xb67   : > { %3929 = vmatprep.subr.bf16.mxu1 %v8404_v19 }
 0xb6a   : > { %3930 = vmatpush1.bf16.msra.mxu1 %v8403_v57 }
 0xb6b   : > { %8929 = vmatprep.subr.bf16.mxu1 %v9622_v35 }
 0xb6d   : > { %8420 = vmatmul.mubr.msk.bf16.vlgmr.msra.gmra.mxu1 %vm1882_vm11, %v11022_v62 }
 0xb6e   : > { %8930 = vmatpush3.bf16.msra.mxu1 %v9623_v61 }
 0xb6f   : > { %8931 = vmatprep.subr.bf16.mxu1 %v9624_v46 }
 0xb72   : > { %8932 = vmatpush3.bf16.msra.mxu1 %v9625_v7 }
 0xb73   : > { %8933 = vmatprep.subr.bf16.mxu1 %v9626_v8 }
 0xb76   : > { %8934 = vmatpush3.bf16.msra.mxu1 %v9627_v9 }
 0xb77   : > { %8935 = vmatprep.subr.bf16.mxu1 %v9628_v58  ;;  %v9635_v58 = vld [vmem:[#allocation15 + $0x288] sm:$0xff]  }
 0xb7a   : > { %8936 = vmatpush3.bf16.msra.mxu1 %v9629_v59  ;;  %v9636_v59 = vld [vmem:[#allocation15 + $0x2c0] sm:$0xff]  }
 0xb7b   : > { %8937 = vmatprep.subr.bf16.mxu1 %v9630_v60  ;;  %v9637_v60 = vld [vmem:[#allocation15 + $0x280] sm:$0xff]  }
 0xb7e   : > { %8938 = vmatpush3.bf16.msra.mxu1 %v9631_v44  ;;  %v4188_v44 = vld [vmem:[#allocation12 + $0x730] sm:$0xff] }
 0xb7f   : > { %8939 = vmatprep.subr.bf16.mxu1 %v9632_v45  ;;  %v4189_v45 = vld [vmem:[#allocation12 + $0x7b0] sm:$0x77] }
 0xb82   : > { %8940 = vmatpush3.bf16.msra.mxu1 %v9633_v47  ;;  %v8452_v47 = vcombine.high %v4188_v44, %v4189_v45 }
 0xc0d   : > { %v8923_v48 = vpop.f32.mrf.mxu1 }
 0xc0f   : > { %v8924_v21 = vpop.f32.mrf.mxu1 }
 0xc10   : > { %v8925_v23 = vadd.f32 %v8924_v21, %v8923_v48  ;;  %v8451_v48 = vcombine.low %v4188_v44, %v4189_v45  ;;  %v4180_v45 = vld [vmem:[#allocation12 + $0x330] sm:$0xff] }
 0xc11   : > { %v8926_v24 = vpop.f32.mrf.mxu1 }
 0xc12   : > { %v11436_v55 = vadd.f32 %v8925_v23, %v11372_v22  ;;  %v9634_v22 = vld [vmem:[#allocation15 + $0x2c8] sm:$0xff]  }
 0xc13   : > { %v8927_v5 = vpop.f32.mrf.mxu1  ;;  %8941 = vmatprep.subr.bf16.mxu1 %v9634_v22 }
 0xc14   : > { %8942 = vmatpush3.bf16.msra.mxu1 %v9635_v58  ;;  %v4182_v58 = vld [vmem:[#allocation12 + $0x430] sm:$0xff] }
 0xc15   : > { %8943 = vmatprep.subr.bf16.mxu1 %v9636_v59  ;;  %v4183_v59 = vld [vmem:[#allocation12 + $0x4b0] sm:$0xff] }
 0xc16   : > { %v8446_v44 = vcombine.high %v4182_v58, %v4183_v59 }
 0xc18   : > { %8944 = vmatpush3.bf16.msra.mxu1 %v9637_v60 }
 0xc19   : > { %8453 = vmatprep.subr.msk.bf16.mxu1 %vm880_vm0, %v8452_v47  ;;  %v4181_v47 = vld [vmem:[#allocation12 + $0x3b0] sm:$0xff] }
 0xc2d   : > { %v3949_v53 = vpop.f32.mrf.mxu1 }
 0xc2e   : > { %v3950_v54 = vadd.f32 %v3949_v53, %v3824_v50  ;;  %v4186_v53 = vld [vmem:[#allocation12 + $0x630] sm:$0xff] }
 0xc2f   : > { %v3951_v19 = vpop.f32.mrf.mxu1 }
 0xc30   : > { %v3952_v57 = vadd.f32 %v3951_v19, %v3828_v52  ;;  %v3956_v35 = vmax.f32 %v3950_v54, 0.0  ;;  %v4187_v54 = vld [vmem:[#allocation12 + $0x6b0] sm:$0xff] }
 0xc31   : > { %v3953_v61 = vpop.f32.mrf.mxu1 }
 0xc32   : > { %v3957_v46 = vmax.f32 %v3952_v57, 0.0  ;;  %v3958_v9 = vpack.c.bf16 %v3956_v35, %v3956_v35  ;;  %v4281_v61 = vsel %vm880_vm0, %v8451_v48, 0  ;;  %v8445_v48 = vcombine.low %v4182_v58, %v4183_v59  ;;  %v9642_v58 = vld [vmem:[#allocation15 + $0x368] sm:$0xff]  }
 0xc33   : > { %v3954_v7 = vpop.f32.mrf.mxu1  ;;  %v9643_v59 = vld [vmem:[#allocation15 + $0x328] sm:$0xff]  }
 0xc34   : > { %v3959_v8 = vpack.c.bf16 %v3957_v46, %v3957_v46  ;;  %v8450_v46 = vcombine.high %v4186_v53, %v4187_v54  ;;  %v4184_v7 = vld [vmem:[#allocation12 + $0x530] sm:$0xff] }
 0xc36   : > { %3992 = vmatprep.mubr.bf16.mxu0 %v3959_v8  ;;  %v4185_v8 = vld [vmem:[#allocation12 + $0x5b0] sm:$0xff] }
 0xc37   : > { %3993 = vmatmul.mubr.bf16.vlgmr.msra.gmra.mxu0 %v3958_v9  ;;  %v8449_v9 = vcombine.low %v4186_v53, %v4187_v54  ;;  %v8448_v22 = vcombine.high %v4184_v7, %v4185_v8  ;;  %v8447_v60 = vcombine.low %v4184_v7, %v4185_v8  ;;  %v9638_v7 = vld [vmem:[#allocation15 + $0x378] sm:$0xff]  }
 0xc38   : > { %4332 = vmatpush1.bf16.msra.mxu0 %v11195_v51  ;;  %v9639_v8 = vld [vmem:[#allocation15 + $0x338] sm:$0xff]  }
 0xc39   : > { %4333 = vmatprep.subr.bf16.mxu0 %v11201_v10 }
 0xc3c   : > { %4334 = vmatpush1.bf16.msra.mxu0 %v11207_v3 }
 0xc3d   : > { %4335 = vmatprep.subr.bf16.mxu0 %v11213_v16 }
 0xc40   : > { %4336 = vmatpush1.bf16.msra.mxu0 %v11219_v11 }
 0xc41   : > { %4337 = vmatprep.subr.bf16.mxu0 %v11225_v12 }
 0xc44   : > { %4338 = vmatpush1.bf16.msra.mxu0 %v11231_v36 }
 0xc45   : > { %4339 = vmatprep.subr.bf16.mxu0 %v11237_v1 }
 0xc48   : > { %4340 = vmatpush1.bf16.msra.mxu0 %v11243_v14 }
 0xc49   : > { %4341 = vmatprep.subr.bf16.mxu0 %v11249_v15 }
 0xc4c   : > { %4342 = vmatpush1.bf16.msra.mxu0 %v11255_v4 }
 0xc4d   : > { %4343 = vmatprep.subr.bf16.mxu0 %v11261_v17 }
 0xc50   : > { %4344 = vmatpush1.bf16.msra.mxu0 %v11267_v25 }
 0xc51   : > { %4345 = vmatprep.subr.bf16.mxu0 %v11273_v26 }
 0xc54   : > { %4346 = vmatpush1.bf16.msra.mxu0 %v11279_v27 }
 0xc55   : > { %4347 = vmatprep.subr.bf16.mxu0 %v11285_v29 }
 0xc58   : > { %4348 = vmatpush2.bf16.msra.mxu0 %v11291_v31 }
 0xc59   : > { %4349 = vmatprep.subr.bf16.mxu0 %v11297_v32 }
 0xc5c   : > { %4350 = vmatpush2.bf16.msra.mxu0 %v11303_v33 }
 0xc5d   : > { %4351 = vmatprep.subr.bf16.mxu0 %v11309_v34 }
 0xc60   : > { %4352 = vmatpush2.bf16.msra.mxu0 %v11315_v37 }
 0xc61   : > { %4353 = vmatprep.subr.bf16.mxu0 %v11321_v28 }
 0xc64   : > { %4354 = vmatpush2.bf16.msra.mxu0 %v11327_v38 }
 0xc65   : > { %4355 = vmatprep.subr.bf16.mxu0 %v11333_v39 }
 0xc68   : > { %4356 = vmatpush2.bf16.msra.mxu0 %v11339_v40 }
 0xc69   : > { %4357 = vmatprep.subr.bf16.mxu0 %v11345_v41 }
 0xc6c   : > { %4358 = vmatpush2.bf16.msra.mxu0 %v11351_v42 }
 0xc6d   : > { %4359 = vmatprep.subr.bf16.mxu0 %v11406_v18 }
 0xc70   : > { %4360 = vmatpush2.bf16.msra.mxu0 %v11412_v30 }
 0xc71   : > { %4361 = vmatprep.subr.bf16.mxu0 %v11418_v2 }
 0xc74   : > { %4362 = vmatpush2.bf16.msra.mxu0 %v11424_v6 }
 0xc75   : > { %4702 = vmatprep.subr.bf16.mxu0 %v11361_v43 }
 0xcf7   : > { %v3994_v21 = vpop.f32.mrf.mxu0 }
 0xcf8   : > { %v3995_v23 = vadd.f32 %v3994_v21, %v11105_v56  ;;  %v8444_v21 = vcombine.high %v4180_v45, %v4181_v47 }
 0xcf9   : > { %v3996_v24 = vpop.f32.mrf.mxu0 }
 0xcfa   : > { %v3997_v5 = vadd.f32 %v3996_v24, %v11102_v20  ;;  %v4001_v49 = vmax.f32 %v3995_v23, 0.0  ;;  %v4178_v23 = vld [vmem:[#allocation12 + $0x230] sm:$0xff] }
 0xcfb   : > { %v3998_v50 = vpop.f32.mrf.mxu0  ;;  %v4179_v24 = vld [vmem:[#allocation12 + $0x2b0] sm:$0xff] }
 0xcfc   : > { %v4002_v52 = vmax.f32 %v3997_v5, 0.0  ;;  %v4003_v35 = vpack.c.bf16 %v4001_v49, %v4001_v49  ;;  %v8443_v5 = vcombine.low %v4180_v45, %v4181_v47  ;;  %v8442_v49 = vcombine.high %v4178_v23, %v4179_v24  ;;  %v4176_v50 = vld [vmem:[#allocation12 + $0x130] sm:$0xff]  ;;  %v9646_v45 = vld [vmem:[#allocation15 + $0x358] sm:$0xff]  }
 0xcfd   : > { %v3999_v19 = vpop.f32.mrf.mxu0  ;;  %v8441_v53 = vcombine.low %v4178_v23, %v4179_v24  ;;  %v9647_v47 = vld [vmem:[#allocation15 + $0x318] sm:$0xff]  }
 0xcfe   : > { %v4004_v57 = vpack.c.bf16 %v4002_v52, %v4002_v52  ;;  %v4177_v52 = vld [vmem:[#allocation12 + $0x1b0] sm:$0xff] }
 0xcff   : > { %v8440_v54 = vcombine.high %v4176_v50, %v4177_v52  ;;  %v4174_v19 = vld [vmem:[#allocation12 + $0x30] sm:$0xff] }
 0xd00   : > { %4165 = vmatprep.mubr.bf16.mxu1 %v4004_v57  ;;  %v4175_v57 = vld [vmem:[#allocation12 + $0xb0] sm:$0xff] }
 0xd01   : > { %4166 = vmatmul.mubr.bf16.vlgmr.msra.gmra.mxu1 %v4003_v35  ;;  %v8439_v35 = vcombine.low %v4176_v50, %v4177_v52 }
 0xd02   : > { %4287 = vmatpush1.bf16.msra.mxu1 %v4281_v61  ;;  %4318 = vmatprep.mubr.bf16.mxu1 %v10280_v13  ;;  %v8438_v61 = vcombine.high %v4174_v19, %v4175_v57 }
 0xd03   : > { %4288 = vmatprep.subr.bf16.mxu1 %v8450_v46  ;;  %v8437_v46 = vcombine.low %v4174_v19, %v4175_v57 }
 0xd06   : > { %4289 = vmatpush1.bf16.msra.mxu1 %v8449_v9  ;;  %v9640_v9 = vld [vmem:[#allocation15 + $0x370] sm:$0xff]  }
 0xd07   : > { %4290 = vmatprep.subr.bf16.mxu1 %v8448_v22  ;;  %v9641_v22 = vld [vmem:[#allocation15 + $0x330] sm:$0xff]  }
 0xd0a   : > { %4291 = vmatpush1.bf16.msra.mxu1 %v8447_v60  ;;  %v9644_v60 = vld [vmem:[#allocation15 + $0x360] sm:$0xff]  }
 0xd0b   : > { %4292 = vmatprep.subr.bf16.mxu1 %v8446_v44  ;;  %v9645_v44 = vld [vmem:[#allocation15 + $0x320] sm:$0xff]  }
 0xd0e   : > { %4293 = vmatpush1.bf16.msra.mxu1 %v8445_v48  ;;  %v9648_v48 = vld [vmem:[#allocation15 + $0x350] sm:$0xff]  }
 0xd0f   : > { %4294 = vmatprep.subr.bf16.mxu1 %v8444_v21  ;;  %v9649_v21 = vld [vmem:[#allocation15 + $0x310] sm:$0xff]  }
 0xd12   : > { %4295 = vmatpush1.bf16.msra.mxu1 %v8443_v5 }
 0xd13   : > { %4296 = vmatprep.subr.bf16.mxu1 %v8442_v49 }
 0xd16   : > { %4297 = vmatpush1.bf16.msra.mxu1 %v8441_v53  ;;  %v4190_v53 = vld [vmem:[#allocation13 + $0xc] sm:$0x3] }
 0xd17   : > { %4298 = vmatprep.subr.bf16.mxu1 %v8440_v54  ;;  %v4195_v54 = vrot.slane %v4190_v53, %v11086_v63  ;;  %v4199_v19 = vrot.slane %v4190_v53, %v11088_v0 }
 0xd1a   : > { %4299 = vmatpush1.bf16.msra.mxu1 %v8439_v35 }
 0xd1b   : > { %4300 = vmatprep.subr.bf16.mxu1 %v8438_v61 }
 0xd1e   : > { %4301 = vmatpush1.bf16.msra.mxu1 %v8437_v46 }
 0xd1f   : > { %8951 = vmatprep.subr.bf16.mxu1 %v9638_v7 }
 0xd21   : > { %8454 = vmatmul.mubr.msk.bf16.vlgmr.msra.gmra.mxu1 %vm1882_vm11, %v11022_v62 }
 0xd22   : > { %8952 = vmatpush3.bf16.msra.mxu1 %v9639_v8 }
 0xd23   : > { %8953 = vmatprep.subr.bf16.mxu1 %v9640_v9 }
 0xd26   : > { %8954 = vmatpush3.bf16.msra.mxu1 %v9641_v22 }
 0xd27   : > { %8955 = vmatprep.subr.bf16.mxu1 %v9642_v58 }
 0xd2a   : > { %8956 = vmatpush3.bf16.msra.mxu1 %v9643_v59 }
 0xd2b   : > { %8957 = vmatprep.subr.bf16.mxu1 %v9644_v60 }
 0xd2e   : > { %8958 = vmatpush3.bf16.msra.mxu1 %v9645_v44  ;;  %v4551_v44 = vld [vmem:[#allocation12 + $0x338] sm:$0xff] }
 0xd2f   : > { %8959 = vmatprep.subr.bf16.mxu1 %v9646_v45  ;;  %v4552_v45 = vld [vmem:[#allocation12 + $0x3b8] sm:$0xff] }
 0xd32   : > { %8960 = vmatpush3.bf16.msra.mxu1 %v9647_v47 }
 0xd33   : > { %8961 = vmatprep.subr.bf16.mxu1 %v9648_v48  ;;  %v8478_v48 = vcombine.high %v4551_v44, %v4552_v45 }
 0xd36   : > { %8962 = vmatpush3.bf16.msra.mxu1 %v9649_v21  ;;  %v4549_v21 = vld [vmem:[#allocation12 + $0x238] sm:$0xff] }
 0xdc1   : > { %v8945_v23 = vpop.f32.mrf.mxu1 }
 0xdc3   : > { %v8946_v24 = vpop.f32.mrf.mxu1 }
 0xdc4   : > { %v8947_v5 = vadd.f32 %v8946_v24, %v8945_v23  ;;  %v4550_v23 = vld [vmem:[#allocation12 + $0x2b8] sm:$0xff]  ;;  %v8477_v24 = vcombine.low %v4551_v44, %v4552_v45  ;;  %v11567_v44 = vld [vmem:[%s12251_s11 + $0x40] ss:$8 sps:$4 sm:$0xff]  }
 0xdc5   : > { %v8948_v49 = vpop.f32.mrf.mxu1  ;;  %v8475_v53 = vcombine.low %v4549_v21, %v4550_v23  ;;  %v11573_v45 = vld [vmem:[%s12251_s11 + $0x34] ss:$8 sps:$4 sm:$0xff]  }
 0xdc6   : > { %v11480_v50 = vadd.f32 %v8947_v5, %v11436_v55  ;;  %v8476_v5 = vcombine.high %v4549_v21, %v4550_v23  ;;  %v4547_v49 = vld [vmem:[#allocation12 + $0x138] sm:$0xff]  ;;  %v11591_v21 = vld [vmem:[%s12251_s11 + $0x20] ss:$8 sps:$4 sm:$0xff]  }
 0xdc7   : > { %v8949_v52 = vpop.f32.mrf.mxu1  ;;  %v11597_v23 = vld [vmem:[%s12251_s11 + $0x14] ss:$8 sps:$4 sm:$0xff]  }
 0xdc8   : > { %v4548_v52 = vld [vmem:[#allocation12 + $0x1b8] sm:$0xff] }
 0xde1   : > { %v4320_v57 = vpop.f32.mrf.mxu1 }
 0xde2   : > { %v4321_v35 = vadd.f32 %v4320_v57, %v4195_v54  ;;  %v8474_v54 = vcombine.high %v4547_v49, %v4548_v52  ;;  %v4546_v57 = vld [vmem:[#allocation12 + $0xb8] sm:$0xff] }
 0xde3   : > { %v4322_v61 = vpop.f32.mrf.mxu1 }
 0xde4   : > { %v4323_v46 = vadd.f32 %v4322_v61, %v4199_v19  ;;  %v4327_v7 = vmax.f32 %v4321_v35, 0.0  ;;  %v4545_v19 = vld [vmem:[#allocation12 + $0x38] sm:$0xff]  ;;  %v8473_v35 = vcombine.low %v4547_v49, %v4548_v52  ;;  %v11615_v49 = vld [vmem:[%s12251_s11] ss:$8 sps:$4 sm:$0xff]  }
 0xde5   : > { %v4324_v8 = vpop.f32.mrf.mxu1  ;;  %v8472_v61 = vcombine.high %v4545_v19, %v4546_v57  ;;  %v11621_v52 = vld [vmem:[%s12251_s11 + $0xf4] ss:$8 sps:$4 sm:$0xff]  }
 0xde6   : > { %v4328_v9 = vmax.f32 %v4323_v46, 0.0  ;;  %v4329_v59 = vpack.c.bf16 %v4327_v7, %v4327_v7  ;;  %v8471_v46 = vcombine.low %v4545_v19, %v4546_v57  ;;  %v9654_v7 = vld [vmem:[#allocation15 + $0x3f8] sm:$0xff]   ;;  %v11639_v19 = vld [vmem:[%s12251_s11 + $0xe0] ss:$8 sps:$4 sm:$0xff]  }
 0xde7   : > { %v4325_v22 = vpop.f32.mrf.mxu1  ;;  %v9655_v8 = vld [vmem:[#allocation15 + $0x3b8] sm:$0xff]  }
 0xde8   : > { %v4330_v58 = vpack.c.bf16 %v4328_v9, %v4328_v9  ;;  %v9656_v9 = vld [vmem:[#allocation15 + $0x3f0] sm:$0xff]  }
 0xde9   : > { %v9657_v22 = vld [vmem:[#allocation15 + $0x3b0] sm:$0xff]  }
 0xdea   : > { %4363 = vmatprep.mubr.bf16.mxu0 %v4330_v58  ;;  %v9658_v58 = vld [vmem:[#allocation15 + $0x3e8] sm:$0xff]   ;;  %v11645_v57 = vld [vmem:[%s12251_s11 + $0xd4] ss:$8 sps:$4 sm:$0xff]  }
 0xdeb   : > { %4364 = vmatmul.mubr.bf16.vlgmr.msra.gmra.mxu0 %v4329_v59  ;;  %v9659_v59 = vld [vmem:[#allocation15 + $0x3a8] sm:$0xff]  }
 0xdec   : > { %4703 = vmatpush1.bf16.msra.mxu0 %v11195_v51  ;;  %v9650_v51 = vld [vmem:[#allocation15 + $0x348] sm:$0xff]  }
 0xded   : > { %4704 = vmatprep.subr.bf16.mxu0 %v11201_v10  ;;  %v9651_v10 = vld [vmem:[#allocation15 + $0x308] sm:$0xff]   ;;  %8963 = vmatprep.subr.bf16.mxu1 %v9650_v51  ;;  %v9660_v51 = vld [vmem:[#allocation15 + $0x3e0] sm:$0xff]  }
 0xdee   : > { %8964 = vmatpush3.bf16.msra.mxu1 %v9651_v10  ;;  %v9661_v10 = vld [vmem:[#allocation15 + $0x3a0] sm:$0xff]  }
 0xdf0   : > { %4705 = vmatpush1.bf16.msra.mxu0 %v11207_v3  ;;  %v9652_v3 = vld [vmem:[#allocation15 + $0x340] sm:$0xff]  }
 0xdf1   : > { %4706 = vmatprep.subr.bf16.mxu0 %v11213_v16  ;;  %v9653_v16 = vld [vmem:[#allocation15 + $0x300] sm:$0xff]   ;;  %8965 = vmatprep.subr.bf16.mxu1 %v9652_v3  ;;  %v9662_v3 = vld [vmem:[#allocation15 + $0x3d8] sm:$0xff]  }
 0xdf2   : > { %8966 = vmatpush3.bf16.msra.mxu1 %v9653_v16  ;;  %v9663_v16 = vld [vmem:[#allocation15 + $0x398] sm:$0xff]  }
 0xdf4   : > { %4707 = vmatpush1.bf16.msra.mxu0 %v11219_v11  ;;  %v4559_v11 = vld [vmem:[#allocation12 + $0x738] sm:$0xff] }
 0xdf5   : > { %4708 = vmatprep.subr.bf16.mxu0 %v11225_v12  ;;  %v4560_v12 = vld [vmem:[#allocation12 + $0x7b8] sm:$0x77] }
 0xdf8   : > { %4709 = vmatpush1.bf16.msra.mxu0 %v11231_v36  ;;  %v8486_v36 = vcombine.high %v4559_v11, %v4560_v12 }
 0xdf9   : > { %4710 = vmatprep.subr.bf16.mxu0 %v11237_v1  ;;  %v8485_v1 = vcombine.low %v4559_v11, %v4560_v12  ;;  %v9664_v11 = vld [vmem:[#allocation15 + $0x3d0] sm:$0xff]  }
 0xdfa   : > { %8487 = vmatprep.subr.msk.bf16.mxu1 %vm880_vm0, %v8486_v36  ;;  %v9665_v12 = vld [vmem:[#allocation15 + $0x390] sm:$0xff]  }
 0xdfc   : > { %4711 = vmatpush1.bf16.msra.mxu0 %v11243_v14 }
 0xdfd   : > { %4712 = vmatprep.subr.bf16.mxu0 %v11249_v15 }
 0xe00   : > { %4713 = vmatpush1.bf16.msra.mxu0 %v11255_v4 }
 0xe01   : > { %4714 = vmatprep.subr.bf16.mxu0 %v11261_v17 }
 0xe04   : > { %4715 = vmatpush1.bf16.msra.mxu0 %v11267_v25 }
 0xe05   : > { %4716 = vmatprep.subr.bf16.mxu0 %v11273_v26 }
 0xe08   : > { %4717 = vmatpush1.bf16.msra.mxu0 %v11279_v27 }
 0xe09   : > { %4718 = vmatprep.subr.bf16.mxu0 %v11285_v29  ;;  %v4557_v29 = vld [vmem:[#allocation12 + $0x638] sm:$0xff] }
 0xe0c   : > { %4719 = vmatpush2.bf16.msra.mxu0 %v11291_v31  ;;  %v4558_v31 = vld [vmem:[#allocation12 + $0x6b8] sm:$0xff] }
 0xe0d   : > { %4720 = vmatprep.subr.bf16.mxu0 %v11297_v32 }
 0xe10   : > { %4721 = vmatpush2.bf16.msra.mxu0 %v11303_v33 }
 0xe11   : > { %4722 = vmatprep.subr.bf16.mxu0 %v11309_v34 }
 0xe14   : > { %4723 = vmatpush2.bf16.msra.mxu0 %v11315_v37  ;;  %v4652_v37 = vsel %vm880_vm0, %v8485_v1, 0 }
 0xe15   : > { %4724 = vmatprep.subr.bf16.mxu0 %v11321_v28  ;;  %v8484_v28 = vcombine.high %v4557_v29, %v4558_v31 }
 0xe18   : > { %4725 = vmatpush2.bf16.msra.mxu0 %v11327_v38  ;;  %v4555_v38 = vld [vmem:[#allocation12 + $0x538] sm:$0xff] }
 0xe19   : > { %4726 = vmatprep.subr.bf16.mxu0 %v11333_v39  ;;  %v4556_v39 = vld [vmem:[#allocation12 + $0x5b8] sm:$0xff] }
 0xe1a   : > { %v8481_v55 = vcombine.low %v4555_v38, %v4556_v39 }
 0xe1c   : > { %4727 = vmatpush2.bf16.msra.mxu0 %v11339_v40  ;;  %v8483_v40 = vcombine.low %v4557_v29, %v4558_v31 }
 0xe1d   : > { %4728 = vmatprep.subr.bf16.mxu0 %v11345_v41  ;;  %v8482_v41 = vcombine.high %v4555_v38, %v4556_v39 }
 0xe20   : > { %4729 = vmatpush2.bf16.msra.mxu0 %v11351_v42  ;;  %v4553_v42 = vld [vmem:[#allocation12 + $0x438] sm:$0xff] }
 0xe21   : > { %4730 = vmatprep.subr.bf16.mxu0 %v11406_v18 }
 0xe24   : > { %4731 = vmatpush2.bf16.msra.mxu0 %v11412_v30 }
 0xe25   : > { %4732 = vmatprep.subr.bf16.mxu0 %v11418_v2 }
 0xe28   : > { %4733 = vmatpush2.bf16.msra.mxu0 %v11424_v6 }
 0xe29   : > { %5073 = vmatprep.subr.bf16.mxu0 %v11361_v43  ;;  %v4554_v43 = vld [vmem:[#allocation12 + $0x4b8] sm:$0xff] }
 0xe2a   : > { %v8480_v60 = vcombine.high %v4553_v42, %v4554_v43  ;;  %v8479_v47 = vcombine.low %v4553_v42, %v4554_v43  ;;  %v11543_v42 = vld [vmem:[%s12251_s11 + $0x60] ss:$8 sps:$4 sm:$0xff]   ;;  %v11549_v43 = vld [vmem:[%s12251_s11 + $0x54] ss:$8 sps:$4 sm:$0xff]  }
 0xeab   : > { %v4365_v14 = vpop.f32.mrf.mxu0 }
 0xeac   : > { %v4366_v15 = vadd.f32 %v4365_v14, %v11105_v56 }
 0xead   : > { %v4367_v4 = vpop.f32.mrf.mxu0 }
 0xeae   : > { %v4368_v17 = vadd.f32 %v4367_v4, %v11102_v20  ;;  %v4372_v25 = vmax.f32 %v4366_v15, 0.0 }
 0xeaf   : > { %v4369_v26 = vpop.f32.mrf.mxu0 }
 0xeb0   : > { %v4373_v27 = vmax.f32 %v4368_v17, 0.0  ;;  %v4374_v34 = vpack.c.bf16 %v4372_v25, %v4372_v25  ;;  %v4561_v25 = vld [vmem:[#allocation13 + $0xe] sm:$0x3] }
 0xeb1   : > { %v4370_v32 = vpop.f32.mrf.mxu0  ;;  %v4566_v26 = vrot.slane %v4561_v25, %v11086_v63 }
 0xeb2   : > { %v4375_v33 = vpack.c.bf16 %v4373_v27, %v4373_v27  ;;  %v4570_v27 = vrot.slane %v4561_v25, %v11088_v0  ;;  %v4929_v25 = vld [vmem:[#allocation12 + $0x6c0] sm:$0xff] }
 0xeb4   : > { %4536 = vmatprep.mubr.bf16.mxu1 %v4375_v33 }
 0xeb5   : > { %4537 = vmatmul.mubr.bf16.vlgmr.msra.gmra.mxu1 %v4374_v34 }
 0xeb6   : > { %4658 = vmatpush1.bf16.msra.mxu1 %v4652_v37  ;;  %4689 = vmatprep.mubr.bf16.mxu1 %v10280_v13 }
 0xeb7   : > { %4659 = vmatprep.subr.bf16.mxu1 %v8484_v28 }
 0xeba   : > { %4660 = vmatpush1.bf16.msra.mxu1 %v8483_v40 }
 0xebb   : > { %4661 = vmatprep.subr.bf16.mxu1 %v8482_v41  ;;  %v11537_v41 = vld [vmem:[%s12251_s11 + $0x64] ss:$8 sps:$4 sm:$0xff]  }
 0xebe   : > { %4662 = vmatpush1.bf16.msra.mxu1 %v8481_v55  ;;  %v11555_v55 = vld [vmem:[%s12251_s11 + $0x50] ss:$8 sps:$4 sm:$0xff]  }
 0xebf   : > { %4663 = vmatprep.subr.bf16.mxu1 %v8480_v60  ;;  %v11561_v60 = vld [vmem:[%s12251_s11 + $0x44] ss:$8 sps:$4 sm:$0xff]  }
 0xec2   : > { %4664 = vmatpush1.bf16.msra.mxu1 %v8479_v47  ;;  %v11579_v47 = vld [vmem:[%s12251_s11 + $0x30] ss:$8 sps:$4 sm:$0xff]  }
 0xec3   : > { %4665 = vmatprep.subr.bf16.mxu1 %v8478_v48  ;;  %v11585_v48 = vld [vmem:[%s12251_s11 + $0x24] ss:$8 sps:$4 sm:$0xff]  }
 0xec6   : > { %4666 = vmatpush1.bf16.msra.mxu1 %v8477_v24  ;;  %v11603_v24 = vld [vmem:[%s12251_s11 + $0x10] ss:$8 sps:$4 sm:$0xff]  }
 0xec7   : > { %4667 = vmatprep.subr.bf16.mxu1 %v8476_v5  ;;  %v11609_v5 = vld [vmem:[%s12251_s11 + $0x4] ss:$8 sps:$4 sm:$0xff]  }
 0xeca   : > { %4668 = vmatpush1.bf16.msra.mxu1 %v8475_v53  ;;  %v11627_v53 = vld [vmem:[%s12251_s11 + $0xf0] ss:$8 sps:$4 sm:$0xff]  }
 0xecb   : > { %4669 = vmatprep.subr.bf16.mxu1 %v8474_v54  ;;  %v11633_v54 = vld [vmem:[%s12251_s11 + $0xe4] ss:$8 sps:$4 sm:$0xff]  }
 0xece   : > { %4670 = vmatpush1.bf16.msra.mxu1 %v8473_v35  ;;  %v11651_v35 = vld [vmem:[%s12251_s11 + $0xd0] ss:$8 sps:$4 sm:$0xff]  }
 0xecf   : > { %4671 = vmatprep.subr.bf16.mxu1 %v8472_v61  ;;  %v11657_v61 = vld [vmem:[%s12251_s11 + $0xc4] ss:$8 sps:$4 sm:$0xff]  }
 0xed2   : > { %4672 = vmatpush1.bf16.msra.mxu1 %v8471_v46  ;;  %v11663_v46 = vld [vmem:[%s12251_s11 + $0xc0] ss:$8 sps:$4 sm:$0xff]  }
 0xed3   : > { %8973 = vmatprep.subr.bf16.mxu1 %v9654_v7  ;;  %v11669_v7 = vld [vmem:[%s12251_s11 + $0xb4] ss:$8 sps:$4 sm:$0xff]  }
 0xed5   : > { %8488 = vmatmul.mubr.msk.bf16.vlgmr.msra.gmra.mxu1 %vm1882_vm11, %v11022_v62 }
 0xed6   : > { %8974 = vmatpush3.bf16.msra.mxu1 %v9655_v8  ;;  %v11675_v8 = vld [vmem:[%s12251_s11 + $0xb0] ss:$8 sps:$4 sm:$0xff]  }
 0xed7   : > { %8975 = vmatprep.subr.bf16.mxu1 %v9656_v9  ;;  %v11681_v9 = vld [vmem:[%s12251_s11 + $0xa4] ss:$8 sps:$4 sm:$0xff]  }
 0xeda   : > { %8976 = vmatpush3.bf16.msra.mxu1 %v9657_v22  ;;  %v11687_v22 = vld [vmem:[%s12251_s11 + $0xa0] ss:$8 sps:$4 sm:$0xff]  }
 0xedb   : > { %8977 = vmatprep.subr.bf16.mxu1 %v9658_v58  ;;  %v11697_v58 = vld [vmem:[%s12251_s11 + $0x74] ss:$8 sps:$4 sm:$0xff]  }
 0xede   : > { %8978 = vmatpush3.bf16.msra.mxu1 %v9659_v59  ;;  %v9666_v59 = vld [vmem:[#allocation15 + $0x3c8] sm:$0xff]  }
 0xedf   : > { %8979 = vmatprep.subr.bf16.mxu1 %v9660_v51  ;;  %v9667_v51 = vld [vmem:[#allocation15 + $0x388] sm:$0xff]  }
 0xee2   : > { %8980 = vmatpush3.bf16.msra.mxu1 %v9661_v10  ;;  %v9668_v10 = vld [vmem:[#allocation15 + $0x3c0] sm:$0xff]  }
 0xee3   : > { %8981 = vmatprep.subr.bf16.mxu1 %v9662_v3  ;;  %v9669_v3 = vld [vmem:[#allocation15 + $0x380] sm:$0xff]  }
 0xee6   : > { %8982 = vmatpush3.bf16.msra.mxu1 %v9663_v16 }
 0xee7   : > { %8983 = vmatprep.subr.bf16.mxu1 %v9664_v11 }
 0xeea   : > { %8984 = vmatpush3.bf16.msra.mxu1 %v9665_v12 }
 0xeeb   : > { %8985 = vmatprep.subr.bf16.mxu1 %v9666_v59 }
 0xeee   : > { %8986 = vmatpush3.bf16.msra.mxu1 %v9667_v51  ;;  %v4922_v51 = vld [vmem:[#allocation12 + $0x340] sm:$0xff] }
 0xeef   : > { %8987 = vmatprep.subr.bf16.mxu1 %v9668_v10  ;;  %v4923_v10 = vld [vmem:[#allocation12 + $0x3c0] sm:$0xff] }
 0xef2   : > { %8988 = vmatpush3.bf16.msra.mxu1 %v9669_v3 }
 0xf75   : > { %v8967_v36 = vpop.f32.mrf.mxu1 }
 0xf77   : > { %v8968_v1 = vpop.f32.mrf.mxu1 }
 0xf78   : > { %v8969_v14 = vadd.f32 %v8968_v1, %v8967_v36 }
 0xf79   : > { %v8970_v15 = vpop.f32.mrf.mxu1 }
 0xf7a   : > { %v11524_v4 = vadd.f32 %v8969_v14, %v11480_v50  ;;  %v11531_v50 = vld [vmem:[%s12251_s11 + $0x70] ss:$8 sps:$4 sm:$0xff]  }
 0xf7b   : > { %v8971_v17 = vpop.f32.mrf.mxu1 }
 0xf7c   : > { %v4928_v17 = vld [vmem:[#allocation12 + $0x640] sm:$0xff] }
 0xf95   : > { %v4691_v29 = vpop.f32.mrf.mxu1 }
 0xf96   : > { %v4692_v31 = vadd.f32 %v4691_v29, %v4566_v26 }
 0xf97   : > { %v4693_v32 = vpop.f32.mrf.mxu1 }
 0xf98   : > { %v4694_v33 = vadd.f32 %v4693_v32, %v4570_v27  ;;  %v4698_v34 = vmax.f32 %v4692_v31, 0.0  ;;  %v8518_v32 = vcombine.high %v4928_v17, %v4929_v25 }
 0xf99   : > { %v4695_v37 = vpop.f32.mrf.mxu1 }
 0xf9a   : > { %v4699_v28 = vmax.f32 %v4694_v33, 0.0  ;;  %v4700_v40 = vpack.c.bf16 %v4698_v34, %v4698_v34  ;;  %v4926_v33 = vld [vmem:[#allocation12 + $0x540] sm:$0xff]  ;;  %v8517_v37 = vcombine.low %v4928_v17, %v4929_v25 }
 0xf9b   : > { %v4696_v38 = vpop.f32.mrf.mxu1  ;;  %v4927_v34 = vld [vmem:[#allocation12 + $0x5c0] sm:$0xff] }
 0xf9c   : > { %v4701_v39 = vpack.c.bf16 %v4699_v28, %v4699_v28  ;;  %v8516_v28 = vcombine.high %v4926_v33, %v4927_v34  ;;  %v4924_v38 = vld [vmem:[#allocation12 + $0x440] sm:$0xff] }
 0xf9e   : > { %4734 = vmatprep.mubr.bf16.mxu0 %v4701_v39  ;;  %v4925_v39 = vld [vmem:[#allocation12 + $0x4c0] sm:$0xff] }
 0xf9f   : > { %4735 = vmatmul.mubr.bf16.vlgmr.msra.gmra.mxu0 %v4700_v40  ;;  %v8515_v40 = vcombine.low %v4926_v33, %v4927_v34  ;;  %v8514_v59 = vcombine.high %v4924_v38, %v4925_v39  ;;  %v8513_v3 = vcombine.low %v4924_v38, %v4925_v39  ;;  %v9674_v33 = vld [vmem:[#allocation15 + $0x468] sm:$0xff]   ;;  %v9678_v38 = vld [vmem:[#allocation15 + $0x458] sm:$0xff]  }
 0xfa0   : > { %5074 = vmatpush1.bf16.msra.mxu0 %v11531_v50  ;;  %v9675_v34 = vld [vmem:[#allocation15 + $0x428] sm:$0xff]   ;;  %v9679_v39 = vld [vmem:[#allocation15 + $0x418] sm:$0xff]  }
 0xfa1   : > { %5075 = vmatprep.subr.bf16.mxu0 %v11537_v41 }
 0xfa4   : > { %5076 = vmatpush1.bf16.msra.mxu0 %v11543_v42 }
 0xfa5   : > { %5077 = vmatprep.subr.bf16.mxu0 %v11549_v43 }
 0xfa8   : > { %5078 = vmatpush1.bf16.msra.mxu0 %v11555_v55 }
 0xfa9   : > { %5079 = vmatprep.subr.bf16.mxu0 %v11561_v60 }
 0xfac   : > { %5080 = vmatpush1.bf16.msra.mxu0 %v11567_v44 }
 0xfad   : > { %5081 = vmatprep.subr.bf16.mxu0 %v11573_v45 }
 0xfb0   : > { %5082 = vmatpush1.bf16.msra.mxu0 %v11579_v47 }
 0xfb1   : > { %5083 = vmatprep.subr.bf16.mxu0 %v11585_v48 }
 0xfb4   : > { %5084 = vmatpush1.bf16.msra.mxu0 %v11591_v21 }
 0xfb5   : > { %5085 = vmatprep.subr.bf16.mxu0 %v11597_v23 }
 0xfb8   : > { %5086 = vmatpush1.bf16.msra.mxu0 %v11603_v24 }
 0xfb9   : > { %5087 = vmatprep.subr.bf16.mxu0 %v11609_v5 }
 0xfbc   : > { %5088 = vmatpush1.bf16.msra.mxu0 %v11615_v49 }
 0xfbd   : > { %5089 = vmatprep.subr.bf16.mxu0 %v11621_v52 }
 0xfc0   : > { %5090 = vmatpush2.bf16.msra.mxu0 %v11627_v53 }
 0xfc1   : > { %5091 = vmatprep.subr.bf16.mxu0 %v11633_v54 }
 0xfc4   : > { %5092 = vmatpush2.bf16.msra.mxu0 %v11639_v19 }
 0xfc5   : > { %5093 = vmatprep.subr.bf16.mxu0 %v11645_v57 }
 0xfc8   : > { %5094 = vmatpush2.bf16.msra.mxu0 %v11651_v35 }
 0xfc9   : > { %5095 = vmatprep.subr.bf16.mxu0 %v11657_v61 }
 0xfcc   : > { %5096 = vmatpush2.bf16.msra.mxu0 %v11663_v46 }
 0xfcd   : > { %5097 = vmatprep.subr.bf16.mxu0 %v11669_v7 }
 0xfd0   : > { %5098 = vmatpush2.bf16.msra.mxu0 %v11675_v8 }
 0xfd1   : > { %5099 = vmatprep.subr.bf16.mxu0 %v11681_v9 }
 0xfd4   : > { %5100 = vmatpush2.bf16.msra.mxu0 %v11687_v22 }
 0xfd5   : > { %5101 = vmatprep.subr.bf16.mxu0 %v11406_v18  ;;  %v4930_v18 = vld [vmem:[#allocation12 + $0x740] sm:$0xff] }
 0xfd8   : > { %5102 = vmatpush2.bf16.msra.mxu0 %v11412_v30  ;;  %v4931_v30 = vld [vmem:[#allocation12 + $0x7c0] sm:$0x77] }
 0xfd9   : > { %5103 = vmatprep.subr.bf16.mxu0 %v11418_v2  ;;  %v8520_v2 = vcombine.high %v4930_v18, %v4931_v30  ;;  %v8519_v16 = vcombine.low %v4930_v18, %v4931_v30  ;;  %v8512_v18 = vcombine.high %v4922_v51, %v4923_v10  ;;  %v4920_v30 = vld [vmem:[#allocation12 + $0x240] sm:$0xff] }
 0xfdb   : > { %8521 = vmatprep.subr.msk.bf16.mxu1 %vm880_vm0, %v8520_v2  ;;  %v5023_v31 = vsel %vm880_vm0, %v8519_v16, 0  ;;  %v4921_v2 = vld [vmem:[#allocation12 + $0x2c0] sm:$0xff]  ;;  %v8511_v16 = vcombine.low %v4922_v51, %v4923_v10 }
 0xfdc   : > { %5104 = vmatpush2.bf16.msra.mxu0 %v11424_v6 }
 0xfdd   : > { %5444 = vmatprep.subr.bf16.mxu0 %v11697_v58 }
0x105f   : > { %v4736_v6 = vpop.f32.mrf.mxu0 }
0x1060   : > { %v4737_v11 = vadd.f32 %v4736_v6, %v11105_v56  ;;  %v8510_v6 = vcombine.high %v4920_v30, %v4921_v2 }
0x1061   : > { %v4738_v12 = vpop.f32.mrf.mxu0 }
0x1062   : > { %v4739_v36 = vadd.f32 %v4738_v12, %v11102_v20  ;;  %v4743_v1 = vmax.f32 %v4737_v11, 0.0  ;;  %v4918_v11 = vld [vmem:[#allocation12 + $0x140] sm:$0xff] }
0x1063   : > { %v4740_v14 = vpop.f32.mrf.mxu0  ;;  %v4919_v12 = vld [vmem:[#allocation12 + $0x1c0] sm:$0xff] }
0x1064   : > { %v4744_v15 = vmax.f32 %v4739_v36, 0.0  ;;  %v4745_v29 = vpack.c.bf16 %v4743_v1, %v4743_v1  ;;  %v8509_v36 = vcombine.low %v4920_v30, %v4921_v2  ;;  %v8508_v1 = vcombine.high %v4918_v11, %v4919_v12  ;;  %v4916_v14 = vld [vmem:[#allocation12 + $0x40] sm:$0xff] }
0x1065   : > { %v4741_v26 = vpop.f32.mrf.mxu0  ;;  %v8507_v17 = vcombine.low %v4918_v11, %v4919_v12 }
0x1066   : > { %v4746_v27 = vpack.c.bf16 %v4744_v15, %v4744_v15  ;;  %v4917_v15 = vld [vmem:[#allocation12 + $0xc0] sm:$0xff] }
0x1067   : > { %v8506_v25 = vcombine.high %v4916_v14, %v4917_v15  ;;  %v8505_v26 = vcombine.low %v4916_v14, %v4917_v15 }
0x1068   : > { %4907 = vmatprep.mubr.bf16.mxu1 %v4746_v27  ;;  %v9670_v27 = vld [vmem:[#allocation15 + $0x478] sm:$0xff]  }
0x1069   : > { %4908 = vmatmul.mubr.bf16.vlgmr.msra.gmra.mxu1 %v4745_v29  ;;  %v9671_v29 = vld [vmem:[#allocation15 + $0x438] sm:$0xff]  }
0x106a   : > { %5029 = vmatpush1.bf16.msra.mxu1 %v5023_v31  ;;  %5060 = vmatprep.mubr.bf16.mxu1 %v10280_v13  ;;  %v9672_v31 = vld [vmem:[#allocation15 + $0x470] sm:$0xff]  }
0x106b   : > { %5030 = vmatprep.subr.bf16.mxu1 %v8518_v32  ;;  %v9673_v32 = vld [vmem:[#allocation15 + $0x430] sm:$0xff]  }
0x106e   : > { %5031 = vmatpush1.bf16.msra.mxu1 %v8517_v37  ;;  %v9676_v37 = vld [vmem:[#allocation15 + $0x460] sm:$0xff]  }
0x106f   : > { %5032 = vmatprep.subr.bf16.mxu1 %v8516_v28  ;;  %v9677_v28 = vld [vmem:[#allocation15 + $0x420] sm:$0xff]  }
0x1072   : > { %5033 = vmatpush1.bf16.msra.mxu1 %v8515_v40  ;;  %v9680_v40 = vld [vmem:[#allocation15 + $0x450] sm:$0xff]  }
0x1073   : > { %5034 = vmatprep.subr.bf16.mxu1 %v8514_v59  ;;  %v9681_v59 = vld [vmem:[#allocation15 + $0x410] sm:$0xff]  }
0x1076   : > { %5035 = vmatpush1.bf16.msra.mxu1 %v8513_v3 }
0x1077   : > { %5036 = vmatprep.subr.bf16.mxu1 %v8512_v18 }
0x107a   : > { %5037 = vmatpush1.bf16.msra.mxu1 %v8511_v16  ;;  %v4932_v16 = vld [vmem:[#allocation13 + $0x10] sm:$0x3] }
0x107b   : > { %5038 = vmatprep.subr.bf16.mxu1 %v8510_v6  ;;  %v4937_v6 = vrot.slane %v4932_v16, %v11086_v63  ;;  %v4941_v11 = vrot.slane %v4932_v16, %v11088_v0 }
0x107e   : > { %5039 = vmatpush1.bf16.msra.mxu1 %v8509_v36 }
0x107f   : > { %5040 = vmatprep.subr.bf16.mxu1 %v8508_v1 }
0x1082   : > { %5041 = vmatpush1.bf16.msra.mxu1 %v8507_v17 }
0x1083   : > { %5042 = vmatprep.subr.bf16.mxu1 %v8506_v25 }
0x1086   : > { %5043 = vmatpush1.bf16.msra.mxu1 %v8505_v26 }
0x1087   : > { %8995 = vmatprep.subr.bf16.mxu1 %v9670_v27 }
0x1089   : > { %8522 = vmatmul.mubr.msk.bf16.vlgmr.msra.gmra.mxu1 %vm1882_vm11, %v11022_v62 }
0x108a   : > { %8996 = vmatpush3.bf16.msra.mxu1 %v9671_v29 }
0x108b   : > { %8997 = vmatprep.subr.bf16.mxu1 %v9672_v31  ;;  %v11748_v31 = vld [vmem:[%s12251_s11 + $0x90] ss:$8 sps:$4 sm:$0xff]  }
0x108e   : > { %8998 = vmatpush3.bf16.msra.mxu1 %v9673_v32  ;;  %v11754_v32 = vld [vmem:[%s12251_s11 + $0x84] ss:$8 sps:$4 sm:$0xff]  }
0x108f   : > { %8999 = vmatprep.subr.bf16.mxu1 %v9674_v33  ;;  %v11760_v33 = vld [vmem:[%s12251_s11 + $0x80] ss:$8 sps:$4 sm:$0xff]  }
0x1092   : > { %9000 = vmatpush3.bf16.msra.mxu1 %v9675_v34  ;;  %v9682_v34 = vld [vmem:[#allocation15 + $0x448] sm:$0xff]  }
0x1093   : > { %9001 = vmatprep.subr.bf16.mxu1 %v9676_v37  ;;  %v9683_v37 = vld [vmem:[#allocation15 + $0x408] sm:$0xff]  }
0x1096   : > { %9002 = vmatpush3.bf16.msra.mxu1 %v9677_v28  ;;  %v9684_v28 = vld [vmem:[#allocation15 + $0x440] sm:$0xff]  }
0x1097   : > { %9003 = vmatprep.subr.bf16.mxu1 %v9678_v38  ;;  %v9685_v38 = vld [vmem:[#allocation15 + $0x400] sm:$0xff]  }
0x109a   : > { %9004 = vmatpush3.bf16.msra.mxu1 %v9679_v39  ;;  %v5301_v39 = vld [vmem:[#allocation12 + $0x748] sm:$0xff] }
0x109b   : > { %9005 = vmatprep.subr.bf16.mxu1 %v9680_v40  ;;  %v5302_v40 = vld [vmem:[#allocation12 + $0x7c8] sm:$0x77] }
0x109e   : > { %9006 = vmatpush3.bf16.msra.mxu1 %v9681_v59  ;;  %v8554_v59 = vcombine.high %v5301_v39, %v5302_v40 }
0x109f   : > { %9007 = vmatprep.subr.bf16.mxu1 %v9682_v34 }
0x10a2   : > { %9008 = vmatpush3.bf16.msra.mxu1 %v9683_v37  ;;  %v5295_v37 = vld [vmem:[#allocation12 + $0x448] sm:$0xff] }
0x10a3   : > { %9009 = vmatprep.subr.bf16.mxu1 %v9684_v28  ;;  %v5296_v28 = vld [vmem:[#allocation12 + $0x4c8] sm:$0xff] }
0x10a6   : > { %9010 = vmatpush3.bf16.msra.mxu1 %v9685_v38 }
0x10a7   : > { %8555 = vmatprep.subr.msk.bf16.mxu1 %vm880_vm0, %v8554_v59  ;;  %v5294_v59 = vld [vmem:[#allocation12 + $0x3c8] sm:$0xff] }
0x1129   : > { %v8989_v51 = vpop.f32.mrf.mxu1 }
0x112b   : > { %v8990_v10 = vpop.f32.mrf.mxu1 }
0x112c   : > { %v8991_v3 = vadd.f32 %v8990_v10, %v8989_v51  ;;  %v8553_v51 = vcombine.low %v5301_v39, %v5302_v40  ;;  %v8548_v39 = vcombine.high %v5295_v37, %v5296_v28  ;;  %v5293_v40 = vld [vmem:[#allocation12 + $0x348] sm:$0xff] }
0x112d   : > { %v8992_v18 = vpop.f32.mrf.mxu1 }
0x112e   : > { %v11708_v30 = vadd.f32 %v8991_v3, %v11524_v4  ;;  %v11742_v4 = vld [vmem:[%s12251_s11 + $0x94] ss:$8 sps:$4 sm:$0xff]  }
0x112f   : > { %v8993_v2 = vpop.f32.mrf.mxu1 }
0x1149   : > { %v5062_v12 = vpop.f32.mrf.mxu1 }
0x114a   : > { %v5063_v36 = vadd.f32 %v5062_v12, %v4937_v6  ;;  %v5299_v12 = vld [vmem:[#allocation12 + $0x648] sm:$0xff] }
0x114b   : > { %v5064_v1 = vpop.f32.mrf.mxu1 }
0x114c   : > { %v5065_v14 = vadd.f32 %v5064_v1, %v4941_v11  ;;  %v5069_v15 = vmax.f32 %v5063_v36, 0.0  ;;  %v5300_v36 = vld [vmem:[#allocation12 + $0x6c8] sm:$0xff] }
0x114d   : > { %v5066_v17 = vpop.f32.mrf.mxu1 }
0x114e   : > { %v5070_v25 = vmax.f32 %v5065_v14, 0.0  ;;  %v5071_v29 = vpack.c.bf16 %v5069_v15, %v5069_v15  ;;  %v5394_v17 = vsel %vm880_vm0, %v8553_v51, 0  ;;  %v8547_v51 = vcombine.low %v5295_v37, %v5296_v28  ;;  %v9690_v37 = vld [vmem:[#allocation15 + $0x4e8] sm:$0xff]  }
0x114f   : > { %v5067_v26 = vpop.f32.mrf.mxu1  ;;  %v9691_v28 = vld [vmem:[#allocation15 + $0x4a8] sm:$0xff]  }
0x1150   : > { %v5072_v27 = vpack.c.bf16 %v5070_v25, %v5070_v25  ;;  %v8552_v25 = vcombine.high %v5299_v12, %v5300_v36  ;;  %v5297_v26 = vld [vmem:[#allocation12 + $0x548] sm:$0xff] }
0x1152   : > { %5105 = vmatprep.mubr.bf16.mxu0 %v5072_v27  ;;  %v5298_v27 = vld [vmem:[#allocation12 + $0x5c8] sm:$0xff] }
0x1153   : > { %5106 = vmatmul.mubr.bf16.vlgmr.msra.gmra.mxu0 %v5071_v29  ;;  %v8551_v29 = vcombine.low %v5299_v12, %v5300_v36  ;;  %v8550_v34 = vcombine.high %v5297_v26, %v5298_v27  ;;  %v8549_v38 = vcombine.low %v5297_v26, %v5298_v27  ;;  %v9686_v26 = vld [vmem:[#allocation15 + $0x4f8] sm:$0xff]  }
0x1154   : > { %5445 = vmatpush1.bf16.msra.mxu0 %v11531_v50  ;;  %v9687_v27 = vld [vmem:[#allocation15 + $0x4b8] sm:$0xff]  }
0x1155   : > { %5446 = vmatprep.subr.bf16.mxu0 %v11537_v41 }
0x1158   : > { %5447 = vmatpush1.bf16.msra.mxu0 %v11543_v42 }
0x1159   : > { %5448 = vmatprep.subr.bf16.mxu0 %v11549_v43 }
0x115c   : > { %5449 = vmatpush1.bf16.msra.mxu0 %v11555_v55 }
0x115d   : > { %5450 = vmatprep.subr.bf16.mxu0 %v11561_v60 }
0x1160   : > { %5451 = vmatpush1.bf16.msra.mxu0 %v11567_v44 }
0x1161   : > { %5452 = vmatprep.subr.bf16.mxu0 %v11573_v45 }
0x1164   : > { %5453 = vmatpush1.bf16.msra.mxu0 %v11579_v47 }
0x1165   : > { %5454 = vmatprep.subr.bf16.mxu0 %v11585_v48 }
0x1168   : > { %5455 = vmatpush1.bf16.msra.mxu0 %v11591_v21 }
0x1169   : > { %5456 = vmatprep.subr.bf16.mxu0 %v11597_v23 }
0x116c   : > { %5457 = vmatpush1.bf16.msra.mxu0 %v11603_v24 }
0x116d   : > { %5458 = vmatprep.subr.bf16.mxu0 %v11609_v5 }
0x1170   : > { %5459 = vmatpush1.bf16.msra.mxu0 %v11615_v49 }
0x1171   : > { %5460 = vmatprep.subr.bf16.mxu0 %v11621_v52 }
0x1174   : > { %5461 = vmatpush2.bf16.msra.mxu0 %v11627_v53 }
0x1175   : > { %5462 = vmatprep.subr.bf16.mxu0 %v11633_v54 }
0x1178   : > { %5463 = vmatpush2.bf16.msra.mxu0 %v11639_v19 }
0x1179   : > { %5464 = vmatprep.subr.bf16.mxu0 %v11645_v57 }
0x117c   : > { %5465 = vmatpush2.bf16.msra.mxu0 %v11651_v35 }
0x117d   : > { %5466 = vmatprep.subr.bf16.mxu0 %v11657_v61 }
0x1180   : > { %5467 = vmatpush2.bf16.msra.mxu0 %v11663_v46 }
0x1181   : > { %5468 = vmatprep.subr.bf16.mxu0 %v11669_v7 }
0x1184   : > { %5469 = vmatpush2.bf16.msra.mxu0 %v11675_v8 }
0x1185   : > { %5470 = vmatprep.subr.bf16.mxu0 %v11681_v9 }
0x1188   : > { %5471 = vmatpush2.bf16.msra.mxu0 %v11687_v22 }
0x1189   : > { %5472 = vmatprep.subr.bf16.mxu0 %v11742_v4 }
0x118c   : > { %5473 = vmatpush2.bf16.msra.mxu0 %v11748_v31 }
0x118d   : > { %5474 = vmatprep.subr.bf16.mxu0 %v11754_v32 }
0x1190   : > { %5475 = vmatpush2.bf16.msra.mxu0 %v11760_v33 }
0x1191   : > { %5815 = vmatprep.subr.bf16.mxu0 %v11697_v58 }
0x1213   : > { %v5107_v10 = vpop.f32.mrf.mxu0 }
0x1214   : > { %v5108_v3 = vadd.f32 %v5107_v10, %v11105_v56  ;;  %v8546_v10 = vcombine.high %v5293_v40, %v5294_v59 }
0x1215   : > { %v5109_v18 = vpop.f32.mrf.mxu0 }
0x1216   : > { %v5110_v2 = vadd.f32 %v5109_v18, %v11102_v20  ;;  %v5114_v16 = vmax.f32 %v5108_v3, 0.0  ;;  %v5291_v3 = vld [vmem:[#allocation12 + $0x248] sm:$0xff] }
0x1217   : > { %v5111_v6 = vpop.f32.mrf.mxu0  ;;  %v5292_v18 = vld [vmem:[#allocation12 + $0x2c8] sm:$0xff] }
0x1218   : > { %v5115_v11 = vmax.f32 %v5110_v2, 0.0  ;;  %v5116_v15 = vpack.c.bf16 %v5114_v16, %v5114_v16  ;;  %v8545_v2 = vcombine.low %v5293_v40, %v5294_v59  ;;  %v8544_v16 = vcombine.high %v5291_v3, %v5292_v18  ;;  %v5289_v6 = vld [vmem:[#allocation12 + $0x148] sm:$0xff]  ;;  %v9694_v40 = vld [vmem:[#allocation15 + $0x4d8] sm:$0xff]  }
0x1219   : > { %v5112_v1 = vpop.f32.mrf.mxu0  ;;  %v8543_v12 = vcombine.low %v5291_v3, %v5292_v18  ;;  %v9695_v59 = vld [vmem:[#allocation15 + $0x498] sm:$0xff]  }
0x121a   : > { %v5117_v14 = vpack.c.bf16 %v5115_v11, %v5115_v11  ;;  %v5290_v11 = vld [vmem:[#allocation12 + $0x1c8] sm:$0xff] }
0x121b   : > { %v8542_v36 = vcombine.high %v5289_v6, %v5290_v11  ;;  %v5287_v1 = vld [vmem:[#allocation12 + $0x48] sm:$0xff] }
0x121c   : > { %5278 = vmatprep.mubr.bf16.mxu1 %v5117_v14  ;;  %v5288_v14 = vld [vmem:[#allocation12 + $0xc8] sm:$0xff] }
0x121d   : > { %5279 = vmatmul.mubr.bf16.vlgmr.msra.gmra.mxu1 %v5116_v15  ;;  %v8541_v15 = vcombine.low %v5289_v6, %v5290_v11 }
0x121e   : > { %5400 = vmatpush1.bf16.msra.mxu1 %v5394_v17  ;;  %5431 = vmatprep.mubr.bf16.mxu1 %v10280_v13  ;;  %v8540_v17 = vcombine.high %v5287_v1, %v5288_v14 }
0x121f   : > { %5401 = vmatprep.subr.bf16.mxu1 %v8552_v25  ;;  %v8539_v25 = vcombine.low %v5287_v1, %v5288_v14 }
0x1222   : > { %5402 = vmatpush1.bf16.msra.mxu1 %v8551_v29  ;;  %v9688_v29 = vld [vmem:[#allocation15 + $0x4f0] sm:$0xff]  }
0x1223   : > { %5403 = vmatprep.subr.bf16.mxu1 %v8550_v34  ;;  %v9689_v34 = vld [vmem:[#allocation15 + $0x4b0] sm:$0xff]  }
0x1226   : > { %5404 = vmatpush1.bf16.msra.mxu1 %v8549_v38  ;;  %v9692_v38 = vld [vmem:[#allocation15 + $0x4e0] sm:$0xff]  }
0x1227   : > { %5405 = vmatprep.subr.bf16.mxu1 %v8548_v39  ;;  %v9693_v39 = vld [vmem:[#allocation15 + $0x4a0] sm:$0xff]  }
0x122a   : > { %5406 = vmatpush1.bf16.msra.mxu1 %v8547_v51  ;;  %v9696_v51 = vld [vmem:[#allocation15 + $0x4d0] sm:$0xff]  }
0x122b   : > { %5407 = vmatprep.subr.bf16.mxu1 %v8546_v10  ;;  %v9697_v10 = vld [vmem:[#allocation15 + $0x490] sm:$0xff]  }
0x122e   : > { %5408 = vmatpush1.bf16.msra.mxu1 %v8545_v2 }
0x122f   : > { %5409 = vmatprep.subr.bf16.mxu1 %v8544_v16 }
0x1232   : > { %5410 = vmatpush1.bf16.msra.mxu1 %v8543_v12  ;;  %v5303_v12 = vld [vmem:[#allocation13 + $0x12] sm:$0x3] }
0x1233   : > { %5411 = vmatprep.subr.bf16.mxu1 %v8542_v36  ;;  %v5308_v36 = vrot.slane %v5303_v12, %v11086_v63  ;;  %v5312_v1 = vrot.slane %v5303_v12, %v11088_v0 }
0x1236   : > { %5412 = vmatpush1.bf16.msra.mxu1 %v8541_v15 }
0x1237   : > { %5413 = vmatprep.subr.bf16.mxu1 %v8540_v17 }
0x123a   : > { %5414 = vmatpush1.bf16.msra.mxu1 %v8539_v25 }
0x123b   : > { %9017 = vmatprep.subr.bf16.mxu1 %v9686_v26 }
0x123d   : > { %8556 = vmatmul.mubr.msk.bf16.vlgmr.msra.gmra.mxu1 %vm1882_vm11, %v11022_v62 }
0x123e   : > { %9018 = vmatpush3.bf16.msra.mxu1 %v9687_v27 }
0x123f   : > { %9019 = vmatprep.subr.bf16.mxu1 %v9688_v29 }
0x1242   : > { %9020 = vmatpush3.bf16.msra.mxu1 %v9689_v34 }
0x1243   : > { %9021 = vmatprep.subr.bf16.mxu1 %v9690_v37 }
0x1246   : > { %9022 = vmatpush3.bf16.msra.mxu1 %v9691_v28 }
0x1247   : > { %9023 = vmatprep.subr.bf16.mxu1 %v9692_v38  ;;  %v9699_v38 = vld [vmem:[#allocation15 + $0x488] sm:$0xff]  }
0x124a   : > { %9024 = vmatpush3.bf16.msra.mxu1 %v9693_v39  ;;  %v9700_v39 = vld [vmem:[#allocation15 + $0x4c0] sm:$0xff]  }
0x124b   : > { %9025 = vmatprep.subr.bf16.mxu1 %v9694_v40  ;;  %v9701_v40 = vld [vmem:[#allocation15 + $0x480] sm:$0xff]  }
0x124e   : > { %9026 = vmatpush3.bf16.msra.mxu1 %v9695_v59  ;;  %v5672_v59 = vld [vmem:[#allocation12 + $0x750] sm:$0xff] }
0x124f   : > { %9027 = vmatprep.subr.bf16.mxu1 %v9696_v51  ;;  %v5673_v51 = vld [vmem:[#allocation12 + $0x7d0] sm:$0x77] }
0x1252   : > { %9028 = vmatpush3.bf16.msra.mxu1 %v9697_v10  ;;  %v8588_v10 = vcombine.high %v5672_v59, %v5673_v51 }
0x12dd   : > { %v9011_v3 = vpop.f32.mrf.mxu1 }
0x12df   : > { %v9012_v18 = vpop.f32.mrf.mxu1 }
0x12e0   : > { %v9013_v2 = vadd.f32 %v9012_v18, %v9011_v3  ;;  %v8587_v3 = vcombine.low %v5672_v59, %v5673_v51  ;;  %v5664_v51 = vld [vmem:[#allocation12 + $0x350] sm:$0xff] }
0x12e1   : > { %v9014_v16 = vpop.f32.mrf.mxu1 }
0x12e2   : > { %v11772_v6 = vadd.f32 %v9013_v2, %v11708_v30  ;;  %v9698_v30 = vld [vmem:[#allocation15 + $0x4c8] sm:$0xff]  }
0x12e3   : > { %v9015_v11 = vpop.f32.mrf.mxu1  ;;  %9029 = vmatprep.subr.bf16.mxu1 %v9698_v30 }
0x12e4   : > { %9030 = vmatpush3.bf16.msra.mxu1 %v9699_v38  ;;  %v5666_v38 = vld [vmem:[#allocation12 + $0x450] sm:$0xff] }
0x12e5   : > { %9031 = vmatprep.subr.bf16.mxu1 %v9700_v39  ;;  %v5667_v39 = vld [vmem:[#allocation12 + $0x4d0] sm:$0xff] }
0x12e6   : > { %v8582_v59 = vcombine.high %v5666_v38, %v5667_v39 }
0x12e8   : > { %9032 = vmatpush3.bf16.msra.mxu1 %v9701_v40 }
0x12e9   : > { %8589 = vmatprep.subr.msk.bf16.mxu1 %vm880_vm0, %v8588_v10  ;;  %v5665_v10 = vld [vmem:[#allocation12 + $0x3d0] sm:$0xff] }
0x12fd   : > { %v5433_v14 = vpop.f32.mrf.mxu1 }
0x12fe   : > { %v5434_v15 = vadd.f32 %v5433_v14, %v5308_v36  ;;  %v5670_v14 = vld [vmem:[#allocation12 + $0x650] sm:$0xff] }
0x12ff   : > { %v5435_v17 = vpop.f32.mrf.mxu1 }
0x1300   : > { %v5436_v25 = vadd.f32 %v5435_v17, %v5312_v1  ;;  %v5440_v26 = vmax.f32 %v5434_v15, 0.0  ;;  %v5671_v15 = vld [vmem:[#allocation12 + $0x6d0] sm:$0xff] }
0x1301   : > { %v5437_v27 = vpop.f32.mrf.mxu1 }
0x1302   : > { %v5441_v29 = vmax.f32 %v5436_v25, 0.0  ;;  %v5442_v28 = vpack.c.bf16 %v5440_v26, %v5440_v26  ;;  %v5765_v27 = vsel %vm880_vm0, %v8587_v3, 0  ;;  %v8581_v3 = vcombine.low %v5666_v38, %v5667_v39  ;;  %v9706_v38 = vld [vmem:[#allocation15 + $0x568] sm:$0xff]  }
0x1303   : > { %v5438_v34 = vpop.f32.mrf.mxu1  ;;  %v9707_v39 = vld [vmem:[#allocation15 + $0x528] sm:$0xff]  }
0x1304   : > { %v5443_v37 = vpack.c.bf16 %v5441_v29, %v5441_v29  ;;  %v8586_v29 = vcombine.high %v5670_v14, %v5671_v15  ;;  %v5668_v34 = vld [vmem:[#allocation12 + $0x550] sm:$0xff] }
0x1306   : > { %5476 = vmatprep.mubr.bf16.mxu0 %v5443_v37  ;;  %v5669_v37 = vld [vmem:[#allocation12 + $0x5d0] sm:$0xff] }
0x1307   : > { %5477 = vmatmul.mubr.bf16.vlgmr.msra.gmra.mxu0 %v5442_v28  ;;  %v8585_v28 = vcombine.low %v5670_v14, %v5671_v15  ;;  %v8584_v30 = vcombine.high %v5668_v34, %v5669_v37  ;;  %v8583_v40 = vcombine.low %v5668_v34, %v5669_v37  ;;  %v9702_v34 = vld [vmem:[#allocation15 + $0x578] sm:$0xff]  }
0x1308   : > { %5816 = vmatpush1.bf16.msra.mxu0 %v11531_v50  ;;  %v9703_v37 = vld [vmem:[#allocation15 + $0x538] sm:$0xff]  }
0x1309   : > { %5817 = vmatprep.subr.bf16.mxu0 %v11537_v41 }
0x130c   : > { %5818 = vmatpush1.bf16.msra.mxu0 %v11543_v42 }
0x130d   : > { %5819 = vmatprep.subr.bf16.mxu0 %v11549_v43 }
0x1310   : > { %5820 = vmatpush1.bf16.msra.mxu0 %v11555_v55 }
0x1311   : > { %5821 = vmatprep.subr.bf16.mxu0 %v11561_v60 }
0x1314   : > { %5822 = vmatpush1.bf16.msra.mxu0 %v11567_v44 }
0x1315   : > { %5823 = vmatprep.subr.bf16.mxu0 %v11573_v45 }
0x1318   : > { %5824 = vmatpush1.bf16.msra.mxu0 %v11579_v47 }
0x1319   : > { %5825 = vmatprep.subr.bf16.mxu0 %v11585_v48 }
0x131c   : > { %5826 = vmatpush1.bf16.msra.mxu0 %v11591_v21 }
0x131d   : > { %5827 = vmatprep.subr.bf16.mxu0 %v11597_v23 }
0x1320   : > { %5828 = vmatpush1.bf16.msra.mxu0 %v11603_v24 }
0x1321   : > { %5829 = vmatprep.subr.bf16.mxu0 %v11609_v5 }
0x1324   : > { %5830 = vmatpush1.bf16.msra.mxu0 %v11615_v49 }
0x1325   : > { %5831 = vmatprep.subr.bf16.mxu0 %v11621_v52 }
0x1328   : > { %5832 = vmatpush2.bf16.msra.mxu0 %v11627_v53 }
0x1329   : > { %5833 = vmatprep.subr.bf16.mxu0 %v11633_v54 }
0x132c   : > { %5834 = vmatpush2.bf16.msra.mxu0 %v11639_v19 }
0x132d   : > { %5835 = vmatprep.subr.bf16.mxu0 %v11645_v57 }
0x1330   : > { %5836 = vmatpush2.bf16.msra.mxu0 %v11651_v35 }
0x1331   : > { %5837 = vmatprep.subr.bf16.mxu0 %v11657_v61 }
0x1334   : > { %5838 = vmatpush2.bf16.msra.mxu0 %v11663_v46 }
0x1335   : > { %5839 = vmatprep.subr.bf16.mxu0 %v11669_v7 }
0x1338   : > { %5840 = vmatpush2.bf16.msra.mxu0 %v11675_v8 }
0x1339   : > { %5841 = vmatprep.subr.bf16.mxu0 %v11681_v9 }
0x133c   : > { %5842 = vmatpush2.bf16.msra.mxu0 %v11687_v22 }
0x133d   : > { %5843 = vmatprep.subr.bf16.mxu0 %v11742_v4 }
0x1340   : > { %5844 = vmatpush2.bf16.msra.mxu0 %v11748_v31 }
0x1341   : > { %5845 = vmatprep.subr.bf16.mxu0 %v11754_v32 }
0x1344   : > { %5846 = vmatpush2.bf16.msra.mxu0 %v11760_v33 }
0x1345   : > { %6186 = vmatprep.subr.bf16.mxu0 %v11697_v58 }
0x13c7   : > { %v5478_v18 = vpop.f32.mrf.mxu0 }
0x13c8   : > { %v5479_v2 = vadd.f32 %v5478_v18, %v11105_v56  ;;  %v8580_v18 = vcombine.high %v5664_v51, %v5665_v10 }
0x13c9   : > { %v5480_v16 = vpop.f32.mrf.mxu0 }
0x13ca   : > { %v5481_v11 = vadd.f32 %v5480_v16, %v11102_v20  ;;  %v5485_v12 = vmax.f32 %v5479_v2, 0.0  ;;  %v5662_v2 = vld [vmem:[#allocation12 + $0x250] sm:$0xff] }
0x13cb   : > { %v5482_v36 = vpop.f32.mrf.mxu0  ;;  %v5663_v16 = vld [vmem:[#allocation12 + $0x2d0] sm:$0xff] }
0x13cc   : > { %v5486_v1 = vmax.f32 %v5481_v11, 0.0  ;;  %v5487_v26 = vpack.c.bf16 %v5485_v12, %v5485_v12  ;;  %v8579_v11 = vcombine.low %v5664_v51, %v5665_v10  ;;  %v8578_v12 = vcombine.high %v5662_v2, %v5663_v16  ;;  %v5660_v36 = vld [vmem:[#allocation12 + $0x150] sm:$0xff]  ;;  %v9710_v51 = vld [vmem:[#allocation15 + $0x558] sm:$0xff]  }
0x13cd   : > { %v5483_v17 = vpop.f32.mrf.mxu0  ;;  %v8577_v14 = vcombine.low %v5662_v2, %v5663_v16  ;;  %v9711_v10 = vld [vmem:[#allocation15 + $0x518] sm:$0xff]  }
0x13ce   : > { %v5488_v25 = vpack.c.bf16 %v5486_v1, %v5486_v1  ;;  %v5661_v1 = vld [vmem:[#allocation12 + $0x1d0] sm:$0xff] }
0x13cf   : > { %v8576_v15 = vcombine.high %v5660_v36, %v5661_v1  ;;  %v5658_v17 = vld [vmem:[#allocation12 + $0x50] sm:$0xff] }
0x13d0   : > { %5649 = vmatprep.mubr.bf16.mxu1 %v5488_v25  ;;  %v5659_v25 = vld [vmem:[#allocation12 + $0xd0] sm:$0xff] }
0x13d1   : > { %5650 = vmatmul.mubr.bf16.vlgmr.msra.gmra.mxu1 %v5487_v26  ;;  %v8575_v26 = vcombine.low %v5660_v36, %v5661_v1 }
0x13d2   : > { %5771 = vmatpush1.bf16.msra.mxu1 %v5765_v27  ;;  %5802 = vmatprep.mubr.bf16.mxu1 %v10280_v13  ;;  %v8574_v27 = vcombine.high %v5658_v17, %v5659_v25 }
0x13d3   : > { %5772 = vmatprep.subr.bf16.mxu1 %v8586_v29  ;;  %v8573_v29 = vcombine.low %v5658_v17, %v5659_v25 }
0x13d6   : > { %5773 = vmatpush1.bf16.msra.mxu1 %v8585_v28  ;;  %v9704_v28 = vld [vmem:[#allocation15 + $0x570] sm:$0xff]  }
0x13d7   : > { %5774 = vmatprep.subr.bf16.mxu1 %v8584_v30  ;;  %v9705_v30 = vld [vmem:[#allocation15 + $0x530] sm:$0xff]  }
0x13da   : > { %5775 = vmatpush1.bf16.msra.mxu1 %v8583_v40  ;;  %v9708_v40 = vld [vmem:[#allocation15 + $0x560] sm:$0xff]  }
0x13db   : > { %5776 = vmatprep.subr.bf16.mxu1 %v8582_v59  ;;  %v9709_v59 = vld [vmem:[#allocation15 + $0x520] sm:$0xff]  }
0x13de   : > { %5777 = vmatpush1.bf16.msra.mxu1 %v8581_v3  ;;  %v9712_v3 = vld [vmem:[#allocation15 + $0x550] sm:$0xff]  }
0x13df   : > { %5778 = vmatprep.subr.bf16.mxu1 %v8580_v18  ;;  %v9713_v18 = vld [vmem:[#allocation15 + $0x510] sm:$0xff]  }
0x13e2   : > { %5779 = vmatpush1.bf16.msra.mxu1 %v8579_v11 }
0x13e3   : > { %5780 = vmatprep.subr.bf16.mxu1 %v8578_v12 }
0x13e6   : > { %5781 = vmatpush1.bf16.msra.mxu1 %v8577_v14  ;;  %v5674_v14 = vld [vmem:[#allocation13 + $0x14] sm:$0x3] }
0x13e7   : > { %5782 = vmatprep.subr.bf16.mxu1 %v8576_v15  ;;  %v5679_v15 = vrot.slane %v5674_v14, %v11086_v63  ;;  %v5683_v17 = vrot.slane %v5674_v14, %v11088_v0 }
0x13ea   : > { %5783 = vmatpush1.bf16.msra.mxu1 %v8575_v26 }
0x13eb   : > { %5784 = vmatprep.subr.bf16.mxu1 %v8574_v27 }
0x13ee   : > { %5785 = vmatpush1.bf16.msra.mxu1 %v8573_v29 }
0x13ef   : > { %9039 = vmatprep.subr.bf16.mxu1 %v9702_v34 }
0x13f1   : > { %8590 = vmatmul.mubr.msk.bf16.vlgmr.msra.gmra.mxu1 %vm1882_vm11, %v11022_v62 }
0x13f2   : > { %9040 = vmatpush3.bf16.msra.mxu1 %v9703_v37 }
0x13f3   : > { %9041 = vmatprep.subr.bf16.mxu1 %v9704_v28 }
0x13f6   : > { %9042 = vmatpush3.bf16.msra.mxu1 %v9705_v30 }
0x13f7   : > { %9043 = vmatprep.subr.bf16.mxu1 %v9706_v38 }
0x13fa   : > { %9044 = vmatpush3.bf16.msra.mxu1 %v9707_v39 }
0x13fb   : > { %9045 = vmatprep.subr.bf16.mxu1 %v9708_v40 }
0x13fe   : > { %9046 = vmatpush3.bf16.msra.mxu1 %v9709_v59  ;;  %v6035_v59 = vld [vmem:[#allocation12 + $0x358] sm:$0xff] }
0x13ff   : > { %9047 = vmatprep.subr.bf16.mxu1 %v9710_v51  ;;  %v6036_v51 = vld [vmem:[#allocation12 + $0x3d8] sm:$0xff] }
0x1402   : > { %9048 = vmatpush3.bf16.msra.mxu1 %v9711_v10 }
0x1403   : > { %9049 = vmatprep.subr.bf16.mxu1 %v9712_v3  ;;  %v8614_v3 = vcombine.high %v6035_v59, %v6036_v51 }
0x1406   : > { %9050 = vmatpush3.bf16.msra.mxu1 %v9713_v18  ;;  %v6033_v18 = vld [vmem:[#allocation12 + $0x258] sm:$0xff] }
0x1491   : > { %v9033_v2 = vpop.f32.mrf.mxu1 }
0x1493   : > { %v9034_v16 = vpop.f32.mrf.mxu1 }
0x1494   : > { %v9035_v11 = vadd.f32 %v9034_v16, %v9033_v2  ;;  %v6034_v2 = vld [vmem:[#allocation12 + $0x2d8] sm:$0xff]  ;;  %v8613_v16 = vcombine.low %v6035_v59, %v6036_v51  ;;  %v11903_v59 = vld [vmem:[%s12251_s11 + $0x40] ss:$8 sps:$4 sm:$0xff]  }
0x1495   : > { %v9036_v12 = vpop.f32.mrf.mxu1  ;;  %v8611_v14 = vcombine.low %v6033_v18, %v6034_v2  ;;  %v11909_v51 = vld [vmem:[%s12251_s11 + $0x34] ss:$8 sps:$4 sm:$0xff]  }
0x1496   : > { %v11816_v36 = vadd.f32 %v9035_v11, %v11772_v6  ;;  %v8612_v11 = vcombine.high %v6033_v18, %v6034_v2  ;;  %v6031_v12 = vld [vmem:[#allocation12 + $0x158] sm:$0xff]  ;;  %v11927_v18 = vld [vmem:[%s12251_s11 + $0x20] ss:$8 sps:$4 sm:$0xff]  }
0x1497   : > { %v9037_v1 = vpop.f32.mrf.mxu1  ;;  %v11933_v2 = vld [vmem:[%s12251_s11 + $0x14] ss:$8 sps:$4 sm:$0xff]  }
0x1498   : > { %v6032_v1 = vld [vmem:[#allocation12 + $0x1d8] sm:$0xff] }
0x14b1   : > { %v5804_v25 = vpop.f32.mrf.mxu1 }
0x14b2   : > { %v5805_v26 = vadd.f32 %v5804_v25, %v5679_v15  ;;  %v8610_v15 = vcombine.high %v6031_v12, %v6032_v1  ;;  %v6030_v25 = vld [vmem:[#allocation12 + $0xd8] sm:$0xff] }
0x14b3   : > { %v5806_v27 = vpop.f32.mrf.mxu1 }
0x14b4   : > { %v5807_v29 = vadd.f32 %v5806_v27, %v5683_v17  ;;  %v5811_v34 = vmax.f32 %v5805_v26, 0.0  ;;  %v6029_v17 = vld [vmem:[#allocation12 + $0x58] sm:$0xff]  ;;  %v8609_v26 = vcombine.low %v6031_v12, %v6032_v1  ;;  %v11951_v12 = vld [vmem:[%s12251_s11] ss:$8 sps:$4 sm:$0xff]  }
0x14b5   : > { %v5808_v37 = vpop.f32.mrf.mxu1  ;;  %v8608_v27 = vcombine.high %v6029_v17, %v6030_v25  ;;  %v11957_v1 = vld [vmem:[%s12251_s11 + $0xf4] ss:$8 sps:$4 sm:$0xff]  }
0x14b6   : > { %v5812_v28 = vmax.f32 %v5807_v29, 0.0  ;;  %v5813_v39 = vpack.c.bf16 %v5811_v34, %v5811_v34  ;;  %v8607_v29 = vcombine.low %v6029_v17, %v6030_v25  ;;  %v9718_v34 = vld [vmem:[#allocation15 + $0x5f8] sm:$0xff]   ;;  %v11975_v17 = vld [vmem:[%s12251_s11 + $0xe0] ss:$8 sps:$4 sm:$0xff]  }
0x14b7   : > { %v5809_v30 = vpop.f32.mrf.mxu1  ;;  %v9719_v37 = vld [vmem:[#allocation15 + $0x5b8] sm:$0xff]  }
0x14b8   : > { %v5814_v38 = vpack.c.bf16 %v5812_v28, %v5812_v28  ;;  %v9720_v28 = vld [vmem:[#allocation15 + $0x5f0] sm:$0xff]  }
0x14b9   : > { %v9721_v30 = vld [vmem:[#allocation15 + $0x5b0] sm:$0xff]  }
0x14ba   : > { %5847 = vmatprep.mubr.bf16.mxu0 %v5814_v38  ;;  %v9722_v38 = vld [vmem:[#allocation15 + $0x5e8] sm:$0xff]   ;;  %v11981_v25 = vld [vmem:[%s12251_s11 + $0xd4] ss:$8 sps:$4 sm:$0xff]  }
0x14bb   : > { %5848 = vmatmul.mubr.bf16.vlgmr.msra.gmra.mxu0 %v5813_v39  ;;  %v9723_v39 = vld [vmem:[#allocation15 + $0x5a8] sm:$0xff]  }
0x14bc   : > { %6187 = vmatpush1.bf16.msra.mxu0 %v11531_v50  ;;  %v9714_v50 = vld [vmem:[#allocation15 + $0x548] sm:$0xff]  }
0x14bd   : > { %6188 = vmatprep.subr.bf16.mxu0 %v11537_v41  ;;  %v9715_v41 = vld [vmem:[#allocation15 + $0x508] sm:$0xff]   ;;  %9051 = vmatprep.subr.bf16.mxu1 %v9714_v50  ;;  %v9724_v50 = vld [vmem:[#allocation15 + $0x5e0] sm:$0xff]  }
0x14be   : > { %9052 = vmatpush3.bf16.msra.mxu1 %v9715_v41  ;;  %v9725_v41 = vld [vmem:[#allocation15 + $0x5a0] sm:$0xff]  }
0x14c0   : > { %6189 = vmatpush1.bf16.msra.mxu0 %v11543_v42  ;;  %v9716_v42 = vld [vmem:[#allocation15 + $0x540] sm:$0xff]  }
0x14c1   : > { %6190 = vmatprep.subr.bf16.mxu0 %v11549_v43  ;;  %v9717_v43 = vld [vmem:[#allocation15 + $0x500] sm:$0xff]   ;;  %9053 = vmatprep.subr.bf16.mxu1 %v9716_v42  ;;  %v9726_v42 = vld [vmem:[#allocation15 + $0x5d8] sm:$0xff]  }
0x14c2   : > { %9054 = vmatpush3.bf16.msra.mxu1 %v9717_v43  ;;  %v9727_v43 = vld [vmem:[#allocation15 + $0x598] sm:$0xff]  }
0x14c4   : > { %6191 = vmatpush1.bf16.msra.mxu0 %v11555_v55  ;;  %v6043_v55 = vld [vmem:[#allocation12 + $0x758] sm:$0xff] }
0x14c5   : > { %6192 = vmatprep.subr.bf16.mxu0 %v11561_v60  ;;  %v6044_v60 = vld [vmem:[#allocation12 + $0x7d8] sm:$0x77] }
0x14c8   : > { %6193 = vmatpush1.bf16.msra.mxu0 %v11567_v44  ;;  %v8622_v44 = vcombine.high %v6043_v55, %v6044_v60 }
0x14c9   : > { %6194 = vmatprep.subr.bf16.mxu0 %v11573_v45  ;;  %v8621_v45 = vcombine.low %v6043_v55, %v6044_v60  ;;  %v9728_v55 = vld [vmem:[#allocation15 + $0x5d0] sm:$0xff]  }
0x14ca   : > { %8623 = vmatprep.subr.msk.bf16.mxu1 %vm880_vm0, %v8622_v44  ;;  %v9729_v60 = vld [vmem:[#allocation15 + $0x590] sm:$0xff]  }
0x14cc   : > { %6195 = vmatpush1.bf16.msra.mxu0 %v11579_v47 }
0x14cd   : > { %6196 = vmatprep.subr.bf16.mxu0 %v11585_v48 }
0x14d0   : > { %6197 = vmatpush1.bf16.msra.mxu0 %v11591_v21 }
0x14d1   : > { %6198 = vmatprep.subr.bf16.mxu0 %v11597_v23 }
0x14d4   : > { %6199 = vmatpush1.bf16.msra.mxu0 %v11603_v24 }
0x14d5   : > { %6200 = vmatprep.subr.bf16.mxu0 %v11609_v5 }
0x14d8   : > { %6201 = vmatpush1.bf16.msra.mxu0 %v11615_v49 }
0x14d9   : > { %6202 = vmatprep.subr.bf16.mxu0 %v11621_v52  ;;  %v6041_v52 = vld [vmem:[#allocation12 + $0x658] sm:$0xff] }
0x14dc   : > { %6203 = vmatpush2.bf16.msra.mxu0 %v11627_v53  ;;  %v6042_v53 = vld [vmem:[#allocation12 + $0x6d8] sm:$0xff] }
0x14dd   : > { %6204 = vmatprep.subr.bf16.mxu0 %v11633_v54 }
0x14e0   : > { %6205 = vmatpush2.bf16.msra.mxu0 %v11639_v19 }
0x14e1   : > { %6206 = vmatprep.subr.bf16.mxu0 %v11645_v57 }
0x14e4   : > { %6207 = vmatpush2.bf16.msra.mxu0 %v11651_v35  ;;  %v6136_v35 = vsel %vm880_vm0, %v8621_v45, 0 }
0x14e5   : > { %6208 = vmatprep.subr.bf16.mxu0 %v11657_v61  ;;  %v8620_v61 = vcombine.high %v6041_v52, %v6042_v53 }
0x14e8   : > { %6209 = vmatpush2.bf16.msra.mxu0 %v11663_v46  ;;  %v6039_v46 = vld [vmem:[#allocation12 + $0x558] sm:$0xff] }
0x14e9   : > { %6210 = vmatprep.subr.bf16.mxu0 %v11669_v7  ;;  %v6040_v7 = vld [vmem:[#allocation12 + $0x5d8] sm:$0xff] }
0x14ea   : > { %v8617_v6 = vcombine.low %v6039_v46, %v6040_v7 }
0x14ec   : > { %6211 = vmatpush2.bf16.msra.mxu0 %v11675_v8  ;;  %v8619_v8 = vcombine.low %v6041_v52, %v6042_v53 }
0x14ed   : > { %6212 = vmatprep.subr.bf16.mxu0 %v11681_v9  ;;  %v8618_v9 = vcombine.high %v6039_v46, %v6040_v7 }
0x14f0   : > { %6213 = vmatpush2.bf16.msra.mxu0 %v11687_v22  ;;  %v6037_v22 = vld [vmem:[#allocation12 + $0x458] sm:$0xff] }
0x14f1   : > { %6214 = vmatprep.subr.bf16.mxu0 %v11742_v4 }
0x14f4   : > { %6215 = vmatpush2.bf16.msra.mxu0 %v11748_v31 }
0x14f5   : > { %6216 = vmatprep.subr.bf16.mxu0 %v11754_v32 }
0x14f8   : > { %6217 = vmatpush2.bf16.msra.mxu0 %v11760_v33 }
0x14f9   : > { %6557 = vmatprep.subr.bf16.mxu0 %v11697_v58  ;;  %v6038_v58 = vld [vmem:[#allocation12 + $0x4d8] sm:$0xff] }
0x14fa   : > { %v8616_v40 = vcombine.high %v6037_v22, %v6038_v58  ;;  %v8615_v10 = vcombine.low %v6037_v22, %v6038_v58  ;;  %v11879_v22 = vld [vmem:[%s12251_s11 + $0x60] ss:$8 sps:$4 sm:$0xff]   ;;  %v11885_v58 = vld [vmem:[%s12251_s11 + $0x54] ss:$8 sps:$4 sm:$0xff]  }
0x157b   : > { %v5849_v47 = vpop.f32.mrf.mxu0 }
0x157c   : > { %v5850_v48 = vadd.f32 %v5849_v47, %v11105_v56 }
0x157d   : > { %v5851_v21 = vpop.f32.mrf.mxu0 }
0x157e   : > { %v5852_v23 = vadd.f32 %v5851_v21, %v11102_v20  ;;  %v5856_v24 = vmax.f32 %v5850_v48, 0.0 }
0x157f   : > { %v5853_v5 = vpop.f32.mrf.mxu0 }
0x1580   : > { %v5857_v49 = vmax.f32 %v5852_v23, 0.0  ;;  %v5858_v57 = vpack.c.bf16 %v5856_v24, %v5856_v24  ;;  %v6045_v24 = vld [vmem:[#allocation13 + $0x16] sm:$0x3] }
0x1581   : > { %v5854_v54 = vpop.f32.mrf.mxu0  ;;  %v6050_v5 = vrot.slane %v6045_v24, %v11086_v63 }
0x1582   : > { %v5859_v19 = vpack.c.bf16 %v5857_v49, %v5857_v49  ;;  %v6054_v49 = vrot.slane %v6045_v24, %v11088_v0  ;;  %v6413_v24 = vld [vmem:[#allocation12 + $0x6e0] sm:$0xff] }
0x1584   : > { %6020 = vmatprep.mubr.bf16.mxu1 %v5859_v19 }
0x1585   : > { %6021 = vmatmul.mubr.bf16.vlgmr.msra.gmra.mxu1 %v5858_v57 }
0x1586   : > { %6142 = vmatpush1.bf16.msra.mxu1 %v6136_v35  ;;  %6173 = vmatprep.mubr.bf16.mxu1 %v10280_v13 }
0x1587   : > { %6143 = vmatprep.subr.bf16.mxu1 %v8620_v61 }
0x158a   : > { %6144 = vmatpush1.bf16.msra.mxu1 %v8619_v8 }
0x158b   : > { %6145 = vmatprep.subr.bf16.mxu1 %v8618_v9  ;;  %v11873_v9 = vld [vmem:[%s12251_s11 + $0x64] ss:$8 sps:$4 sm:$0xff]  }
0x158e   : > { %6146 = vmatpush1.bf16.msra.mxu1 %v8617_v6  ;;  %v11891_v6 = vld [vmem:[%s12251_s11 + $0x50] ss:$8 sps:$4 sm:$0xff]  }
0x158f   : > { %6147 = vmatprep.subr.bf16.mxu1 %v8616_v40  ;;  %v11897_v40 = vld [vmem:[%s12251_s11 + $0x44] ss:$8 sps:$4 sm:$0xff]  }
0x1592   : > { %6148 = vmatpush1.bf16.msra.mxu1 %v8615_v10  ;;  %v11915_v10 = vld [vmem:[%s12251_s11 + $0x30] ss:$8 sps:$4 sm:$0xff]  }
0x1593   : > { %6149 = vmatprep.subr.bf16.mxu1 %v8614_v3  ;;  %v11921_v3 = vld [vmem:[%s12251_s11 + $0x24] ss:$8 sps:$4 sm:$0xff]  }
0x1596   : > { %6150 = vmatpush1.bf16.msra.mxu1 %v8613_v16  ;;  %v11939_v16 = vld [vmem:[%s12251_s11 + $0x10] ss:$8 sps:$4 sm:$0xff]  }
0x1597   : > { %6151 = vmatprep.subr.bf16.mxu1 %v8612_v11  ;;  %v11945_v11 = vld [vmem:[%s12251_s11 + $0x4] ss:$8 sps:$4 sm:$0xff]  }
0x159a   : > { %6152 = vmatpush1.bf16.msra.mxu1 %v8611_v14  ;;  %v11963_v14 = vld [vmem:[%s12251_s11 + $0xf0] ss:$8 sps:$4 sm:$0xff]  }
0x159b   : > { %6153 = vmatprep.subr.bf16.mxu1 %v8610_v15  ;;  %v11969_v15 = vld [vmem:[%s12251_s11 + $0xe4] ss:$8 sps:$4 sm:$0xff]  }
0x159e   : > { %6154 = vmatpush1.bf16.msra.mxu1 %v8609_v26  ;;  %v11987_v26 = vld [vmem:[%s12251_s11 + $0xd0] ss:$8 sps:$4 sm:$0xff]  }
0x159f   : > { %6155 = vmatprep.subr.bf16.mxu1 %v8608_v27  ;;  %v11993_v27 = vld [vmem:[%s12251_s11 + $0xc4] ss:$8 sps:$4 sm:$0xff]  }
0x15a2   : > { %6156 = vmatpush1.bf16.msra.mxu1 %v8607_v29  ;;  %v11999_v29 = vld [vmem:[%s12251_s11 + $0xc0] ss:$8 sps:$4 sm:$0xff]  }
0x15a3   : > { %9061 = vmatprep.subr.bf16.mxu1 %v9718_v34  ;;  %v12005_v34 = vld [vmem:[%s12251_s11 + $0xb4] ss:$8 sps:$4 sm:$0xff]  }
0x15a5   : > { %8624 = vmatmul.mubr.msk.bf16.vlgmr.msra.gmra.mxu1 %vm1882_vm11, %v11022_v62 }
0x15a6   : > { %9062 = vmatpush3.bf16.msra.mxu1 %v9719_v37  ;;  %v12011_v37 = vld [vmem:[%s12251_s11 + $0xb0] ss:$8 sps:$4 sm:$0xff]  }
0x15a7   : > { %9063 = vmatprep.subr.bf16.mxu1 %v9720_v28  ;;  %v12017_v28 = vld [vmem:[%s12251_s11 + $0xa4] ss:$8 sps:$4 sm:$0xff]  }
0x15aa   : > { %9064 = vmatpush3.bf16.msra.mxu1 %v9721_v30  ;;  %v12023_v30 = vld [vmem:[%s12251_s11 + $0xa0] ss:$8 sps:$4 sm:$0xff]  }
0x15ab   : > { %9065 = vmatprep.subr.bf16.mxu1 %v9722_v38  ;;  %v12033_v38 = vld [vmem:[%s12251_s11 + $0x74] ss:$8 sps:$4 sm:$0xff]  }
0x15ae   : > { %9066 = vmatpush3.bf16.msra.mxu1 %v9723_v39  ;;  %v9730_v39 = vld [vmem:[#allocation15 + $0x5c8] sm:$0xff]  }
0x15af   : > { %9067 = vmatprep.subr.bf16.mxu1 %v9724_v50  ;;  %v9731_v50 = vld [vmem:[#allocation15 + $0x588] sm:$0xff]  }
0x15b2   : > { %9068 = vmatpush3.bf16.msra.mxu1 %v9725_v41  ;;  %v9732_v41 = vld [vmem:[#allocation15 + $0x5c0] sm:$0xff]  }
0x15b3   : > { %9069 = vmatprep.subr.bf16.mxu1 %v9726_v42  ;;  %v9733_v42 = vld [vmem:[#allocation15 + $0x580] sm:$0xff]  }
0x15b6   : > { %9070 = vmatpush3.bf16.msra.mxu1 %v9727_v43 }
0x15b7   : > { %9071 = vmatprep.subr.bf16.mxu1 %v9728_v55 }
0x15ba   : > { %9072 = vmatpush3.bf16.msra.mxu1 %v9729_v60 }
0x15bb   : > { %9073 = vmatprep.subr.bf16.mxu1 %v9730_v39 }
0x15be   : > { %9074 = vmatpush3.bf16.msra.mxu1 %v9731_v50  ;;  %v6406_v50 = vld [vmem:[#allocation12 + $0x360] sm:$0xff] }
0x15bf   : > { %9075 = vmatprep.subr.bf16.mxu1 %v9732_v41  ;;  %v6407_v41 = vld [vmem:[#allocation12 + $0x3e0] sm:$0xff] }
0x15c2   : > { %9076 = vmatpush3.bf16.msra.mxu1 %v9733_v42 }
0x1645   : > { %v9055_v44 = vpop.f32.mrf.mxu1 }
0x1647   : > { %v9056_v45 = vpop.f32.mrf.mxu1 }
0x1648   : > { %v9057_v47 = vadd.f32 %v9056_v45, %v9055_v44 }
0x1649   : > { %v9058_v48 = vpop.f32.mrf.mxu1 }
0x164a   : > { %v11860_v21 = vadd.f32 %v9057_v47, %v11816_v36  ;;  %v11867_v36 = vld [vmem:[%s12251_s11 + $0x70] ss:$8 sps:$4 sm:$0xff]  }
0x164b   : > { %v9059_v23 = vpop.f32.mrf.mxu1 }
0x164c   : > { %v6412_v23 = vld [vmem:[#allocation12 + $0x660] sm:$0xff] }
0x1665   : > { %v6175_v52 = vpop.f32.mrf.mxu1 }
0x1666   : > { %v6176_v53 = vadd.f32 %v6175_v52, %v6050_v5 }
0x1667   : > { %v6177_v54 = vpop.f32.mrf.mxu1 }
0x1668   : > { %v6178_v19 = vadd.f32 %v6177_v54, %v6054_v49  ;;  %v6182_v57 = vmax.f32 %v6176_v53, 0.0  ;;  %v8654_v54 = vcombine.high %v6412_v23, %v6413_v24 }
0x1669   : > { %v6179_v35 = vpop.f32.mrf.mxu1 }
0x166a   : > { %v6183_v61 = vmax.f32 %v6178_v19, 0.0  ;;  %v6184_v8 = vpack.c.bf16 %v6182_v57, %v6182_v57  ;;  %v6410_v19 = vld [vmem:[#allocation12 + $0x560] sm:$0xff]  ;;  %v8653_v35 = vcombine.low %v6412_v23, %v6413_v24 }
0x166b   : > { %v6180_v46 = vpop.f32.mrf.mxu1  ;;  %v6411_v57 = vld [vmem:[#allocation12 + $0x5e0] sm:$0xff] }
0x166c   : > { %v6185_v7 = vpack.c.bf16 %v6183_v61, %v6183_v61  ;;  %v8652_v61 = vcombine.high %v6410_v19, %v6411_v57  ;;  %v6408_v46 = vld [vmem:[#allocation12 + $0x460] sm:$0xff] }
0x166e   : > { %6218 = vmatprep.mubr.bf16.mxu0 %v6185_v7  ;;  %v6409_v7 = vld [vmem:[#allocation12 + $0x4e0] sm:$0xff] }
0x166f   : > { %6219 = vmatmul.mubr.bf16.vlgmr.msra.gmra.mxu0 %v6184_v8  ;;  %v8651_v8 = vcombine.low %v6410_v19, %v6411_v57  ;;  %v8650_v39 = vcombine.high %v6408_v46, %v6409_v7  ;;  %v8649_v42 = vcombine.low %v6408_v46, %v6409_v7  ;;  %v9738_v19 = vld [vmem:[#allocation15 + $0x668] sm:$0xff]   ;;  %v9742_v46 = vld [vmem:[#allocation15 + $0x658] sm:$0xff]  }
0x1670   : > { %6558 = vmatpush1.bf16.msra.mxu0 %v11867_v36  ;;  %v9739_v57 = vld [vmem:[#allocation15 + $0x628] sm:$0xff]   ;;  %v9743_v7 = vld [vmem:[#allocation15 + $0x618] sm:$0xff]  }
0x1671   : > { %6559 = vmatprep.subr.bf16.mxu0 %v11873_v9 }
0x1674   : > { %6560 = vmatpush1.bf16.msra.mxu0 %v11879_v22 }
0x1675   : > { %6561 = vmatprep.subr.bf16.mxu0 %v11885_v58 }
0x1678   : > { %6562 = vmatpush1.bf16.msra.mxu0 %v11891_v6 }
0x1679   : > { %6563 = vmatprep.subr.bf16.mxu0 %v11897_v40 }
0x167c   : > { %6564 = vmatpush1.bf16.msra.mxu0 %v11903_v59 }
0x167d   : > { %6565 = vmatprep.subr.bf16.mxu0 %v11909_v51 }
0x1680   : > { %6566 = vmatpush1.bf16.msra.mxu0 %v11915_v10 }
0x1681   : > { %6567 = vmatprep.subr.bf16.mxu0 %v11921_v3 }
0x1684   : > { %6568 = vmatpush1.bf16.msra.mxu0 %v11927_v18 }
0x1685   : > { %6569 = vmatprep.subr.bf16.mxu0 %v11933_v2 }
0x1688   : > { %6570 = vmatpush1.bf16.msra.mxu0 %v11939_v16 }
0x1689   : > { %6571 = vmatprep.subr.bf16.mxu0 %v11945_v11 }
0x168c   : > { %6572 = vmatpush1.bf16.msra.mxu0 %v11951_v12 }
0x168d   : > { %6573 = vmatprep.subr.bf16.mxu0 %v11957_v1 }
0x1690   : > { %6574 = vmatpush2.bf16.msra.mxu0 %v11963_v14 }
0x1691   : > { %6575 = vmatprep.subr.bf16.mxu0 %v11969_v15 }
0x1694   : > { %6576 = vmatpush2.bf16.msra.mxu0 %v11975_v17 }
0x1695   : > { %6577 = vmatprep.subr.bf16.mxu0 %v11981_v25 }
0x1698   : > { %6578 = vmatpush2.bf16.msra.mxu0 %v11987_v26 }
0x1699   : > { %6579 = vmatprep.subr.bf16.mxu0 %v11993_v27 }
0x169c   : > { %6580 = vmatpush2.bf16.msra.mxu0 %v11999_v29 }
0x169d   : > { %6581 = vmatprep.subr.bf16.mxu0 %v12005_v34 }
0x16a0   : > { %6582 = vmatpush2.bf16.msra.mxu0 %v12011_v37 }
0x16a1   : > { %6583 = vmatprep.subr.bf16.mxu0 %v12017_v28 }
0x16a4   : > { %6584 = vmatpush2.bf16.msra.mxu0 %v12023_v30 }
0x16a5   : > { %6585 = vmatprep.subr.bf16.mxu0 %v11742_v4  ;;  %v6414_v4 = vld [vmem:[#allocation12 + $0x760] sm:$0xff] }
0x16a8   : > { %6586 = vmatpush2.bf16.msra.mxu0 %v11748_v31  ;;  %v6415_v31 = vld [vmem:[#allocation12 + $0x7e0] sm:$0x77] }
0x16a9   : > { %6587 = vmatprep.subr.bf16.mxu0 %v11754_v32  ;;  %v8656_v32 = vcombine.high %v6414_v4, %v6415_v31  ;;  %v8655_v43 = vcombine.low %v6414_v4, %v6415_v31  ;;  %v8648_v4 = vcombine.high %v6406_v50, %v6407_v41  ;;  %v6404_v31 = vld [vmem:[#allocation12 + $0x260] sm:$0xff] }
0x16ab   : > { %8657 = vmatprep.subr.msk.bf16.mxu1 %vm880_vm0, %v8656_v32  ;;  %v6507_v53 = vsel %vm880_vm0, %v8655_v43, 0  ;;  %v6405_v32 = vld [vmem:[#allocation12 + $0x2e0] sm:$0xff]  ;;  %v8647_v43 = vcombine.low %v6406_v50, %v6407_v41 }
0x16ac   : > { %6588 = vmatpush2.bf16.msra.mxu0 %v11760_v33 }
0x16ad   : > { %6928 = vmatprep.subr.bf16.mxu0 %v12033_v38 }
0x172f   : > { %v6220_v33 = vpop.f32.mrf.mxu0 }
0x1730   : > { %v6221_v55 = vadd.f32 %v6220_v33, %v11105_v56  ;;  %v8646_v33 = vcombine.high %v6404_v31, %v6405_v32 }
0x1731   : > { %v6222_v60 = vpop.f32.mrf.mxu0 }
0x1732   : > { %v6223_v44 = vadd.f32 %v6222_v60, %v11102_v20  ;;  %v6227_v45 = vmax.f32 %v6221_v55, 0.0  ;;  %v6402_v55 = vld [vmem:[#allocation12 + $0x160] sm:$0xff] }
0x1733   : > { %v6224_v47 = vpop.f32.mrf.mxu0  ;;  %v6403_v60 = vld [vmem:[#allocation12 + $0x1e0] sm:$0xff] }
0x1734   : > { %v6228_v48 = vmax.f32 %v6223_v44, 0.0  ;;  %v6229_v52 = vpack.c.bf16 %v6227_v45, %v6227_v45  ;;  %v8645_v44 = vcombine.low %v6404_v31, %v6405_v32  ;;  %v8644_v45 = vcombine.high %v6402_v55, %v6403_v60  ;;  %v6400_v47 = vld [vmem:[#allocation12 + $0x60] sm:$0xff] }
0x1735   : > { %v6225_v5 = vpop.f32.mrf.mxu0  ;;  %v8643_v23 = vcombine.low %v6402_v55, %v6403_v60 }
0x1736   : > { %v6230_v49 = vpack.c.bf16 %v6228_v48, %v6228_v48  ;;  %v6401_v48 = vld [vmem:[#allocation12 + $0xe0] sm:$0xff] }
0x1737   : > { %v8642_v24 = vcombine.high %v6400_v47, %v6401_v48  ;;  %v8641_v5 = vcombine.low %v6400_v47, %v6401_v48 }
0x1738   : > { %6391 = vmatprep.mubr.bf16.mxu1 %v6230_v49  ;;  %v9734_v49 = vld [vmem:[#allocation15 + $0x678] sm:$0xff]  }
0x1739   : > { %6392 = vmatmul.mubr.bf16.vlgmr.msra.gmra.mxu1 %v6229_v52  ;;  %v9735_v52 = vld [vmem:[#allocation15 + $0x638] sm:$0xff]  }
0x173a   : > { %6513 = vmatpush1.bf16.msra.mxu1 %v6507_v53  ;;  %6544 = vmatprep.mubr.bf16.mxu1 %v10280_v13  ;;  %v9736_v53 = vld [vmem:[#allocation15 + $0x670] sm:$0xff]  }
0x173b   : > { %6514 = vmatprep.subr.bf16.mxu1 %v8654_v54  ;;  %v9737_v54 = vld [vmem:[#allocation15 + $0x630] sm:$0xff]  }
0x173e   : > { %6515 = vmatpush1.bf16.msra.mxu1 %v8653_v35  ;;  %v9740_v35 = vld [vmem:[#allocation15 + $0x660] sm:$0xff]  }
0x173f   : > { %6516 = vmatprep.subr.bf16.mxu1 %v8652_v61  ;;  %v9741_v61 = vld [vmem:[#allocation15 + $0x620] sm:$0xff]  }
0x1742   : > { %6517 = vmatpush1.bf16.msra.mxu1 %v8651_v8  ;;  %v9744_v8 = vld [vmem:[#allocation15 + $0x650] sm:$0xff]  }
0x1743   : > { %6518 = vmatprep.subr.bf16.mxu1 %v8650_v39  ;;  %v9745_v39 = vld [vmem:[#allocation15 + $0x610] sm:$0xff]  }
0x1746   : > { %6519 = vmatpush1.bf16.msra.mxu1 %v8649_v42 }
0x1747   : > { %6520 = vmatprep.subr.bf16.mxu1 %v8648_v4 }
0x174a   : > { %6521 = vmatpush1.bf16.msra.mxu1 %v8647_v43  ;;  %v6416_v43 = vld [vmem:[#allocation13 + $0x18] sm:$0x3] }
0x174b   : > { %6522 = vmatprep.subr.bf16.mxu1 %v8646_v33  ;;  %v6421_v33 = vrot.slane %v6416_v43, %v11086_v63  ;;  %v6425_v55 = vrot.slane %v6416_v43, %v11088_v0 }
0x174e   : > { %6523 = vmatpush1.bf16.msra.mxu1 %v8645_v44 }
0x174f   : > { %6524 = vmatprep.subr.bf16.mxu1 %v8644_v45 }
0x1752   : > { %6525 = vmatpush1.bf16.msra.mxu1 %v8643_v23 }
0x1753   : > { %6526 = vmatprep.subr.bf16.mxu1 %v8642_v24 }
0x1756   : > { %6527 = vmatpush1.bf16.msra.mxu1 %v8641_v5 }
0x1757   : > { %9083 = vmatprep.subr.bf16.mxu1 %v9734_v49 }
0x1759   : > { %8658 = vmatmul.mubr.msk.bf16.vlgmr.msra.gmra.mxu1 %vm1882_vm11, %v11022_v62 }
0x175a   : > { %9084 = vmatpush3.bf16.msra.mxu1 %v9735_v52 }
0x175b   : > { %9085 = vmatprep.subr.bf16.mxu1 %v9736_v53  ;;  %v12084_v53 = vld [vmem:[%s12251_s11 + $0x90] ss:$8 sps:$4 sm:$0xff]  }
0x175e   : > { %9086 = vmatpush3.bf16.msra.mxu1 %v9737_v54  ;;  %v12090_v54 = vld [vmem:[%s12251_s11 + $0x84] ss:$8 sps:$4 sm:$0xff]  }
0x175f   : > { %9087 = vmatprep.subr.bf16.mxu1 %v9738_v19  ;;  %v12096_v19 = vld [vmem:[%s12251_s11 + $0x80] ss:$8 sps:$4 sm:$0xff]  }
0x1762   : > { %9088 = vmatpush3.bf16.msra.mxu1 %v9739_v57  ;;  %v9746_v57 = vld [vmem:[#allocation15 + $0x648] sm:$0xff]  }
0x1763   : > { %9089 = vmatprep.subr.bf16.mxu1 %v9740_v35  ;;  %v9747_v35 = vld [vmem:[#allocation15 + $0x608] sm:$0xff]  }
0x1766   : > { %9090 = vmatpush3.bf16.msra.mxu1 %v9741_v61  ;;  %v9748_v61 = vld [vmem:[#allocation15 + $0x640] sm:$0xff]  }
0x1767   : > { %9091 = vmatprep.subr.bf16.mxu1 %v9742_v46  ;;  %v9749_v46 = vld [vmem:[#allocation15 + $0x600] sm:$0xff]  }
0x176a   : > { %9092 = vmatpush3.bf16.msra.mxu1 %v9743_v7  ;;  %v6785_v7 = vld [vmem:[#allocation12 + $0x768] sm:$0xff] }
0x176b   : > { %9093 = vmatprep.subr.bf16.mxu1 %v9744_v8  ;;  %v6786_v8 = vld [vmem:[#allocation12 + $0x7e8] sm:$0x77] }
0x176e   : > { %9094 = vmatpush3.bf16.msra.mxu1 %v9745_v39  ;;  %v8690_v39 = vcombine.high %v6785_v7, %v6786_v8 }
0x176f   : > { %9095 = vmatprep.subr.bf16.mxu1 %v9746_v57 }
0x1772   : > { %9096 = vmatpush3.bf16.msra.mxu1 %v9747_v35  ;;  %v6779_v35 = vld [vmem:[#allocation12 + $0x468] sm:$0xff] }
0x1773   : > { %9097 = vmatprep.subr.bf16.mxu1 %v9748_v61  ;;  %v6780_v61 = vld [vmem:[#allocation12 + $0x4e8] sm:$0xff] }
0x1776   : > { %9098 = vmatpush3.bf16.msra.mxu1 %v9749_v46 }
0x1777   : > { %8691 = vmatprep.subr.msk.bf16.mxu1 %vm880_vm0, %v8690_v39  ;;  %v6778_v39 = vld [vmem:[#allocation12 + $0x3e8] sm:$0xff] }
0x17f9   : > { %v9077_v50 = vpop.f32.mrf.mxu1 }
0x17fb   : > { %v9078_v41 = vpop.f32.mrf.mxu1 }
0x17fc   : > { %v9079_v42 = vadd.f32 %v9078_v41, %v9077_v50  ;;  %v8689_v50 = vcombine.low %v6785_v7, %v6786_v8  ;;  %v8684_v7 = vcombine.high %v6779_v35, %v6780_v61  ;;  %v6777_v8 = vld [vmem:[#allocation12 + $0x368] sm:$0xff] }
0x17fd   : > { %v9080_v4 = vpop.f32.mrf.mxu1 }
0x17fe   : > { %v12044_v31 = vadd.f32 %v9079_v42, %v11860_v21  ;;  %v12078_v21 = vld [vmem:[%s12251_s11 + $0x94] ss:$8 sps:$4 sm:$0xff]  }
0x17ff   : > { %v9081_v32 = vpop.f32.mrf.mxu1 }
0x1819   : > { %v6546_v60 = vpop.f32.mrf.mxu1 }
0x181a   : > { %v6547_v44 = vadd.f32 %v6546_v60, %v6421_v33  ;;  %v6783_v60 = vld [vmem:[#allocation12 + $0x668] sm:$0xff] }
0x181b   : > { %v6548_v45 = vpop.f32.mrf.mxu1 }
0x181c   : > { %v6549_v47 = vadd.f32 %v6548_v45, %v6425_v55  ;;  %v6553_v48 = vmax.f32 %v6547_v44, 0.0  ;;  %v6784_v44 = vld [vmem:[#allocation12 + $0x6e8] sm:$0xff] }
0x181d   : > { %v6550_v23 = vpop.f32.mrf.mxu1 }
0x181e   : > { %v6554_v24 = vmax.f32 %v6549_v47, 0.0  ;;  %v6555_v52 = vpack.c.bf16 %v6553_v48, %v6553_v48  ;;  %v6878_v23 = vsel %vm880_vm0, %v8689_v50, 0  ;;  %v8683_v50 = vcombine.low %v6779_v35, %v6780_v61  ;;  %v9754_v35 = vld [vmem:[#allocation15 + $0x6e8] sm:$0xff]  }
0x181f   : > { %v6551_v5 = vpop.f32.mrf.mxu1  ;;  %v9755_v61 = vld [vmem:[#allocation15 + $0x6a8] sm:$0xff]  }
0x1820   : > { %v6556_v49 = vpack.c.bf16 %v6554_v24, %v6554_v24  ;;  %v8688_v24 = vcombine.high %v6783_v60, %v6784_v44  ;;  %v6781_v5 = vld [vmem:[#allocation12 + $0x568] sm:$0xff] }
0x1822   : > { %6589 = vmatprep.mubr.bf16.mxu0 %v6556_v49  ;;  %v6782_v49 = vld [vmem:[#allocation12 + $0x5e8] sm:$0xff] }
0x1823   : > { %6590 = vmatmul.mubr.bf16.vlgmr.msra.gmra.mxu0 %v6555_v52  ;;  %v8687_v52 = vcombine.low %v6783_v60, %v6784_v44  ;;  %v8686_v57 = vcombine.high %v6781_v5, %v6782_v49  ;;  %v8685_v46 = vcombine.low %v6781_v5, %v6782_v49  ;;  %v9750_v5 = vld [vmem:[#allocation15 + $0x6f8] sm:$0xff]  }
0x1824   : > { %6929 = vmatpush1.bf16.msra.mxu0 %v11867_v36  ;;  %v9751_v49 = vld [vmem:[#allocation15 + $0x6b8] sm:$0xff]  }
0x1825   : > { %6930 = vmatprep.subr.bf16.mxu0 %v11873_v9 }
0x1828   : > { %6931 = vmatpush1.bf16.msra.mxu0 %v11879_v22 }
0x1829   : > { %6932 = vmatprep.subr.bf16.mxu0 %v11885_v58 }
0x182c   : > { %6933 = vmatpush1.bf16.msra.mxu0 %v11891_v6 }
0x182d   : > { %6934 = vmatprep.subr.bf16.mxu0 %v11897_v40 }
0x1830   : > { %6935 = vmatpush1.bf16.msra.mxu0 %v11903_v59 }
0x1831   : > { %6936 = vmatprep.subr.bf16.mxu0 %v11909_v51 }
0x1834   : > { %6937 = vmatpush1.bf16.msra.mxu0 %v11915_v10 }
0x1835   : > { %6938 = vmatprep.subr.bf16.mxu0 %v11921_v3 }
0x1838   : > { %6939 = vmatpush1.bf16.msra.mxu0 %v11927_v18 }
0x1839   : > { %6940 = vmatprep.subr.bf16.mxu0 %v11933_v2 }
0x183c   : > { %6941 = vmatpush1.bf16.msra.mxu0 %v11939_v16 }
0x183d   : > { %6942 = vmatprep.subr.bf16.mxu0 %v11945_v11 }
0x1840   : > { %6943 = vmatpush1.bf16.msra.mxu0 %v11951_v12 }
0x1841   : > { %6944 = vmatprep.subr.bf16.mxu0 %v11957_v1 }
0x1844   : > { %6945 = vmatpush2.bf16.msra.mxu0 %v11963_v14 }
0x1845   : > { %6946 = vmatprep.subr.bf16.mxu0 %v11969_v15 }
0x1848   : > { %6947 = vmatpush2.bf16.msra.mxu0 %v11975_v17 }
0x1849   : > { %6948 = vmatprep.subr.bf16.mxu0 %v11981_v25 }
0x184c   : > { %6949 = vmatpush2.bf16.msra.mxu0 %v11987_v26 }
0x184d   : > { %6950 = vmatprep.subr.bf16.mxu0 %v11993_v27 }
0x1850   : > { %6951 = vmatpush2.bf16.msra.mxu0 %v11999_v29 }
0x1851   : > { %6952 = vmatprep.subr.bf16.mxu0 %v12005_v34 }
0x1854   : > { %6953 = vmatpush2.bf16.msra.mxu0 %v12011_v37 }
0x1855   : > { %6954 = vmatprep.subr.bf16.mxu0 %v12017_v28 }
0x1858   : > { %6955 = vmatpush2.bf16.msra.mxu0 %v12023_v30 }
0x1859   : > { %6956 = vmatprep.subr.bf16.mxu0 %v12078_v21 }
0x185c   : > { %6957 = vmatpush2.bf16.msra.mxu0 %v12084_v53 }
0x185d   : > { %6958 = vmatprep.subr.bf16.mxu0 %v12090_v54 }
0x1860   : > { %6959 = vmatpush2.bf16.msra.mxu0 %v12096_v19 }
0x1861   : > { %7299 = vmatprep.subr.bf16.mxu0 %v12033_v38 }
0x18e3   : > { %v6591_v41 = vpop.f32.mrf.mxu0 }
0x18e4   : > { %v6592_v42 = vadd.f32 %v6591_v41, %v11105_v56  ;;  %v8682_v41 = vcombine.high %v6777_v8, %v6778_v39 }
0x18e5   : > { %v6593_v4 = vpop.f32.mrf.mxu0 }
0x18e6   : > { %v6594_v32 = vadd.f32 %v6593_v4, %v11102_v20  ;;  %v6598_v43 = vmax.f32 %v6592_v42, 0.0  ;;  %v6775_v42 = vld [vmem:[#allocation12 + $0x268] sm:$0xff] }
0x18e7   : > { %v6595_v33 = vpop.f32.mrf.mxu0  ;;  %v6776_v4 = vld [vmem:[#allocation12 + $0x2e8] sm:$0xff] }
0x18e8   : > { %v6599_v55 = vmax.f32 %v6594_v32, 0.0  ;;  %v6600_v48 = vpack.c.bf16 %v6598_v43, %v6598_v43  ;;  %v8681_v32 = vcombine.low %v6777_v8, %v6778_v39  ;;  %v8680_v43 = vcombine.high %v6775_v42, %v6776_v4  ;;  %v6773_v33 = vld [vmem:[#allocation12 + $0x168] sm:$0xff]  ;;  %v9758_v8 = vld [vmem:[#allocation15 + $0x6d8] sm:$0xff]  }
0x18e9   : > { %v6596_v45 = vpop.f32.mrf.mxu0  ;;  %v8679_v60 = vcombine.low %v6775_v42, %v6776_v4  ;;  %v9759_v39 = vld [vmem:[#allocation15 + $0x698] sm:$0xff]  }
0x18ea   : > { %v6601_v47 = vpack.c.bf16 %v6599_v55, %v6599_v55  ;;  %v6774_v55 = vld [vmem:[#allocation12 + $0x1e8] sm:$0xff] }
0x18eb   : > { %v8678_v44 = vcombine.high %v6773_v33, %v6774_v55  ;;  %v6771_v45 = vld [vmem:[#allocation12 + $0x68] sm:$0xff] }
0x18ec   : > { %6762 = vmatprep.mubr.bf16.mxu1 %v6601_v47  ;;  %v6772_v47 = vld [vmem:[#allocation12 + $0xe8] sm:$0xff] }
0x18ed   : > { %6763 = vmatmul.mubr.bf16.vlgmr.msra.gmra.mxu1 %v6600_v48  ;;  %v8677_v48 = vcombine.low %v6773_v33, %v6774_v55 }
0x18ee   : > { %6884 = vmatpush1.bf16.msra.mxu1 %v6878_v23  ;;  %6915 = vmatprep.mubr.bf16.mxu1 %v10280_v13  ;;  %v8676_v23 = vcombine.high %v6771_v45, %v6772_v47 }
0x18ef   : > { %6885 = vmatprep.subr.bf16.mxu1 %v8688_v24  ;;  %v8675_v24 = vcombine.low %v6771_v45, %v6772_v47 }
0x18f2   : > { %6886 = vmatpush1.bf16.msra.mxu1 %v8687_v52  ;;  %v9752_v52 = vld [vmem:[#allocation15 + $0x6f0] sm:$0xff]  }
0x18f3   : > { %6887 = vmatprep.subr.bf16.mxu1 %v8686_v57  ;;  %v9753_v57 = vld [vmem:[#allocation15 + $0x6b0] sm:$0xff]  }
0x18f6   : > { %6888 = vmatpush1.bf16.msra.mxu1 %v8685_v46  ;;  %v9756_v46 = vld [vmem:[#allocation15 + $0x6e0] sm:$0xff]  }
0x18f7   : > { %6889 = vmatprep.subr.bf16.mxu1 %v8684_v7  ;;  %v9757_v7 = vld [vmem:[#allocation15 + $0x6a0] sm:$0xff]  }
0x18fa   : > { %6890 = vmatpush1.bf16.msra.mxu1 %v8683_v50  ;;  %v9760_v50 = vld [vmem:[#allocation15 + $0x6d0] sm:$0xff]  }
0x18fb   : > { %6891 = vmatprep.subr.bf16.mxu1 %v8682_v41  ;;  %v9761_v41 = vld [vmem:[#allocation15 + $0x690] sm:$0xff]  }
0x18fe   : > { %6892 = vmatpush1.bf16.msra.mxu1 %v8681_v32 }
0x18ff   : > { %6893 = vmatprep.subr.bf16.mxu1 %v8680_v43 }
0x1902   : > { %6894 = vmatpush1.bf16.msra.mxu1 %v8679_v60  ;;  %v6787_v60 = vld [vmem:[#allocation13 + $0x1a] sm:$0x3] }
0x1903   : > { %6895 = vmatprep.subr.bf16.mxu1 %v8678_v44  ;;  %v6792_v44 = vrot.slane %v6787_v60, %v11086_v63  ;;  %v6796_v45 = vrot.slane %v6787_v60, %v11088_v0 }
0x1906   : > { %6896 = vmatpush1.bf16.msra.mxu1 %v8677_v48 }
0x1907   : > { %6897 = vmatprep.subr.bf16.mxu1 %v8676_v23 }
0x190a   : > { %6898 = vmatpush1.bf16.msra.mxu1 %v8675_v24 }
0x190b   : > { %9105 = vmatprep.subr.bf16.mxu1 %v9750_v5 }
0x190d   : > { %8692 = vmatmul.mubr.msk.bf16.vlgmr.msra.gmra.mxu1 %vm1882_vm11, %v11022_v62 }
0x190e   : > { %9106 = vmatpush3.bf16.msra.mxu1 %v9751_v49 }
0x190f   : > { %9107 = vmatprep.subr.bf16.mxu1 %v9752_v52 }
0x1912   : > { %9108 = vmatpush3.bf16.msra.mxu1 %v9753_v57 }
0x1913   : > { %9109 = vmatprep.subr.bf16.mxu1 %v9754_v35 }
0x1916   : > { %9110 = vmatpush3.bf16.msra.mxu1 %v9755_v61 }
0x1917   : > { %9111 = vmatprep.subr.bf16.mxu1 %v9756_v46  ;;  %v9763_v46 = vld [vmem:[#allocation15 + $0x688] sm:$0xff]  }
0x191a   : > { %9112 = vmatpush3.bf16.msra.mxu1 %v9757_v7  ;;  %v9764_v7 = vld [vmem:[#allocation15 + $0x6c0] sm:$0xff]  }
0x191b   : > { %9113 = vmatprep.subr.bf16.mxu1 %v9758_v8  ;;  %v9765_v8 = vld [vmem:[#allocation15 + $0x680] sm:$0xff]  }
0x191e   : > { %9114 = vmatpush3.bf16.msra.mxu1 %v9759_v39  ;;  %v7156_v39 = vld [vmem:[#allocation12 + $0x770] sm:$0xff] }
0x191f   : > { %9115 = vmatprep.subr.bf16.mxu1 %v9760_v50  ;;  %v7157_v50 = vld [vmem:[#allocation12 + $0x7f0] sm:$0x77] }
0x1922   : > { %9116 = vmatpush3.bf16.msra.mxu1 %v9761_v41  ;;  %v8724_v41 = vcombine.high %v7156_v39, %v7157_v50 }
0x19ad   : > { %v9099_v42 = vpop.f32.mrf.mxu1 }
0x19af   : > { %v9100_v4 = vpop.f32.mrf.mxu1 }
0x19b0   : > { %v9101_v32 = vadd.f32 %v9100_v4, %v9099_v42  ;;  %v8723_v42 = vcombine.low %v7156_v39, %v7157_v50  ;;  %v7148_v39 = vld [vmem:[#allocation12 + $0x370] sm:$0xff] }
0x19b1   : > { %v9102_v43 = vpop.f32.mrf.mxu1  ;;  %v7149_v50 = vld [vmem:[#allocation12 + $0x3f0] sm:$0xff] }
0x19b2   : > { %v12108_v33 = vadd.f32 %v9101_v32, %v12044_v31  ;;  %v9762_v31 = vld [vmem:[#allocation15 + $0x6c8] sm:$0xff]  }
0x19b3   : > { %v9103_v55 = vpop.f32.mrf.mxu1  ;;  %9117 = vmatprep.subr.bf16.mxu1 %v9762_v31  ;;  %v7150_v31 = vld [vmem:[#allocation12 + $0x470] sm:$0xff] }
0x19b4   : > { %9118 = vmatpush3.bf16.msra.mxu1 %v9763_v46  ;;  %v7151_v46 = vld [vmem:[#allocation12 + $0x4f0] sm:$0xff] }
0x19b5   : > { %9119 = vmatprep.subr.bf16.mxu1 %v9764_v7 }
0x19b8   : > { %9120 = vmatpush3.bf16.msra.mxu1 %v9765_v8  ;;  %v8718_v8 = vcombine.high %v7150_v31, %v7151_v46 }
0x19b9   : > { %8725 = vmatprep.subr.msk.bf16.mxu1 %vm880_vm0, %v8724_v41  ;;  %v8717_v41 = vcombine.low %v7150_v31, %v7151_v46  ;;  %v9771_v31 = vld [vmem:[#allocation15 + $0x728] sm:$0xff]   ;;  %v9772_v46 = vld [vmem:[#allocation15 + $0x760] sm:$0xff]  }
0x19cd   : > { %v6917_v47 = vpop.f32.mrf.mxu1 }
0x19ce   : > { %v6918_v48 = vadd.f32 %v6917_v47, %v6792_v44  ;;  %v7155_v47 = vld [vmem:[#allocation12 + $0x6f0] sm:$0xff] }
0x19cf   : > { %v6919_v23 = vpop.f32.mrf.mxu1 }
0x19d0   : > { %v6920_v24 = vadd.f32 %v6919_v23, %v6796_v45  ;;  %v6924_v5 = vmax.f32 %v6918_v48, 0.0  ;;  %v7154_v45 = vld [vmem:[#allocation12 + $0x670] sm:$0xff] }
0x19d1   : > { %v6921_v49 = vpop.f32.mrf.mxu1 }
0x19d2   : > { %v6925_v52 = vmax.f32 %v6920_v24, 0.0  ;;  %v6926_v61 = vpack.c.bf16 %v6924_v5, %v6924_v5  ;;  %v7249_v5 = vsel %vm880_vm0, %v8723_v42, 0  ;;  %v8722_v49 = vcombine.high %v7154_v45, %v7155_v47 }
0x19d3   : > { %v6922_v57 = vpop.f32.mrf.mxu1  ;;  %v8716_v42 = vcombine.high %v7148_v39, %v7149_v50 }
0x19d4   : > { %v6927_v35 = vpack.c.bf16 %v6925_v52, %v6925_v52  ;;  %v7152_v52 = vld [vmem:[#allocation12 + $0x570] sm:$0xff] }
0x19d5   : > { %v7153_v57 = vld [vmem:[#allocation12 + $0x5f0] sm:$0xff] }
0x19d6   : > { %6960 = vmatprep.mubr.bf16.mxu0 %v6927_v35  ;;  %v8721_v35 = vcombine.low %v7154_v45, %v7155_v47  ;;  %v8719_v7 = vcombine.low %v7152_v52, %v7153_v57  ;;  %v7142_v47 = vld [vmem:[#allocation12 + $0x70] sm:$0xff] }
0x19d7   : > { %6961 = vmatmul.mubr.bf16.vlgmr.msra.gmra.mxu0 %v6926_v61  ;;  %v8720_v61 = vcombine.high %v7152_v52, %v7153_v57  ;;  %v9767_v52 = vld [vmem:[#allocation15 + $0x738] sm:$0xff]   ;;  %v9768_v57 = vld [vmem:[#allocation15 + $0x770] sm:$0xff]  }
0x19d8   : > { %7300 = vmatpush1.bf16.msra.mxu0 %v11867_v36 }
0x19d9   : > { %7301 = vmatprep.subr.bf16.mxu0 %v11873_v9 }
0x19dc   : > { %7302 = vmatpush1.bf16.msra.mxu0 %v11879_v22 }
0x19dd   : > { %7303 = vmatprep.subr.bf16.mxu0 %v11885_v58 }
0x19e0   : > { %7304 = vmatpush1.bf16.msra.mxu0 %v11891_v6 }
0x19e1   : > { %7305 = vmatprep.subr.bf16.mxu0 %v11897_v40 }
0x19e4   : > { %7306 = vmatpush1.bf16.msra.mxu0 %v11903_v59 }
0x19e5   : > { %7307 = vmatprep.subr.bf16.mxu0 %v11909_v51 }
0x19e8   : > { %7308 = vmatpush1.bf16.msra.mxu0 %v11915_v10 }
0x19e9   : > { %7309 = vmatprep.subr.bf16.mxu0 %v11921_v3 }
0x19ec   : > { %7310 = vmatpush1.bf16.msra.mxu0 %v11927_v18 }
0x19ed   : > { %7311 = vmatprep.subr.bf16.mxu0 %v11933_v2 }
0x19f0   : > { %7312 = vmatpush1.bf16.msra.mxu0 %v11939_v16 }
0x19f1   : > { %7313 = vmatprep.subr.bf16.mxu0 %v11945_v11 }
0x19f4   : > { %7314 = vmatpush1.bf16.msra.mxu0 %v11951_v12 }
0x19f5   : > { %7315 = vmatprep.subr.bf16.mxu0 %v11957_v1 }
0x19f8   : > { %7316 = vmatpush2.bf16.msra.mxu0 %v11963_v14 }
0x19f9   : > { %7317 = vmatprep.subr.bf16.mxu0 %v11969_v15 }
0x19fc   : > { %7318 = vmatpush2.bf16.msra.mxu0 %v11975_v17 }
0x19fd   : > { %7319 = vmatprep.subr.bf16.mxu0 %v11981_v25 }
0x1a00   : > { %7320 = vmatpush2.bf16.msra.mxu0 %v11987_v26 }
0x1a01   : > { %7321 = vmatprep.subr.bf16.mxu0 %v11993_v27 }
0x1a04   : > { %7322 = vmatpush2.bf16.msra.mxu0 %v11999_v29 }
0x1a05   : > { %7323 = vmatprep.subr.bf16.mxu0 %v12005_v34 }
0x1a08   : > { %7324 = vmatpush2.bf16.msra.mxu0 %v12011_v37 }
0x1a09   : > { %7325 = vmatprep.subr.bf16.mxu0 %v12017_v28 }
0x1a0c   : > { %7326 = vmatpush2.bf16.msra.mxu0 %v12023_v30 }
0x1a0d   : > { %7327 = vmatprep.subr.bf16.mxu0 %v12078_v21 }
0x1a10   : > { %7328 = vmatpush2.bf16.msra.mxu0 %v12084_v53 }
0x1a11   : > { %7329 = vmatprep.subr.bf16.mxu0 %v12090_v54 }
0x1a14   : > { %7330 = vmatpush2.bf16.msra.mxu0 %v12096_v19 }
0x1a15   : > { %7670 = vmatprep.subr.bf16.mxu0 %v12033_v38 }
0x1a97   : > { %v6962_v4 = vpop.f32.mrf.mxu0 }
0x1a98   : > { %v6963_v32 = vadd.f32 %v6962_v4, %v11105_v56  ;;  %v7146_v4 = vld [vmem:[#allocation12 + $0x270] sm:$0xff] }
0x1a99   : > { %v6964_v43 = vpop.f32.mrf.mxu0 }
0x1a9a   : > { %v6965_v38 = vadd.f32 %v6964_v43, %v11102_v20  ;;  %v6969_v55 = vmax.f32 %v6963_v32, 0.0  ;;  %v7147_v32 = vld [vmem:[#allocation12 + $0x2f0] sm:$0xff]  ;;  %v8715_v43 = vcombine.low %v7148_v39, %v7149_v50  ;;  %v9775_v39 = vld [vmem:[#allocation15 + $0x718] sm:$0xff]  }
0x1a9b   : > { %v6966_v60 = vpop.f32.mrf.mxu0  ;;  %v9776_v50 = vld [vmem:[#allocation15 + $0x750] sm:$0xff]  }
0x1a9c   : > { %v6970_v44 = vmax.f32 %v6965_v38, 0.0  ;;  %v6971_v24 = vpack.c.bf16 %v6969_v55, %v6969_v55  ;;  %v8714_v38 = vcombine.high %v7146_v4, %v7147_v32  ;;  %v7144_v55 = vld [vmem:[#allocation12 + $0x170] sm:$0xff] }
0x1a9d   : > { %v6967_v48 = vpop.f32.mrf.mxu0  ;;  %v7145_v60 = vld [vmem:[#allocation12 + $0x1f0] sm:$0xff] }
0x1a9e   : > { %v6972_v23 = vpack.c.bf16 %v6970_v44, %v6970_v44  ;;  %v8713_v44 = vcombine.low %v7146_v4, %v7147_v32  ;;  %v8712_v45 = vcombine.high %v7144_v55, %v7145_v60  ;;  %v7143_v48 = vld [vmem:[#allocation12 + $0xf0] sm:$0xff] }
0x1aa0   : > { %7133 = vmatprep.mubr.bf16.mxu1 %v6972_v23  ;;  %v8711_v23 = vcombine.low %v7144_v55, %v7145_v60  ;;  %v7158_v60 = vld [vmem:[#allocation13 + $0x1c] sm:$0x3] }
0x1aa1   : > { %7134 = vmatmul.mubr.bf16.vlgmr.msra.gmra.mxu1 %v6971_v24  ;;  %v8710_v24 = vcombine.high %v7142_v47, %v7143_v48 }
0x1aa2   : > { %7255 = vmatpush1.bf16.msra.mxu1 %v7249_v5  ;;  %7286 = vmatprep.mubr.bf16.mxu1 %v10280_v13  ;;  %v8709_v5 = vcombine.low %v7142_v47, %v7143_v48 }
0x1aa3   : > { %7256 = vmatprep.subr.bf16.mxu1 %v8722_v49  ;;  %v9766_v49 = vld [vmem:[#allocation15 + $0x778] sm:$0xff]  }
0x1aa6   : > { %7257 = vmatpush1.bf16.msra.mxu1 %v8721_v35  ;;  %v9769_v35 = vld [vmem:[#allocation15 + $0x730] sm:$0xff]  }
0x1aa7   : > { %7258 = vmatprep.subr.bf16.mxu1 %v8720_v61  ;;  %v9770_v61 = vld [vmem:[#allocation15 + $0x768] sm:$0xff]  }
0x1aaa   : > { %7259 = vmatpush1.bf16.msra.mxu1 %v8719_v7  ;;  %v9773_v7 = vld [vmem:[#allocation15 + $0x720] sm:$0xff]  }
0x1aab   : > { %7260 = vmatprep.subr.bf16.mxu1 %v8718_v8  ;;  %v9774_v8 = vld [vmem:[#allocation15 + $0x758] sm:$0xff]  }
0x1aae   : > { %7261 = vmatpush1.bf16.msra.mxu1 %v8717_v41  ;;  %v9777_v41 = vld [vmem:[#allocation15 + $0x710] sm:$0xff]  }
0x1aaf   : > { %7262 = vmatprep.subr.bf16.mxu1 %v8716_v42 }
0x1ab2   : > { %7263 = vmatpush1.bf16.msra.mxu1 %v8715_v43 }
0x1ab3   : > { %7264 = vmatprep.subr.bf16.mxu1 %v8714_v38 }
0x1ab6   : > { %7265 = vmatpush1.bf16.msra.mxu1 %v8713_v44  ;;  %v7163_v44 = vrot.slane %v7158_v60, %v11086_v63 }
0x1ab7   : > { %7266 = vmatprep.subr.bf16.mxu1 %v8712_v45  ;;  %v7167_v45 = vrot.slane %v7158_v60, %v11088_v0 }
0x1aba   : > { %7267 = vmatpush1.bf16.msra.mxu1 %v8711_v23 }
0x1abb   : > { %7268 = vmatprep.subr.bf16.mxu1 %v8710_v24 }
0x1abe   : > { %7269 = vmatpush1.bf16.msra.mxu1 %v8709_v5 }
0x1abf   : > { %9127 = vmatprep.subr.bf16.mxu1 %v9766_v49 }
0x1ac1   : > { %8726 = vmatmul.mubr.msk.bf16.vlgmr.msra.gmra.mxu1 %vm1882_vm11, %v11022_v62 }
0x1ac2   : > { %9128 = vmatpush3.bf16.msra.mxu1 %v9767_v52 }
0x1ac3   : > { %9129 = vmatprep.subr.bf16.mxu1 %v9768_v57 }
0x1ac6   : > { %9130 = vmatpush3.bf16.msra.mxu1 %v9769_v35 }
0x1ac7   : > { %9131 = vmatprep.subr.bf16.mxu1 %v9770_v61 }
0x1aca   : > { %9132 = vmatpush3.bf16.msra.mxu1 %v9771_v31 }
0x1acb   : > { %9133 = vmatprep.subr.bf16.mxu1 %v9772_v46 }
0x1ace   : > { %9134 = vmatpush3.bf16.msra.mxu1 %v9773_v7  ;;  %v7517_v7 = vld [vmem:[#allocation12 + $0x278] sm:$0xff] }
0x1acf   : > { %9135 = vmatprep.subr.bf16.mxu1 %v9774_v8  ;;  %v7518_v8 = vld [vmem:[#allocation12 + $0x2f8] sm:$0xff] }
0x1ad2   : > { %9136 = vmatpush3.bf16.msra.mxu1 %v9775_v39 }
0x1ad3   : > { %9137 = vmatprep.subr.bf16.mxu1 %v9776_v50  ;;  %v7515_v50 = vld [vmem:[#allocation12 + $0x178] sm:$0xff] }
0x1ad6   : > { %9138 = vmatpush3.bf16.msra.mxu1 %v9777_v41  ;;  %v7516_v41 = vld [vmem:[#allocation12 + $0x1f8] sm:$0xff] }
0x1b61   : > { %v9121_v42 = vpop.f32.mrf.mxu1 }
0x1b63   : > { %v9122_v4 = vpop.f32.mrf.mxu1 }
0x1b64   : > { %v9123_v32 = vadd.f32 %v9122_v4, %v9121_v42  ;;  %v8747_v42 = vcombine.low %v7517_v7, %v7518_v8  ;;  %v8746_v4 = vcombine.high %v7515_v50, %v7516_v41 }
0x1b65   : > { %v9124_v43 = vpop.f32.mrf.mxu1 }
0x1b66   : > { %v12152_v38 = vadd.f32 %v9123_v32, %v12108_v33  ;;  %v7520_v33 = vld [vmem:[#allocation12 + $0x3f8] sm:$0xff] }
0x1b67   : > { %v9125_v55 = vpop.f32.mrf.mxu1  ;;  %v7513_v32 = vld [vmem:[#allocation12 + $0x78] sm:$0xff] }
0x1b68   : > { %v7514_v43 = vld [vmem:[#allocation12 + $0xf8] sm:$0xff]  ;;  %v8745_v55 = vcombine.low %v7515_v50, %v7516_v41 }
0x1b69   : > { %v8744_v60 = vcombine.high %v7513_v32, %v7514_v43 }
0x1b81   : > { %v7288_v47 = vpop.f32.mrf.mxu1 }
0x1b82   : > { %v7289_v48 = vadd.f32 %v7288_v47, %v7163_v44  ;;  %v8743_v44 = vcombine.low %v7513_v32, %v7514_v43  ;;  %v9783_v47 = vld [vmem:[#allocation15 + $0x7b8] sm:$0xff]  }
0x1b83   : > { %v7290_v23 = vpop.f32.mrf.mxu1 }
0x1b84   : > { %v7291_v24 = vadd.f32 %v7290_v23, %v7167_v45  ;;  %v7295_v5 = vmax.f32 %v7289_v48, 0.0  ;;  %v9782_v45 = vld [vmem:[#allocation15 + $0x7f8] sm:$0xff]   ;;  %v9784_v48 = vld [vmem:[#allocation15 + $0x7f0] sm:$0xff]  }
0x1b85   : > { %v7292_v49 = vpop.f32.mrf.mxu1  ;;  %v9785_v23 = vld [vmem:[#allocation15 + $0x7b0] sm:$0xff]  }
0x1b86   : > { %v7296_v52 = vmax.f32 %v7291_v24, 0.0  ;;  %v7297_v61 = vpack.c.bf16 %v7295_v5, %v7295_v5  ;;  %v9786_v24 = vld [vmem:[#allocation15 + $0x7e8] sm:$0xff]   ;;  %v9788_v49 = vld [vmem:[#allocation15 + $0x7e0] sm:$0xff]  }
0x1b87   : > { %v7293_v57 = vpop.f32.mrf.mxu1  ;;  %v9787_v5 = vld [vmem:[#allocation15 + $0x7a8] sm:$0xff]  }
0x1b88   : > { %v7298_v35 = vpack.c.bf16 %v7296_v52, %v7296_v52  ;;  %v9789_v52 = vld [vmem:[#allocation15 + $0x7a0] sm:$0xff]   ;;  %v9790_v57 = vld [vmem:[#allocation15 + $0x7d8] sm:$0xff]  }
0x1b8a   : > { %7331 = vmatprep.mubr.bf16.mxu0 %v7298_v35  ;;  %v9791_v35 = vld [vmem:[#allocation15 + $0x798] sm:$0xff]  }
0x1b8b   : > { %7332 = vmatmul.mubr.bf16.vlgmr.msra.gmra.mxu0 %v7297_v61  ;;  %v9793_v61 = vld [vmem:[#allocation15 + $0x790] sm:$0xff]  }
0x1b8c   : > { %7671 = vmatpush1.bf16.msra.mxu0 %v11867_v36  ;;  %v9778_v36 = vld [vmem:[#allocation15 + $0x748] sm:$0xff]  }
0x1b8d   : > { %7672 = vmatprep.subr.bf16.mxu0 %v11873_v9  ;;  %v9779_v9 = vld [vmem:[#allocation15 + $0x708] sm:$0xff]   ;;  %9139 = vmatprep.subr.bf16.mxu1 %v9778_v36 }
0x1b8e   : > { %9140 = vmatpush3.bf16.msra.mxu1 %v9779_v9 }
0x1b90   : > { %7673 = vmatpush1.bf16.msra.mxu0 %v11879_v22  ;;  %v9780_v22 = vld [vmem:[#allocation15 + $0x740] sm:$0xff]  }
0x1b91   : > { %7674 = vmatprep.subr.bf16.mxu0 %v11885_v58  ;;  %v9781_v58 = vld [vmem:[#allocation15 + $0x700] sm:$0xff]   ;;  %9141 = vmatprep.subr.bf16.mxu1 %v9780_v22 }
0x1b92   : > { %9142 = vmatpush3.bf16.msra.mxu1 %v9781_v58 }
0x1b94   : > { %7675 = vmatpush1.bf16.msra.mxu0 %v11891_v6  ;;  %v7527_v6 = vld [vmem:[#allocation12 + $0x778] sm:$0xff] }
0x1b95   : > { %7676 = vmatprep.subr.bf16.mxu0 %v11897_v40  ;;  %v7528_v40 = vld [vmem:[#allocation12 + $0x7f8] sm:$0x77] }
0x1b98   : > { %7677 = vmatpush1.bf16.msra.mxu0 %v11903_v59  ;;  %v8758_v59 = vcombine.high %v7527_v6, %v7528_v40 }
0x1b99   : > { %7678 = vmatprep.subr.bf16.mxu0 %v11909_v51  ;;  %v8757_v51 = vcombine.low %v7527_v6, %v7528_v40 }
0x1b9a   : > { %8759 = vmatprep.subr.msk.bf16.mxu1 %vm880_vm0, %v8758_v59  ;;  %v7529_v59 = vld [vmem:[#allocation13 + $0x1e] sm:$0x3] }
0x1b9c   : > { %7679 = vmatpush1.bf16.msra.mxu0 %v11915_v10 }
0x1b9d   : > { %7680 = vmatprep.subr.bf16.mxu0 %v11921_v3 }
0x1ba0   : > { %7681 = vmatpush1.bf16.msra.mxu0 %v11927_v18 }
0x1ba1   : > { %7682 = vmatprep.subr.bf16.mxu0 %v11933_v2 }
0x1ba4   : > { %7683 = vmatpush1.bf16.msra.mxu0 %v11939_v16 }
0x1ba5   : > { %7684 = vmatprep.subr.bf16.mxu0 %v11945_v11 }
0x1ba8   : > { %7685 = vmatpush1.bf16.msra.mxu0 %v11951_v12 }
0x1ba9   : > { %7686 = vmatprep.subr.bf16.mxu0 %v11957_v1  ;;  %v7525_v1 = vld [vmem:[#allocation12 + $0x678] sm:$0xff] }
0x1bac   : > { %7687 = vmatpush2.bf16.msra.mxu0 %v11963_v14  ;;  %v7526_v14 = vld [vmem:[#allocation12 + $0x6f8] sm:$0xff] }
0x1bad   : > { %7688 = vmatprep.subr.bf16.mxu0 %v11969_v15 }
0x1bb0   : > { %7689 = vmatpush2.bf16.msra.mxu0 %v11975_v17 }
0x1bb1   : > { %7690 = vmatprep.subr.bf16.mxu0 %v11981_v25 }
0x1bb4   : > { %7691 = vmatpush2.bf16.msra.mxu0 %v11987_v26  ;;  %v7620_v26 = vsel %vm880_vm0, %v8757_v51, 0  ;;  %v7534_v51 = vrot.slane %v7529_v59, %v11086_v63  ;;  %v9797_v63 = vld [vmem:[#allocation15 + $0x780] sm:$0xff]  }
0x1bb5   : > { %7692 = vmatprep.subr.bf16.mxu0 %v11993_v27  ;;  %v8756_v27 = vcombine.high %v7525_v1, %v7526_v14 }
0x1bb8   : > { %7693 = vmatpush2.bf16.msra.mxu0 %v11999_v29  ;;  %v7523_v29 = vld [vmem:[#allocation12 + $0x578] sm:$0xff] }
0x1bb9   : > { %7694 = vmatprep.subr.bf16.mxu0 %v12005_v34  ;;  %v7524_v34 = vld [vmem:[#allocation12 + $0x5f8] sm:$0xff] }
0x1bbc   : > { %7695 = vmatpush2.bf16.msra.mxu0 %v12011_v37  ;;  %v8755_v37 = vcombine.low %v7525_v1, %v7526_v14 }
0x1bbd   : > { %7696 = vmatprep.subr.bf16.mxu0 %v12017_v28  ;;  %v8754_v28 = vcombine.high %v7523_v29, %v7524_v34 }
0x1bc0   : > { %7697 = vmatpush2.bf16.msra.mxu0 %v12023_v30  ;;  %v7521_v30 = vld [vmem:[#allocation12 + $0x478] sm:$0xff] }
0x1bc1   : > { %7698 = vmatprep.subr.bf16.mxu0 %v12078_v21  ;;  %v7522_v21 = vld [vmem:[#allocation12 + $0x4f8] sm:$0xff] }
0x1bc2   : > { %v8751_v31 = vcombine.low %v7521_v30, %v7522_v21 }
0x1bc4   : > { %7699 = vmatpush2.bf16.msra.mxu0 %v12084_v53  ;;  %v8753_v53 = vcombine.low %v7523_v29, %v7524_v34 }
0x1bc5   : > { %7700 = vmatprep.subr.bf16.mxu0 %v12090_v54  ;;  %v8752_v54 = vcombine.high %v7521_v30, %v7522_v21 }
0x1bc8   : > { %7701 = vmatpush2.bf16.msra.mxu0 %v12096_v19  ;;  %v7519_v19 = vld [vmem:[#allocation12 + $0x378] sm:$0xff] }
0x1bc9   : > { %v8750_v46 = vcombine.high %v7519_v19, %v7520_v33  ;;  %v8749_v39 = vcombine.low %v7519_v19, %v7520_v33 }
0x1c4b   : > { %v7333_v10 = vpop.f32.mrf.mxu0 }
0x1c4c   : > { %v7334_v3 = vadd.f32 %v7333_v10, %v11105_v56  ;;  %v7538_v10 = vrot.slane %v7529_v59, %v11088_v0 }
0x1c4d   : > { %v7335_v18 = vpop.f32.mrf.mxu0 }
0x1c4e   : > { %v7336_v2 = vadd.f32 %v7335_v18, %v11102_v20  ;;  %v7340_v16 = vmax.f32 %v7334_v3, 0.0 }
0x1c4f   : > { %v7337_v11 = vpop.f32.mrf.mxu0 }
0x1c50   : > { %v7341_v12 = vmax.f32 %v7336_v2, 0.0  ;;  %v7342_v25 = vpack.c.bf16 %v7340_v16, %v7340_v16 }
0x1c51   : > { %v7338_v15 = vpop.f32.mrf.mxu0 }
0x1c52   : > { %v7343_v17 = vpack.c.bf16 %v7341_v12, %v7341_v12 }
0x1c54   : > { %7504 = vmatprep.mubr.bf16.mxu1 %v7343_v17 }
0x1c55   : > { %7505 = vmatmul.mubr.bf16.vlgmr.msra.gmra.mxu1 %v7342_v25  ;;  %v9794_v25 = vld [vmem:[#allocation15 + $0x7c8] sm:$0xff]  }
0x1c56   : > { %7626 = vmatpush1.bf16.msra.mxu1 %v7620_v26  ;;  %7657 = vmatprep.mubr.bf16.mxu1 %v10280_v13  ;;  %v8748_v13 = vcombine.high %v7517_v7, %v7518_v8  ;;  %v9796_v26 = vld [vmem:[#allocation15 + $0x7c0] sm:$0xff]  }
0x1c57   : > { %7627 = vmatprep.subr.bf16.mxu1 %v8756_v27 }
0x1c5a   : > { %7628 = vmatpush1.bf16.msra.mxu1 %v8755_v37 }
0x1c5b   : > { %7629 = vmatprep.subr.bf16.mxu1 %v8754_v28 }
0x1c5e   : > { %7630 = vmatpush1.bf16.msra.mxu1 %v8753_v53 }
0x1c5f   : > { %7631 = vmatprep.subr.bf16.mxu1 %v8752_v54 }
0x1c62   : > { %7632 = vmatpush1.bf16.msra.mxu1 %v8751_v31 }
0x1c63   : > { %7633 = vmatprep.subr.bf16.mxu1 %v8750_v46 }
0x1c66   : > { %7634 = vmatpush1.bf16.msra.mxu1 %v8749_v39 }
0x1c67   : > { %7635 = vmatprep.subr.bf16.mxu1 %v8748_v13 }
0x1c6a   : > { %7636 = vmatpush1.bf16.msra.mxu1 %v8747_v42 }
0x1c6b   : > { %7637 = vmatprep.subr.bf16.mxu1 %v8746_v4 }
0x1c6e   : > { %7638 = vmatpush1.bf16.msra.mxu1 %v8745_v55 }
0x1c6f   : > { %7639 = vmatprep.subr.bf16.mxu1 %v8744_v60 }
0x1c72   : > { %7640 = vmatpush1.bf16.msra.mxu1 %v8743_v44 }
0x1c73   : > { %9149 = vmatprep.subr.bf16.mxu1 %v9782_v45 }
0x1c75   : > { %8760 = vmatmul.mubr.msk.bf16.vlgmr.msra.gmra.mxu1 %vm1882_vm11, %v11022_v62  ;;  %v9792_v62 = vld [vmem:[#allocation15 + $0x7d0] sm:$0xff]  }
0x1c76   : > { %9150 = vmatpush3.bf16.msra.mxu1 %v9783_v47 }
0x1c77   : > { %9151 = vmatprep.subr.bf16.mxu1 %v9784_v48 }
0x1c7a   : > { %9152 = vmatpush3.bf16.msra.mxu1 %v9785_v23 }
0x1c7b   : > { %9153 = vmatprep.subr.bf16.mxu1 %v9786_v24 }
0x1c7e   : > { %9154 = vmatpush3.bf16.msra.mxu1 %v9787_v5 }
0x1c7f   : > { %9155 = vmatprep.subr.bf16.mxu1 %v9788_v49 }
0x1c82   : > { %9156 = vmatpush3.bf16.msra.mxu1 %v9789_v52 }
0x1c83   : > { %9157 = vmatprep.subr.bf16.mxu1 %v9790_v57 }
0x1c86   : > { %9158 = vmatpush3.bf16.msra.mxu1 %v9791_v35 }
0x1c87   : > { %9159 = vmatprep.subr.bf16.mxu1 %v9792_v62 }
0x1c8a   : > { %9160 = vmatpush3.bf16.msra.mxu1 %v9793_v61 }
0x1c8b   : > { %9161 = vmatprep.subr.bf16.mxu1 %v9794_v25 }
0x1d15   : > { %v9143_v36 = vpop.f32.mrf.mxu1 }
0x1d17   : > { %v9144_v9 = vpop.f32.mrf.mxu1 }
0x1d18   : > { %v9145_v22 = vadd.f32 %v9144_v9, %v9143_v36 }
0x1d19   : > { %v9146_v58 = vpop.f32.mrf.mxu1 }
0x1d1a   : > { %v7512_v6 = vadd.f32 %v9145_v22, %v12152_v38  ;;  %v9795_v38 = vld [vmem:[#allocation15 + $0x788] sm:$0xff]  }
0x1d1b   : > { %v9147_v40 = vpop.f32.mrf.mxu1  ;;  %9162 = vmatpush3.bf16.msra.mxu1 %v9795_v38 }
0x1d1c   : > { %9163 = vmatprep.subr.bf16.mxu1 %v9796_v26 }
0x1d1f   : > { %9164 = vmatpush3.bf16.msra.mxu1 %v9797_v63 }
0x1d35   : > { %v7659_v3 = vpop.f32.mrf.mxu1 }
0x1d36   : > { %v7660_v18 = vadd.f32 %v7659_v3, %v7534_v51 }
0x1d37   : > { %v7661_v2 = vpop.f32.mrf.mxu1 }
0x1d38   : > { %v7662_v16 = vadd.f32 %v7661_v2, %v7538_v10  ;;  %v7666_v11 = vmax.f32 %v7660_v18, 0.0 }
0x1d39   : > { %v7663_v12 = vpop.f32.mrf.mxu1 }
0x1d3a   : > { %v7667_v1 = vmax.f32 %v7662_v16, 0.0  ;;  %v7668_v17 = vpack.c.bf16 %v7666_v11, %v7666_v11 }
0x1d3b   : > { %v7664_v14 = vpop.f32.mrf.mxu1 }
0x1d3c   : > { %v7669_v15 = vpack.c.bf16 %v7667_v1, %v7667_v1 }
0x1d3e   : > { %7702 = vmatprep.mubr.bf16.mxu0 %v7669_v15 }
0x1d3f   : > { %7703 = vmatmul.mubr.bf16.vlgmr.msra.gmra.mxu0 %v7668_v17 }
0x1dff   : > { %v7704_v0 = vpop.f32.mrf.mxu0 }
0x1e00   : > { %v7705_v27 = vadd.f32 %v7704_v0, %v11105_v56  ;;  %v8777_v56 = vld [vmem:[%s12312_s1] ss:$0 sm:$0xff] }
0x1e01   : > { %v7706_v29 = vpop.f32.mrf.mxu0 }
0x1e02   : > { %v7707_v34 = vadd.f32 %v7706_v29, %v11102_v20  ;;  %v7711_v37 = vmax.f32 %v7705_v27, 0.0 }
0x1e03   : > { %v7708_v28 = vpop.f32.mrf.mxu0 }
0x1e04   : > { %v7712_v30 = vmax.f32 %v7707_v34, 0.0  ;;  %v7713_v54 = vpack.c.bf16 %v7711_v37, %v7711_v37 }
0x1e05   : > { %v7709_v21 = vpop.f32.mrf.mxu0 }
0x1e06   : > { %v7714_v53 = vpack.c.bf16 %v7712_v30, %v7712_v30 }
0x1e08   : > { %7875 = vmatprep.mubr.bf16.mxu1 %v7714_v53 }
0x1e09   : > { %7876 = vmatmul.mubr.bf16.vlgmr.msra.gmra.mxu1 %v7713_v54 }
0x1ec9   : > { %v9165_v19 = vpop.f32.mrf.mxu1 }
0x1ecb   : > { %v9166_v33 = vpop.f32.mrf.mxu1 }
0x1ecc   : > { %v9167_v31 = vadd.f32 %v9166_v33, %v9165_v19 }
0x1ecd   : > { %v9168_v46 = vpop.f32.mrf.mxu1 }
0x1ece   : > { %v7883_v20 = vadd.f32 %v9167_v31, %v7512_v6 }
0x1ecf   : > { %v9169_v7 = vpop.f32.mrf.mxu1 }
0x1ed0   : > { %v7891_v8 = vadd.f32 %v8777_v56, %v7883_v20 }
0x1ed2   : > { %7892 = vst.msk [vmem:[%s10757_s28] sm:$0xff] %vm1882_vm11, %v7891_v8 }
0x1ed3   : > { %10123 = shalt.err (!%p10120_p2)
}
0x1ed4   : > { %s10124_s9 = scalar_lea.hbm %s7905_s14, 128  ;;  %s10128_s21 = scalar_lea.hbm %s12313_s15, 256 }
0x1ed5   : > { %p10125_p8 = scmp.ne.s32.totalorder %s7905_s14, %s10124_s9  ;;  %p10129_p1 = scmp.lt.s32.totalorder %s7905_s14, %s12313_s15 }
0x1ed6   : > { %p10130_p3 = scmp.lt.s32.totalorder %s10128_s21, %s10124_s9 }
0x1ed7   : > { %p10126_p7 = pnand %p10125_p8, %p12314_p9 }
0x1ed8   : > { %p10131_p5 = por %p10130_p3, %p10129_p1 }
0x1ed9   : > { %p10127_p12 = pneg %p10126_p7 }
0x1edb   : > { %p10132_p10 = pnand %p10131_p5, %p10127_p12 }
0x1edd   : > { %10135 = shalt.err (!%p10132_p10)
}
0x1ede   : > { %9245 = dma.vmem_to_hbm [thread:$0]  (%p12314_p9), %s7908_s27, 128, %s7905_s14, %s7894_s5  }
0x1edf PF: > { %s7919_s1 = sand.u32 1, %s10218_s29   ;;  %p12315_p6 = scmp.ne.s32.totalorder %s12294_s25, 0 }
0x1ee0   : > { %p12316_p4 = scmp.ge.s32.totalorder %s10230_s19, 2  ;;  %s7920_s13 = scalar_lea.sflag [#allocation5], %s7919_s1 }
0x1ee2   : > { %p9277_p11 = pnand %p12316_p4, %p12315_p6 }
0x1ee4   : > { %p9278_p13 = pneg %p9277_p11 }
0x1ee6   : > { %10213 = dma.done.wait (%p9278_p13), %s7920_s13, 128  }
0x1ee7   : > { %10215 = vsyncadd (%p9278_p13), %s7920_s13, 4294967168  ;;  %s12317_s17 = sld [smem:[#allocation28_spill]]  ;;  %p39_p0 = scmp.ge.s32.totalorder %s10501_s26, 4  }
0x1ee8   : > { %s12318_s0 = sld [smem:[#allocation29_spill]]  ;;  %s12319_s29 = smov %s10222_s30 }
0x1ee9   : > { %s12321_s19 = smov %s10501_s26  ;;  %41 = sbr.rel (!%p39_p0) target bundleno = 25 (0x19), region = 218 }
0x1eed   : > { %s12320_s30 = smov %s12317_s17 }
0x1eee   :  { %7925 = vsyncpa [#allocation4], 1 }
0x1eef   :  { %7927 = vsyncpa [#allocation4 + $0x1], 1 }
0x1ef0   :  { %7928 = vsyncpa [#allocation8], 1 }
0x1ef1   :  { %7930 = vsyncpa [#allocation8 + $0x1], 1 }
0x1ef2   :  { %7931 = vsyncpa [#allocation11], 1 }
0x1ef3   :  { %7932 = vsyncpa [#allocation14], 1 }
0x1ef4   :  { %7933 = vsyncpa [#allocation5], 1 }
0x1ef5   :  { %7935 = vsyncpa [#allocation5 + $0x1], 1 }
0x1ef6   :  { %7936 = vsyncpa [#allocation6], 1 }
0x1ef7   :  { %7938 = vsyncpa [#allocation6 + $0x1], 1 }
0x1ef8   :  { %7939 = vsyncpa [#allocation18], 1 }

</bundles_post_ra>
